<compile_context>
chip_gen: v7x
topology: tpu7x:2x2x1
jax: 0.10.0
libtpu: 0.0.40
codegen_flags: <defaults>
</compile_context>

<pallas_src>
import functools
import numpy as np
import jax
import jax.numpy as jnp
from jax.experimental import pallas as pl
from jax.experimental.pallas import tpu as pltpu


def _round_up(x, m):
    return (x + m - 1) // m * m


# Column-tile target.  Multiple of 128.  Sweep 512/1024/2048 for large inputs
# (v6e can take the largest; re-derive the VMEM budget for v7x's 64 MiB).
TN_MAX = 512


# ----------------------------- Pallas kernel ------------------------------ #

def _gemm_kernel(a_ref, b_ref, bias_ref, alpha_ref, *rest,
                 act, res_scale, has_residual, use_scratch, kr):
    """out = [residual +] res_scale_or_1 * act(A @ B + bias_rows).

    When use_scratch: the HBM patches block only carries the real K rows (kr);
    they are dropped into a zero-tailed VMEM scratch so the dot contraction
    stays 128-aligned without DMAing zero rows from HBM.
    """
    idx = 0
    r_ref = None
    if has_residual:
        r_ref = rest[idx]
        idx += 1
    o_ref = rest[idx]
    idx += 1

    if use_scratch:
        pad_ref = rest[idx]
        kp, tn = pad_ref.shape
        if kp > kr:                                    # zero the K-pad tail
            pad_ref[kr:, :] = jnp.zeros((kp - kr, tn), pad_ref.dtype)
        pad_ref[:kr, :] = b_ref[...]                   # unpadded patch tile
        bmat = pad_ref[...]
    else:
        bmat = b_ref[...]

    y = jnp.dot(a_ref[...], bmat, preferred_element_type=jnp.float32)
    y = y + bias_ref[...]                              # (tm, tn) + (tm, 1)

    if act == "relu":
        y = jnp.maximum(y, 0.0)
    elif act == "prelu":
        al = alpha_ref[0]                              # scalar from SMEM
        y = jnp.where(y > 0, y, al * y)

    if has_residual:
        y = r_ref[...] + jnp.float32(res_scale) * y

    o_ref[...] = y.astype(o_ref.dtype)


def _pick_tn(np_cols):
    """Largest 128-multiple tile <= TN_MAX dividing np_cols, preferring >= 2
    column steps so the grid can shard across 2 TensorCores (v7x)."""
    cands = [t for t in range(128, min(TN_MAX, np_cols) + 1, 128)
             if np_cols % t == 0]
    best = max(cands)
    if np_cols // best < 2:
        two = [t for t in cands if np_cols // t >= 2]
        if two:
            best = max(two)
    return best


def gemm_bias_act(a, bias2d, patches, *, act="none", alpha=None,
                  residual=None, res_scale=1.0, out_dtype=jnp.float32):
    """a: (Mp, Kp) bf16 pre-padded weights, bias2d: (Mp, 1) f32,
    patches: (K, Ncols) activation patches, residual: (rM, rN) f32 or None.
    Returns ((Mp, Np) out_dtype array, Ncols)."""
    Mp, Kp = a.shape
    K, Nc = patches.shape
    Kr = _round_up(K, 16)                 # bf16 sublane multiple
    Np = _round_up(Nc, 128)
    tn = _pick_tn(Np)
    tm = 128 if (Mp > 128 and Mp % 128 == 0) else Mp
    # Skip the HBM K-padding only when it is significant (>= 1/8 of Kp);
    # otherwise keep the plain pre-padded path (e.g. conv2: 1600 -> 1664).
    use_scratch = (Kp - Kr) * 8 >= Kp

    b = patches.astype(jnp.bfloat16)
    kb = Kr if use_scratch else Kp
    if (kb - K) or (Np - Nc):
        b = jnp.pad(b, ((0, kb - K), (0, Np - Nc)))

    alpha_arr = jnp.reshape(
        jnp.asarray(0.0 if alpha is None else alpha, jnp.float32), (1,))

    args = [a, b, bias2d, alpha_arr]
    # Grid order: (column tiles, Mp row blocks) with row blocks innermost, so
    # the big patches tile stays resident while the small weight blocks cycle.
    in_specs = [
        pl.BlockSpec((tm, Kp), lambda j, i: (i, 0)),    # weight row block
        pl.BlockSpec((kb, tn), lambda j, i: (0, j)),    # patches column tile
        pl.BlockSpec((tm, 1), lambda j, i: (i, 0)),     # row bias
        pl.BlockSpec(memory_space=pltpu.MemorySpace.SMEM),  # PReLU alpha
    ]

    has_res = residual is not None
    if has_res:
        rM, rN = residual.shape
        r = residual.astype(jnp.float32)
        if (Mp - rM) or (Np - rN):
            r = jnp.pad(r, ((0, Mp - rM), (0, Np - rN)))
        args.append(r)
        in_specs.append(pl.BlockSpec((tm, tn), lambda j, i: (i, j)))

    scratch_shapes = ([pltpu.VMEM((Kp, tn), jnp.bfloat16)]
                      if use_scratch else [])

    out = pl.pallas_call(
        functools.partial(_gemm_kernel, act=act, res_scale=float(res_scale),
                          has_residual=has_res, use_scratch=use_scratch,
                          kr=Kr),
        out_shape=jax.ShapeDtypeStruct((Mp, Np), out_dtype),
        grid=(Np // tn, Mp // tm),
        in_specs=in_specs,
        out_specs=pl.BlockSpec((tm, tn), lambda j, i: (i, j)),
        scratch_shapes=scratch_shapes,
        compiler_params=pltpu.CompilerParams(
            dimension_semantics=("parallel", "parallel"),
            vmem_limit_bytes=32 * 1024 * 1024),
    )(*args)
    return out, Nc


# --------------------------- conv / shuffle glue --------------------------- #

def im2col_cm(x, kh, kw, stride, pad):
    """x: (C, N, H, W) -> patches (C*kh*kw, N*OH*OW).
    K order is (c, kh, kw) -> matches PyTorch weight.reshape(Cout, Cin*KH*KW)."""
    C, N, H, W = x.shape
    xp = jnp.pad(x, ((0, 0), (0, 0), (pad, pad), (pad, pad)))
    Hp, Wp = H + 2 * pad, W + 2 * pad
    OH = (Hp - kh) // stride + 1
    OW = (Wp - kw) // stride + 1
    cols = []
    for i in range(kh):
        for j in range(kw):
            cols.append(xp[:, :,
                           i:i + stride * (OH - 1) + 1:stride,
                           j:j + stride * (OW - 1) + 1:stride])
    p = jnp.stack(cols, axis=1)                      # (C, KH*KW, N, OH, OW)
    return p.reshape(C * kh * kw, N * OH * OW), OH, OW


def conv_cm(x, a, bias2d, cout, kh, kw, *, stride=1, pad=0, act="none",
            alpha=None, residual=None, res_scale=1.0, out_dtype=jnp.float32):
    """Conv2d on a CNHW activation via transposed-orientation Pallas GEMM.
    x: (Cin, N, H, W) -> (Cout, N, OH, OW).  Optional fused epilogue:
    out = residual + res_scale * act(conv(x))."""
    C, N, H, W = x.shape
    patches, OH, OW = im2col_cm(x, kh, kw, stride, pad)
    r = None if residual is None else residual.reshape(residual.shape[0], -1)
    out, _ = gemm_bias_act(a, bias2d, patches, act=act, alpha=alpha,
                           residual=r, res_scale=res_scale,
                           out_dtype=out_dtype)
    return out[:cout, :N * OH * OW].reshape(cout, N, OH, OW)


def pixel_shuffle_cm(x, r):
    """PixelShuffle(r) on CNHW: (C*r*r, N, H, W) -> (C, N, H*r, W*r)."""
    C, N, H, W = x.shape
    Co = C // (r * r)
    x = x.reshape(Co, r, r, N, H, W)
    x = x.transpose(0, 3, 4, 1, 5, 2)               # (Co, N, H, r, W, r)
    return x.reshape(Co, N, H * r, W * r)


def pixel_shuffle_nchw(x, r):
    """PyTorch nn.PixelShuffle(r): (N, C*r*r, H, W) -> (N, C, H*r, W*r)."""
    N, C, H, W = x.shape
    Co = C // (r * r)
    x = x.reshape(N, Co, r, r, H, W)
    x = x.transpose(0, 1, 4, 2, 5, 3)
    return x.reshape(N, Co, H * r, W * r)


# ------------------------------- parameters -------------------------------- #

N_RESBLOCKS = 2
N_FEATS = 32
SCALE = 2
RES_SCALE = 0.1
N_COLORS = 3


def init_params(key):
    keys = iter(jax.random.split(key, 32))

    def w(shape):
        fan_in = shape[1] * shape[2] * shape[3]
        return jax.random.normal(next(keys), shape, jnp.float32) / jnp.sqrt(
            jnp.float32(fan_in))

    def b(n):
        return jax.random.normal(next(keys), (n,), jnp.float32) * 0.01

    r2 = SCALE * SCALE
    return dict(
        w1=w((256, 1, 4, 4)), b1=b(256),                  # Conv2d(1,256,4,s2,p1)
        w2=w((256, 256 // r2, 5, 5)), b2=b(256),          # Conv2d(64,256,5,p2)
        prelu_alpha=jnp.float32(0.25),                    # nn.PReLU() default
        wh=w((N_FEATS, 256, 3, 3)), bh=b(N_FEATS),        # head
        res_blocks=[(w((N_FEATS, N_FEATS, 3, 3)), b(N_FEATS),
                     w((N_FEATS, N_FEATS, 3, 3)), b(N_FEATS))
                    for _ in range(N_RESBLOCKS)],
        wbody=w((N_FEATS, N_FEATS, 3, 3)), bbody=b(N_FEATS),
        wup=w((4 * N_FEATS, N_FEATS, 3, 3)), bup=b(4 * N_FEATS),
        wtail=w((N_COLORS, N_FEATS, 3, 3)), btail=b(N_COLORS),
    )


def _prep_conv(w, b):
    """OIHW weight -> (Mp, Kp) bf16 GEMM matrix + (Mp, 1) f32 bias.
    Mp rounded to 16 (bf16 sublane packing); Kp rounded to 128 so the MXU
    contraction is always aligned (zero-padded rows cost nothing: the padded
    patch rows are zero in VMEM)."""
    cout, cin, kh, kw = w.shape
    K = cin * kh * kw
    Kp = _round_up(K, 128)
    Mp = _round_up(cout, 16)
    a = jnp.zeros((Mp, Kp), jnp.bfloat16)
    a = a.at[:cout, :K].set(w.reshape(cout, K).astype(jnp.bfloat16))
    bias = jnp.zeros((Mp, 1), jnp.float32).at[:cout, 0].set(b)
    return a, bias


def preprocess_params(p):
    """One-time weight reshape / pad / bf16 cast (outside the forward path)."""
    return dict(
        prelu_alpha=p["prelu_alpha"],
        conv1=_prep_conv(p["w1"], p["b1"]),
        conv2=_prep_conv(p["w2"], p["b2"]),
        head=_prep_conv(p["wh"], p["bh"]),
        res_blocks=[(_prep_conv(wa, ba), _prep_conv(wb, bb))
                    for (wa, ba, wb, bb) in p["res_blocks"]],
        body_tail=_prep_conv(p["wbody"], p["bbody"]),
        up=_prep_conv(p["wup"], p["bup"]),
        tail=_prep_conv(p["wtail"], p["btail"]),
    )


# ------------------------------ EDSR forward ------------------------------- #

@jax.jit
def edsr_forward(pp, x_nchw):
    bf16 = jnp.bfloat16
    # NCHW -> CNHW once (C=1, trivial); everything stays CNHW until the end.
    x = jnp.transpose(x_nchw, (1, 0, 2, 3))

    a, b = pp["conv1"]
    x = conv_cm(x, a, b, 256, 4, 4, stride=2, pad=1, out_dtype=bf16)     # conv1
    x = pixel_shuffle_cm(x, SCALE)                                       # subpix1
    a, b = pp["conv2"]
    x = conv_cm(x, a, b, 256, 5, 5, stride=1, pad=2,
                act="prelu", alpha=pp["prelu_alpha"], out_dtype=bf16)    # conv2+prelu1
    a, b = pp["head"]
    x = conv_cm(x, a, b, N_FEATS, 3, 3, stride=1, pad=1,
                out_dtype=jnp.float32)                                   # head (f32: skip source)

    res = x
    for (la, lb) in pp["res_blocks"]:                                    # body ResBlocks
        t = conv_cm(res, la[0], la[1], N_FEATS, 3, 3, stride=1, pad=1,
                    act="relu", out_dtype=bf16)
        # fused: res = res + RES_SCALE * conv(t)  (residual chain stays f32)
        res = conv_cm(t, lb[0], lb[1], N_FEATS, 3, 3, stride=1, pad=1,
                      residual=res, res_scale=RES_SCALE,
                      out_dtype=jnp.float32)
    a, b = pp["body_tail"]
    # fused skip: res = x + conv(res)
    res = conv_cm(res, a, b, N_FEATS, 3, 3, stride=1, pad=1,
                  residual=x, res_scale=1.0, out_dtype=jnp.float32)

    a, b = pp["up"]
    t = conv_cm(res, a, b, 4 * N_FEATS, 3, 3, stride=1, pad=1,
                out_dtype=bf16)                                          # tail upsampler
    t = pixel_shuffle_cm(t, 2)
    a, b = pp["tail"]
    out = conv_cm(t, a, b, N_COLORS, 3, 3, stride=1, pad=1,
                  out_dtype=jnp.float32)                                 # tail final conv

    return jnp.transpose(out, (1, 0, 2, 3))                              # back to NCHW


# -------------------------- pure-JAX reference ----------------------------- #
# Same bf16-operand / f32-accumulation arithmetic as the kernels so the
# comparison isolates structural correctness.  (Kernel bf16 activation stores
# only affect tensors whose sole consumer already casts to bf16, so the
# numerics are unchanged vs this reference.)

def _ref_conv(x, w, b, stride=1, pad=0):
    out = jax.lax.conv_general_dilated(
        x.astype(jnp.bfloat16), w.astype(jnp.bfloat16),
        (stride, stride), [(pad, pad), (pad, pad)],
        dimension_numbers=("NCHW", "OIHW", "NCHW"),
        preferred_element_type=jnp.float32)
    return out + b[None, :, None, None]


def ref_forward(p, x):
    x = _ref_conv(x, p["w1"], p["b1"], stride=2, pad=1)
    x = pixel_shuffle_nchw(x, SCALE)
    y = _ref_conv(x, p["w2"], p["b2"], stride=1, pad=2)
    x = jnp.where(y > 0, y, p["prelu_alpha"] * y)
    x = _ref_conv(x, p["wh"], p["bh"], stride=1, pad=1)
    res = x
    for (wa, ba, wb, bb) in p["res_blocks"]:
        t = jnp.maximum(_ref_conv(res, wa, ba, stride=1, pad=1), 0.0)
        t = _ref_conv(t, wb, bb, stride=1, pad=1)
        res = res + RES_SCALE * t
    res = _ref_conv(res, p["wbody"], p["bbody"], stride=1, pad=1)
    res = res + x
    t = _ref_conv(res, p["wup"], p["bup"], stride=1, pad=1)
    t = pixel_shuffle_nchw(t, 2)
    return _ref_conv(t, p["wtail"], p["btail"], stride=1, pad=1)


# ---------------------------------- main ----------------------------------- #

if __name__ == "__main__":
    key = jax.random.PRNGKey(0)
    kx, kp = jax.random.split(key)
    x = jax.random.normal(kx, (2, 1, 16, 16), jnp.float32)   # (N, 1, H, W)
    params = init_params(kp)
    prepped = preprocess_params(params)                      # one-time weight prep

    out = jax.block_until_ready(edsr_forward(prepped, x))
    assert out.shape == (2, N_COLORS, 32, 32), out.shape

    ref = jax.block_until_ready(ref_forward(params, x))
    np.testing.assert_allclose(np.asarray(out), np.asarray(ref),
                               rtol=5e-3, atol=5e-3)
    print("KERNEL_OK")
</pallas_src>

<mosaic_0001>
module attributes {stable_mosaic.version = 11 : i64} {
  func.func @_gemm_kernel(%arg0: i32, %arg1: i32, %arg2: memref<128x128xbf16, #tpu.memory_space<vmem>>, %arg3: memref<16x128xbf16, #tpu.memory_space<vmem>>, %arg4: memref<128x1xf32, #tpu.memory_space<vmem>>, %arg5: memref<1xf32, #tpu.memory_space<smem>>, %arg6: memref<128x128xbf16, #tpu.memory_space<vmem>>, %arg7: memref<128x128xbf16, #tpu.memory_space<vmem>>) attributes {dimension_semantics = [#tpu.dimension_semantics<parallel>, #tpu.dimension_semantics<parallel>], iteration_bounds = array<i64: 1, 2>, scalar_prefetch = 0 : i64, scratch_operands = 1 : i64, tpu.core_type = #tpu.core_type<tc>, window_params = [{transform_indices = @transform_0, window_bounds = array<i64: 128, 128>}, {transform_indices = @transform_1, window_bounds = array<i64: 16, 128>}, {transform_indices = @transform_2, window_bounds = array<i64: 128, 1>}, {transform_indices = @transform_3, window_bounds = array<i64: 1>}, {transform_indices = @transform_4, window_bounds = array<i64: 128, 128>}]} {
    %cst = arith.constant 0.000000e+00 : bf16
    %0 = vector.broadcast %cst : bf16 to vector<112x128xbf16>
    %c16 = arith.constant 16 : index
    %c0 = arith.constant 0 : index
    %1 = vector.load %arg7[%c16, %c0] : memref<128x128xbf16, #tpu.memory_space<vmem>>, vector<112x128xbf16>
    tpu.vector_store %arg7[%c16, %c0], %0 {strides = array<i32>} : memref<128x128xbf16, #tpu.memory_space<vmem>>, vector<112x128xbf16>,
    %c0_0 = arith.constant 0 : index
    %c0_1 = arith.constant 0 : index
    %2 = vector.load %arg3[%c0_0, %c0_1] : memref<16x128xbf16, #tpu.memory_space<vmem>>, vector<16x128xbf16>
    %c0_2 = arith.constant 0 : index
    %c0_3 = arith.constant 0 : index
    %3 = vector.load %arg7[%c0_2, %c0_3] : memref<128x128xbf16, #tpu.memory_space<vmem>>, vector<16x128xbf16>
    tpu.vector_store %arg7[%c0_2, %c0_3], %2 {strides = array<i32>} : memref<128x128xbf16, #tpu.memory_space<vmem>>, vector<16x128xbf16>,
    %c0_4 = arith.constant 0 : index
    %c0_5 = arith.constant 0 : index
    %4 = vector.load %arg7[%c0_4, %c0_5] : memref<128x128xbf16, #tpu.memory_space<vmem>>, vector<128x128xbf16>
    %c0_6 = arith.constant 0 : index
    %c0_7 = arith.constant 0 : index
    %5 = vector.load %arg2[%c0_6, %c0_7] : memref<128x128xbf16, #tpu.memory_space<vmem>>, vector<128x128xbf16>
    %cst_8 = arith.constant dense<0.000000e+00> : vector<128x128xf32>
    %6 = tpu.matmul %5, %4, %cst_8 {dimension_numbers = #tpu.dot_dimension_numbers<[1], [0], [0], [1], [0, 0, 1, 1], [], []>} : vector<128x128xbf16>, vector<128x128xbf16>, vector<128x128xf32> -> vector<128x128xf32>
    %c0_9 = arith.constant 0 : index
    %c0_10 = arith.constant 0 : index
    %7 = vector.load %arg4[%c0_9, %c0_10] : memref<128x1xf32, #tpu.memory_space<vmem>>, vector<128x1xf32>
    %8 = vector.broadcast %7 : vector<128x1xf32> to vector<128x128xf32>
    %9 = arith.addf %6, %8 : vector<128x128xf32>
    %10 = arith.truncf %9 : vector<128x128xf32> to vector<128x128xbf16>
    %c0_11 = arith.constant 0 : index
    %c0_12 = arith.constant 0 : index
    %11 = vector.load %arg6[%c0_11, %c0_12] : memref<128x128xbf16, #tpu.memory_space<vmem>>, vector<128x128xbf16>
    tpu.vector_store %arg6[%c0_11, %c0_12], %10 {strides = array<i32>} : memref<128x128xbf16, #tpu.memory_space<vmem>>, vector<128x128xbf16>,
    return
  }
  func.func @transform_0(%arg0: i32, %arg1: i32) -> (i32, i32) {
    %c0_i32 = arith.constant 0 : i32
    %c0_i32_0 = arith.constant 0 : i32
    return %arg1, %c0_i32 : i32, i32
  }
  func.func @transform_1(%arg0: i32, %arg1: i32) -> (i32, i32) {
    %c0_i32 = arith.constant 0 : i32
    %c0_i32_0 = arith.constant 0 : i32
    return %c0_i32, %arg0 : i32, i32
  }
  func.func @transform_2(%arg0: i32, %arg1: i32) -> (i32, i32) {
    %c0_i32 = arith.constant 0 : i32
    %c0_i32_0 = arith.constant 0 : i32
    return %arg1, %c0_i32 : i32, i32
  }
  func.func @transform_3(%arg0: i32, %arg1: i32) -> i32 {
    %c0_i32 = arith.constant 0 : i32
    %c0_i32_0 = arith.constant 0 : i32
    return %c0_i32 : i32
  }
  func.func @transform_4(%arg0: i32, %arg1: i32) -> (i32, i32) {
    %c0_i32 = arith.constant 0 : i32
    return %arg1, %arg0 : i32, i32
  }
}

module attributes {stable_mosaic.version = 11 : i64} {
  func.func @_gemm_kernel(%arg0: i32, %arg1: i32, %arg2: memref<128x1664xbf16, #tpu.memory_space<vmem>>, %arg3: memref<1664x256xbf16, #tpu.memory_space<vmem>>, %arg4: memref<128x1xf32, #tpu.memory_space<vmem>>, %arg5: memref<1xf32, #tpu.memory_space<smem>>, %arg6: memref<128x256xbf16, #tpu.memory_space<vmem>>) attributes {dimension_semantics = [#tpu.dimension_semantics<parallel>, #tpu.dimension_semantics<parallel>], iteration_bounds = array<i64: 2, 2>, scalar_prefetch = 0 : i64, scratch_operands = 0 : i64, tpu.core_type = #tpu.core_type<tc>, window_params = [{transform_indices = @transform_0, window_bounds = array<i64: 128, 1664>}, {transform_indices = @transform_1, window_bounds = array<i64: 1664, 256>}, {transform_indices = @transform_2, window_bounds = array<i64: 128, 1>}, {transform_indices = @transform_3, window_bounds = array<i64: 1>}, {transform_indices = @transform_4, window_bounds = array<i64: 128, 256>}]} {
    %c0 = arith.constant 0 : index
    %c0_0 = arith.constant 0 : index
    %0 = vector.load %arg3[%c0, %c0_0] : memref<1664x256xbf16, #tpu.memory_space<vmem>>, vector<1664x256xbf16>
    %c0_1 = arith.constant 0 : index
    %c0_2 = arith.constant 0 : index
    %1 = vector.load %arg2[%c0_1, %c0_2] : memref<128x1664xbf16, #tpu.memory_space<vmem>>, vector<128x1664xbf16>
    %cst = arith.constant dense<0.000000e+00> : vector<128x256xf32>
    %2 = tpu.matmul %1, %0, %cst {dimension_numbers = #tpu.dot_dimension_numbers<[1], [0], [0], [1], [0, 0, 1, 1], [], []>} : vector<128x1664xbf16>, vector<1664x256xbf16>, vector<128x256xf32> -> vector<128x256xf32>
    %c0_3 = arith.constant 0 : index
    %c0_4 = arith.constant 0 : index
    %3 = vector.load %arg4[%c0_3, %c0_4] : memref<128x1xf32, #tpu.memory_space<vmem>>, vector<128x1xf32>
    %4 = vector.broadcast %3 : vector<128x1xf32> to vector<128x256xf32>
    %5 = arith.addf %2, %4 : vector<128x256xf32>
    %c0_5 = arith.constant 0 : index
    %6 = memref.load %arg5[%c0_5] : memref<1xf32, #tpu.memory_space<smem>>
    %cst_6 = arith.constant 0.000000e+00 : f32
    %7 = vector.broadcast %cst_6 : f32 to vector<128x256xf32>
    %8 = arith.cmpf ogt, %5, %7 : vector<128x256xf32>
    %9 = vector.broadcast %6 : f32 to vector<128x256xf32>
    %10 = arith.mulf %9, %5 : vector<128x256xf32>
    %11 = arith.select %8, %5, %10 : vector<128x256xi1>, vector<128x256xf32>
    %12 = arith.truncf %11 : vector<128x256xf32> to vector<128x256xbf16>
    %c0_7 = arith.constant 0 : index
    %c0_8 = arith.constant 0 : index
    %13 = vector.load %arg6[%c0_7, %c0_8] : memref<128x256xbf16, #tpu.memory_space<vmem>>, vector<128x256xbf16>
    tpu.vector_store %arg6[%c0_7, %c0_8], %12 {strides = array<i32>} : memref<128x256xbf16, #tpu.memory_space<vmem>>, vector<128x256xbf16>,
    return
  }
  func.func @transform_0(%arg0: i32, %arg1: i32) -> (i32, i32) {
    %c0_i32 = arith.constant 0 : i32
    %c0_i32_0 = arith.constant 0 : i32
    return %arg1, %c0_i32 : i32, i32
  }
  func.func @transform_1(%arg0: i32, %arg1: i32) -> (i32, i32) {
    %c0_i32 = arith.constant 0 : i32
    %c0_i32_0 = arith.constant 0 : i32
    return %c0_i32, %arg0 : i32, i32
  }
  func.func @transform_2(%arg0: i32, %arg1: i32) -> (i32, i32) {
    %c0_i32 = arith.constant 0 : i32
    %c0_i32_0 = arith.constant 0 : i32
    return %arg1, %c0_i32 : i32, i32
  }
  func.func @transform_3(%arg0: i32, %arg1: i32) -> i32 {
    %c0_i32 = arith.constant 0 : i32
    %c0_i32_0 = arith.constant 0 : i32
    return %c0_i32 : i32
  }
  func.func @transform_4(%arg0: i32, %arg1: i32) -> (i32, i32) {
    %c0_i32 = arith.constant 0 : i32
    return %arg1, %arg0 : i32, i32
  }
}

module attributes {stable_mosaic.version = 11 : i64} {
  func.func @_gemm_kernel(%arg0: i32, %arg1: i32, %arg2: memref<32x2304xbf16, #tpu.memory_space<vmem>>, %arg3: memref<2304x256xbf16, #tpu.memory_space<vmem>>, %arg4: memref<32x1xf32, #tpu.memory_space<vmem>>, %arg5: memref<1xf32, #tpu.memory_space<smem>>, %arg6: memref<32x256xf32, #tpu.memory_space<vmem>>) attributes {dimension_semantics = [#tpu.dimension_semantics<parallel>, #tpu.dimension_semantics<parallel>], iteration_bounds = array<i64: 2, 1>, scalar_prefetch = 0 : i64, scratch_operands = 0 : i64, tpu.core_type = #tpu.core_type<tc>, window_params = [{transform_indices = @transform_0, window_bounds = array<i64: 32, 2304>}, {transform_indices = @transform_1, window_bounds = array<i64: 2304, 256>}, {transform_indices = @transform_2, window_bounds = array<i64: 32, 1>}, {transform_indices = @transform_3, window_bounds = array<i64: 1>}, {transform_indices = @transform_4, window_bounds = array<i64: 32, 256>}]} {
    %c0 = arith.constant 0 : index
    %c0_0 = arith.constant 0 : index
    %0 = vector.load %arg3[%c0, %c0_0] : memref<2304x256xbf16, #tpu.memory_space<vmem>>, vector<2304x256xbf16>
    %c0_1 = arith.constant 0 : index
    %c0_2 = arith.constant 0 : index
    %1 = vector.load %arg2[%c0_1, %c0_2] : memref<32x2304xbf16, #tpu.memory_space<vmem>>, vector<32x2304xbf16>
    %cst = arith.constant dense<0.000000e+00> : vector<32x256xf32>
    %2 = tpu.matmul %1, %0, %cst {dimension_numbers = #tpu.dot_dimension_numbers<[1], [0], [0], [1], [0, 0, 1, 1], [], []>} : vector<32x2304xbf16>, vector<2304x256xbf16>, vector<32x256xf32> -> vector<32x256xf32>
    %c0_3 = arith.constant 0 : index
    %c0_4 = arith.constant 0 : index
    %3 = vector.load %arg4[%c0_3, %c0_4] : memref<32x1xf32, #tpu.memory_space<vmem>>, vector<32x1xf32>
    %4 = vector.broadcast %3 : vector<32x1xf32> to vector<32x256xf32>
    %5 = arith.addf %2, %4 : vector<32x256xf32>
    %c0_5 = arith.constant 0 : index
    %c0_6 = arith.constant 0 : index
    %6 = vector.load %arg6[%c0_5, %c0_6] : memref<32x256xf32, #tpu.memory_space<vmem>>, vector<32x256xf32>
    tpu.vector_store %arg6[%c0_5, %c0_6], %5 {strides = array<i32>} : memref<32x256xf32, #tpu.memory_space<vmem>>, vector<32x256xf32>,
    return
  }
  func.func @transform_0(%arg0: i32, %arg1: i32) -> (i32, i32) {
    %c0_i32 = arith.constant 0 : i32
    %c0_i32_0 = arith.constant 0 : i32
    return %arg1, %c0_i32 : i32, i32
  }
  func.func @transform_1(%arg0: i32, %arg1: i32) -> (i32, i32) {
    %c0_i32 = arith.constant 0 : i32
    %c0_i32_0 = arith.constant 0 : i32
    return %c0_i32, %arg0 : i32, i32
  }
  func.func @transform_2(%arg0: i32, %arg1: i32) -> (i32, i32) {
    %c0_i32 = arith.constant 0 : i32
    %c0_i32_0 = arith.constant 0 : i32
    return %arg1, %c0_i32 : i32, i32
  }
  func.func @transform_3(%arg0: i32, %arg1: i32) -> i32 {
    %c0_i32 = arith.constant 0 : i32
    %c0_i32_0 = arith.constant 0 : i32
    return %c0_i32 : i32
  }
  func.func @transform_4(%arg0: i32, %arg1: i32) -> (i32, i32) {
    %c0_i32 = arith.constant 0 : i32
    return %arg1, %arg0 : i32, i32
  }
}

module attributes {stable_mosaic.version = 11 : i64} {
  func.func @_gemm_kernel(%arg0: i32, %arg1: i32, %arg2: memref<32x384xbf16, #tpu.memory_space<vmem>>, %arg3: memref<288x256xbf16, #tpu.memory_space<vmem>>, %arg4: memref<32x1xf32, #tpu.memory_space<vmem>>, %arg5: memref<1xf32, #tpu.memory_space<smem>>, %arg6: memref<32x256xbf16, #tpu.memory_space<vmem>>, %arg7: memref<384x256xbf16, #tpu.memory_space<vmem>>) attributes {dimension_semantics = [#tpu.dimension_semantics<parallel>, #tpu.dimension_semantics<parallel>], iteration_bounds = array<i64: 2, 1>, scalar_prefetch = 0 : i64, scratch_operands = 1 : i64, tpu.core_type = #tpu.core_type<tc>, window_params = [{transform_indices = @transform_0, window_bounds = array<i64: 32, 384>}, {transform_indices = @transform_1, window_bounds = array<i64: 288, 256>}, {transform_indices = @transform_2, window_bounds = array<i64: 32, 1>}, {transform_indices = @transform_3, window_bounds = array<i64: 1>}, {transform_indices = @transform_4, window_bounds = array<i64: 32, 256>}]} {
    %cst = arith.constant 0.000000e+00 : bf16
    %0 = vector.broadcast %cst : bf16 to vector<96x256xbf16>
    %c288 = arith.constant 288 : index
    %c0 = arith.constant 0 : index
    %1 = vector.load %arg7[%c288, %c0] : memref<384x256xbf16, #tpu.memory_space<vmem>>, vector<96x256xbf16>
    tpu.vector_store %arg7[%c288, %c0], %0 {strides = array<i32>} : memref<384x256xbf16, #tpu.memory_space<vmem>>, vector<96x256xbf16>,
    %c0_0 = arith.constant 0 : index
    %c0_1 = arith.constant 0 : index
    %2 = vector.load %arg3[%c0_0, %c0_1] : memref<288x256xbf16, #tpu.memory_space<vmem>>, vector<288x256xbf16>
    %c0_2 = arith.constant 0 : index
    %c0_3 = arith.constant 0 : index
    %3 = vector.load %arg7[%c0_2, %c0_3] : memref<384x256xbf16, #tpu.memory_space<vmem>>, vector<288x256xbf16>
    tpu.vector_store %arg7[%c0_2, %c0_3], %2 {strides = array<i32>} : memref<384x256xbf16, #tpu.memory_space<vmem>>, vector<288x256xbf16>,
    %c0_4 = arith.constant 0 : index
    %c0_5 = arith.constant 0 : index
    %4 = vector.load %arg7[%c0_4, %c0_5] : memref<384x256xbf16, #tpu.memory_space<vmem>>, vector<384x256xbf16>
    %c0_6 = arith.constant 0 : index
    %c0_7 = arith.constant 0 : index
    %5 = vector.load %arg2[%c0_6, %c0_7] : memref<32x384xbf16, #tpu.memory_space<vmem>>, vector<32x384xbf16>
    %cst_8 = arith.constant dense<0.000000e+00> : vector<32x256xf32>
    %6 = tpu.matmul %5, %4, %cst_8 {dimension_numbers = #tpu.dot_dimension_numbers<[1], [0], [0], [1], [0, 0, 1, 1], [], []>} : vector<32x384xbf16>, vector<384x256xbf16>, vector<32x256xf32> -> vector<32x256xf32>
    %c0_9 = arith.constant 0 : index
    %c0_10 = arith.constant 0 : index
    %7 = vector.load %arg4[%c0_9, %c0_10] : memref<32x1xf32, #tpu.memory_space<vmem>>, vector<32x1xf32>
    %8 = vector.broadcast %7 : vector<32x1xf32> to vector<32x256xf32>
    %9 = arith.addf %6, %8 : vector<32x256xf32>
    %cst_11 = arith.constant 0.000000e+00 : f32
    %10 = vector.broadcast %cst_11 : f32 to vector<32x256xf32>
    %11 = arith.maximumf %9, %10 : vector<32x256xf32>
    %12 = arith.truncf %11 : vector<32x256xf32> to vector<32x256xbf16>
    %c0_12 = arith.constant 0 : index
    %c0_13 = arith.constant 0 : index
    %13 = vector.load %arg6[%c0_12, %c0_13] : memref<32x256xbf16, #tpu.memory_space<vmem>>, vector<32x256xbf16>
    tpu.vector_store %arg6[%c0_12, %c0_13], %12 {strides = array<i32>} : memref<32x256xbf16, #tpu.memory_space<vmem>>, vector<32x256xbf16>,
    return
  }
  func.func @transform_0(%arg0: i32, %arg1: i32) -> (i32, i32) {
    %c0_i32 = arith.constant 0 : i32
    %c0_i32_0 = arith.constant 0 : i32
    return %arg1, %c0_i32 : i32, i32
  }
  func.func @transform_1(%arg0: i32, %arg1: i32) -> (i32, i32) {
    %c0_i32 = arith.constant 0 : i32
    %c0_i32_0 = arith.constant 0 : i32
    return %c0_i32, %arg0 : i32, i32
  }
  func.func @transform_2(%arg0: i32, %arg1: i32) -> (i32, i32) {
    %c0_i32 = arith.constant 0 : i32
    %c0_i32_0 = arith.constant 0 : i32
    return %arg1, %c0_i32 : i32, i32
  }
  func.func @transform_3(%arg0: i32, %arg1: i32) -> i32 {
    %c0_i32 = arith.constant 0 : i32
    %c0_i32_0 = arith.constant 0 : i32
    return %c0_i32 : i32
  }
  func.func @transform_4(%arg0: i32, %arg1: i32) -> (i32, i32) {
    %c0_i32 = arith.constant 0 : i32
    return %arg1, %arg0 : i32, i32
  }
}

module attributes {stable_mosaic.version = 11 : i64} {
  func.func @_gemm_kernel(%arg0: i32, %arg1: i32, %arg2: memref<32x384xbf16, #tpu.memory_space<vmem>>, %arg3: memref<288x256xbf16, #tpu.memory_space<vmem>>, %arg4: memref<32x1xf32, #tpu.memory_space<vmem>>, %arg5: memref<1xf32, #tpu.memory_space<smem>>, %arg6: memref<32x256xf32, #tpu.memory_space<vmem>>, %arg7: memref<32x256xf32, #tpu.memory_space<vmem>>, %arg8: memref<384x256xbf16, #tpu.memory_space<vmem>>) attributes {dimension_semantics = [#tpu.dimension_semantics<parallel>, #tpu.dimension_semantics<parallel>], iteration_bounds = array<i64: 2, 1>, scalar_prefetch = 0 : i64, scratch_operands = 1 : i64, tpu.core_type = #tpu.core_type<tc>, window_params = [{transform_indices = @transform_0, window_bounds = array<i64: 32, 384>}, {transform_indices = @transform_1, window_bounds = array<i64: 288, 256>}, {transform_indices = @transform_2, window_bounds = array<i64: 32, 1>}, {transform_indices = @transform_3, window_bounds = array<i64: 1>}, {transform_indices = @transform_4, window_bounds = array<i64: 32, 256>}, {transform_indices = @transform_5, window_bounds = array<i64: 32, 256>}]} {
    %cst = arith.constant 0.000000e+00 : bf16
    %0 = vector.broadcast %cst : bf16 to vector<96x256xbf16>
    %c288 = arith.constant 288 : index
    %c0 = arith.constant 0 : index
    %1 = vector.load %arg8[%c288, %c0] : memref<384x256xbf16, #tpu.memory_space<vmem>>, vector<96x256xbf16>
    tpu.vector_store %arg8[%c288, %c0], %0 {strides = array<i32>} : memref<384x256xbf16, #tpu.memory_space<vmem>>, vector<96x256xbf16>,
    %c0_0 = arith.constant 0 : index
    %c0_1 = arith.constant 0 : index
    %2 = vector.load %arg3[%c0_0, %c0_1] : memref<288x256xbf16, #tpu.memory_space<vmem>>, vector<288x256xbf16>
    %c0_2 = arith.constant 0 : index
    %c0_3 = arith.constant 0 : index
    %3 = vector.load %arg8[%c0_2, %c0_3] : memref<384x256xbf16, #tpu.memory_space<vmem>>, vector<288x256xbf16>
    tpu.vector_store %arg8[%c0_2, %c0_3], %2 {strides = array<i32>} : memref<384x256xbf16, #tpu.memory_space<vmem>>, vector<288x256xbf16>,
    %c0_4 = arith.constant 0 : index
    %c0_5 = arith.constant 0 : index
    %4 = vector.load %arg8[%c0_4, %c0_5] : memref<384x256xbf16, #tpu.memory_space<vmem>>, vector<384x256xbf16>
    %c0_6 = arith.constant 0 : index
    %c0_7 = arith.constant 0 : index
    %5 = vector.load %arg2[%c0_6, %c0_7] : memref<32x384xbf16, #tpu.memory_space<vmem>>, vector<32x384xbf16>
    %cst_8 = arith.constant dense<0.000000e+00> : vector<32x256xf32>
    %6 = tpu.matmul %5, %4, %cst_8 {dimension_numbers = #tpu.dot_dimension_numbers<[1], [0], [0], [1], [0, 0, 1, 1], [], []>} : vector<32x384xbf16>, vector<384x256xbf16>, vector<32x256xf32> -> vector<32x256xf32>
    %c0_9 = arith.constant 0 : index
    %c0_10 = arith.constant 0 : index
    %7 = vector.load %arg4[%c0_9, %c0_10] : memref<32x1xf32, #tpu.memory_space<vmem>>, vector<32x1xf32>
    %8 = vector.broadcast %7 : vector<32x1xf32> to vector<32x256xf32>
    %9 = arith.addf %6, %8 : vector<32x256xf32>
    %c0_11 = arith.constant 0 : index
    %c0_12 = arith.constant 0 : index
    %10 = vector.load %arg6[%c0_11, %c0_12] : memref<32x256xf32, #tpu.memory_space<vmem>>, vector<32x256xf32>
    %cst_13 = arith.constant 1.000000e-01 : f32
    %11 = vector.broadcast %cst_13 : f32 to vector<32x256xf32>
    %12 = arith.mulf %11, %9 : vector<32x256xf32>
    %13 = arith.addf %10, %12 : vector<32x256xf32>
    %c0_14 = arith.constant 0 : index
    %c0_15 = arith.constant 0 : index
    %14 = vector.load %arg7[%c0_14, %c0_15] : memref<32x256xf32, #tpu.memory_space<vmem>>, vector<32x256xf32>
    tpu.vector_store %arg7[%c0_14, %c0_15], %13 {strides = array<i32>} : memref<32x256xf32, #tpu.memory_space<vmem>>, vector<32x256xf32>,
    return
  }
  func.func @transform_0(%arg0: i32, %arg1: i32) -> (i32, i32) {
    %c0_i32 = arith.constant 0 : i32
    %c0_i32_0 = arith.constant 0 : i32
    return %arg1, %c0_i32 : i32, i32
  }
  func.func @transform_1(%arg0: i32, %arg1: i32) -> (i32, i32) {
    %c0_i32 = arith.constant 0 : i32
    %c0_i32_0 = arith.constant 0 : i32
    return %c0_i32, %arg0 : i32, i32
  }
  func.func @transform_2(%arg0: i32, %arg1: i32) -> (i32, i32) {
    %c0_i32 = arith.constant 0 : i32
    %c0_i32_0 = arith.constant 0 : i32
    return %arg1, %c0_i32 : i32, i32
  }
  func.func @transform_3(%arg0: i32, %arg1: i32) -> i32 {
    %c0_i32 = arith.constant 0 : i32
    %c0_i32_0 = arith.constant 0 : i32
    return %c0_i32 : i32
  }
  func.func @transform_4(%arg0: i32, %arg1: i32) -> (i32, i32) {
    %c0_i32 = arith.constant 0 : i32
    return %arg1, %arg0 : i32, i32
  }
  func.func @transform_5(%arg0: i32, %arg1: i32) -> (i32, i32) {
    %c0_i32 = arith.constant 0 : i32
    return %arg1, %arg0 : i32, i32
  }
}

module attributes {stable_mosaic.version = 11 : i64} {
  func.func @_gemm_kernel(%arg0: i32, %arg1: i32, %arg2: memref<32x384xbf16, #tpu.memory_space<vmem>>, %arg3: memref<288x256xbf16, #tpu.memory_space<vmem>>, %arg4: memref<32x1xf32, #tpu.memory_space<vmem>>, %arg5: memref<1xf32, #tpu.memory_space<smem>>, %arg6: memref<32x256xf32, #tpu.memory_space<vmem>>, %arg7: memref<32x256xf32, #tpu.memory_space<vmem>>, %arg8: memref<384x256xbf16, #tpu.memory_space<vmem>>) attributes {dimension_semantics = [#tpu.dimension_semantics<parallel>, #tpu.dimension_semantics<parallel>], iteration_bounds = array<i64: 2, 1>, scalar_prefetch = 0 : i64, scratch_operands = 1 : i64, tpu.core_type = #tpu.core_type<tc>, window_params = [{transform_indices = @transform_0, window_bounds = array<i64: 32, 384>}, {transform_indices = @transform_1, window_bounds = array<i64: 288, 256>}, {transform_indices = @transform_2, window_bounds = array<i64: 32, 1>}, {transform_indices = @transform_3, window_bounds = array<i64: 1>}, {transform_indices = @transform_4, window_bounds = array<i64: 32, 256>}, {transform_indices = @transform_5, window_bounds = array<i64: 32, 256>}]} {
    %cst = arith.constant 0.000000e+00 : bf16
    %0 = vector.broadcast %cst : bf16 to vector<96x256xbf16>
    %c288 = arith.constant 288 : index
    %c0 = arith.constant 0 : index
    %1 = vector.load %arg8[%c288, %c0] : memref<384x256xbf16, #tpu.memory_space<vmem>>, vector<96x256xbf16>
    tpu.vector_store %arg8[%c288, %c0], %0 {strides = array<i32>} : memref<384x256xbf16, #tpu.memory_space<vmem>>, vector<96x256xbf16>,
    %c0_0 = arith.constant 0 : index
    %c0_1 = arith.constant 0 : index
    %2 = vector.load %arg3[%c0_0, %c0_1] : memref<288x256xbf16, #tpu.memory_space<vmem>>, vector<288x256xbf16>
    %c0_2 = arith.constant 0 : index
    %c0_3 = arith.constant 0 : index
    %3 = vector.load %arg8[%c0_2, %c0_3] : memref<384x256xbf16, #tpu.memory_space<vmem>>, vector<288x256xbf16>
    tpu.vector_store %arg8[%c0_2, %c0_3], %2 {strides = array<i32>} : memref<384x256xbf16, #tpu.memory_space<vmem>>, vector<288x256xbf16>,
    %c0_4 = arith.constant 0 : index
    %c0_5 = arith.constant 0 : index
    %4 = vector.load %arg8[%c0_4, %c0_5] : memref<384x256xbf16, #tpu.memory_space<vmem>>, vector<384x256xbf16>
    %c0_6 = arith.constant 0 : index
    %c0_7 = arith.constant 0 : index
    %5 = vector.load %arg2[%c0_6, %c0_7] : memref<32x384xbf16, #tpu.memory_space<vmem>>, vector<32x384xbf16>
    %cst_8 = arith.constant dense<0.000000e+00> : vector<32x256xf32>
    %6 = tpu.matmul %5, %4, %cst_8 {dimension_numbers = #tpu.dot_dimension_numbers<[1], [0], [0], [1], [0, 0, 1, 1], [], []>} : vector<32x384xbf16>, vector<384x256xbf16>, vector<32x256xf32> -> vector<32x256xf32>
    %c0_9 = arith.constant 0 : index
    %c0_10 = arith.constant 0 : index
    %7 = vector.load %arg4[%c0_9, %c0_10] : memref<32x1xf32, #tpu.memory_space<vmem>>, vector<32x1xf32>
    %8 = vector.broadcast %7 : vector<32x1xf32> to vector<32x256xf32>
    %9 = arith.addf %6, %8 : vector<32x256xf32>
    %c0_11 = arith.constant 0 : index
    %c0_12 = arith.constant 0 : index
    %10 = vector.load %arg6[%c0_11, %c0_12] : memref<32x256xf32, #tpu.memory_space<vmem>>, vector<32x256xf32>
    %cst_13 = arith.constant 1.000000e+00 : f32
    %11 = vector.broadcast %cst_13 : f32 to vector<32x256xf32>
    %12 = arith.mulf %11, %9 : vector<32x256xf32>
    %13 = arith.addf %10, %12 : vector<32x256xf32>
    %c0_14 = arith.constant 0 : index
    %c0_15 = arith.constant 0 : index
    %14 = vector.load %arg7[%c0_14, %c0_15] : memref<32x256xf32, #tpu.memory_space<vmem>>, vector<32x256xf32>
    tpu.vector_store %arg7[%c0_14, %c0_15], %13 {strides = array<i32>} : memref<32x256xf32, #tpu.memory_space<vmem>>, vector<32x256xf32>,
    return
  }
  func.func @transform_0(%arg0: i32, %arg1: i32) -> (i32, i32) {
    %c0_i32 = arith.constant 0 : i32
    %c0_i32_0 = arith.constant 0 : i32
    return %arg1, %c0_i32 : i32, i32
  }
  func.func @transform_1(%arg0: i32, %arg1: i32) -> (i32, i32) {
    %c0_i32 = arith.constant 0 : i32
    %c0_i32_0 = arith.constant 0 : i32
    return %c0_i32, %arg0 : i32, i32
  }
  func.func @transform_2(%arg0: i32, %arg1: i32) -> (i32, i32) {
    %c0_i32 = arith.constant 0 : i32
    %c0_i32_0 = arith.constant 0 : i32
    return %arg1, %c0_i32 : i32, i32
  }
  func.func @transform_3(%arg0: i32, %arg1: i32) -> i32 {
    %c0_i32 = arith.constant 0 : i32
    %c0_i32_0 = arith.constant 0 : i32
    return %c0_i32 : i32
  }
  func.func @transform_4(%arg0: i32, %arg1: i32) -> (i32, i32) {
    %c0_i32 = arith.constant 0 : i32
    return %arg1, %arg0 : i32, i32
  }
  func.func @transform_5(%arg0: i32, %arg1: i32) -> (i32, i32) {
    %c0_i32 = arith.constant 0 : i32
    return %arg1, %arg0 : i32, i32
  }
}

module attributes {stable_mosaic.version = 11 : i64} {
  func.func @_gemm_kernel(%arg0: i32, %arg1: i32, %arg2: memref<128x384xbf16, #tpu.memory_space<vmem>>, %arg3: memref<288x256xbf16, #tpu.memory_space<vmem>>, %arg4: memref<128x1xf32, #tpu.memory_space<vmem>>, %arg5: memref<1xf32, #tpu.memory_space<smem>>, %arg6: memref<128x256xbf16, #tpu.memory_space<vmem>>, %arg7: memref<384x256xbf16, #tpu.memory_space<vmem>>) attributes {dimension_semantics = [#tpu.dimension_semantics<parallel>, #tpu.dimension_semantics<parallel>], iteration_bounds = array<i64: 2, 1>, scalar_prefetch = 0 : i64, scratch_operands = 1 : i64, tpu.core_type = #tpu.core_type<tc>, window_params = [{transform_indices = @transform_0, window_bounds = array<i64: 128, 384>}, {transform_indices = @transform_1, window_bounds = array<i64: 288, 256>}, {transform_indices = @transform_2, window_bounds = array<i64: 128, 1>}, {transform_indices = @transform_3, window_bounds = array<i64: 1>}, {transform_indices = @transform_4, window_bounds = array<i64: 128, 256>}]} {
    %cst = arith.constant 0.000000e+00 : bf16
    %0 = vector.broadcast %cst : bf16 to vector<96x256xbf16>
    %c288 = arith.constant 288 : index
    %c0 = arith.constant 0 : index
    %1 = vector.load %arg7[%c288, %c0] : memref<384x256xbf16, #tpu.memory_space<vmem>>, vector<96x256xbf16>
    tpu.vector_store %arg7[%c288, %c0], %0 {strides = array<i32>} : memref<384x256xbf16, #tpu.memory_space<vmem>>, vector<96x256xbf16>,
    %c0_0 = arith.constant 0 : index
    %c0_1 = arith.constant 0 : index
    %2 = vector.load %arg3[%c0_0, %c0_1] : memref<288x256xbf16, #tpu.memory_space<vmem>>, vector<288x256xbf16>
    %c0_2 = arith.constant 0 : index
    %c0_3 = arith.constant 0 : index
    %3 = vector.load %arg7[%c0_2, %c0_3] : memref<384x256xbf16, #tpu.memory_space<vmem>>, vector<288x256xbf16>
    tpu.vector_store %arg7[%c0_2, %c0_3], %2 {strides = array<i32>} : memref<384x256xbf16, #tpu.memory_space<vmem>>, vector<288x256xbf16>,
    %c0_4 = arith.constant 0 : index
    %c0_5 = arith.constant 0 : index
    %4 = vector.load %arg7[%c0_4, %c0_5] : memref<384x256xbf16, #tpu.memory_space<vmem>>, vector<384x256xbf16>
    %c0_6 = arith.constant 0 : index
    %c0_7 = arith.constant 0 : index
    %5 = vector.load %arg2[%c0_6, %c0_7] : memref<128x384xbf16, #tpu.memory_space<vmem>>, vector<128x384xbf16>
    %cst_8 = arith.constant dense<0.000000e+00> : vector<128x256xf32>
    %6 = tpu.matmul %5, %4, %cst_8 {dimension_numbers = #tpu.dot_dimension_numbers<[1], [0], [0], [1], [0, 0, 1, 1], [], []>} : vector<128x384xbf16>, vector<384x256xbf16>, vector<128x256xf32> -> vector<128x256xf32>
    %c0_9 = arith.constant 0 : index
    %c0_10 = arith.constant 0 : index
    %7 = vector.load %arg4[%c0_9, %c0_10] : memref<128x1xf32, #tpu.memory_space<vmem>>, vector<128x1xf32>
    %8 = vector.broadcast %7 : vector<128x1xf32> to vector<128x256xf32>
    %9 = arith.addf %6, %8 : vector<128x256xf32>
    %10 = arith.truncf %9 : vector<128x256xf32> to vector<128x256xbf16>
    %c0_11 = arith.constant 0 : index
    %c0_12 = arith.constant 0 : index
    %11 = vector.load %arg6[%c0_11, %c0_12] : memref<128x256xbf16, #tpu.memory_space<vmem>>, vector<128x256xbf16>
    tpu.vector_store %arg6[%c0_11, %c0_12], %10 {strides = array<i32>} : memref<128x256xbf16, #tpu.memory_space<vmem>>, vector<128x256xbf16>,
    return
  }
  func.func @transform_0(%arg0: i32, %arg1: i32) -> (i32, i32) {
    %c0_i32 = arith.constant 0 : i32
    %c0_i32_0 = arith.constant 0 : i32
    return %arg1, %c0_i32 : i32, i32
  }
  func.func @transform_1(%arg0: i32, %arg1: i32) -> (i32, i32) {
    %c0_i32 = arith.constant 0 : i32
    %c0_i32_0 = arith.constant 0 : i32
    return %c0_i32, %arg0 : i32, i32
  }
  func.func @transform_2(%arg0: i32, %arg1: i32) -> (i32, i32) {
    %c0_i32 = arith.constant 0 : i32
    %c0_i32_0 = arith.constant 0 : i32
    return %arg1, %c0_i32 : i32, i32
  }
  func.func @transform_3(%arg0: i32, %arg1: i32) -> i32 {
    %c0_i32 = arith.constant 0 : i32
    %c0_i32_0 = arith.constant 0 : i32
    return %c0_i32 : i32
  }
  func.func @transform_4(%arg0: i32, %arg1: i32) -> (i32, i32) {
    %c0_i32 = arith.constant 0 : i32
    return %arg1, %arg0 : i32, i32
  }
}

module attributes {stable_mosaic.version = 11 : i64} {
  func.func @_gemm_kernel(%arg0: i32, %arg1: i32, %arg2: memref<16x384xbf16, #tpu.memory_space<vmem>>, %arg3: memref<288x512xbf16, #tpu.memory_space<vmem>>, %arg4: memref<16x1xf32, #tpu.memory_space<vmem>>, %arg5: memref<1xf32, #tpu.memory_space<smem>>, %arg6: memref<16x512xf32, #tpu.memory_space<vmem>>, %arg7: memref<384x512xbf16, #tpu.memory_space<vmem>>) attributes {dimension_semantics = [#tpu.dimension_semantics<parallel>, #tpu.dimension_semantics<parallel>], iteration_bounds = array<i64: 4, 1>, scalar_prefetch = 0 : i64, scratch_operands = 1 : i64, tpu.core_type = #tpu.core_type<tc>, window_params = [{transform_indices = @transform_0, window_bounds = array<i64: 16, 384>}, {transform_indices = @transform_1, window_bounds = array<i64: 288, 512>}, {transform_indices = @transform_2, window_bounds = array<i64: 16, 1>}, {transform_indices = @transform_3, window_bounds = array<i64: 1>}, {transform_indices = @transform_4, window_bounds = array<i64: 16, 512>}]} {
    %cst = arith.constant 0.000000e+00 : bf16
    %0 = vector.broadcast %cst : bf16 to vector<96x512xbf16>
    %c288 = arith.constant 288 : index
    %c0 = arith.constant 0 : index
    %1 = vector.load %arg7[%c288, %c0] : memref<384x512xbf16, #tpu.memory_space<vmem>>, vector<96x512xbf16>
    tpu.vector_store %arg7[%c288, %c0], %0 {strides = array<i32>} : memref<384x512xbf16, #tpu.memory_space<vmem>>, vector<96x512xbf16>,
    %c0_0 = arith.constant 0 : index
    %c0_1 = arith.constant 0 : index
    %2 = vector.load %arg3[%c0_0, %c0_1] : memref<288x512xbf16, #tpu.memory_space<vmem>>, vector<288x512xbf16>
    %c0_2 = arith.constant 0 : index
    %c0_3 = arith.constant 0 : index
    %3 = vector.load %arg7[%c0_2, %c0_3] : memref<384x512xbf16, #tpu.memory_space<vmem>>, vector<288x512xbf16>
    tpu.vector_store %arg7[%c0_2, %c0_3], %2 {strides = array<i32>} : memref<384x512xbf16, #tpu.memory_space<vmem>>, vector<288x512xbf16>,
    %c0_4 = arith.constant 0 : index
    %c0_5 = arith.constant 0 : index
    %4 = vector.load %arg7[%c0_4, %c0_5] : memref<384x512xbf16, #tpu.memory_space<vmem>>, vector<384x512xbf16>
    %c0_6 = arith.constant 0 : index
    %c0_7 = arith.constant 0 : index
    %5 = vector.load %arg2[%c0_6, %c0_7] : memref<16x384xbf16, #tpu.memory_space<vmem>>, vector<16x384xbf16>
    %cst_8 = arith.constant dense<0.000000e+00> : vector<16x512xf32>
    %6 = tpu.matmul %5, %4, %cst_8 {dimension_numbers = #tpu.dot_dimension_numbers<[1], [0], [0], [1], [0, 0, 1, 1], [], []>} : vector<16x384xbf16>, vector<384x512xbf16>, vector<16x512xf32> -> vector<16x512xf32>
    %c0_9 = arith.constant 0 : index
    %c0_10 = arith.constant 0 : index
    %7 = vector.load %arg4[%c0_9, %c0_10] : memref<16x1xf32, #tpu.memory_space<vmem>>, vector<16x1xf32>
    %8 = vector.broadcast %7 : vector<16x1xf32> to vector<16x512xf32>
    %9 = arith.addf %6, %8 : vector<16x512xf32>
    %c0_11 = arith.constant 0 : index
    %c0_12 = arith.constant 0 : index
    %10 = vector.load %arg6[%c0_11, %c0_12] : memref<16x512xf32, #tpu.memory_space<vmem>>, vector<16x512xf32>
    tpu.vector_store %arg6[%c0_11, %c0_12], %9 {strides = array<i32>} : memref<16x512xf32, #tpu.memory_space<vmem>>, vector<16x512xf32>,
    return
  }
  func.func @transform_0(%arg0: i32, %arg1: i32) -> (i32, i32) {
    %c0_i32 = arith.constant 0 : i32
    %c0_i32_0 = arith.constant 0 : i32
    return %arg1, %c0_i32 : i32, i32
  }
  func.func @transform_1(%arg0: i32, %arg1: i32) -> (i32, i32) {
    %c0_i32 = arith.constant 0 : i32
    %c0_i32_0 = arith.constant 0 : i32
    return %c0_i32, %arg0 : i32, i32
  }
  func.func @transform_2(%arg0: i32, %arg1: i32) -> (i32, i32) {
    %c0_i32 = arith.constant 0 : i32
    %c0_i32_0 = arith.constant 0 : i32
    return %arg1, %c0_i32 : i32, i32
  }
  func.func @transform_3(%arg0: i32, %arg1: i32) -> i32 {
    %c0_i32 = arith.constant 0 : i32
    %c0_i32_0 = arith.constant 0 : i32
    return %c0_i32 : i32
  }
  func.func @transform_4(%arg0: i32, %arg1: i32) -> (i32, i32) {
    %c0_i32 = arith.constant 0 : i32
    return %arg1, %arg0 : i32, i32
  }
}

</mosaic_0001>

<bundles_post_ra>
// kernel: edsr_forward.10
= control target key start
LH: loop header
LB: loop body
LE: loop exit
PB: predicated region body
PF: predicated region fallthrough
CT: control target
= control target key end

     0   :  { %10 = vsyncpa [#allocation5], 0  ;;  %s1240_s0 = inlined_call_operand.hbm [shape: bf16[256,128], index: 0, kind: input, shape index: {}]   ;;  %s1241_s1 = inlined_call_operand.vmem [shape: bf16[16,128], index: 1, kind: input, shape index: {}]   ;;  %s1242_s2 = inlined_call_operand.vmem [shape: f32[256,1], index: 2, kind: input, shape index: {}]   ;;  %s1243_s3 = inlined_call_operand.<no memory space> [shape: f32[1], index: 3, kind: input, shape index: {}]   ;;  %s1244_s4 = inlined_call_operand.vmem [shape: bf16[256,128], index: 4, kind: output, shape index: {}]  }
   0x1   :  { %12 = vsyncpa [#allocation5 + $0x1], 0  ;;  %s1069_s15 = smov 0   ;;  %s1071_s16 = smov 0  }
   0x2   :  { %s1073_s17 = smov 0   ;;  %s1075_s18 = smov 0  }
   0x3   :  { %s1077_s19 = smov 0   ;;  %s1079_s20 = smov 0  }
   0x4 LB: > { %s755_s3 = sadd.s32 4294967295, %s1038_s20   ;;  %s27_s21 = sadd.s32 1, %s1034_s19  ;;  %s1038_s20 = sphi %s1079_s20, %s18_s20   ;;  %s1034_s19 = sphi %s1077_s19, %s1252_s19   ;;  %s1030_s18 = sphi %s1075_s18, %s1251_s18   ;;  %s1026_s17 = sphi %s1073_s17, %s1250_s17   ;;  %s1022_s16 = sphi %s1071_s16, %s1249_s16   ;;  %s1018_s15 = sphi %s1069_s15, %s1248_s15  }
   0x5   : > { %p28_p0 = scmp.ge.s32.totalorder %s27_s21, 2  ;;  %s37_s22 = sadd.s32 1, %s1026_s17 }
   0x6   : > { %p44_p1 = scmp.ne.s32.totalorder %s1026_s17, %s1022_s16  ;;  %p45_p2 = scmp.eq.s32.totalorder %s1038_s20, 0 }
   0x7   : > { %s1254_s21 = smov (%p28_p0, %s27_s21), 0  ;;  %p50_p4 = scmp.ne.s32.totalorder %s1022_s16, %s1018_s15 }
   0x8   : > { %p1105_p3 = por %p45_p2, %p44_p1  ;;  %s34_s24 = ssub.s32 %s1034_s19, %s1254_s21 }
   0x9   : > { %p51_p5 = scmp.eq.s32.totalorder %s755_s3, 0  ;;  %p35_p6 = scmp.eq.s32.totalorder %s34_s24, 0 }
   0xa   : > { %p895_p8 = scmp.lt.s32.totalorder %s1038_s20, 2  ;;  %s185_s27 = sand.u32 1, %s1026_s17  }
   0xb   : > { %p1112_p7 = por %p51_p5, %p50_p4  ;;  %s796_s28 = sshll.u32 %s1034_s19, 10 }
   0xc   : > { %s1118_s26 = scalar_select %p35_p6, %s1026_s17, %s37_s22  }
   0xd   : > { %s760_s29 = sshll.u32 %s185_s27, 6  ;;  %s1125_s6 = scalar_lea.hbm %s1240_s0, %s796_s28 }
   0xe   : > { %s189_s7 = scalar_lea.vmem [#allocation4], %s760_s29  ;;  %p1129_p9 = pnand %p895_p8, %p1105_p3 }
   0xf   : > { %s196_s8 = sshll.u32 %s189_s7, 4  ;;  %s1135_s10 = scalar_lea.sflag [#allocation5], %s185_s27  ;;  %s1133_s8 = int_to_ptr.vmem [resolvable:$true] %s196_s8 }
  0x10   : > { %s958_s11 = scalar_lea.hbm %s1125_s6, 1024  ;;  %p960_p11 = pneg %p1129_p9 }
  0x11   : > { %p959_p10 = scmp.ne.s32.totalorder %s1125_s6, %s958_s11  ;;  %s963_s14 = scalar_lea.hbm %s1240_s0, 2048 }
  0x12   : > { %p964_p0 = scmp.lt.u32.totalorder %s1125_s6, %s1240_s0  ;;  %p965_p1 = scmp.lt.u32.totalorder %s963_s14, %s958_s11 }
  0x13   : > { %p961_p12 = pnand %p960_p11, %p959_p10  ;;  %p967_p3 = scmp.lt.u32.totalorder %s958_s11, %s1125_s6 }
  0x14   : > { %p966_p2 = por %p965_p1, %p964_p0 }
  0x15   : > { %p962_p13 = pneg %p961_p12 }
  0x16   : > { %p968_p4 = por %p967_p3, %p966_p2 }
  0x18   : > { %p969_p5 = pnand %p968_p4, %p962_p13 }
  0x1a   : > { %972 = shalt.err (!%p969_p5)
}
  0x1b   : > { %s973_s22 = scalar_lea.vmem %s1133_s8, 1024  ;;  %s1040_s23 = smov [#allocation4]  }
  0x1c   : > { %p974_p6 = scmp.ne.s32.totalorder %s1133_s8, %s973_s22  ;;  %s978_s24 = sshll.u32 %s1040_s23, 4  ;;  %s979_s24 = int_to_ptr.vmem [resolvable:$false] %s978_s24 }
  0x1d   : > { %s980_s27 = scalar_lea.vmem %s979_s24, 2048  ;;  %p981_p12 = scmp.lt.s32.totalorder %s1133_s8, %s979_s24 }
  0x1e   : > { %p976_p8 = pnand %p974_p6, %p960_p11  ;;  %p982_p0 = scmp.lt.s32.totalorder %s980_s27, %s973_s22 }
  0x20   : > { %p977_p10 = pneg %p976_p8  ;;  %p983_p1 = por %p982_p0, %p981_p12 }
  0x22   : > { %p984_p2 = pnand %p983_p1, %p977_p10 }
  0x24   : > { %987 = shalt.err (!%p984_p2)
}
  0x25   : > { %s1041_s28 = smov 64   ;;  %s1042_s29 = smov 4  }
  0x26   : > { %894 = dma.hbm_to_vmem [thread:$0]  (!%p1129_p9), %s1125_s6, 1024, %s1133_s8, %s1135_s10, %s1041_s28, %s1041_s28, %s1042_s29  }
  0x27   : > { %p763_p11 = scmp.ge.s32.totalorder %s1038_s20, 1  ;;  %p213_p13 = scmp.lt.s32.totalorder %s1038_s20, 3 }
  0x29   : > { %p214_p3 = pnand %p763_p11, %p213_p13 }
  0x2a   : > { %s219_s30 = sand.u32 (!%p214_p3), 1, %s1022_s16  }
  0x2b   : > { %217 = sbr.rel (%p214_p3) target bundleno = 285 (0x11d), region = 36  ;;  %s764_s5 = sshll.u32 (!%p214_p3), %s219_s30, 6 }
  0x2c   : > { %s220_s7 = scalar_lea.sflag (!%p214_p3), [#allocation5], %s219_s30  ;;  %s1166_s11 = scalar_lea.vmem (!%p214_p3), [#allocation4], %s764_s5 }
  0x32   : > { %1013 = dma.done.wait (%p1112_p7), %s220_s7, 1024  }
  0x33   : > { %1015 = vsyncadd (%p1112_p7), %s220_s7, 4294966272  ;;  %s765_s6 = sshll.u32 %s1030_s18, 4  ;;  %v1043_v0 = vmov 0   ;;  %v949_v1 = vld [vmem:[%s1241_s1] sm:$0xff]   ;;  %v952_v4 = vld [vmem:[%s1166_s11 + $0x8] sm:$0xff]  }
  0x34   : > { %948 = vset.pattern.permute.xlu1 %v1043_v0  ;;  %947 = vset.pattern.permute.xlu0 %v1043_v0  ;;  %p266_p9 = scmp.lt.s32.totalorder %s765_s6, 31  ;;  %v950_v2 = vld [vmem:[%s1166_s11] sm:$0xff]   ;;  %v953_v5 = vld [vmem:[%s1166_s11 + $0x28] sm:$0xff]   ;;  %v954_v6 = vld [vmem:[%s1166_s11 + $0x10] sm:$0xff]  }
  0x35   : > { %869 = vmatprep.subr.bf16.mxu0 %v949_v1  ;;  %887 = vmatprep.subr.bf16.mxu1 %v949_v1  ;;  %v951_v3 = vld [vmem:[%s1166_s11 + $0x20] sm:$0xff]   ;;  %v955_v7 = vld [vmem:[%s1166_s11 + $0x30] sm:$0xff]   ;;  %v956_v10 = vld [vmem:[%s1166_s11 + $0x18] sm:$0xff]  }
  0x36   : > { %s1256_s6 = smov (!%p266_p9, %s765_s6), 31  ;;  %870 = vmatpush3.bf16.msra.mxu0 %v949_v1  ;;  %888 = vmatpush3.bf16.msra.mxu1 %v949_v1  ;;  %v957_v11 = vld [vmem:[%s1166_s11 + $0x38] sm:$0xff]  }
  0x37   : > { %s766_s18 = sshll.u32 %s1256_s6, 3  ;;  %871 = vmatprep.mubr.bf16.mxu0 %v950_v2  ;;  %879 = vmatprep.mubr.bf16.mxu1 %v951_v3  ;;  %s768_s13 = sshll.u32 %s1256_s6, 2 }
  0x38   : > { %s1188_s12 = scalar_lea.vmem %s1242_s2, %s766_s18  ;;  %s1212_s3 = scalar_lea.vmem %s1244_s4, %s768_s13 }
  0x39   : > { %872 = vmatmul.mubr.bf16.vlgmr.msra.gmra.mrb[0].mxu0 %v952_v4  ;;  %880 = vmatmul.mubr.bf16.vlgmr.msra.gmra.mrb[0].mxu1 %v953_v5  ;;  %v323_v8 = vld [vmem:[%s1188_s12 + $0x10] sm:$0xff]  ;;  %v321_v9 = vld [vmem:[%s1188_s12] sm:$0xff]  ;;  %v324_v12 = vld [vmem:[%s1188_s12 + $0x18] sm:$0xff] }
  0x3a   : > { %875 = vmatprep.mubr.bf16.mxu0 %v954_v6  ;;  %883 = vmatprep.mubr.bf16.mxu1 %v955_v7  ;;  %v322_v13 = vld [vmem:[%s1188_s12 + $0x8] sm:$0xff]  ;;  %v325_v15 = vld [vmem:[%s1188_s12 + $0x20] sm:$0xff]  ;;  %v328_v16 = vld [vmem:[%s1188_s12 + $0x38] sm:$0xff] }
  0x3b   : > { %349 = vperm.xlu1 %948, %v323_v8   ;;  %339 = vperm.xlu0 %947, %v321_v9   ;;  %v326_v14 = vld [vmem:[%s1188_s12 + $0x28] sm:$0xff]  ;;  %v327_v17 = vld [vmem:[%s1188_s12 + $0x30] sm:$0xff]  ;;  %v329_v19 = vld [vmem:[%s1188_s12 + $0x40] sm:$0xff] }
  0x3c   : > { %v330_v18 = vld [vmem:[%s1188_s12 + $0x48] sm:$0xff]  ;;  %v332_v20 = vld [vmem:[%s1188_s12 + $0x58] sm:$0xff]  ;;  %v331_v21 = vld [vmem:[%s1188_s12 + $0x50] sm:$0xff] }
  0x3d   : > { %v334_v22 = vld [vmem:[%s1188_s12 + $0x68] sm:$0xff]  ;;  %v333_v23 = vld [vmem:[%s1188_s12 + $0x60] sm:$0xff]  ;;  %v336_v24 = vld [vmem:[%s1188_s12 + $0x78] sm:$0xff] }
  0x3e   : > { %v335_v25 = vld [vmem:[%s1188_s12 + $0x70] sm:$0xff] }
  0x3f   : > { %354 = vperm.xlu1 %948, %v324_v12   ;;  %344 = vperm.xlu0 %947, %v322_v13  }
  0x41   : > { %876 = vmatmul.mubr.bf16.gmra.mrb[4].mxu0 %v956_v10  ;;  %884 = vmatmul.mubr.bf16.gmra.mrb[4].mxu1 %v957_v11 }
  0x43   : > { %364 = vperm.xlu1 %948, %v326_v14   ;;  %359 = vperm.xlu0 %947, %v325_v15  }
  0x47   : > { %374 = vperm.xlu1 %948, %v328_v16   ;;  %369 = vperm.xlu0 %947, %v327_v17  }
  0x4b   : > { %384 = vperm.xlu1 %948, %v330_v18   ;;  %379 = vperm.xlu0 %947, %v329_v19  }
  0x4f   : > { %394 = vperm.xlu1 %948, %v332_v20   ;;  %389 = vperm.xlu0 %947, %v331_v21  }
  0x53   : > { %404 = vperm.xlu1 %948, %v334_v22   ;;  %399 = vperm.xlu0 %947, %v333_v23  }
  0x57   : > { %414 = vperm.xlu1 %948, %v336_v24   ;;  %409 = vperm.xlu0 %947, %v335_v25  }
  0xba   : > { %v350_v26 = vpop.permute.xlu1 %349  ;;  %v340_v27 = vpop.permute.xlu0 %339 }
  0xbe   : > { %v355_v28 = vpop.permute.xlu1 %354  ;;  %v345_v29 = vpop.permute.xlu0 %344 }
  0xc2   : > { %v365_v30 = vpop.permute.xlu1 %364  ;;  %v360_v31 = vpop.permute.xlu0 %359 }
  0xc6   : > { %v375_v32 = vpop.permute.xlu1 %374  ;;  %v370_v33 = vpop.permute.xlu0 %369 }
  0xca   : > { %v385_v34 = vpop.permute.xlu1 %384  ;;  %v380_v35 = vpop.permute.xlu0 %379 }
  0xce   : > { %v395_v36 = vpop.permute.xlu1 %394  ;;  %v390_v37 = vpop.permute.xlu0 %389 }
  0xd2   : > { %v405_v38 = vpop.permute.xlu1 %404  ;;  %v400_v39 = vpop.permute.xlu0 %399 }
  0xd6   : > { %v415_v60 = vpop.permute.xlu1 %414  ;;  %v410_v61 = vpop.permute.xlu0 %409 }
 0x10c   : > { %v873_v40 = vpop.f32.mrb[0].mxu0  ;;  %v881_v41 = vpop.f32.mrb[0].mxu1 }
 0x10d   : > { %v499_v42 = vpop.f32.mrb[1].mxu0  ;;  %v531_v43 = vpop.f32.mrb[1].mxu1  ;;  %v508_v46 = vadd.f32 %v873_v40, %v350_v26  ;;  %v540_v47 = vadd.f32 %v881_v41, %v390_v37 }
 0x10e   : > { %v874_v44 = vpop.f32.mrb[2].mxu0  ;;  %v882_v45 = vpop.f32.mrb[2].mxu1  ;;  %v500_v52 = vadd.f32 %v499_v42, %v340_v27  ;;  %v532_v53 = vadd.f32 %v531_v43, %v380_v35 }
 0x10f   : > { %v511_v48 = vadd.f32 %v874_v44, %v355_v28  ;;  %v543_v49 = vadd.f32 %v882_v45, %v395_v36  ;;  %v502_v50 = vpop.f32.mrb[3].mxu0  ;;  %v534_v51 = vpop.f32.mrb[3].mxu1 }
 0x110   : > { %v503_v54 = vadd.f32 %v502_v50, %v345_v29  ;;  %v535_v55 = vadd.f32 %v534_v51, %v385_v34 }
 0x111   : > { %v821_v56 = vpack.c.bf16 %v511_v48, %v508_v46  ;;  %v841_v57 = vpack.c.bf16 %v543_v49, %v540_v47 }
 0x112   : > { %v816_v58 = vpack.c.bf16 %v503_v54, %v500_v52  ;;  %v836_v59 = vpack.c.bf16 %v535_v55, %v532_v53 }
 0x113   : > { %853 = vst [vmem:[%s1212_s3 + $0x8] sm:$0xff] %v821_v56   ;;  %857 = vst [vmem:[%s1212_s3 + $0x28] sm:$0xff] %v841_v57  }
 0x114   : > { %817 = vst [vmem:[%s1212_s3] sm:$0xff] %v816_v58   ;;  %856 = vst [vmem:[%s1212_s3 + $0x20] sm:$0xff] %v836_v59   ;;  %v877_v62 = vpop.f32.mrb[4].mxu0  ;;  %v885_v63 = vpop.f32.mrb[4].mxu1 }
 0x115   : > { %v515_v0 = vpop.f32.mrb[5].mxu0  ;;  %v547_v1 = vpop.f32.mrb[5].mxu1  ;;  %v524_v4 = vadd.f32 %v877_v62, %v370_v33  ;;  %v556_v5 = vadd.f32 %v885_v63, %v410_v61 }
 0x116   : > { %v878_v2 = vpop.f32.mrb[6].mxu0  ;;  %v886_v3 = vpop.f32.mrb[6].mxu1  ;;  %v516_v10 = vadd.f32 %v515_v0, %v360_v31  ;;  %v548_v11 = vadd.f32 %v547_v1, %v400_v39 }
 0x117   : > { %v527_v6 = vadd.f32 %v878_v2, %v375_v32  ;;  %v559_v7 = vadd.f32 %v886_v3, %v415_v60  ;;  %v518_v8 = vpop.f32.mrb[7].mxu0  ;;  %v550_v9 = vpop.f32.mrb[7].mxu1 }
 0x118   : > { %v519_v12 = vadd.f32 %v518_v8, %v365_v30  ;;  %v551_v13 = vadd.f32 %v550_v9, %v405_v38 }
 0x119   : > { %v831_v14 = vpack.c.bf16 %v527_v6, %v524_v4  ;;  %v851_v15 = vpack.c.bf16 %v559_v7, %v556_v5 }
 0x11a   : > { %v826_v16 = vpack.c.bf16 %v519_v12, %v516_v10  ;;  %v846_v17 = vpack.c.bf16 %v551_v13, %v548_v11 }
 0x11b   : > { %855 = vst [vmem:[%s1212_s3 + $0x18] sm:$0xff] %v831_v14   ;;  %859 = vst [vmem:[%s1212_s3 + $0x38] sm:$0xff] %v851_v15  }
 0x11c   : > { %854 = vst [vmem:[%s1212_s3 + $0x10] sm:$0xff] %v826_v16   ;;  %858 = vst [vmem:[%s1212_s3 + $0x30] sm:$0xff] %v846_v17  }
 0x11d PF: > { %s18_s20 = sadd.s32 1, %s1038_s20   ;;  %s1248_s15 = smov %s1022_s16 }
 0x11e   : > { %p15_p7 = scmp.ge.s32.totalorder %s18_s20, 4   ;;  %s1249_s16 = smov %s1026_s17 }
 0x11f   : > { %s1250_s17 = smov %s1118_s26  ;;  %s1251_s18 = smov %s1034_s19 }
 0x120   : > { %s1252_s19 = smov %s1254_s21  ;;  %17 = sbr.rel (!%p15_p7) target bundleno = 4 (0x4), region = 82 }
 0x127   :  { %670 = vsyncpa [#allocation5], 1 }
 0x128   :  { %672 = vsyncpa [#allocation5 + $0x1], 1 }

// kernel: edsr_forward.11
= control target key start
LH: loop header
LB: loop body
LE: loop exit
PB: predicated region body
PF: predicated region fallthrough
CT: control target
= control target key end

     0   :  { %s6815_s0 = inlined_call_operand.vmem [shape: bf16[256,1664], index: 0, kind: input, shape index: {}]   ;;  %s6816_s1 = inlined_call_operand.vmem [shape: bf16[1664,512], index: 1, kind: input, shape index: {}]   ;;  %s6817_s2 = inlined_call_operand.vmem [shape: f32[256,1], index: 2, kind: input, shape index: {}]   ;;  %s6818_s3 = inlined_call_operand.<no memory space> [shape: f32[1], index: 3, kind: input, shape index: {}]   ;;  %s6819_s4 = inlined_call_operand.vmem [shape: bf16[256,512], index: 4, kind: output, shape index: {}]  }
   0x1   :  { %9 = sst [smem:[#allocation2]] %s6818_s3 }
   0x2   :  { %s5570_s17 = smov 0   ;;  %s5572_s18 = smov 0  }
   0x3   :  { %s5574_s19 = smov 0   ;;  %s5576_s20 = smov 0  }
   0x4   :  { %s5578_s21 = smov 0   ;;  %s5580_s22 = smov 0  }
   0x5   :  { %s5582_s23 = smov 0   ;;  %s5584_s24 = smov 0  }
   0x6   :  { %s5586_s25 = smov 0  }
   0x7 LB: > { %s24_s3 = sadd.s32 1, %s5531_s23  ;;  %s27_s26 = sadd.s32 1, %s5535_s24  ;;  %s5539_s25 = sphi %s5586_s25, %s15_s25   ;;  %s5535_s24 = sphi %s5584_s24, %s6829_s24   ;;  %s5531_s23 = sphi %s5582_s23, %s6828_s23   ;;  %s5527_s22 = sphi %s5580_s22, %s6827_s22   ;;  %s5523_s21 = sphi %s5578_s21, %s6826_s21   ;;  %s5519_s20 = sphi %s5576_s20, %s6825_s20   ;;  %s5515_s19 = sphi %s5574_s19, %s6824_s19   ;;  %s5511_s18 = sphi %s5572_s18, %s6823_s18   ;;  %s5507_s17 = sphi %s5570_s17, %s6822_s17  }
   0x8   : > { %p25_p0 = scmp.ge.s32.totalorder %s24_s3, 2  ;;  %p67_p1 = scmp.ne.s32.totalorder %s5519_s20, %s5515_s19 }
   0x9   : > { %s4306_s27 = sadd.s32 4294967295, %s5539_s25   ;;  %p68_p2 = scmp.eq.s32.totalorder %s5539_s25, 0 }
   0xa   : > { %s6831_s3 = smov (%p25_p0, %s24_s3), 0  ;;  %s6833_s26 = smov (!%p25_p0, %s27_s26), %s5535_s24 }
   0xb   : > { %p29_p3 = scmp.ge.s32.totalorder %s6833_s26, 2  ;;  %s130_s28 = ssub.s32 %s5531_s23, %s6831_s3 }
   0xc   : > { %p5626_p4 = por %p68_p2, %p67_p1  ;;  %p145_p5 = scmp.ne.s32.totalorder %s5511_s18, %s5507_s17 }
   0xd   : > { %s6835_s26 = smov (%p29_p3, %s6833_s26), 0  ;;  %s60_s30 = sadd.s32 1, %s5519_s20 }
   0xe   : > { %p146_p6 = scmp.eq.s32.totalorder %s4306_s27, 3  ;;  %s57_s5 = ssub.s32 %s5535_s24, %s6835_s26 }
   0xf   : > { %s135_s6 = sadd.s32 1, %s5511_s18  ;;  %p58_p7 = scmp.eq.s32.totalorder %s57_s5, 0 }
  0x10   : > { %s132_s7 = sor.u32 %s130_s28, %s57_s5  ;;  %p5638_p9 = por %p146_p6, %p145_p5 }
  0x11   : > { %p133_p8 = scmp.eq.s32.totalorder %s132_s7, 0  ;;  %p4309_p10 = scmp.ge.s32.totalorder %s5539_s25, 4 }
  0x12   : > { %s5643_s9 = scalar_select %p58_p7, %s5519_s20, %s60_s30  }
  0x13   : > { %s5646_s10 = scalar_select %p133_p8, %s5511_s18, %s135_s6  }
  0x14   : > { %171 = sbr.rel (%p4309_p10) target bundleno = 135 (0x87), region = 20 }
  0x1b   : > { %184 = sbr.rel (!%p5626_p4) target bundleno = 135 (0x87), region = 28  ;;  %s186_s11 = sand.u32 (%p5626_p4), 1, %s5519_s20  }
  0x1c   : > { %s4653_s12 = sshll.u32 (%p5626_p4), %s5535_s24, 3  ;;  %s4927_s13 = smul.u32 (%p5626_p4), 1664, %s186_s11 }
  0x1d   : > { %s5656_s16 = scalar_lea.vmem (%p5626_p4), %s6816_s1, %s4653_s12 }
  0x1e   : > { %v633_v0 = vld [vmem:[%s5656_s16] sm:$0xff] (%p5626_p4)  ;;  %v635_v1 = vld [vmem:[%s5656_s16 + $0x10] sm:$0xff] (%p5626_p4)  ;;  %s5664_s27 = scalar_lea.vmem (%p5626_p4), [#allocation3], %s4927_s13 }
  0x1f   : > { %v637_v2 = vld [vmem:[%s5656_s16 + $0x20] sm:$0xff] (%p5626_p4)  ;;  %v639_v3 = vld [vmem:[%s5656_s16 + $0x30] sm:$0xff] (%p5626_p4)  ;;  %634 = vst [vmem:[%s5664_s27] sm:$0xff] (%p5626_p4), %v633_v0  ;;  %636 = vst [vmem:[%s5664_s27 + $0x8] sm:$0xff] (%p5626_p4), %v635_v1 }
  0x20   : > { %v641_v4 = vld [vmem:[%s5656_s16 + $0x40] sm:$0xff] (%p5626_p4)  ;;  %v643_v5 = vld [vmem:[%s5656_s16 + $0x50] sm:$0xff] (%p5626_p4)  ;;  %638 = vst [vmem:[%s5664_s27 + $0x10] sm:$0xff] (%p5626_p4), %v637_v2  ;;  %640 = vst [vmem:[%s5664_s27 + $0x18] sm:$0xff] (%p5626_p4), %v639_v3 }
  0x21   : > { %642 = vst [vmem:[%s5664_s27 + $0x20] sm:$0xff] (%p5626_p4), %v641_v4  ;;  %644 = vst [vmem:[%s5664_s27 + $0x28] sm:$0xff] (%p5626_p4), %v643_v5  ;;  %v645_v6 = vld [vmem:[%s5656_s16 + $0x60] sm:$0xff] (%p5626_p4)  ;;  %v647_v7 = vld [vmem:[%s5656_s16 + $0x70] sm:$0xff] (%p5626_p4) }
  0x22   : > { %v649_v8 = vld [vmem:[%s5656_s16 + $0x80] sm:$0xff]  ;;  %646 = vst [vmem:[%s5664_s27 + $0x30] sm:$0xff] %v645_v6  ;;  %648 = vst [vmem:[%s5664_s27 + $0x38] sm:$0xff] %v647_v7  ;;  %v651_v9 = vld [vmem:[%s5656_s16 + $0x90] sm:$0xff] }
  0x23   : > { %650 = vst [vmem:[%s5664_s27 + $0x40] sm:$0xff] %v649_v8  ;;  %v653_v10 = vld [vmem:[%s5656_s16 + $0xa0] sm:$0xff]  ;;  %v655_v11 = vld [vmem:[%s5656_s16 + $0xb0] sm:$0xff]  ;;  %652 = vst [vmem:[%s5664_s27 + $0x48] sm:$0xff] %v651_v9 }
  0x24   : > { %654 = vst [vmem:[%s5664_s27 + $0x50] sm:$0xff] %v653_v10  ;;  %656 = vst [vmem:[%s5664_s27 + $0x58] sm:$0xff] %v655_v11  ;;  %v657_v12 = vld [vmem:[%s5656_s16 + $0xc0] sm:$0xff]  ;;  %v659_v13 = vld [vmem:[%s5656_s16 + $0xd0] sm:$0xff] }
  0x25   : > { %v661_v14 = vld [vmem:[%s5656_s16 + $0xe0] sm:$0xff]  ;;  %658 = vst [vmem:[%s5664_s27 + $0x60] sm:$0xff] %v657_v12  ;;  %660 = vst [vmem:[%s5664_s27 + $0x68] sm:$0xff] %v659_v13  ;;  %v663_v15 = vld [vmem:[%s5656_s16 + $0xf0] sm:$0xff] }
  0x26   : > { %662 = vst [vmem:[%s5664_s27 + $0x70] sm:$0xff] %v661_v14  ;;  %v665_v16 = vld [vmem:[%s5656_s16 + $0x100] sm:$0xff]  ;;  %v667_v17 = vld [vmem:[%s5656_s16 + $0x110] sm:$0xff]  ;;  %664 = vst [vmem:[%s5664_s27 + $0x78] sm:$0xff] %v663_v15 }
  0x27   : > { %666 = vst [vmem:[%s5664_s27 + $0x80] sm:$0xff] %v665_v16  ;;  %668 = vst [vmem:[%s5664_s27 + $0x88] sm:$0xff] %v667_v17  ;;  %v669_v18 = vld [vmem:[%s5656_s16 + $0x120] sm:$0xff]  ;;  %v671_v19 = vld [vmem:[%s5656_s16 + $0x130] sm:$0xff] }
  0x28   : > { %v673_v20 = vld [vmem:[%s5656_s16 + $0x140] sm:$0xff]  ;;  %670 = vst [vmem:[%s5664_s27 + $0x90] sm:$0xff] %v669_v18  ;;  %672 = vst [vmem:[%s5664_s27 + $0x98] sm:$0xff] %v671_v19  ;;  %v675_v21 = vld [vmem:[%s5656_s16 + $0x150] sm:$0xff] }
  0x29   : > { %674 = vst [vmem:[%s5664_s27 + $0xa0] sm:$0xff] %v673_v20  ;;  %v677_v22 = vld [vmem:[%s5656_s16 + $0x160] sm:$0xff]  ;;  %v679_v23 = vld [vmem:[%s5656_s16 + $0x170] sm:$0xff]  ;;  %676 = vst [vmem:[%s5664_s27 + $0xa8] sm:$0xff] %v675_v21 }
  0x2a   : > { %678 = vst [vmem:[%s5664_s27 + $0xb0] sm:$0xff] %v677_v22  ;;  %680 = vst [vmem:[%s5664_s27 + $0xb8] sm:$0xff] %v679_v23  ;;  %v681_v24 = vld [vmem:[%s5656_s16 + $0x180] sm:$0xff]  ;;  %v683_v25 = vld [vmem:[%s5656_s16 + $0x190] sm:$0xff] }
  0x2b   : > { %v685_v26 = vld [vmem:[%s5656_s16 + $0x1a0] sm:$0xff]  ;;  %682 = vst [vmem:[%s5664_s27 + $0xc0] sm:$0xff] %v681_v24  ;;  %684 = vst [vmem:[%s5664_s27 + $0xc8] sm:$0xff] %v683_v25  ;;  %v687_v27 = vld [vmem:[%s5656_s16 + $0x1b0] sm:$0xff] }
  0x2c   : > { %686 = vst [vmem:[%s5664_s27 + $0xd0] sm:$0xff] %v685_v26  ;;  %v689_v28 = vld [vmem:[%s5656_s16 + $0x1c0] sm:$0xff]  ;;  %v691_v29 = vld [vmem:[%s5656_s16 + $0x1d0] sm:$0xff]  ;;  %688 = vst [vmem:[%s5664_s27 + $0xd8] sm:$0xff] %v687_v27 }
  0x2d   : > { %690 = vst [vmem:[%s5664_s27 + $0xe0] sm:$0xff] %v689_v28  ;;  %692 = vst [vmem:[%s5664_s27 + $0xe8] sm:$0xff] %v691_v29  ;;  %v693_v30 = vld [vmem:[%s5656_s16 + $0x1e0] sm:$0xff]  ;;  %v695_v31 = vld [vmem:[%s5656_s16 + $0x1f0] sm:$0xff] }
  0x2e   : > { %v697_v32 = vld [vmem:[%s5656_s16 + $0x200] sm:$0xff]  ;;  %694 = vst [vmem:[%s5664_s27 + $0xf0] sm:$0xff] %v693_v30  ;;  %696 = vst [vmem:[%s5664_s27 + $0xf8] sm:$0xff] %v695_v31  ;;  %v699_v33 = vld [vmem:[%s5656_s16 + $0x210] sm:$0xff] }
  0x2f   : > { %698 = vst [vmem:[%s5664_s27 + $0x100] sm:$0xff] %v697_v32  ;;  %v701_v34 = vld [vmem:[%s5656_s16 + $0x220] sm:$0xff]  ;;  %v703_v35 = vld [vmem:[%s5656_s16 + $0x230] sm:$0xff]  ;;  %700 = vst [vmem:[%s5664_s27 + $0x108] sm:$0xff] %v699_v33 }
  0x30   : > { %702 = vst [vmem:[%s5664_s27 + $0x110] sm:$0xff] %v701_v34  ;;  %704 = vst [vmem:[%s5664_s27 + $0x118] sm:$0xff] %v703_v35  ;;  %v705_v36 = vld [vmem:[%s5656_s16 + $0x240] sm:$0xff]  ;;  %v707_v37 = vld [vmem:[%s5656_s16 + $0x250] sm:$0xff] }
  0x31   : > { %v709_v38 = vld [vmem:[%s5656_s16 + $0x260] sm:$0xff]  ;;  %706 = vst [vmem:[%s5664_s27 + $0x120] sm:$0xff] %v705_v36  ;;  %708 = vst [vmem:[%s5664_s27 + $0x128] sm:$0xff] %v707_v37  ;;  %v711_v39 = vld [vmem:[%s5656_s16 + $0x270] sm:$0xff] }
  0x32   : > { %710 = vst [vmem:[%s5664_s27 + $0x130] sm:$0xff] %v709_v38  ;;  %v713_v40 = vld [vmem:[%s5656_s16 + $0x280] sm:$0xff]  ;;  %v715_v41 = vld [vmem:[%s5656_s16 + $0x290] sm:$0xff]  ;;  %712 = vst [vmem:[%s5664_s27 + $0x138] sm:$0xff] %v711_v39 }
  0x33   : > { %714 = vst [vmem:[%s5664_s27 + $0x140] sm:$0xff] %v713_v40  ;;  %716 = vst [vmem:[%s5664_s27 + $0x148] sm:$0xff] %v715_v41  ;;  %v717_v42 = vld [vmem:[%s5656_s16 + $0x2a0] sm:$0xff]  ;;  %v719_v43 = vld [vmem:[%s5656_s16 + $0x2b0] sm:$0xff] }
  0x34   : > { %v721_v44 = vld [vmem:[%s5656_s16 + $0x2c0] sm:$0xff]  ;;  %718 = vst [vmem:[%s5664_s27 + $0x150] sm:$0xff] %v717_v42  ;;  %720 = vst [vmem:[%s5664_s27 + $0x158] sm:$0xff] %v719_v43  ;;  %v723_v45 = vld [vmem:[%s5656_s16 + $0x2d0] sm:$0xff] }
  0x35   : > { %722 = vst [vmem:[%s5664_s27 + $0x160] sm:$0xff] %v721_v44  ;;  %v725_v46 = vld [vmem:[%s5656_s16 + $0x2e0] sm:$0xff]  ;;  %v727_v47 = vld [vmem:[%s5656_s16 + $0x2f0] sm:$0xff]  ;;  %724 = vst [vmem:[%s5664_s27 + $0x168] sm:$0xff] %v723_v45 }
  0x36   : > { %726 = vst [vmem:[%s5664_s27 + $0x170] sm:$0xff] %v725_v46  ;;  %728 = vst [vmem:[%s5664_s27 + $0x178] sm:$0xff] %v727_v47  ;;  %v729_v48 = vld [vmem:[%s5656_s16 + $0x300] sm:$0xff]  ;;  %v731_v49 = vld [vmem:[%s5656_s16 + $0x310] sm:$0xff] }
  0x37   : > { %v733_v50 = vld [vmem:[%s5656_s16 + $0x320] sm:$0xff]  ;;  %730 = vst [vmem:[%s5664_s27 + $0x180] sm:$0xff] %v729_v48  ;;  %732 = vst [vmem:[%s5664_s27 + $0x188] sm:$0xff] %v731_v49  ;;  %v735_v51 = vld [vmem:[%s5656_s16 + $0x330] sm:$0xff] }
  0x38   : > { %734 = vst [vmem:[%s5664_s27 + $0x190] sm:$0xff] %v733_v50  ;;  %v737_v52 = vld [vmem:[%s5656_s16 + $0x340] sm:$0xff]  ;;  %v739_v53 = vld [vmem:[%s5656_s16 + $0x350] sm:$0xff]  ;;  %736 = vst [vmem:[%s5664_s27 + $0x198] sm:$0xff] %v735_v51 }
  0x39   : > { %738 = vst [vmem:[%s5664_s27 + $0x1a0] sm:$0xff] %v737_v52  ;;  %740 = vst [vmem:[%s5664_s27 + $0x1a8] sm:$0xff] %v739_v53  ;;  %v741_v54 = vld [vmem:[%s5656_s16 + $0x360] sm:$0xff]  ;;  %v743_v55 = vld [vmem:[%s5656_s16 + $0x370] sm:$0xff] }
  0x3a   : > { %v745_v56 = vld [vmem:[%s5656_s16 + $0x380] sm:$0xff]  ;;  %742 = vst [vmem:[%s5664_s27 + $0x1b0] sm:$0xff] %v741_v54  ;;  %744 = vst [vmem:[%s5664_s27 + $0x1b8] sm:$0xff] %v743_v55  ;;  %v747_v57 = vld [vmem:[%s5656_s16 + $0x390] sm:$0xff] }
  0x3b   : > { %746 = vst [vmem:[%s5664_s27 + $0x1c0] sm:$0xff] %v745_v56  ;;  %v749_v58 = vld [vmem:[%s5656_s16 + $0x3a0] sm:$0xff]  ;;  %v751_v59 = vld [vmem:[%s5656_s16 + $0x3b0] sm:$0xff]  ;;  %748 = vst [vmem:[%s5664_s27 + $0x1c8] sm:$0xff] %v747_v57 }
  0x3c   : > { %750 = vst [vmem:[%s5664_s27 + $0x1d0] sm:$0xff] %v749_v58  ;;  %752 = vst [vmem:[%s5664_s27 + $0x1d8] sm:$0xff] %v751_v59  ;;  %v753_v60 = vld [vmem:[%s5656_s16 + $0x3c0] sm:$0xff]  ;;  %v755_v61 = vld [vmem:[%s5656_s16 + $0x3d0] sm:$0xff] }
  0x3d   : > { %v757_v62 = vld [vmem:[%s5656_s16 + $0x3e0] sm:$0xff]  ;;  %754 = vst [vmem:[%s5664_s27 + $0x1e0] sm:$0xff] %v753_v60  ;;  %756 = vst [vmem:[%s5664_s27 + $0x1e8] sm:$0xff] %v755_v61  ;;  %v759_v63 = vld [vmem:[%s5656_s16 + $0x3f0] sm:$0xff] }
  0x3e   : > { %758 = vst [vmem:[%s5664_s27 + $0x1f0] sm:$0xff] %v757_v62  ;;  %v761_v0 = vld [vmem:[%s5656_s16 + $0x400] sm:$0xff]  ;;  %v763_v1 = vld [vmem:[%s5656_s16 + $0x410] sm:$0xff]  ;;  %760 = vst [vmem:[%s5664_s27 + $0x1f8] sm:$0xff] %v759_v63 }
  0x3f   : > { %762 = vst [vmem:[%s5664_s27 + $0x200] sm:$0xff] %v761_v0  ;;  %764 = vst [vmem:[%s5664_s27 + $0x208] sm:$0xff] %v763_v1  ;;  %v765_v2 = vld [vmem:[%s5656_s16 + $0x420] sm:$0xff]  ;;  %v767_v3 = vld [vmem:[%s5656_s16 + $0x430] sm:$0xff] }
  0x40   : > { %v769_v4 = vld [vmem:[%s5656_s16 + $0x440] sm:$0xff]  ;;  %766 = vst [vmem:[%s5664_s27 + $0x210] sm:$0xff] %v765_v2  ;;  %768 = vst [vmem:[%s5664_s27 + $0x218] sm:$0xff] %v767_v3  ;;  %v771_v5 = vld [vmem:[%s5656_s16 + $0x450] sm:$0xff] }
  0x41   : > { %770 = vst [vmem:[%s5664_s27 + $0x220] sm:$0xff] %v769_v4  ;;  %v773_v6 = vld [vmem:[%s5656_s16 + $0x460] sm:$0xff]  ;;  %v775_v7 = vld [vmem:[%s5656_s16 + $0x470] sm:$0xff]  ;;  %772 = vst [vmem:[%s5664_s27 + $0x228] sm:$0xff] %v771_v5 }
  0x42   : > { %774 = vst [vmem:[%s5664_s27 + $0x230] sm:$0xff] %v773_v6  ;;  %776 = vst [vmem:[%s5664_s27 + $0x238] sm:$0xff] %v775_v7  ;;  %v777_v8 = vld [vmem:[%s5656_s16 + $0x480] sm:$0xff]  ;;  %v779_v9 = vld [vmem:[%s5656_s16 + $0x490] sm:$0xff] }
  0x43   : > { %v781_v10 = vld [vmem:[%s5656_s16 + $0x4a0] sm:$0xff]  ;;  %778 = vst [vmem:[%s5664_s27 + $0x240] sm:$0xff] %v777_v8  ;;  %780 = vst [vmem:[%s5664_s27 + $0x248] sm:$0xff] %v779_v9  ;;  %v783_v11 = vld [vmem:[%s5656_s16 + $0x4b0] sm:$0xff] }
  0x44   : > { %782 = vst [vmem:[%s5664_s27 + $0x250] sm:$0xff] %v781_v10  ;;  %v785_v12 = vld [vmem:[%s5656_s16 + $0x4c0] sm:$0xff]  ;;  %v787_v13 = vld [vmem:[%s5656_s16 + $0x4d0] sm:$0xff]  ;;  %784 = vst [vmem:[%s5664_s27 + $0x258] sm:$0xff] %v783_v11 }
  0x45   : > { %786 = vst [vmem:[%s5664_s27 + $0x260] sm:$0xff] %v785_v12  ;;  %788 = vst [vmem:[%s5664_s27 + $0x268] sm:$0xff] %v787_v13  ;;  %v789_v14 = vld [vmem:[%s5656_s16 + $0x4e0] sm:$0xff]  ;;  %v791_v15 = vld [vmem:[%s5656_s16 + $0x4f0] sm:$0xff] }
  0x46   : > { %v793_v16 = vld [vmem:[%s5656_s16 + $0x500] sm:$0xff]  ;;  %790 = vst [vmem:[%s5664_s27 + $0x270] sm:$0xff] %v789_v14  ;;  %792 = vst [vmem:[%s5664_s27 + $0x278] sm:$0xff] %v791_v15  ;;  %v795_v17 = vld [vmem:[%s5656_s16 + $0x510] sm:$0xff] }
  0x47   : > { %794 = vst [vmem:[%s5664_s27 + $0x280] sm:$0xff] %v793_v16  ;;  %v797_v18 = vld [vmem:[%s5656_s16 + $0x520] sm:$0xff]  ;;  %v799_v19 = vld [vmem:[%s5656_s16 + $0x530] sm:$0xff]  ;;  %796 = vst [vmem:[%s5664_s27 + $0x288] sm:$0xff] %v795_v17 }
  0x48   : > { %798 = vst [vmem:[%s5664_s27 + $0x290] sm:$0xff] %v797_v18  ;;  %800 = vst [vmem:[%s5664_s27 + $0x298] sm:$0xff] %v799_v19  ;;  %v801_v20 = vld [vmem:[%s5656_s16 + $0x540] sm:$0xff]  ;;  %v803_v21 = vld [vmem:[%s5656_s16 + $0x550] sm:$0xff] }
  0x49   : > { %v805_v22 = vld [vmem:[%s5656_s16 + $0x560] sm:$0xff]  ;;  %802 = vst [vmem:[%s5664_s27 + $0x2a0] sm:$0xff] %v801_v20  ;;  %804 = vst [vmem:[%s5664_s27 + $0x2a8] sm:$0xff] %v803_v21  ;;  %v807_v23 = vld [vmem:[%s5656_s16 + $0x570] sm:$0xff] }
  0x4a   : > { %806 = vst [vmem:[%s5664_s27 + $0x2b0] sm:$0xff] %v805_v22  ;;  %v809_v24 = vld [vmem:[%s5656_s16 + $0x580] sm:$0xff]  ;;  %v811_v25 = vld [vmem:[%s5656_s16 + $0x590] sm:$0xff]  ;;  %808 = vst [vmem:[%s5664_s27 + $0x2b8] sm:$0xff] %v807_v23 }
  0x4b   : > { %810 = vst [vmem:[%s5664_s27 + $0x2c0] sm:$0xff] %v809_v24  ;;  %812 = vst [vmem:[%s5664_s27 + $0x2c8] sm:$0xff] %v811_v25  ;;  %v813_v26 = vld [vmem:[%s5656_s16 + $0x5a0] sm:$0xff]  ;;  %v815_v27 = vld [vmem:[%s5656_s16 + $0x5b0] sm:$0xff] }
  0x4c   : > { %v817_v28 = vld [vmem:[%s5656_s16 + $0x5c0] sm:$0xff]  ;;  %814 = vst [vmem:[%s5664_s27 + $0x2d0] sm:$0xff] %v813_v26  ;;  %816 = vst [vmem:[%s5664_s27 + $0x2d8] sm:$0xff] %v815_v27  ;;  %v819_v29 = vld [vmem:[%s5656_s16 + $0x5d0] sm:$0xff] }
  0x4d   : > { %818 = vst [vmem:[%s5664_s27 + $0x2e0] sm:$0xff] %v817_v28  ;;  %v821_v30 = vld [vmem:[%s5656_s16 + $0x5e0] sm:$0xff]  ;;  %v823_v31 = vld [vmem:[%s5656_s16 + $0x5f0] sm:$0xff]  ;;  %820 = vst [vmem:[%s5664_s27 + $0x2e8] sm:$0xff] %v819_v29 }
  0x4e   : > { %822 = vst [vmem:[%s5664_s27 + $0x2f0] sm:$0xff] %v821_v30  ;;  %824 = vst [vmem:[%s5664_s27 + $0x2f8] sm:$0xff] %v823_v31  ;;  %v825_v32 = vld [vmem:[%s5656_s16 + $0x600] sm:$0xff]  ;;  %v827_v33 = vld [vmem:[%s5656_s16 + $0x610] sm:$0xff] }
  0x4f   : > { %v829_v34 = vld [vmem:[%s5656_s16 + $0x620] sm:$0xff]  ;;  %826 = vst [vmem:[%s5664_s27 + $0x300] sm:$0xff] %v825_v32  ;;  %828 = vst [vmem:[%s5664_s27 + $0x308] sm:$0xff] %v827_v33  ;;  %v831_v35 = vld [vmem:[%s5656_s16 + $0x630] sm:$0xff] }
  0x50   : > { %830 = vst [vmem:[%s5664_s27 + $0x310] sm:$0xff] %v829_v34  ;;  %v833_v36 = vld [vmem:[%s5656_s16 + $0x640] sm:$0xff]  ;;  %v835_v37 = vld [vmem:[%s5656_s16 + $0x650] sm:$0xff]  ;;  %832 = vst [vmem:[%s5664_s27 + $0x318] sm:$0xff] %v831_v35 }
  0x51   : > { %834 = vst [vmem:[%s5664_s27 + $0x320] sm:$0xff] %v833_v36  ;;  %836 = vst [vmem:[%s5664_s27 + $0x328] sm:$0xff] %v835_v37  ;;  %v837_v38 = vld [vmem:[%s5656_s16 + $0x660] sm:$0xff]  ;;  %v839_v39 = vld [vmem:[%s5656_s16 + $0x670] sm:$0xff] }
  0x52   : > { %v841_v40 = vld [vmem:[%s5656_s16 + $0x680] sm:$0xff]  ;;  %838 = vst [vmem:[%s5664_s27 + $0x330] sm:$0xff] %v837_v38  ;;  %840 = vst [vmem:[%s5664_s27 + $0x338] sm:$0xff] %v839_v39  ;;  %v843_v41 = vld [vmem:[%s5656_s16 + $0x690] sm:$0xff] }
  0x53   : > { %842 = vst [vmem:[%s5664_s27 + $0x340] sm:$0xff] %v841_v40  ;;  %v845_v42 = vld [vmem:[%s5656_s16 + $0x6a0] sm:$0xff]  ;;  %v847_v43 = vld [vmem:[%s5656_s16 + $0x6b0] sm:$0xff]  ;;  %844 = vst [vmem:[%s5664_s27 + $0x348] sm:$0xff] %v843_v41 }
  0x54   : > { %846 = vst [vmem:[%s5664_s27 + $0x350] sm:$0xff] %v845_v42  ;;  %848 = vst [vmem:[%s5664_s27 + $0x358] sm:$0xff] %v847_v43  ;;  %v849_v44 = vld [vmem:[%s5656_s16 + $0x6c0] sm:$0xff]  ;;  %v851_v45 = vld [vmem:[%s5656_s16 + $0x6d0] sm:$0xff] }
  0x55   : > { %v853_v46 = vld [vmem:[%s5656_s16 + $0x6e0] sm:$0xff]  ;;  %850 = vst [vmem:[%s5664_s27 + $0x360] sm:$0xff] %v849_v44  ;;  %852 = vst [vmem:[%s5664_s27 + $0x368] sm:$0xff] %v851_v45  ;;  %v855_v47 = vld [vmem:[%s5656_s16 + $0x6f0] sm:$0xff] }
  0x56   : > { %854 = vst [vmem:[%s5664_s27 + $0x370] sm:$0xff] %v853_v46  ;;  %v857_v48 = vld [vmem:[%s5656_s16 + $0x700] sm:$0xff]  ;;  %v859_v49 = vld [vmem:[%s5656_s16 + $0x710] sm:$0xff]  ;;  %856 = vst [vmem:[%s5664_s27 + $0x378] sm:$0xff] %v855_v47 }
  0x57   : > { %858 = vst [vmem:[%s5664_s27 + $0x380] sm:$0xff] %v857_v48  ;;  %860 = vst [vmem:[%s5664_s27 + $0x388] sm:$0xff] %v859_v49  ;;  %v861_v50 = vld [vmem:[%s5656_s16 + $0x720] sm:$0xff]  ;;  %v863_v51 = vld [vmem:[%s5656_s16 + $0x730] sm:$0xff] }
  0x58   : > { %v865_v52 = vld [vmem:[%s5656_s16 + $0x740] sm:$0xff]  ;;  %862 = vst [vmem:[%s5664_s27 + $0x390] sm:$0xff] %v861_v50  ;;  %864 = vst [vmem:[%s5664_s27 + $0x398] sm:$0xff] %v863_v51  ;;  %v867_v53 = vld [vmem:[%s5656_s16 + $0x750] sm:$0xff] }
  0x59   : > { %866 = vst [vmem:[%s5664_s27 + $0x3a0] sm:$0xff] %v865_v52  ;;  %v869_v54 = vld [vmem:[%s5656_s16 + $0x760] sm:$0xff]  ;;  %v871_v55 = vld [vmem:[%s5656_s16 + $0x770] sm:$0xff]  ;;  %868 = vst [vmem:[%s5664_s27 + $0x3a8] sm:$0xff] %v867_v53 }
  0x5a   : > { %870 = vst [vmem:[%s5664_s27 + $0x3b0] sm:$0xff] %v869_v54  ;;  %872 = vst [vmem:[%s5664_s27 + $0x3b8] sm:$0xff] %v871_v55  ;;  %v873_v56 = vld [vmem:[%s5656_s16 + $0x780] sm:$0xff]  ;;  %v875_v57 = vld [vmem:[%s5656_s16 + $0x790] sm:$0xff] }
  0x5b   : > { %v877_v58 = vld [vmem:[%s5656_s16 + $0x7a0] sm:$0xff]  ;;  %874 = vst [vmem:[%s5664_s27 + $0x3c0] sm:$0xff] %v873_v56  ;;  %876 = vst [vmem:[%s5664_s27 + $0x3c8] sm:$0xff] %v875_v57  ;;  %v879_v59 = vld [vmem:[%s5656_s16 + $0x7b0] sm:$0xff] }
  0x5c   : > { %878 = vst [vmem:[%s5664_s27 + $0x3d0] sm:$0xff] %v877_v58  ;;  %v881_v60 = vld [vmem:[%s5656_s16 + $0x7c0] sm:$0xff]  ;;  %v883_v61 = vld [vmem:[%s5656_s16 + $0x7d0] sm:$0xff]  ;;  %880 = vst [vmem:[%s5664_s27 + $0x3d8] sm:$0xff] %v879_v59 }
  0x5d   : > { %882 = vst [vmem:[%s5664_s27 + $0x3e0] sm:$0xff] %v881_v60  ;;  %884 = vst [vmem:[%s5664_s27 + $0x3e8] sm:$0xff] %v883_v61  ;;  %v885_v62 = vld [vmem:[%s5656_s16 + $0x7e0] sm:$0xff]  ;;  %v887_v63 = vld [vmem:[%s5656_s16 + $0x7f0] sm:$0xff] }
  0x5e   : > { %v889_v0 = vld [vmem:[%s5656_s16 + $0x800] sm:$0xff]  ;;  %886 = vst [vmem:[%s5664_s27 + $0x3f0] sm:$0xff] %v885_v62  ;;  %888 = vst [vmem:[%s5664_s27 + $0x3f8] sm:$0xff] %v887_v63  ;;  %v891_v1 = vld [vmem:[%s5656_s16 + $0x810] sm:$0xff] }
  0x5f   : > { %890 = vst [vmem:[%s5664_s27 + $0x400] sm:$0xff] %v889_v0  ;;  %v893_v2 = vld [vmem:[%s5656_s16 + $0x820] sm:$0xff]  ;;  %v895_v3 = vld [vmem:[%s5656_s16 + $0x830] sm:$0xff]  ;;  %892 = vst [vmem:[%s5664_s27 + $0x408] sm:$0xff] %v891_v1 }
  0x60   : > { %894 = vst [vmem:[%s5664_s27 + $0x410] sm:$0xff] %v893_v2  ;;  %896 = vst [vmem:[%s5664_s27 + $0x418] sm:$0xff] %v895_v3  ;;  %v897_v4 = vld [vmem:[%s5656_s16 + $0x840] sm:$0xff]  ;;  %v899_v5 = vld [vmem:[%s5656_s16 + $0x850] sm:$0xff] }
  0x61   : > { %v901_v6 = vld [vmem:[%s5656_s16 + $0x860] sm:$0xff]  ;;  %898 = vst [vmem:[%s5664_s27 + $0x420] sm:$0xff] %v897_v4  ;;  %900 = vst [vmem:[%s5664_s27 + $0x428] sm:$0xff] %v899_v5  ;;  %v903_v7 = vld [vmem:[%s5656_s16 + $0x870] sm:$0xff] }
  0x62   : > { %902 = vst [vmem:[%s5664_s27 + $0x430] sm:$0xff] %v901_v6  ;;  %v905_v8 = vld [vmem:[%s5656_s16 + $0x880] sm:$0xff]  ;;  %v907_v9 = vld [vmem:[%s5656_s16 + $0x890] sm:$0xff]  ;;  %904 = vst [vmem:[%s5664_s27 + $0x438] sm:$0xff] %v903_v7 }
  0x63   : > { %906 = vst [vmem:[%s5664_s27 + $0x440] sm:$0xff] %v905_v8  ;;  %908 = vst [vmem:[%s5664_s27 + $0x448] sm:$0xff] %v907_v9  ;;  %v909_v10 = vld [vmem:[%s5656_s16 + $0x8a0] sm:$0xff]  ;;  %v911_v11 = vld [vmem:[%s5656_s16 + $0x8b0] sm:$0xff] }
  0x64   : > { %v913_v12 = vld [vmem:[%s5656_s16 + $0x8c0] sm:$0xff]  ;;  %910 = vst [vmem:[%s5664_s27 + $0x450] sm:$0xff] %v909_v10  ;;  %912 = vst [vmem:[%s5664_s27 + $0x458] sm:$0xff] %v911_v11  ;;  %v915_v13 = vld [vmem:[%s5656_s16 + $0x8d0] sm:$0xff] }
  0x65   : > { %914 = vst [vmem:[%s5664_s27 + $0x460] sm:$0xff] %v913_v12  ;;  %v917_v14 = vld [vmem:[%s5656_s16 + $0x8e0] sm:$0xff]  ;;  %v919_v15 = vld [vmem:[%s5656_s16 + $0x8f0] sm:$0xff]  ;;  %916 = vst [vmem:[%s5664_s27 + $0x468] sm:$0xff] %v915_v13 }
  0x66   : > { %918 = vst [vmem:[%s5664_s27 + $0x470] sm:$0xff] %v917_v14  ;;  %920 = vst [vmem:[%s5664_s27 + $0x478] sm:$0xff] %v919_v15  ;;  %v921_v16 = vld [vmem:[%s5656_s16 + $0x900] sm:$0xff]  ;;  %v923_v17 = vld [vmem:[%s5656_s16 + $0x910] sm:$0xff] }
  0x67   : > { %v925_v18 = vld [vmem:[%s5656_s16 + $0x920] sm:$0xff]  ;;  %922 = vst [vmem:[%s5664_s27 + $0x480] sm:$0xff] %v921_v16  ;;  %924 = vst [vmem:[%s5664_s27 + $0x488] sm:$0xff] %v923_v17  ;;  %v927_v19 = vld [vmem:[%s5656_s16 + $0x930] sm:$0xff] }
  0x68   : > { %926 = vst [vmem:[%s5664_s27 + $0x490] sm:$0xff] %v925_v18  ;;  %v929_v20 = vld [vmem:[%s5656_s16 + $0x940] sm:$0xff]  ;;  %v931_v21 = vld [vmem:[%s5656_s16 + $0x950] sm:$0xff]  ;;  %928 = vst [vmem:[%s5664_s27 + $0x498] sm:$0xff] %v927_v19 }
  0x69   : > { %930 = vst [vmem:[%s5664_s27 + $0x4a0] sm:$0xff] %v929_v20  ;;  %932 = vst [vmem:[%s5664_s27 + $0x4a8] sm:$0xff] %v931_v21  ;;  %v933_v22 = vld [vmem:[%s5656_s16 + $0x960] sm:$0xff]  ;;  %v935_v23 = vld [vmem:[%s5656_s16 + $0x970] sm:$0xff] }
  0x6a   : > { %v937_v24 = vld [vmem:[%s5656_s16 + $0x980] sm:$0xff]  ;;  %934 = vst [vmem:[%s5664_s27 + $0x4b0] sm:$0xff] %v933_v22  ;;  %936 = vst [vmem:[%s5664_s27 + $0x4b8] sm:$0xff] %v935_v23  ;;  %v939_v25 = vld [vmem:[%s5656_s16 + $0x990] sm:$0xff] }
  0x6b   : > { %938 = vst [vmem:[%s5664_s27 + $0x4c0] sm:$0xff] %v937_v24  ;;  %v941_v26 = vld [vmem:[%s5656_s16 + $0x9a0] sm:$0xff]  ;;  %v943_v27 = vld [vmem:[%s5656_s16 + $0x9b0] sm:$0xff]  ;;  %940 = vst [vmem:[%s5664_s27 + $0x4c8] sm:$0xff] %v939_v25 }
  0x6c   : > { %942 = vst [vmem:[%s5664_s27 + $0x4d0] sm:$0xff] %v941_v26  ;;  %944 = vst [vmem:[%s5664_s27 + $0x4d8] sm:$0xff] %v943_v27  ;;  %v945_v28 = vld [vmem:[%s5656_s16 + $0x9c0] sm:$0xff]  ;;  %v947_v29 = vld [vmem:[%s5656_s16 + $0x9d0] sm:$0xff] }
  0x6d   : > { %v949_v30 = vld [vmem:[%s5656_s16 + $0x9e0] sm:$0xff]  ;;  %946 = vst [vmem:[%s5664_s27 + $0x4e0] sm:$0xff] %v945_v28  ;;  %948 = vst [vmem:[%s5664_s27 + $0x4e8] sm:$0xff] %v947_v29  ;;  %v951_v31 = vld [vmem:[%s5656_s16 + $0x9f0] sm:$0xff] }
  0x6e   : > { %950 = vst [vmem:[%s5664_s27 + $0x4f0] sm:$0xff] %v949_v30  ;;  %v953_v32 = vld [vmem:[%s5656_s16 + $0xa00] sm:$0xff]  ;;  %v955_v33 = vld [vmem:[%s5656_s16 + $0xa10] sm:$0xff]  ;;  %952 = vst [vmem:[%s5664_s27 + $0x4f8] sm:$0xff] %v951_v31 }
  0x6f   : > { %954 = vst [vmem:[%s5664_s27 + $0x500] sm:$0xff] %v953_v32  ;;  %956 = vst [vmem:[%s5664_s27 + $0x508] sm:$0xff] %v955_v33  ;;  %v957_v34 = vld [vmem:[%s5656_s16 + $0xa20] sm:$0xff]  ;;  %v959_v35 = vld [vmem:[%s5656_s16 + $0xa30] sm:$0xff] }
  0x70   : > { %v961_v36 = vld [vmem:[%s5656_s16 + $0xa40] sm:$0xff]  ;;  %958 = vst [vmem:[%s5664_s27 + $0x510] sm:$0xff] %v957_v34  ;;  %960 = vst [vmem:[%s5664_s27 + $0x518] sm:$0xff] %v959_v35  ;;  %v963_v37 = vld [vmem:[%s5656_s16 + $0xa50] sm:$0xff] }
  0x71   : > { %962 = vst [vmem:[%s5664_s27 + $0x520] sm:$0xff] %v961_v36  ;;  %v965_v38 = vld [vmem:[%s5656_s16 + $0xa60] sm:$0xff]  ;;  %v967_v39 = vld [vmem:[%s5656_s16 + $0xa70] sm:$0xff]  ;;  %964 = vst [vmem:[%s5664_s27 + $0x528] sm:$0xff] %v963_v37 }
  0x72   : > { %966 = vst [vmem:[%s5664_s27 + $0x530] sm:$0xff] %v965_v38  ;;  %968 = vst [vmem:[%s5664_s27 + $0x538] sm:$0xff] %v967_v39  ;;  %v969_v40 = vld [vmem:[%s5656_s16 + $0xa80] sm:$0xff]  ;;  %v971_v41 = vld [vmem:[%s5656_s16 + $0xa90] sm:$0xff] }
  0x73   : > { %v973_v42 = vld [vmem:[%s5656_s16 + $0xaa0] sm:$0xff]  ;;  %970 = vst [vmem:[%s5664_s27 + $0x540] sm:$0xff] %v969_v40  ;;  %972 = vst [vmem:[%s5664_s27 + $0x548] sm:$0xff] %v971_v41  ;;  %v975_v43 = vld [vmem:[%s5656_s16 + $0xab0] sm:$0xff] }
  0x74   : > { %974 = vst [vmem:[%s5664_s27 + $0x550] sm:$0xff] %v973_v42  ;;  %v977_v44 = vld [vmem:[%s5656_s16 + $0xac0] sm:$0xff]  ;;  %v979_v45 = vld [vmem:[%s5656_s16 + $0xad0] sm:$0xff]  ;;  %976 = vst [vmem:[%s5664_s27 + $0x558] sm:$0xff] %v975_v43 }
  0x75   : > { %978 = vst [vmem:[%s5664_s27 + $0x560] sm:$0xff] %v977_v44  ;;  %980 = vst [vmem:[%s5664_s27 + $0x568] sm:$0xff] %v979_v45  ;;  %v981_v46 = vld [vmem:[%s5656_s16 + $0xae0] sm:$0xff]  ;;  %v983_v47 = vld [vmem:[%s5656_s16 + $0xaf0] sm:$0xff] }
  0x76   : > { %v985_v48 = vld [vmem:[%s5656_s16 + $0xb00] sm:$0xff]  ;;  %982 = vst [vmem:[%s5664_s27 + $0x570] sm:$0xff] %v981_v46  ;;  %984 = vst [vmem:[%s5664_s27 + $0x578] sm:$0xff] %v983_v47  ;;  %v987_v49 = vld [vmem:[%s5656_s16 + $0xb10] sm:$0xff] }
  0x77   : > { %986 = vst [vmem:[%s5664_s27 + $0x580] sm:$0xff] %v985_v48  ;;  %v989_v50 = vld [vmem:[%s5656_s16 + $0xb20] sm:$0xff]  ;;  %v991_v51 = vld [vmem:[%s5656_s16 + $0xb30] sm:$0xff]  ;;  %988 = vst [vmem:[%s5664_s27 + $0x588] sm:$0xff] %v987_v49 }
  0x78   : > { %990 = vst [vmem:[%s5664_s27 + $0x590] sm:$0xff] %v989_v50  ;;  %992 = vst [vmem:[%s5664_s27 + $0x598] sm:$0xff] %v991_v51  ;;  %v993_v52 = vld [vmem:[%s5656_s16 + $0xb40] sm:$0xff]  ;;  %v995_v53 = vld [vmem:[%s5656_s16 + $0xb50] sm:$0xff] }
  0x79   : > { %v997_v54 = vld [vmem:[%s5656_s16 + $0xb60] sm:$0xff]  ;;  %994 = vst [vmem:[%s5664_s27 + $0x5a0] sm:$0xff] %v993_v52  ;;  %996 = vst [vmem:[%s5664_s27 + $0x5a8] sm:$0xff] %v995_v53  ;;  %v999_v55 = vld [vmem:[%s5656_s16 + $0xb70] sm:$0xff] }
  0x7a   : > { %998 = vst [vmem:[%s5664_s27 + $0x5b0] sm:$0xff] %v997_v54  ;;  %v1001_v56 = vld [vmem:[%s5656_s16 + $0xb80] sm:$0xff]  ;;  %v1003_v57 = vld [vmem:[%s5656_s16 + $0xb90] sm:$0xff]  ;;  %1000 = vst [vmem:[%s5664_s27 + $0x5b8] sm:$0xff] %v999_v55 }
  0x7b   : > { %1002 = vst [vmem:[%s5664_s27 + $0x5c0] sm:$0xff] %v1001_v56  ;;  %1004 = vst [vmem:[%s5664_s27 + $0x5c8] sm:$0xff] %v1003_v57  ;;  %v1005_v58 = vld [vmem:[%s5656_s16 + $0xba0] sm:$0xff]  ;;  %v1007_v59 = vld [vmem:[%s5656_s16 + $0xbb0] sm:$0xff] }
  0x7c   : > { %v1009_v60 = vld [vmem:[%s5656_s16 + $0xbc0] sm:$0xff]  ;;  %1006 = vst [vmem:[%s5664_s27 + $0x5d0] sm:$0xff] %v1005_v58  ;;  %1008 = vst [vmem:[%s5664_s27 + $0x5d8] sm:$0xff] %v1007_v59  ;;  %v1011_v61 = vld [vmem:[%s5656_s16 + $0xbd0] sm:$0xff] }
  0x7d   : > { %1010 = vst [vmem:[%s5664_s27 + $0x5e0] sm:$0xff] %v1009_v60  ;;  %v1013_v62 = vld [vmem:[%s5656_s16 + $0xbe0] sm:$0xff]  ;;  %v1015_v63 = vld [vmem:[%s5656_s16 + $0xbf0] sm:$0xff]  ;;  %1012 = vst [vmem:[%s5664_s27 + $0x5e8] sm:$0xff] %v1011_v61 }
  0x7e   : > { %1014 = vst [vmem:[%s5664_s27 + $0x5f0] sm:$0xff] %v1013_v62  ;;  %1016 = vst [vmem:[%s5664_s27 + $0x5f8] sm:$0xff] %v1015_v63  ;;  %v1017_v0 = vld [vmem:[%s5656_s16 + $0xc00] sm:$0xff]  ;;  %v1019_v1 = vld [vmem:[%s5656_s16 + $0xc10] sm:$0xff] }
  0x7f   : > { %v1021_v2 = vld [vmem:[%s5656_s16 + $0xc20] sm:$0xff]  ;;  %1018 = vst [vmem:[%s5664_s27 + $0x600] sm:$0xff] %v1017_v0  ;;  %1020 = vst [vmem:[%s5664_s27 + $0x608] sm:$0xff] %v1019_v1  ;;  %v1023_v3 = vld [vmem:[%s5656_s16 + $0xc30] sm:$0xff] }
  0x80   : > { %1022 = vst [vmem:[%s5664_s27 + $0x610] sm:$0xff] %v1021_v2  ;;  %v1025_v4 = vld [vmem:[%s5656_s16 + $0xc40] sm:$0xff]  ;;  %v1027_v5 = vld [vmem:[%s5656_s16 + $0xc50] sm:$0xff]  ;;  %1024 = vst [vmem:[%s5664_s27 + $0x618] sm:$0xff] %v1023_v3 }
  0x81   : > { %1026 = vst [vmem:[%s5664_s27 + $0x620] sm:$0xff] %v1025_v4  ;;  %1028 = vst [vmem:[%s5664_s27 + $0x628] sm:$0xff] %v1027_v5  ;;  %v1029_v6 = vld [vmem:[%s5656_s16 + $0xc60] sm:$0xff]  ;;  %v1031_v7 = vld [vmem:[%s5656_s16 + $0xc70] sm:$0xff] }
  0x82   : > { %v1033_v8 = vld [vmem:[%s5656_s16 + $0xc80] sm:$0xff]  ;;  %1030 = vst [vmem:[%s5664_s27 + $0x630] sm:$0xff] %v1029_v6  ;;  %1032 = vst [vmem:[%s5664_s27 + $0x638] sm:$0xff] %v1031_v7  ;;  %v1035_v9 = vld [vmem:[%s5656_s16 + $0xc90] sm:$0xff] }
  0x83   : > { %1034 = vst [vmem:[%s5664_s27 + $0x640] sm:$0xff] %v1033_v8  ;;  %v1037_v10 = vld [vmem:[%s5656_s16 + $0xca0] sm:$0xff]  ;;  %v1039_v11 = vld [vmem:[%s5656_s16 + $0xcb0] sm:$0xff]  ;;  %1036 = vst [vmem:[%s5664_s27 + $0x648] sm:$0xff] %v1035_v9 }
  0x84   : > { %1038 = vst [vmem:[%s5664_s27 + $0x650] sm:$0xff] %v1037_v10  ;;  %1040 = vst [vmem:[%s5664_s27 + $0x658] sm:$0xff] %v1039_v11  ;;  %v1041_v12 = vld [vmem:[%s5656_s16 + $0xcc0] sm:$0xff]  ;;  %v1043_v13 = vld [vmem:[%s5656_s16 + $0xcd0] sm:$0xff] }
  0x85   : > { %v1045_v14 = vld [vmem:[%s5656_s16 + $0xce0] sm:$0xff]  ;;  %1042 = vst [vmem:[%s5664_s27 + $0x660] sm:$0xff] %v1041_v12  ;;  %1044 = vst [vmem:[%s5664_s27 + $0x668] sm:$0xff] %v1043_v13  ;;  %v1047_v15 = vld [vmem:[%s5656_s16 + $0xcf0] sm:$0xff] }
  0x86   : > { %1046 = vst [vmem:[%s5664_s27 + $0x670] sm:$0xff] %v1045_v14  ;;  %1048 = vst [vmem:[%s5664_s27 + $0x678] sm:$0xff] %v1047_v15 }
  0x87 PF: > { %p4312_p11 = scmp.ge.s32.totalorder %s5539_s25, 1  ;;  %p1062_p12 = scmp.lt.s32.totalorder %s5539_s25, 5 }
  0x89   : > { %p1063_p13 = pnand %p4312_p11, %p1062_p12 }
  0x8a   : > { %s1069_s28 = sand.u32 (!%p1063_p13), 1, %s5515_s19   ;;  %s4314_s19 = sshll.u32 (!%p1063_p13), %s5523_s21, 4 }
  0x8b   : > { %1066 = sbr.rel (%p1063_p13) target bundleno = 657 (0x291), region = 70  ;;  %p1105_p0 = scmp.lt.s32.totalorder (!%p1063_p13), %s4314_s19, 31 }
  0x8c   : > { %s4928_s29 = smul.u32 (!%p1063_p13), 1664, %s1069_s28  ;;  %s3896_s16 = sld [smem:[#allocation2]] (!%p1063_p13) }
  0x8d   : > { %s1101_s27 = sand.u32 (!%p1063_p13), 1, %s5507_s17  }
  0x8e   : > { %s6079_s30 = scalar_lea.vmem (!%p1063_p13), [#allocation3], %s4928_s29  ;;  %s4313_s28 = sshll.u32 (!%p1063_p13), %s1101_s27, 7 }
  0x8f   : > { %v5005_v16 = vld [vmem:[%s6079_s30 + $0x4] ss:$8 sps:$4 sm:$0xff] (!%p1063_p13)   ;;  %v5009_v18 = vld [vmem:[%s6079_s30] ss:$8 sps:$4 sm:$0xff] (!%p1063_p13)   ;;  %v5011_v20 = vld [vmem:[%s6079_s30 + $0x14] ss:$8 sps:$4 sm:$0xff] (!%p1063_p13)  }
  0x90   : > { %v5007_v17 = vld [vmem:[%s6079_s30 + $0x304] ss:$8 sps:$4 sm:$0xff] (!%p1063_p13)   ;;  %3105 = vmatprep.subr.bf16.mxu1 (!%p1063_p13), %v5005_v16  ;;  %v5010_v19 = vld [vmem:[%s6079_s30 + $0x300] ss:$8 sps:$4 sm:$0xff] (!%p1063_p13)   ;;  %v5013_v21 = vld [vmem:[%s6079_s30 + $0x314] ss:$8 sps:$4 sm:$0xff] (!%p1063_p13)  }
  0x91   : > { %3444 = vmatprep.subr.bf16.mxu0 (!%p1063_p13), %v5007_v17  ;;  %3106 = vmatpush1.bf16.msra.mxu1 (!%p1063_p13), %v5009_v18  ;;  %v5015_v22 = vld [vmem:[%s6079_s30 + $0x10] ss:$8 sps:$4 sm:$0xff] (!%p1063_p13)   ;;  %v5017_v24 = vld [vmem:[%s6079_s30 + $0x24] ss:$8 sps:$4 sm:$0xff] (!%p1063_p13)   ;;  %v5021_v26 = vld [vmem:[%s6079_s30 + $0x20] ss:$8 sps:$4 sm:$0xff] (!%p1063_p13)  }
  0x92   : > { %3445 = vmatpush1.bf16.msra.mxu0 %v5010_v19  ;;  %3107 = vmatprep.subr.bf16.mxu1 %v5011_v20  ;;  %v5016_v23 = vld [vmem:[%s6079_s30 + $0x310] ss:$8 sps:$4 sm:$0xff]   ;;  %v5019_v25 = vld [vmem:[%s6079_s30 + $0x324] ss:$8 sps:$4 sm:$0xff]   ;;  %v5022_v27 = vld [vmem:[%s6079_s30 + $0x320] ss:$8 sps:$4 sm:$0xff]  }
  0x93   : > { %3446 = vmatprep.subr.bf16.mxu0 %v5013_v21  ;;  %v5023_v28 = vld [vmem:[%s6079_s30 + $0x34] ss:$8 sps:$4 sm:$0xff]   ;;  %v5027_v30 = vld [vmem:[%s6079_s30 + $0x30] ss:$8 sps:$4 sm:$0xff]   ;;  %v5029_v32 = vld [vmem:[%s6079_s30 + $0x44] ss:$8 sps:$4 sm:$0xff]  }
  0x94   : > { %v5025_v29 = vld [vmem:[%s6079_s30 + $0x334] ss:$8 sps:$4 sm:$0xff]   ;;  %v5028_v31 = vld [vmem:[%s6079_s30 + $0x330] ss:$8 sps:$4 sm:$0xff]   ;;  %v5031_v33 = vld [vmem:[%s6079_s30 + $0x344] ss:$8 sps:$4 sm:$0xff]  }
  0x95   : > { %3108 = vmatpush1.bf16.msra.mxu1 %v5015_v22  ;;  %v5033_v34 = vld [vmem:[%s6079_s30 + $0x40] ss:$8 sps:$4 sm:$0xff]   ;;  %v5035_v36 = vld [vmem:[%s6079_s30 + $0x54] ss:$8 sps:$4 sm:$0xff]   ;;  %v5039_v38 = vld [vmem:[%s6079_s30 + $0x50] ss:$8 sps:$4 sm:$0xff]  }
  0x96   : > { %3447 = vmatpush1.bf16.msra.mxu0 %v5016_v23  ;;  %3109 = vmatprep.subr.bf16.mxu1 %v5017_v24  ;;  %v5034_v35 = vld [vmem:[%s6079_s30 + $0x340] ss:$8 sps:$4 sm:$0xff]   ;;  %v5037_v37 = vld [vmem:[%s6079_s30 + $0x354] ss:$8 sps:$4 sm:$0xff]   ;;  %v5040_v39 = vld [vmem:[%s6079_s30 + $0x350] ss:$8 sps:$4 sm:$0xff]  }
  0x97   : > { %3448 = vmatprep.subr.bf16.mxu0 %v5019_v25  ;;  %v5041_v40 = vld [vmem:[%s6079_s30 + $0x64] ss:$8 sps:$4 sm:$0xff]   ;;  %v5045_v42 = vld [vmem:[%s6079_s30 + $0x60] ss:$8 sps:$4 sm:$0xff]   ;;  %v5047_v44 = vld [vmem:[%s6079_s30 + $0x74] ss:$8 sps:$4 sm:$0xff]  }
  0x98   : > { %v5043_v41 = vld [vmem:[%s6079_s30 + $0x364] ss:$8 sps:$4 sm:$0xff]   ;;  %v5046_v43 = vld [vmem:[%s6079_s30 + $0x360] ss:$8 sps:$4 sm:$0xff]   ;;  %v5049_v45 = vld [vmem:[%s6079_s30 + $0x374] ss:$8 sps:$4 sm:$0xff]  }
  0x99   : > { %3110 = vmatpush1.bf16.msra.mxu1 %v5021_v26  ;;  %v5051_v46 = vld [vmem:[%s6079_s30 + $0x70] ss:$8 sps:$4 sm:$0xff]   ;;  %v5053_v48 = vld [vmem:[%s6079_s30 + $0x84] ss:$8 sps:$4 sm:$0xff]   ;;  %v5057_v50 = vld [vmem:[%s6079_s30 + $0x80] ss:$8 sps:$4 sm:$0xff]  }
  0x9a   : > { %3449 = vmatpush1.bf16.msra.mxu0 %v5022_v27  ;;  %3111 = vmatprep.subr.bf16.mxu1 %v5023_v28  ;;  %v5052_v47 = vld [vmem:[%s6079_s30 + $0x370] ss:$8 sps:$4 sm:$0xff]   ;;  %v5055_v49 = vld [vmem:[%s6079_s30 + $0x384] ss:$8 sps:$4 sm:$0xff]   ;;  %v5058_v51 = vld [vmem:[%s6079_s30 + $0x380] ss:$8 sps:$4 sm:$0xff]  }
  0x9b   : > { %3450 = vmatprep.subr.bf16.mxu0 %v5025_v29  ;;  %v5059_v52 = vld [vmem:[%s6079_s30 + $0x94] ss:$8 sps:$4 sm:$0xff]   ;;  %s6837_s19 = smov (!%p1105_p0, %s4314_s19), 31  ;;  %v5063_v54 = vld [vmem:[%s6079_s30 + $0x90] ss:$8 sps:$4 sm:$0xff]   ;;  %s6646_s17 = scalar_lea.vmem [#allocation4], %s4313_s28 }
  0x9c   : > { %v5061_v53 = vld [vmem:[%s6079_s30 + $0x394] ss:$8 sps:$4 sm:$0xff]   ;;  %v5064_v55 = vld [vmem:[%s6079_s30 + $0x390] ss:$8 sps:$4 sm:$0xff]   ;;  %v5065_v56 = vld [vmem:[%s6079_s30 + $0xa4] ss:$8 sps:$4 sm:$0xff]  }
  0x9d   : > { %3112 = vmatpush1.bf16.msra.mxu1 %v5027_v30  ;;  %s4929_s5 = smul.u32 52, %s6837_s19  ;;  %v5067_v57 = vld [vmem:[%s6079_s30 + $0x3a4] ss:$8 sps:$4 sm:$0xff]   ;;  %v5069_v58 = vld [vmem:[%s6079_s30 + $0xa0] ss:$8 sps:$4 sm:$0xff]   ;;  %s4317_s12 = sshll.u32 %s6837_s19, 3 }
  0x9e   : > { %3451 = vmatpush1.bf16.msra.mxu0 %v5028_v31  ;;  %3113 = vmatprep.subr.bf16.mxu1 %v5029_v32  ;;  %v5070_v59 = vld [vmem:[%s6079_s30 + $0x3a0] ss:$8 sps:$4 sm:$0xff]   ;;  %v5071_v60 = vld [vmem:[%s6079_s30 + $0xb4] ss:$8 sps:$4 sm:$0xff]   ;;  %v5075_v62 = vld [vmem:[%s6079_s30 + $0xb0] ss:$8 sps:$4 sm:$0xff]   ;;  %s6466_s15 = scalar_lea.vmem %s6817_s2, %s4317_s12 }
  0x9f   : > { %3452 = vmatprep.subr.bf16.mxu0 %v5031_v33  ;;  %s6133_s11 = scalar_lea.vmem %s6815_s0, %s4929_s5  ;;  %v5073_v61 = vld [vmem:[%s6079_s30 + $0x3b4] ss:$8 sps:$4 sm:$0xff]   ;;  %v5076_v63 = vld [vmem:[%s6079_s30 + $0x3b0] ss:$8 sps:$4 sm:$0xff]   ;;  %v5077_v0 = vld [vmem:[%s6079_s30 + $0xc4] ss:$8 sps:$4 sm:$0xff]  }
  0xa0   : > { %v5103_v1 = vld [vmem:[%s6133_s11 + $0x4] ss:$52 sps:$4 sm:$0xff]   ;;  %v5106_v3 = vld [vmem:[%s6133_s11 + $0x1c] ss:$52 sps:$4 sm:$0xff]   ;;  %v5081_v4 = vld [vmem:[%s6079_s30 + $0xc0] ss:$8 sps:$4 sm:$0xff]  }
  0xa1   : > { %3114 = vmatpush1.bf16.msra.mxu1 %v5033_v34  ;;  %v5079_v2 = vld [vmem:[%s6079_s30 + $0x3c4] ss:$8 sps:$4 sm:$0xff]   ;;  %3137 = vmatprep.mubr.bf16.mxu1 %v5103_v1  ;;  %v5082_v5 = vld [vmem:[%s6079_s30 + $0x3c0] ss:$8 sps:$4 sm:$0xff]   ;;  %v5083_v6 = vld [vmem:[%s6079_s30 + $0xd4] ss:$8 sps:$4 sm:$0xff]  }
  0xa2   : > { %3453 = vmatpush1.bf16.msra.mxu0 %v5034_v35  ;;  %3115 = vmatprep.subr.bf16.mxu1 %v5035_v36  ;;  %v5085_v7 = vld [vmem:[%s6079_s30 + $0x3d4] ss:$8 sps:$4 sm:$0xff]   ;;  %v5087_v8 = vld [vmem:[%s6079_s30 + $0xd0] ss:$8 sps:$4 sm:$0xff]   ;;  %v5089_v10 = vld [vmem:[%s6079_s30 + $0xe4] ss:$8 sps:$4 sm:$0xff]  }
  0xa3   : > { %3454 = vmatprep.subr.bf16.mxu0 %v5037_v37  ;;  %3476 = vmatprep.mubr.bf16.mxu0 %v5106_v3  ;;  %v5088_v9 = vld [vmem:[%s6079_s30 + $0x3d0] ss:$8 sps:$4 sm:$0xff]   ;;  %v5091_v11 = vld [vmem:[%s6079_s30 + $0x3e4] ss:$8 sps:$4 sm:$0xff]   ;;  %v5093_v12 = vld [vmem:[%s6079_s30 + $0xe0] ss:$8 sps:$4 sm:$0xff]  }
  0xa4   : > { %v5094_v13 = vld [vmem:[%s6079_s30 + $0x3e0] ss:$8 sps:$4 sm:$0xff]   ;;  %v5095_v14 = vld [vmem:[%s6079_s30 + $0xf4] ss:$8 sps:$4 sm:$0xff]   ;;  %v5099_v16 = vld [vmem:[%s6079_s30 + $0xf0] ss:$8 sps:$4 sm:$0xff]  }
  0xa5   : > { %3116 = vmatpush1.bf16.msra.mxu1 %v5039_v38  ;;  %v5097_v15 = vld [vmem:[%s6079_s30 + $0x3f4] ss:$8 sps:$4 sm:$0xff]   ;;  %v5100_v17 = vld [vmem:[%s6079_s30 + $0x3f0] ss:$8 sps:$4 sm:$0xff]   ;;  %v5109_v18 = vld [vmem:[%s6079_s30 + $0x104] ss:$8 sps:$4 sm:$0xff]  }
  0xa6   : > { %3455 = vmatpush1.bf16.msra.mxu0 %v5040_v39  ;;  %3117 = vmatprep.subr.bf16.mxu1 %v5041_v40  ;;  %v5112_v19 = vld [vmem:[%s6079_s30 + $0x404] ss:$8 sps:$4 sm:$0xff]   ;;  %v5101_v20 = vld [vmem:[%s6133_s11] ss:$52 sps:$4 sm:$0xff]   ;;  %v5113_v28 = vld [vmem:[%s6079_s30 + $0x110] ss:$8 sps:$4 sm:$0xff]  }
  0xa7   : > { %3456 = vmatprep.subr.bf16.mxu0 %v5043_v41  ;;  %v5104_v21 = vld [vmem:[%s6133_s11 + $0x18] ss:$52 sps:$4 sm:$0xff]   ;;  %v5107_v22 = vld [vmem:[%s6079_s30 + $0x100] ss:$8 sps:$4 sm:$0xff]   ;;  %v5115_v24 = vld [vmem:[%s6079_s30 + $0x114] ss:$8 sps:$4 sm:$0xff]  }
  0xa8   : > { %v5110_v23 = vld [vmem:[%s6079_s30 + $0x400] ss:$8 sps:$4 sm:$0xff]   ;;  %v5118_v25 = vld [vmem:[%s6079_s30 + $0x414] ss:$8 sps:$4 sm:$0xff]   ;;  %v5121_v27 = vld [vmem:[%s6133_s11 + $0x84] ss:$52 sps:$4 sm:$0xff]  }
  0xa9   : > { %3118 = vmatpush1.bf16.msra.mxu1 %v5045_v42  ;;  %v5119_v26 = vld [vmem:[%s6133_s11 + $0x6c] ss:$52 sps:$4 sm:$0xff]   ;;  %v5116_v29 = vld [vmem:[%s6079_s30 + $0x410] ss:$8 sps:$4 sm:$0xff]   ;;  %v5123_v32 = vld [vmem:[%s6133_s11 + $0x68] ss:$52 sps:$4 sm:$0xff]  }
  0xaa   : > { %3457 = vmatpush1.bf16.msra.mxu0 %v5046_v43  ;;  %3119 = vmatprep.subr.bf16.mxu1 %v5047_v44  ;;  %v5126_v30 = vld [vmem:[%s6079_s30 + $0x124] ss:$8 sps:$4 sm:$0xff]   ;;  %v5124_v33 = vld [vmem:[%s6079_s30 + $0x120] ss:$8 sps:$4 sm:$0xff]   ;;  %v5133_v36 = vld [vmem:[%s6079_s30 + $0x134] ss:$8 sps:$4 sm:$0xff]  }
  0xab   : > { %3458 = vmatprep.subr.bf16.mxu0 %v5049_v45  ;;  %v5130_v31 = vld [vmem:[%s6079_s30 + $0x424] ss:$8 sps:$4 sm:$0xff]   ;;  %v5127_v34 = vld [vmem:[%s6133_s11 + $0x80] ss:$52 sps:$4 sm:$0xff]   ;;  %v5131_v40 = vld [vmem:[%s6079_s30 + $0x130] ss:$8 sps:$4 sm:$0xff]  }
  0xac   : > { %v5128_v35 = vld [vmem:[%s6079_s30 + $0x420] ss:$8 sps:$4 sm:$0xff]   ;;  %v5136_v37 = vld [vmem:[%s6079_s30 + $0x434] ss:$8 sps:$4 sm:$0xff]   ;;  %v5134_v41 = vld [vmem:[%s6079_s30 + $0x430] ss:$8 sps:$4 sm:$0xff]  }
  0xad   : > { %3120 = vmatpush1.bf16.msra.mxu1 %v5051_v46  ;;  %v5137_v38 = vld [vmem:[%s6133_s11 + $0xd4] ss:$52 sps:$4 sm:$0xff]   ;;  %v5139_v39 = vld [vmem:[%s6133_s11 + $0xec] ss:$52 sps:$4 sm:$0xff]   ;;  %v5141_v44 = vld [vmem:[%s6133_s11 + $0xd0] ss:$52 sps:$4 sm:$0xff]  }
  0xae   : > { %3459 = vmatpush1.bf16.msra.mxu0 %v5052_v47  ;;  %3121 = vmatprep.subr.bf16.mxu1 %v5053_v48  ;;  %v5144_v42 = vld [vmem:[%s6079_s30 + $0x144] ss:$8 sps:$4 sm:$0xff]   ;;  %v5142_v45 = vld [vmem:[%s6079_s30 + $0x140] ss:$8 sps:$4 sm:$0xff]   ;;  %v5151_v48 = vld [vmem:[%s6079_s30 + $0x154] ss:$8 sps:$4 sm:$0xff]  }
  0xaf   : > { %3460 = vmatprep.subr.bf16.mxu0 %v5055_v49  ;;  %v5148_v43 = vld [vmem:[%s6079_s30 + $0x444] ss:$8 sps:$4 sm:$0xff]   ;;  %v5145_v46 = vld [vmem:[%s6133_s11 + $0xe8] ss:$52 sps:$4 sm:$0xff]   ;;  %v5170_v1 = vld [vmem:[%s6079_s30 + $0x470] ss:$8 sps:$4 sm:$0xff]  }
  0xb0   : > { %v5146_v47 = vld [vmem:[%s6079_s30 + $0x440] ss:$8 sps:$4 sm:$0xff]   ;;  %v5154_v49 = vld [vmem:[%s6079_s30 + $0x454] ss:$8 sps:$4 sm:$0xff]   ;;  %v5184_v3 = vld [vmem:[%s6079_s30 + $0x484] ss:$8 sps:$4 sm:$0xff]  }
  0xb1   : > { %3122 = vmatpush1.bf16.msra.mxu1 %v5057_v50  ;;  %v5155_v50 = vld [vmem:[%s6133_s11 + $0x13c] ss:$52 sps:$4 sm:$0xff]   ;;  %s4648_s29 = sshll.u32 (%p5638_p9), %s5527_s22, 1 }
  0xb2   : > { %3461 = vmatpush1.bf16.msra.mxu0 %v5058_v51  ;;  %3123 = vmatprep.subr.bf16.mxu1 %v5059_v52  ;;  %v5157_v51 = vld [vmem:[%s6133_s11 + $0x154] ss:$52 sps:$4 sm:$0xff]   ;;  %v5149_v52 = vld [vmem:[%s6079_s30 + $0x150] ss:$8 sps:$4 sm:$0xff]  }
  0xb3   : > { %3462 = vmatprep.subr.bf16.mxu0 %v5061_v53  ;;  %v5152_v53 = vld [vmem:[%s6079_s30 + $0x450] ss:$8 sps:$4 sm:$0xff]  }
  0xb5   : > { %3124 = vmatpush1.bf16.msra.mxu1 %v5063_v54  ;;  %v5162_v54 = vld [vmem:[%s6079_s30 + $0x164] ss:$8 sps:$4 sm:$0xff]  }
  0xb6   : > { %3463 = vmatpush1.bf16.msra.mxu0 %v5064_v55  ;;  %3125 = vmatprep.subr.bf16.mxu1 %v5065_v56  ;;  %v5166_v55 = vld [vmem:[%s6079_s30 + $0x464] ss:$8 sps:$4 sm:$0xff]  }
  0xb7   : > { %3464 = vmatprep.subr.bf16.mxu0 %v5067_v57  ;;  %v5159_v56 = vld [vmem:[%s6133_s11 + $0x138] ss:$52 sps:$4 sm:$0xff]   ;;  %v5160_v57 = vld [vmem:[%s6079_s30 + $0x160] ss:$8 sps:$4 sm:$0xff]  }
  0xb9   : > { %3126 = vmatpush1.bf16.msra.mxu1 %v5069_v58  ;;  %v5163_v58 = vld [vmem:[%s6133_s11 + $0x150] ss:$52 sps:$4 sm:$0xff]  }
  0xba   : > { %3465 = vmatpush1.bf16.msra.mxu0 %v5070_v59  ;;  %3127 = vmatprep.subr.bf16.mxu1 %v5071_v60  ;;  %v5164_v59 = vld [vmem:[%s6079_s30 + $0x460] ss:$8 sps:$4 sm:$0xff]   ;;  %v5169_v60 = vld [vmem:[%s6079_s30 + $0x174] ss:$8 sps:$4 sm:$0xff]  }
  0xbb   : > { %3466 = vmatprep.subr.bf16.mxu0 %v5073_v61  ;;  %v5172_v61 = vld [vmem:[%s6079_s30 + $0x474] ss:$8 sps:$4 sm:$0xff]  }
  0xbd   : > { %3128 = vmatpush1.bf16.msra.mxu1 %v5075_v62  ;;  %v5173_v62 = vld [vmem:[%s6133_s11 + $0x1a4] ss:$52 sps:$4 sm:$0xff]  }
  0xbe   : > { %3467 = vmatpush1.bf16.msra.mxu0 %v5076_v63  ;;  %3129 = vmatprep.subr.bf16.mxu1 %v5077_v0  ;;  %v5175_v63 = vld [vmem:[%s6133_s11 + $0x1bc] ss:$52 sps:$4 sm:$0xff]  }
  0xbf   : > { %3468 = vmatprep.subr.bf16.mxu0 %v5079_v2  ;;  %v5167_v0 = vld [vmem:[%s6079_s30 + $0x170] ss:$8 sps:$4 sm:$0xff]   ;;  %v5180_v2 = vld [vmem:[%s6079_s30 + $0x184] ss:$8 sps:$4 sm:$0xff]  }
  0xc1   : > { %3130 = vmatpush1.bf16.msra.mxu1 %v5081_v4  ;;  %v5177_v4 = vld [vmem:[%s6133_s11 + $0x1a0] ss:$52 sps:$4 sm:$0xff]  }
  0xc2   : > { %3469 = vmatpush1.bf16.msra.mxu0 %v5082_v5  ;;  %3131 = vmatprep.subr.bf16.mxu1 %v5083_v6  ;;  %v5178_v5 = vld [vmem:[%s6079_s30 + $0x180] ss:$8 sps:$4 sm:$0xff]   ;;  %v5181_v6 = vld [vmem:[%s6133_s11 + $0x1b8] ss:$52 sps:$4 sm:$0xff]  }
  0xc3   : > { %3470 = vmatprep.subr.bf16.mxu0 %v5085_v7  ;;  %v5182_v7 = vld [vmem:[%s6079_s30 + $0x480] ss:$8 sps:$4 sm:$0xff]  }
  0xc5   : > { %3132 = vmatpush1.bf16.msra.mxu1 %v5087_v8  ;;  %v5187_v8 = vld [vmem:[%s6079_s30 + $0x194] ss:$8 sps:$4 sm:$0xff]  }
  0xc6   : > { %3471 = vmatpush1.bf16.msra.mxu0 %v5088_v9  ;;  %3133 = vmatprep.subr.bf16.mxu1 %v5089_v10  ;;  %v5190_v9 = vld [vmem:[%s6079_s30 + $0x494] ss:$8 sps:$4 sm:$0xff]   ;;  %v5191_v10 = vld [vmem:[%s6133_s11 + $0x20c] ss:$52 sps:$4 sm:$0xff]  }
  0xc7   : > { %3472 = vmatprep.subr.bf16.mxu0 %v5091_v11  ;;  %v5193_v11 = vld [vmem:[%s6133_s11 + $0x224] ss:$52 sps:$4 sm:$0xff]  }
  0xc9   : > { %3134 = vmatpush1.bf16.msra.mxu1 %v5093_v12  ;;  %v5541_v12 = vmov 0  }
  0xca   : > { %3473 = vmatpush1.bf16.msra.mxu0 %v5094_v13  ;;  %3135 = vmatprep.subr.bf16.mxu1 %v5095_v14  ;;  %v5185_v13 = vld [vmem:[%s6079_s30 + $0x190] ss:$8 sps:$4 sm:$0xff]  }
  0xcb   : > { %3474 = vmatprep.subr.bf16.mxu0 %v5097_v15  ;;  %5003 = vset.pattern.permute.xlu0 %v5541_v12  ;;  %v5188_v14 = vld [vmem:[%s6079_s30 + $0x490] ss:$8 sps:$4 sm:$0xff]   ;;  %v5198_v15 = vld [vmem:[%s6079_s30 + $0x1a4] ss:$8 sps:$4 sm:$0xff]  }
  0xcc   : > { %5004 = vset.pattern.permute.xlu1 %v5541_v12 }
  0xcd   : > { %3136 = vmatpush1.bf16.msra.mxu1 %v5099_v16  ;;  %v5202_v16 = vld [vmem:[%s6079_s30 + $0x4a4] ss:$8 sps:$4 sm:$0xff]  }
  0xce   : > { %3475 = vmatpush1.bf16.msra.mxu0 %v5100_v17  ;;  %3218 = vmatprep.subr.bf16.mxu1 %v5109_v18  ;;  %v5195_v17 = vld [vmem:[%s6133_s11 + $0x208] ss:$52 sps:$4 sm:$0xff]  }
  0xcf   : > { %3557 = vmatprep.subr.bf16.mxu0 %v5112_v19  ;;  %v5196_v18 = vld [vmem:[%s6079_s30 + $0x1a0] ss:$8 sps:$4 sm:$0xff]  }
  0xd0   : > { %3138 = vmatmul.mubr.bf16.vlgmr.msra.gmra.mrb[0].mxu1 %v5101_v20  ;;  %v5199_v19 = vld [vmem:[%s6133_s11 + $0x220] ss:$52 sps:$4 sm:$0xff]  }
  0xd1   : > { %3477 = vmatmul.mubr.bf16.vlgmr.msra.gmra.mrb[0].mxu0 %v5104_v21  ;;  %3219 = vmatpush1.bf16.msra.mxu1 %v5107_v22  ;;  %v5200_v20 = vld [vmem:[%s6079_s30 + $0x4a0] ss:$8 sps:$4 sm:$0xff]   ;;  %v5205_v21 = vld [vmem:[%s6079_s30 + $0x1b4] ss:$8 sps:$4 sm:$0xff]  }
  0xd2   : > { %3558 = vmatpush1.bf16.msra.mxu0 %v5110_v23  ;;  %3220 = vmatprep.subr.bf16.mxu1 %v5115_v24  ;;  %v5208_v22 = vld [vmem:[%s6079_s30 + $0x4b4] ss:$8 sps:$4 sm:$0xff]   ;;  %v5211_v24 = vld [vmem:[%s6133_s11 + $0x28c] ss:$52 sps:$4 sm:$0xff]  }
  0xd3   : > { %3559 = vmatprep.subr.bf16.mxu0 %v5118_v25  ;;  %3147 = vmatprep.mubr.bf16.mxu1 %v5119_v26  ;;  %v5209_v23 = vld [vmem:[%s6133_s11 + $0x274] ss:$52 sps:$4 sm:$0xff]   ;;  %v5203_v25 = vld [vmem:[%s6079_s30 + $0x1b0] ss:$8 sps:$4 sm:$0xff]  }
  0xd4   : > { %3486 = vmatprep.mubr.bf16.mxu0 %v5121_v27  ;;  %v5206_v26 = vld [vmem:[%s6079_s30 + $0x4b0] ss:$8 sps:$4 sm:$0xff]   ;;  %v5216_v27 = vld [vmem:[%s6079_s30 + $0x1c4] ss:$8 sps:$4 sm:$0xff]  }
  0xd5   : > { %3221 = vmatpush1.bf16.msra.mxu1 %v5113_v28  ;;  %v5220_v28 = vld [vmem:[%s6079_s30 + $0x4c4] ss:$8 sps:$4 sm:$0xff]  }
  0xd6   : > { %3560 = vmatpush1.bf16.msra.mxu0 %v5116_v29  ;;  %3222 = vmatprep.subr.bf16.mxu1 %v5126_v30  ;;  %v5213_v29 = vld [vmem:[%s6133_s11 + $0x270] ss:$52 sps:$4 sm:$0xff]   ;;  %v5214_v30 = vld [vmem:[%s6079_s30 + $0x1c0] ss:$8 sps:$4 sm:$0xff]  }
  0xd7   : > { %3561 = vmatprep.subr.bf16.mxu0 %v5130_v31  ;;  %v5217_v31 = vld [vmem:[%s6133_s11 + $0x288] ss:$52 sps:$4 sm:$0xff]  }
  0xd8   : > { %3148 = vmatmul.mubr.bf16.gmra.mrb[4].mxu1 %v5123_v32  ;;  %v5218_v32 = vld [vmem:[%s6079_s30 + $0x4c0] ss:$8 sps:$4 sm:$0xff]  }
  0xd9   : > { %3487 = vmatmul.mubr.bf16.gmra.mrb[4].mxu0 %v5127_v34  ;;  %3223 = vmatpush1.bf16.msra.mxu1 %v5124_v33  ;;  %v5223_v33 = vld [vmem:[%s6079_s30 + $0x1d4] ss:$8 sps:$4 sm:$0xff]  }
  0xda   : > { %3562 = vmatpush1.bf16.msra.mxu0 %v5128_v35  ;;  %3224 = vmatprep.subr.bf16.mxu1 %v5133_v36  ;;  %v5226_v34 = vld [vmem:[%s6079_s30 + $0x4d4] ss:$8 sps:$4 sm:$0xff]  }
  0xdb   : > { %3563 = vmatprep.subr.bf16.mxu0 %v5136_v37  ;;  %3157 = vmatprep.mubr.bf16.mxu1 %v5137_v38  ;;  %v5227_v35 = vld [vmem:[%s6133_s11 + $0x2dc] ss:$52 sps:$4 sm:$0xff]   ;;  %v5229_v36 = vld [vmem:[%s6133_s11 + $0x2f4] ss:$52 sps:$4 sm:$0xff]  }
  0xdc   : > { %3496 = vmatprep.mubr.bf16.mxu0 %v5139_v39  ;;  %v5221_v37 = vld [vmem:[%s6079_s30 + $0x1d0] ss:$8 sps:$4 sm:$0xff]   ;;  %v5234_v39 = vld [vmem:[%s6079_s30 + $0x1e4] ss:$8 sps:$4 sm:$0xff]  }
  0xdd   : > { %3225 = vmatpush1.bf16.msra.mxu1 %v5131_v40  ;;  %v5224_v38 = vld [vmem:[%s6079_s30 + $0x4d0] ss:$8 sps:$4 sm:$0xff]   ;;  %v5238_v40 = vld [vmem:[%s6079_s30 + $0x4e4] ss:$8 sps:$4 sm:$0xff]  }
  0xde   : > { %3564 = vmatpush1.bf16.msra.mxu0 %v5134_v41  ;;  %3226 = vmatprep.subr.bf16.mxu1 %v5144_v42  ;;  %v5231_v41 = vld [vmem:[%s6133_s11 + $0x2d8] ss:$52 sps:$4 sm:$0xff]   ;;  %v5232_v42 = vld [vmem:[%s6079_s30 + $0x1e0] ss:$8 sps:$4 sm:$0xff]  }
  0xdf   : > { %3565 = vmatprep.subr.bf16.mxu0 %v5148_v43  ;;  %v5235_v43 = vld [vmem:[%s6133_s11 + $0x2f0] ss:$52 sps:$4 sm:$0xff]  }
  0xe0   : > { %3158 = vmatmul.mubr.bf16.gmra.mrb[8].mxu1 %v5141_v44  ;;  %v5236_v44 = vld [vmem:[%s6079_s30 + $0x4e0] ss:$8 sps:$4 sm:$0xff]  }
  0xe1   : > { %3497 = vmatmul.mubr.bf16.gmra.mrb[8].mxu0 %v5145_v46  ;;  %3227 = vmatpush1.bf16.msra.mxu1 %v5142_v45  ;;  %v5241_v45 = vld [vmem:[%s6079_s30 + $0x1f4] ss:$8 sps:$4 sm:$0xff]  }
  0xe2   : > { %3566 = vmatpush1.bf16.msra.mxu0 %v5146_v47  ;;  %3228 = vmatprep.subr.bf16.mxu1 %v5151_v48  ;;  %v5244_v46 = vld [vmem:[%s6079_s30 + $0x4f4] ss:$8 sps:$4 sm:$0xff]   ;;  %v5247_v47 = vld [vmem:[%s6133_s11 + $0xc] ss:$52 sps:$4 sm:$0xff]   ;;  %v5250_v48 = vld [vmem:[%s6133_s11 + $0x24] ss:$52 sps:$4 sm:$0xff]  }
  0xe3   : > { %3567 = vmatprep.subr.bf16.mxu0 %v5154_v49  ;;  %3167 = vmatprep.mubr.bf16.mxu1 %v5155_v50  ;;  %v5239_v49 = vld [vmem:[%s6079_s30 + $0x1f0] ss:$8 sps:$4 sm:$0xff]  }
  0xe4   : > { %3506 = vmatprep.mubr.bf16.mxu0 %v5157_v51  ;;  %v5242_v50 = vld [vmem:[%s6079_s30 + $0x4f0] ss:$8 sps:$4 sm:$0xff]   ;;  %v5253_v51 = vld [vmem:[%s6079_s30 + $0x204] ss:$8 sps:$4 sm:$0xff]  }
  0xe5   : > { %3229 = vmatpush1.bf16.msra.mxu1 %v5149_v52  ;;  %v6256_v52 = vld [vmem:[%s6079_s30 + $0x504] ss:$8 sps:$4 sm:$0xff]  }
  0xe6   : > { %3568 = vmatpush1.bf16.msra.mxu0 %v5152_v53  ;;  %3230 = vmatprep.subr.bf16.mxu1 %v5162_v54  ;;  %v5245_v53 = vld [vmem:[%s6133_s11 + $0x8] ss:$52 sps:$4 sm:$0xff]   ;;  %v5248_v54 = vld [vmem:[%s6133_s11 + $0x20] ss:$52 sps:$4 sm:$0xff]  }
  0xe7   : > { %3569 = vmatprep.subr.bf16.mxu0 %v5166_v55  ;;  %v5251_v55 = vld [vmem:[%s6079_s30 + $0x200] ss:$8 sps:$4 sm:$0xff]  }
  0xe8   : > { %3168 = vmatmul.mubr.bf16.gmra.mrb[12].mxu1 %v5159_v56  ;;  %v6262_v56 = vld [vmem:[%s6079_s30 + $0x500] ss:$8 sps:$4 sm:$0xff]  }
  0xe9   : > { %3507 = vmatmul.mubr.bf16.gmra.mrb[12].mxu0 %v5163_v58  ;;  %3231 = vmatpush1.bf16.msra.mxu1 %v5160_v57  ;;  %v5259_v57 = vld [vmem:[%s6079_s30 + $0x214] ss:$8 sps:$4 sm:$0xff]  }
  0xea   : > { %3570 = vmatpush1.bf16.msra.mxu0 %v5164_v59  ;;  %3232 = vmatprep.subr.bf16.mxu1 %v5169_v60  ;;  %v6267_v58 = vld [vmem:[%s6079_s30 + $0x514] ss:$8 sps:$4 sm:$0xff]   ;;  %v5265_v60 = vld [vmem:[%s6133_s11 + $0x8c] ss:$52 sps:$4 sm:$0xff]  }
  0xeb   : > { %3571 = vmatprep.subr.bf16.mxu0 %v5172_v61  ;;  %3177 = vmatprep.mubr.bf16.mxu1 %v5173_v62  ;;  %v5263_v59 = vld [vmem:[%s6133_s11 + $0x74] ss:$52 sps:$4 sm:$0xff]   ;;  %v5257_v61 = vld [vmem:[%s6079_s30 + $0x210] ss:$8 sps:$4 sm:$0xff]  }
  0xec   : > { %3516 = vmatprep.mubr.bf16.mxu0 %v5175_v63  ;;  %v6274_v62 = vld [vmem:[%s6079_s30 + $0x510] ss:$8 sps:$4 sm:$0xff]   ;;  %v5270_v63 = vld [vmem:[%s6079_s30 + $0x224] ss:$8 sps:$4 sm:$0xff]  }
  0xed   : > { %3233 = vmatpush1.bf16.msra.mxu1 %v5167_v0  ;;  %v6279_v0 = vld [vmem:[%s6079_s30 + $0x524] ss:$8 sps:$4 sm:$0xff]  }
  0xee   : > { %3572 = vmatpush1.bf16.msra.mxu0 %v5170_v1  ;;  %3234 = vmatprep.subr.bf16.mxu1 %v5180_v2  ;;  %v5267_v1 = vld [vmem:[%s6133_s11 + $0x70] ss:$52 sps:$4 sm:$0xff]   ;;  %v5268_v2 = vld [vmem:[%s6079_s30 + $0x220] ss:$8 sps:$4 sm:$0xff]  }
  0xef   : > { %3573 = vmatprep.subr.bf16.mxu0 %v5184_v3  ;;  %v5271_v3 = vld [vmem:[%s6133_s11 + $0x88] ss:$52 sps:$4 sm:$0xff]  }
  0xf0   : > { %3178 = vmatmul.mubr.bf16.gmra.mrb[16].mxu1 %v5177_v4  ;;  %v6285_v4 = vld [vmem:[%s6079_s30 + $0x520] ss:$8 sps:$4 sm:$0xff]  }
  0xf1   : > { %3517 = vmatmul.mubr.bf16.gmra.mrb[16].mxu0 %v5181_v6  ;;  %3235 = vmatpush1.bf16.msra.mxu1 %v5178_v5  ;;  %v5277_v5 = vld [vmem:[%s6079_s30 + $0x234] ss:$8 sps:$4 sm:$0xff]  }
  0xf2   : > { %3574 = vmatpush1.bf16.msra.mxu0 %v5182_v7  ;;  %3236 = vmatprep.subr.bf16.mxu1 %v5187_v8  ;;  %v6291_v6 = vld [vmem:[%s6079_s30 + $0x534] ss:$8 sps:$4 sm:$0xff]  }
  0xf3   : > { %3575 = vmatprep.subr.bf16.mxu0 %v5190_v9  ;;  %3187 = vmatprep.mubr.bf16.mxu1 %v5191_v10  ;;  %v5281_v7 = vld [vmem:[%s6133_s11 + $0xdc] ss:$52 sps:$4 sm:$0xff]   ;;  %v5283_v8 = vld [vmem:[%s6133_s11 + $0xf4] ss:$52 sps:$4 sm:$0xff]  }
  0xf4   : > { %3526 = vmatprep.mubr.bf16.mxu0 %v5193_v11  ;;  %v5275_v9 = vld [vmem:[%s6079_s30 + $0x230] ss:$8 sps:$4 sm:$0xff]   ;;  %v5288_v11 = vld [vmem:[%s6079_s30 + $0x244] ss:$8 sps:$4 sm:$0xff]  }
  0xf5   : > { %3237 = vmatpush1.bf16.msra.mxu1 %v5185_v13  ;;  %v6298_v10 = vld [vmem:[%s6079_s30 + $0x530] ss:$8 sps:$4 sm:$0xff]   ;;  %v6303_v13 = vld [vmem:[%s6079_s30 + $0x544] ss:$8 sps:$4 sm:$0xff]  }
  0xf6   : > { %3576 = vmatpush1.bf16.msra.mxu0 %v5188_v14  ;;  %3238 = vmatprep.subr.bf16.mxu1 %v5198_v15  ;;  %v5285_v14 = vld [vmem:[%s6133_s11 + $0xd8] ss:$52 sps:$4 sm:$0xff]   ;;  %v5286_v15 = vld [vmem:[%s6079_s30 + $0x240] ss:$8 sps:$4 sm:$0xff]  }
  0xf7   : > { %3577 = vmatprep.subr.bf16.mxu0 %v5202_v16  ;;  %v5289_v16 = vld [vmem:[%s6133_s11 + $0xf0] ss:$52 sps:$4 sm:$0xff]  }
  0xf8   : > { %3188 = vmatmul.mubr.bf16.gmra.mrb[20].mxu1 %v5195_v17  ;;  %v6309_v17 = vld [vmem:[%s6079_s30 + $0x540] ss:$8 sps:$4 sm:$0xff]  }
  0xf9   : > { %3527 = vmatmul.mubr.bf16.gmra.mrb[20].mxu0 %v5199_v19  ;;  %3239 = vmatpush1.bf16.msra.mxu1 %v5196_v18  ;;  %v5295_v18 = vld [vmem:[%s6079_s30 + $0x254] ss:$8 sps:$4 sm:$0xff]  }
  0xfa   : > { %3578 = vmatpush1.bf16.msra.mxu0 %v5200_v20  ;;  %3240 = vmatprep.subr.bf16.mxu1 %v5205_v21  ;;  %v6315_v19 = vld [vmem:[%s6079_s30 + $0x554] ss:$8 sps:$4 sm:$0xff]   ;;  %v5299_v20 = vld [vmem:[%s6133_s11 + $0x144] ss:$52 sps:$4 sm:$0xff]  }
  0xfb   : > { %3579 = vmatprep.subr.bf16.mxu0 %v5208_v22  ;;  %3197 = vmatprep.mubr.bf16.mxu1 %v5209_v23  ;;  %v5301_v21 = vld [vmem:[%s6133_s11 + $0x15c] ss:$52 sps:$4 sm:$0xff]  }
  0xfc   : > { %3536 = vmatprep.mubr.bf16.mxu0 %v5211_v24  ;;  %v5293_v22 = vld [vmem:[%s6079_s30 + $0x250] ss:$8 sps:$4 sm:$0xff]   ;;  %v5306_v24 = vld [vmem:[%s6079_s30 + $0x264] ss:$8 sps:$4 sm:$0xff]  }
  0xfd   : > { %3241 = vmatpush1.bf16.msra.mxu1 %v5203_v25  ;;  %v6322_v23 = vld [vmem:[%s6079_s30 + $0x550] ss:$8 sps:$4 sm:$0xff]   ;;  %v6327_v25 = vld [vmem:[%s6079_s30 + $0x564] ss:$8 sps:$4 sm:$0xff]  }
  0xfe   : > { %3580 = vmatpush1.bf16.msra.mxu0 %v5206_v26  ;;  %3242 = vmatprep.subr.bf16.mxu1 %v5216_v27  ;;  %v5303_v26 = vld [vmem:[%s6133_s11 + $0x140] ss:$52 sps:$4 sm:$0xff]  }
  0xff   : > { %3581 = vmatprep.subr.bf16.mxu0 %v5220_v28  ;;  %v5304_v27 = vld [vmem:[%s6079_s30 + $0x260] ss:$8 sps:$4 sm:$0xff]   ;;  %v5307_v28 = vld [vmem:[%s6133_s11 + $0x158] ss:$52 sps:$4 sm:$0xff]  }
 0x100   : > { %3198 = vmatmul.mubr.bf16.gmra.mrb[24].mxu1 %v5213_v29  ;;  %v6333_v29 = vld [vmem:[%s6079_s30 + $0x560] ss:$8 sps:$4 sm:$0xff]  }
 0x101   : > { %3537 = vmatmul.mubr.bf16.gmra.mrb[24].mxu0 %v5217_v31  ;;  %3243 = vmatpush1.bf16.msra.mxu1 %v5214_v30  ;;  %v5313_v30 = vld [vmem:[%s6079_s30 + $0x274] ss:$8 sps:$4 sm:$0xff]  }
 0x102   : > { %3582 = vmatpush1.bf16.msra.mxu0 %v5218_v32  ;;  %3244 = vmatprep.subr.bf16.mxu1 %v5223_v33  ;;  %v6339_v31 = vld [vmem:[%s6079_s30 + $0x574] ss:$8 sps:$4 sm:$0xff]   ;;  %v5317_v32 = vld [vmem:[%s6133_s11 + $0x1ac] ss:$52 sps:$4 sm:$0xff]   ;;  %v5319_v33 = vld [vmem:[%s6133_s11 + $0x1c4] ss:$52 sps:$4 sm:$0xff]  }
 0x103   : > { %3583 = vmatprep.subr.bf16.mxu0 %v5226_v34  ;;  %3207 = vmatprep.mubr.bf16.mxu1 %v5227_v35  ;;  %v5311_v34 = vld [vmem:[%s6079_s30 + $0x270] ss:$8 sps:$4 sm:$0xff]  }
 0x104   : > { %3546 = vmatprep.mubr.bf16.mxu0 %v5229_v36  ;;  %v6346_v35 = vld [vmem:[%s6079_s30 + $0x570] ss:$8 sps:$4 sm:$0xff]   ;;  %v5324_v36 = vld [vmem:[%s6079_s30 + $0x284] ss:$8 sps:$4 sm:$0xff]  }
 0x105   : > { %3245 = vmatpush1.bf16.msra.mxu1 %v5221_v37  ;;  %v6351_v37 = vld [vmem:[%s6079_s30 + $0x584] ss:$8 sps:$4 sm:$0xff]  }
 0x106   : > { %3584 = vmatpush1.bf16.msra.mxu0 %v5224_v38  ;;  %3246 = vmatprep.subr.bf16.mxu1 %v5234_v39  ;;  %v5321_v38 = vld [vmem:[%s6133_s11 + $0x1a8] ss:$52 sps:$4 sm:$0xff]  }
 0x107   : > { %3585 = vmatprep.subr.bf16.mxu0 %v5238_v40  ;;  %v5322_v39 = vld [vmem:[%s6079_s30 + $0x280] ss:$8 sps:$4 sm:$0xff]  }
 0x108   : > { %3208 = vmatmul.mubr.bf16.gmra.mrb[28].mxu1 %v5231_v41  ;;  %v5325_v40 = vld [vmem:[%s6133_s11 + $0x1c0] ss:$52 sps:$4 sm:$0xff]  }
 0x109   : > { %3547 = vmatmul.mubr.bf16.gmra.mrb[28].mxu0 %v5235_v43  ;;  %3247 = vmatpush1.bf16.msra.mxu1 %v5232_v42  ;;  %v6357_v41 = vld [vmem:[%s6079_s30 + $0x580] ss:$8 sps:$4 sm:$0xff]   ;;  %v5331_v42 = vld [vmem:[%s6079_s30 + $0x294] ss:$8 sps:$4 sm:$0xff]  }
 0x10a   : > { %3586 = vmatpush1.bf16.msra.mxu0 %v5236_v44  ;;  %3248 = vmatprep.subr.bf16.mxu1 %v5241_v45  ;;  %v6363_v43 = vld [vmem:[%s6079_s30 + $0x594] ss:$8 sps:$4 sm:$0xff]   ;;  %v5337_v45 = vld [vmem:[%s6133_s11 + $0x22c] ss:$52 sps:$4 sm:$0xff]  }
 0x10b   : > { %3587 = vmatprep.subr.bf16.mxu0 %v5244_v46  ;;  %3250 = vmatprep.mubr.bf16.mxu1 %v5247_v47  ;;  %v5335_v44 = vld [vmem:[%s6133_s11 + $0x214] ss:$52 sps:$4 sm:$0xff]   ;;  %v5329_v46 = vld [vmem:[%s6079_s30 + $0x290] ss:$8 sps:$4 sm:$0xff]  }
 0x10c   : > { %3589 = vmatprep.mubr.bf16.mxu0 %v5250_v48  ;;  %v6370_v47 = vld [vmem:[%s6079_s30 + $0x590] ss:$8 sps:$4 sm:$0xff]   ;;  %v5342_v48 = vld [vmem:[%s6079_s30 + $0x2a4] ss:$8 sps:$4 sm:$0xff]  }
 0x10d   : > { %3249 = vmatpush1.bf16.msra.mxu1 %v5239_v49  ;;  %v6375_v49 = vld [vmem:[%s6079_s30 + $0x5a4] ss:$8 sps:$4 sm:$0xff]  }
 0x10e   : > { %3588 = vmatpush1.bf16.msra.mxu0 %v5242_v50  ;;  %3331 = vmatprep.subr.bf16.mxu1 %v5253_v51  ;;  %v5339_v50 = vld [vmem:[%s6133_s11 + $0x210] ss:$52 sps:$4 sm:$0xff]   ;;  %v5340_v51 = vld [vmem:[%s6079_s30 + $0x2a0] ss:$8 sps:$4 sm:$0xff]  }
 0x10f   : > { %3670 = vmatprep.subr.bf16.mxu0 %v6256_v52 }
 0x110   : > { %3251 = vmatmul.mubr.bf16.vlgmr.msra.gmra.mrb[0].mxu1 %v5245_v53  ;;  %v5343_v53 = vld [vmem:[%s6133_s11 + $0x228] ss:$52 sps:$4 sm:$0xff]  }
 0x111   : > { %3590 = vmatmul.mubr.bf16.vlgmr.msra.gmra.mrb[0].mxu0 %v5248_v54  ;;  %3332 = vmatpush1.bf16.msra.mxu1 %v5251_v55  ;;  %v6381_v54 = vld [vmem:[%s6079_s30 + $0x5a0] ss:$8 sps:$4 sm:$0xff]   ;;  %v5349_v55 = vld [vmem:[%s6079_s30 + $0x2b4] ss:$8 sps:$4 sm:$0xff]  }
 0x112   : > { %3671 = vmatpush1.bf16.msra.mxu0 %v6262_v56  ;;  %3333 = vmatprep.subr.bf16.mxu1 %v5259_v57  ;;  %v6387_v57 = vld [vmem:[%s6079_s30 + $0x5b4] ss:$8 sps:$4 sm:$0xff]  }
 0x113   : > { %3672 = vmatprep.subr.bf16.mxu0 %v6267_v58  ;;  %3260 = vmatprep.mubr.bf16.mxu1 %v5263_v59  ;;  %v5353_v59 = vld [vmem:[%s6133_s11 + $0x27c] ss:$52 sps:$4 sm:$0xff]  }
 0x114   : > { %3599 = vmatprep.mubr.bf16.mxu0 %v5265_v60  ;;  %v5355_v60 = vld [vmem:[%s6133_s11 + $0x294] ss:$52 sps:$4 sm:$0xff]  }
 0x115   : > { %3334 = vmatpush1.bf16.msra.mxu1 %v5257_v61  ;;  %v5347_v61 = vld [vmem:[%s6079_s30 + $0x2b0] ss:$8 sps:$4 sm:$0xff]  }
 0x116   : > { %3673 = vmatpush1.bf16.msra.mxu0 %v6274_v62  ;;  %3335 = vmatprep.subr.bf16.mxu1 %v5270_v63  ;;  %v6393_v63 = vld [vmem:[%s6079_s30 + $0x5b0] ss:$8 sps:$4 sm:$0xff]  }
 0x117   : > { %3674 = vmatprep.subr.bf16.mxu0 %v6279_v0 }
 0x118   : > { %3261 = vmatmul.mubr.bf16.gmra.mrb[4].mxu1 %v5267_v1  ;;  %v5360_v1 = vld [vmem:[%s6079_s30 + $0x2c4] ss:$8 sps:$4 sm:$0xff]  }
 0x119   : > { %3600 = vmatmul.mubr.bf16.gmra.mrb[4].mxu0 %v5271_v3  ;;  %3336 = vmatpush1.bf16.msra.mxu1 %v5268_v2  ;;  %v6399_v2 = vld [vmem:[%s6079_s30 + $0x5c4] ss:$8 sps:$4 sm:$0xff]  }
 0x11a   : > { %3675 = vmatpush1.bf16.msra.mxu0 %v6285_v4  ;;  %3337 = vmatprep.subr.bf16.mxu1 %v5277_v5  ;;  %v5357_v3 = vld [vmem:[%s6133_s11 + $0x278] ss:$52 sps:$4 sm:$0xff]   ;;  %v5358_v5 = vld [vmem:[%s6079_s30 + $0x2c0] ss:$8 sps:$4 sm:$0xff]  }
 0x11b   : > { %3676 = vmatprep.subr.bf16.mxu0 %v6291_v6  ;;  %3270 = vmatprep.mubr.bf16.mxu1 %v5281_v7  ;;  %v5361_v7 = vld [vmem:[%s6133_s11 + $0x290] ss:$52 sps:$4 sm:$0xff]  }
 0x11c   : > { %3609 = vmatprep.mubr.bf16.mxu0 %v5283_v8  ;;  %v6405_v8 = vld [vmem:[%s6079_s30 + $0x5c0] ss:$8 sps:$4 sm:$0xff]  }
 0x11d   : > { %3338 = vmatpush1.bf16.msra.mxu1 %v5275_v9  ;;  %v5367_v9 = vld [vmem:[%s6079_s30 + $0x2d4] ss:$8 sps:$4 sm:$0xff]  }
 0x11e   : > { %3677 = vmatpush1.bf16.msra.mxu0 %v6298_v10  ;;  %3339 = vmatprep.subr.bf16.mxu1 %v5288_v11  ;;  %v6411_v11 = vld [vmem:[%s6079_s30 + $0x5d4] ss:$8 sps:$4 sm:$0xff]  }
 0x11f   : > { %3678 = vmatprep.subr.bf16.mxu0 %v6303_v13 }
 0x120   : > { %3271 = vmatmul.mubr.bf16.gmra.mrb[8].mxu1 %v5285_v14  ;;  %v5371_v14 = vld [vmem:[%s6133_s11 + $0x2e4] ss:$52 sps:$4 sm:$0xff]  }
 0x121   : > { %3610 = vmatmul.mubr.bf16.gmra.mrb[8].mxu0 %v5289_v16  ;;  %3340 = vmatpush1.bf16.msra.mxu1 %v5286_v15  ;;  %v5373_v15 = vld [vmem:[%s6133_s11 + $0x2fc] ss:$52 sps:$4 sm:$0xff]  }
 0x122   : > { %3679 = vmatpush1.bf16.msra.mxu0 %v6309_v17  ;;  %3341 = vmatprep.subr.bf16.mxu1 %v5295_v18  ;;  %v5365_v16 = vld [vmem:[%s6079_s30 + $0x2d0] ss:$8 sps:$4 sm:$0xff]  }
 0x123   : > { %3680 = vmatprep.subr.bf16.mxu0 %v6315_v19  ;;  %3280 = vmatprep.mubr.bf16.mxu1 %v5299_v20  ;;  %v6417_v18 = vld [vmem:[%s6079_s30 + $0x5d0] ss:$8 sps:$4 sm:$0xff]   ;;  %v5378_v20 = vld [vmem:[%s6079_s30 + $0x2e4] ss:$8 sps:$4 sm:$0xff]  }
 0x124   : > { %3619 = vmatprep.mubr.bf16.mxu0 %v5301_v21  ;;  %v6423_v21 = vld [vmem:[%s6079_s30 + $0x5e4] ss:$8 sps:$4 sm:$0xff]  }
 0x125   : > { %3342 = vmatpush1.bf16.msra.mxu1 %v5293_v22  ;;  %v5375_v22 = vld [vmem:[%s6133_s11 + $0x2e0] ss:$52 sps:$4 sm:$0xff]  }
 0x126   : > { %3681 = vmatpush1.bf16.msra.mxu0 %v6322_v23  ;;  %3343 = vmatprep.subr.bf16.mxu1 %v5306_v24  ;;  %v5376_v24 = vld [vmem:[%s6079_s30 + $0x2e0] ss:$8 sps:$4 sm:$0xff]  }
 0x127   : > { %3682 = vmatprep.subr.bf16.mxu0 %v6327_v25 }
 0x128   : > { %3281 = vmatmul.mubr.bf16.gmra.mrb[12].mxu1 %v5303_v26  ;;  %v5379_v26 = vld [vmem:[%s6133_s11 + $0x2f8] ss:$52 sps:$4 sm:$0xff]  }
 0x129   : > { %3620 = vmatmul.mubr.bf16.gmra.mrb[12].mxu0 %v5307_v28  ;;  %3344 = vmatpush1.bf16.msra.mxu1 %v5304_v27  ;;  %v6429_v27 = vld [vmem:[%s6079_s30 + $0x5e0] ss:$8 sps:$4 sm:$0xff]   ;;  %v5385_v28 = vld [vmem:[%s6079_s30 + $0x2f4] ss:$8 sps:$4 sm:$0xff]  }
 0x12a   : > { %3683 = vmatpush1.bf16.msra.mxu0 %v6333_v29  ;;  %3345 = vmatprep.subr.bf16.mxu1 %v5313_v30  ;;  %v6435_v30 = vld [vmem:[%s6079_s30 + $0x5f4] ss:$8 sps:$4 sm:$0xff]  }
 0x12b   : > { %3684 = vmatprep.subr.bf16.mxu0 %v6339_v31  ;;  %3290 = vmatprep.mubr.bf16.mxu1 %v5317_v32  ;;  %v5391_v32 = vld [vmem:[%s6133_s11 + $0x14] ss:$52 sps:$4 sm:$0xff]  }
 0x12c   : > { %3629 = vmatprep.mubr.bf16.mxu0 %v5319_v33  ;;  %v5394_v33 = vld [vmem:[%s6133_s11 + $0x2c] ss:$52 sps:$4 sm:$0xff]  }
 0x12d   : > { %3346 = vmatpush1.bf16.msra.mxu1 %v5311_v34  ;;  %v5383_v34 = vld [vmem:[%s6079_s30 + $0x2f0] ss:$8 sps:$4 sm:$0xff]  }
 0x12e   : > { %3685 = vmatpush1.bf16.msra.mxu0 %v6346_v35  ;;  %3347 = vmatprep.subr.bf16.mxu1 %v5324_v36  ;;  %v6442_v36 = vld [vmem:[%s6079_s30 + $0x5f0] ss:$8 sps:$4 sm:$0xff]  }
 0x12f   : > { %3686 = vmatprep.subr.bf16.mxu0 %v6351_v37 }
 0x130   : > { %3291 = vmatmul.mubr.bf16.gmra.mrb[16].mxu1 %v5321_v38  ;;  %v5397_v38 = vld [vmem:[%s6079_s30 + $0x604] ss:$8 sps:$4 sm:$0xff]  }
 0x131   : > { %3630 = vmatmul.mubr.bf16.gmra.mrb[16].mxu0 %v5325_v40  ;;  %3348 = vmatpush1.bf16.msra.mxu1 %v5322_v39  ;;  %v5389_v39 = vld [vmem:[%s6133_s11 + $0x10] ss:$52 sps:$4 sm:$0xff]   ;;  %v5392_v40 = vld [vmem:[%s6133_s11 + $0x28] ss:$52 sps:$4 sm:$0xff]  }
 0x132   : > { %3687 = vmatpush1.bf16.msra.mxu0 %v6357_v41  ;;  %3349 = vmatprep.subr.bf16.mxu1 %v5331_v42  ;;  %v5395_v42 = vld [vmem:[%s6079_s30 + $0x600] ss:$8 sps:$4 sm:$0xff]  }
 0x133   : > { %3688 = vmatprep.subr.bf16.mxu0 %v6363_v43  ;;  %3300 = vmatprep.mubr.bf16.mxu1 %v5335_v44  ;;  %v5400_v44 = vld [vmem:[%s6079_s30 + $0x614] ss:$8 sps:$4 sm:$0xff]  }
 0x134   : > { %3639 = vmatprep.mubr.bf16.mxu0 %v5337_v45  ;;  %v5401_v45 = vld [vmem:[%s6133_s11 + $0x7c] ss:$52 sps:$4 sm:$0xff]  }
 0x135   : > { %3350 = vmatpush1.bf16.msra.mxu1 %v5329_v46  ;;  %v5403_v46 = vld [vmem:[%s6133_s11 + $0x94] ss:$52 sps:$4 sm:$0xff]  }
 0x136   : > { %3689 = vmatpush1.bf16.msra.mxu0 %v6370_v47  ;;  %3351 = vmatprep.subr.bf16.mxu1 %v5342_v48  ;;  %v5398_v48 = vld [vmem:[%s6079_s30 + $0x610] ss:$8 sps:$4 sm:$0xff]  }
 0x137   : > { %3690 = vmatprep.subr.bf16.mxu0 %v6375_v49 }
 0x138   : > { %3301 = vmatmul.mubr.bf16.gmra.mrb[20].mxu1 %v5339_v50  ;;  %v5409_v50 = vld [vmem:[%s6079_s30 + $0x624] ss:$8 sps:$4 sm:$0xff]  }
 0x139   : > { %3640 = vmatmul.mubr.bf16.gmra.mrb[20].mxu0 %v5343_v53  ;;  %3352 = vmatpush1.bf16.msra.mxu1 %v5340_v51  ;;  %v5406_v51 = vld [vmem:[%s6133_s11 + $0x90] ss:$52 sps:$4 sm:$0xff]   ;;  %v5407_v53 = vld [vmem:[%s6079_s30 + $0x620] ss:$8 sps:$4 sm:$0xff]  }
 0x13a   : > { %3691 = vmatpush1.bf16.msra.mxu0 %v6381_v54  ;;  %3353 = vmatprep.subr.bf16.mxu1 %v5349_v55  ;;  %v5415_v55 = vld [vmem:[%s6133_s11 + $0xfc] ss:$52 sps:$4 sm:$0xff]  }
 0x13b   : > { %3692 = vmatprep.subr.bf16.mxu0 %v6387_v57  ;;  %3310 = vmatprep.mubr.bf16.mxu1 %v5353_v59  ;;  %v1449_v59 = vld [vmem:[%s6466_s15 + $0x40] sm:$0xff] }
 0x13c   : > { %3649 = vmatprep.mubr.bf16.mxu0 %v5355_v60  ;;  %v1451_v60 = vld [vmem:[%s6466_s15 + $0x50] sm:$0xff]  ;;  %1499 = vperm.xlu0 %5003, %v1449_v59  }
 0x13d   : > { %3354 = vmatpush1.bf16.msra.mxu1 %v5347_v61  ;;  %v5417_v61 = vld [vmem:[%s6133_s11 + $0xe0] ss:$52 sps:$4 sm:$0xff]   ;;  %1509 = vperm.xlu1 %5004, %v1451_v60  }
 0x13e   : > { %3693 = vmatpush1.bf16.msra.mxu0 %v6393_v63  ;;  %3355 = vmatprep.subr.bf16.mxu1 %v5360_v1  ;;  %v5418_v1 = vld [vmem:[%s6133_s11 + $0xf8] ss:$52 sps:$4 sm:$0xff]  }
 0x13f   : > { %3694 = vmatprep.subr.bf16.mxu0 %v6399_v2 }
 0x140   : > { %3311 = vmatmul.mubr.bf16.gmra.mrb[24].mxu1 %v5357_v3  ;;  %v5425_v3 = vld [vmem:[%s6133_s11 + $0x14c] ss:$52 sps:$4 sm:$0xff]  }
 0x141   : > { %3650 = vmatmul.mubr.bf16.gmra.mrb[24].mxu0 %v5361_v7  ;;  %3356 = vmatpush1.bf16.msra.mxu1 %v5358_v5  ;;  %v5427_v5 = vld [vmem:[%s6133_s11 + $0x164] ss:$52 sps:$4 sm:$0xff]  }
 0x142   : > { %3695 = vmatpush1.bf16.msra.mxu0 %v6405_v8  ;;  %3357 = vmatprep.subr.bf16.mxu1 %v5367_v9  ;;  %v5422_v7 = vld [vmem:[%s6079_s30 + $0x650] ss:$8 sps:$4 sm:$0xff]   ;;  %v1450_v9 = vld [vmem:[%s6466_s15 + $0x48] sm:$0xff] }
 0x143   : > { %3696 = vmatprep.subr.bf16.mxu0 %v6411_v11  ;;  %3320 = vmatprep.mubr.bf16.mxu1 %v5371_v14  ;;  %v5429_v14 = vld [vmem:[%s6133_s11 + $0x148] ss:$52 sps:$4 sm:$0xff]  }
 0x144   : > { %3659 = vmatprep.mubr.bf16.mxu0 %v5373_v15  ;;  %v5430_v15 = vld [vmem:[%s6133_s11 + $0x160] ss:$52 sps:$4 sm:$0xff]   ;;  %1504 = vperm.xlu0 %5003, %v1450_v9  }
 0x145   : > { %3358 = vmatpush1.bf16.msra.mxu1 %v5365_v16  ;;  %v5437_v16 = vld [vmem:[%s6133_s11 + $0x1b4] ss:$52 sps:$4 sm:$0xff]  }
 0x146   : > { %3697 = vmatpush1.bf16.msra.mxu0 %v6417_v18  ;;  %3359 = vmatprep.subr.bf16.mxu1 %v5378_v20  ;;  %v5434_v20 = vld [vmem:[%s6079_s30 + $0x670] ss:$8 sps:$4 sm:$0xff]  }
 0x147   : > { %3698 = vmatprep.subr.bf16.mxu0 %v6423_v21 }
 0x148   : > { %3321 = vmatmul.mubr.bf16.gmra.mrb[28].mxu1 %v5375_v22  ;;  %v1453_v22 = vld [vmem:[%s6466_s15 + $0x60] sm:$0xff] }
 0x149   : > { %3660 = vmatmul.mubr.bf16.gmra.mrb[28].mxu0 %v5379_v26  ;;  %3360 = vmatpush1.bf16.msra.mxu1 %v5376_v24  ;;  %v1454_v24 = vld [vmem:[%s6466_s15 + $0x68] sm:$0xff]  ;;  %v1456_v26 = vld [vmem:[%s6466_s15 + $0x78] sm:$0xff] }
 0x14a   : > { %3699 = vmatpush1.bf16.msra.mxu0 %v6429_v27  ;;  %3361 = vmatprep.subr.bf16.mxu1 %v5385_v28  ;;  %v5444_v28 = vld [vmem:[%s6133_s11 + $0x98] ss:$52 sps:$4 sm:$0xff]  }
 0x14b   : > { %3700 = vmatprep.subr.bf16.mxu0 %v6435_v30  ;;  %3363 = vmatprep.mubr.bf16.mxu1 %v5391_v32  ;;  %v1442_v32 = vld [vmem:[%s6466_s15 + $0x8] sm:$0xff] }
 0x14c   : > { %3702 = vmatprep.mubr.bf16.mxu0 %v5394_v33  ;;  %1519 = vperm.xlu0 %5003, %v1453_v22   ;;  %v5445_v33 = vld [vmem:[%s6133_s11 + $0x284] ss:$52 sps:$4 sm:$0xff]  }
 0x14d   : > { %3362 = vmatpush1.bf16.msra.mxu1 %v5383_v34  ;;  %v1445_v34 = vld [vmem:[%s6466_s15 + $0x20] sm:$0xff] }
 0x14e   : > { %3701 = vmatpush1.bf16.msra.mxu0 %v6442_v36  ;;  %4671 = vmatprep.subr.bf16.mxu1 %v6256_v52  ;;  %v5405_v52 = vld [vmem:[%s6133_s11 + $0x78] ss:$52 sps:$4 sm:$0xff]  }
 0x14f   : > { %3783 = vmatprep.subr.bf16.mxu0 %v5397_v38  ;;  %v1446_v38 = vld [vmem:[%s6466_s15 + $0x28] sm:$0xff] }
 0x150   : > { %3364 = vmatmul.mubr.bf16.vlgmr.msra.gmra.mrb[0].mxu1 %v5389_v39  ;;  %v5449_v39 = vld [vmem:[%s6133_s11 + $0x2ec] ss:$52 sps:$4 sm:$0xff]  }
 0x151   : > { %3703 = vmatmul.mubr.bf16.vlgmr.msra.gmra.mrb[0].mxu0 %v5392_v40  ;;  %4687 = vmatpush1.bf16.msra.mxu1 %v6262_v56  ;;  %v5412_v56 = vld [vmem:[%s6079_s30 + $0x634] ss:$8 sps:$4 sm:$0xff]   ;;  %v5455_v40 = vld [vmem:[%s6133_s11 + $0x1cc] ss:$52 sps:$4 sm:$0xff]  }
 0x152   : > { %3784 = vmatpush1.bf16.msra.mxu0 %v5395_v42  ;;  %4672 = vmatprep.subr.bf16.mxu1 %v6267_v58  ;;  %v5413_v58 = vld [vmem:[%s6133_s11 + $0xe4] ss:$52 sps:$4 sm:$0xff]  }
 0x153   : > { %3785 = vmatprep.subr.bf16.mxu0 %v5400_v44  ;;  %3373 = vmatprep.mubr.bf16.mxu1 %v5401_v45  ;;  %v5463_v42 = vld [vmem:[%s6133_s11 + $0x298] ss:$52 sps:$4 sm:$0xff]   ;;  %v5464_v44 = vld [vmem:[%s6133_s11 + $0x2a0] ss:$52 sps:$4 sm:$0xff]  }
 0x154   : > { %3712 = vmatprep.mubr.bf16.mxu0 %v5403_v46  ;;  %v5465_v45 = vld [vmem:[%s6133_s11 + $0x304] ss:$52 sps:$4 sm:$0xff]   ;;  %v5468_v46 = vld [vmem:[%s6133_s11 + $0x308] ss:$52 sps:$4 sm:$0xff]  }
 0x155   : > { %4688 = vmatpush1.bf16.msra.mxu1 %v6274_v62  ;;  %v5410_v62 = vld [vmem:[%s6079_s30 + $0x630] ss:$8 sps:$4 sm:$0xff]  }
 0x156   : > { %3786 = vmatpush1.bf16.msra.mxu0 %v5398_v48  ;;  %4673 = vmatprep.subr.bf16.mxu1 %v6279_v0  ;;  %v5421_v0 = vld [vmem:[%s6079_s30 + $0x644] ss:$8 sps:$4 sm:$0xff]  }
 0x157   : > { %3787 = vmatprep.subr.bf16.mxu0 %v5409_v50 }
 0x158   : > { %3374 = vmatmul.mubr.bf16.gmra.mrb[4].mxu1 %v5405_v52 }
 0x159   : > { %3713 = vmatmul.mubr.bf16.gmra.mrb[4].mxu0 %v5406_v51  ;;  %4689 = vmatpush1.bf16.msra.mxu1 %v6285_v4  ;;  %v5419_v4 = vld [vmem:[%s6079_s30 + $0x640] ss:$8 sps:$4 sm:$0xff]  }
 0x15a   : > { %3788 = vmatpush1.bf16.msra.mxu0 %v5407_v53  ;;  %4674 = vmatprep.subr.bf16.mxu1 %v6291_v6  ;;  %v5424_v6 = vld [vmem:[%s6079_s30 + $0x654] ss:$8 sps:$4 sm:$0xff]  }
 0x15b   : > { %3789 = vmatprep.subr.bf16.mxu0 %v5412_v56  ;;  %3383 = vmatprep.mubr.bf16.mxu1 %v5413_v58 }
 0x15c   : > { %3722 = vmatprep.mubr.bf16.mxu0 %v5415_v55 }
 0x15d   : > { %4690 = vmatpush1.bf16.msra.mxu1 %v6298_v10  ;;  %v1452_v10 = vld [vmem:[%s6466_s15 + $0x58] sm:$0xff] }
 0x15e   : > { %3790 = vmatpush1.bf16.msra.mxu0 %v5410_v62  ;;  %4675 = vmatprep.subr.bf16.mxu1 %v6303_v13  ;;  %v5433_v13 = vld [vmem:[%s6079_s30 + $0x664] ss:$8 sps:$4 sm:$0xff]  }
 0x15f   : > { %3791 = vmatprep.subr.bf16.mxu0 %v5421_v0  ;;  %1514 = vperm.xlu1 %5004, %v1452_v10  }
 0x160   : > { %3384 = vmatmul.mubr.bf16.gmra.mrb[8].mxu1 %v5417_v61 }
 0x161   : > { %3723 = vmatmul.mubr.bf16.gmra.mrb[8].mxu0 %v5418_v1  ;;  %4691 = vmatpush1.bf16.msra.mxu1 %v6309_v17  ;;  %v5431_v17 = vld [vmem:[%s6079_s30 + $0x660] ss:$8 sps:$4 sm:$0xff]  }
 0x162   : > { %3792 = vmatpush1.bf16.msra.mxu0 %v5419_v4  ;;  %4676 = vmatprep.subr.bf16.mxu1 %v6315_v19  ;;  %v5436_v19 = vld [vmem:[%s6079_s30 + $0x674] ss:$8 sps:$4 sm:$0xff]   ;;  %s4670_s30 = sshll.u32 (%p5638_p9), %s5523_s21, 6 }
 0x163   : > { %3793 = vmatprep.subr.bf16.mxu0 %v5424_v6  ;;  %3393 = vmatprep.mubr.bf16.mxu1 %v5425_v3  ;;  %s4116_s8 = sadd.s32 (%p5638_p9), %s4670_s30, %s4648_s29 }
 0x164   : > { %3732 = vmatprep.mubr.bf16.mxu0 %v5427_v5  ;;  %1524 = vperm.xlu1 %5004, %v1454_v24   ;;  %s4650_s19 = sshll.u32 (%p5638_p9), %s4116_s8, 2 }
 0x165   : > { %4692 = vmatpush1.bf16.msra.mxu1 %v6322_v23  ;;  %v5439_v23 = vld [vmem:[%s6133_s11 + $0x1b0] ss:$52 sps:$4 sm:$0xff]   ;;  %s4118_s7 = scalar_lea.vmem (%p5638_p9), %s6819_s4, %s4650_s19 }
 0x166   : > { %3794 = vmatpush1.bf16.msra.mxu0 %v5422_v7  ;;  %4677 = vmatprep.subr.bf16.mxu1 %v6327_v25  ;;  %v5440_v25 = vld [vmem:[%s6133_s11 + $0x30] ss:$52 sps:$4 sm:$0xff]  }
 0x167   : > { %3795 = vmatprep.subr.bf16.mxu0 %v5433_v13 }
 0x168   : > { %3394 = vmatmul.mubr.bf16.gmra.mrb[12].mxu1 %v5429_v14  ;;  %1534 = vperm.xlu1 %5004, %v1456_v26  }
 0x169   : > { %3733 = vmatmul.mubr.bf16.gmra.mrb[12].mxu0 %v5430_v15  ;;  %4693 = vmatpush1.bf16.msra.mxu1 %v6333_v29  ;;  %v5441_v29 = vld [vmem:[%s6133_s11 + $0x21c] ss:$52 sps:$4 sm:$0xff]  }
 0x16a   : > { %3796 = vmatpush1.bf16.msra.mxu0 %v5431_v17  ;;  %4678 = vmatprep.subr.bf16.mxu1 %v6339_v31  ;;  %v1455_v31 = vld [vmem:[%s6466_s15 + $0x70] sm:$0xff] }
 0x16b   : > { %3797 = vmatprep.subr.bf16.mxu0 %v5436_v19  ;;  %3403 = vmatprep.mubr.bf16.mxu1 %v5437_v16 }
 0x16c   : > { %3815 = vmatprep.mubr.bf16.mxu0 %v5541_v12  ;;  %1529 = vperm.xlu0 %5003, %v1455_v31  }
 0x16d   : > { %4694 = vmatpush1.bf16.msra.mxu1 %v6346_v35  ;;  %v5443_v35 = vld [vmem:[%s6133_s11 + $0x218] ss:$52 sps:$4 sm:$0xff]   ;;  %1464 = vperm.xlu1 %5004, %v1442_v32  }
 0x16e   : > { %3798 = vmatpush1.bf16.msra.mxu0 %v5434_v20  ;;  %4679 = vmatprep.subr.bf16.mxu1 %v6351_v37  ;;  %v1441_v37 = vld [vmem:[%s6466_s15] sm:$0xff] }
 0x170   : > { %3404 = vmatmul.mubr.bf16.gmra.mrb[16].mxu1 %v5439_v23  ;;  %1459 = vperm.xlu0 %5003, %v1441_v37  }
 0x171   : > { %3816 = vmatmul.mubr.bf16.vlgmr.msra.gmra.mrb[0].mxu0 %v5440_v25  ;;  %4695 = vmatpush1.bf16.msra.mxu1 %v6357_v41  ;;  %v1443_v41 = vld [vmem:[%s6466_s15 + $0x10] sm:$0xff] }
 0x172   : > { %3413 = vmatprep.mubr.bf16.mxu1 %v5441_v29  ;;  %4680 = vmatprep.subr.bf16.mxu1 %v6363_v43  ;;  %v1444_v43 = vld [vmem:[%s6466_s15 + $0x18] sm:$0xff] }
 0x173   : > { %3825 = vmatprep.mubr.bf16.mxu0 %v5541_v12  ;;  %1474 = vperm.xlu1 %5004, %v1444_v43  }
 0x174   : > { %1469 = vperm.xlu0 %5003, %v1443_v41  }
 0x175   : > { %4696 = vmatpush1.bf16.msra.mxu1 %v6370_v47  ;;  %v5447_v47 = vld [vmem:[%s6133_s11 + $0x280] ss:$52 sps:$4 sm:$0xff]  }
 0x176   : > { %4681 = vmatprep.subr.bf16.mxu1 %v6375_v49  ;;  %v5448_v49 = vld [vmem:[%s6133_s11 + $0x100] ss:$52 sps:$4 sm:$0xff]  }
 0x177   : > { %1484 = vperm.xlu1 %5004, %v1446_v38  }
 0x178   : > { %3414 = vmatmul.mubr.bf16.gmra.mrb[20].mxu1 %v5443_v35  ;;  %1479 = vperm.xlu0 %5003, %v1445_v34  }
 0x179   : > { %3826 = vmatmul.mubr.bf16.gmra.mrb[4].mxu0 %v5444_v28  ;;  %4697 = vmatpush1.bf16.msra.mxu1 %v6381_v54  ;;  %v1447_v54 = vld [vmem:[%s6466_s15 + $0x30] sm:$0xff] }
 0x17a   : > { %3423 = vmatprep.mubr.bf16.mxu1 %v5445_v33  ;;  %4682 = vmatprep.subr.bf16.mxu1 %v6387_v57  ;;  %v1448_v57 = vld [vmem:[%s6466_s15 + $0x38] sm:$0xff] }
 0x17b   : > { %3835 = vmatprep.mubr.bf16.mxu0 %v5541_v12  ;;  %1494 = vperm.xlu1 %5004, %v1448_v57  }
 0x17c   : > { %1489 = vperm.xlu0 %5003, %v1447_v54  }
 0x17d   : > { %4698 = vmatpush1.bf16.msra.mxu1 %v6393_v63  ;;  %v5451_v63 = vld [vmem:[%s6133_s11 + $0x2e8] ss:$52 sps:$4 sm:$0xff]  }
 0x17e   : > { %4683 = vmatprep.subr.bf16.mxu1 %v6399_v2  ;;  %v5452_v2 = vld [vmem:[%s6133_s11 + $0x168] ss:$52 sps:$4 sm:$0xff]  }
 0x180   : > { %3424 = vmatmul.mubr.bf16.gmra.mrb[24].mxu1 %v5447_v47 }
 0x181   : > { %3836 = vmatmul.mubr.bf16.gmra.mrb[8].mxu0 %v5448_v49  ;;  %4699 = vmatpush1.bf16.msra.mxu1 %v6405_v8  ;;  %v5453_v8 = vld [vmem:[%s6133_s11 + $0x1c8] ss:$52 sps:$4 sm:$0xff]  }
 0x182   : > { %3433 = vmatprep.mubr.bf16.mxu1 %v5449_v39  ;;  %4684 = vmatprep.subr.bf16.mxu1 %v6411_v11  ;;  %v5456_v11 = vld [vmem:[%s6133_s11 + $0x1d0] ss:$52 sps:$4 sm:$0xff]   ;;  %v6626_v39 = vstv %s3896_s16 }
 0x183   : > { %3845 = vmatprep.mubr.bf16.mxu0 %v5541_v12 }
 0x185   : > { %4700 = vmatpush1.bf16.msra.mxu1 %v6417_v18  ;;  %v5457_v18 = vld [vmem:[%s6133_s11 + $0x234] ss:$52 sps:$4 sm:$0xff]  }
 0x186   : > { %4685 = vmatprep.subr.bf16.mxu1 %v6423_v21  ;;  %v5459_v21 = vld [vmem:[%s6133_s11 + $0x230] ss:$52 sps:$4 sm:$0xff]  }
 0x188   : > { %3434 = vmatmul.mubr.bf16.gmra.mrb[28].mxu1 %v5451_v63 }
 0x189   : > { %3846 = vmatmul.mubr.bf16.gmra.mrb[12].mxu0 %v5452_v2  ;;  %4701 = vmatpush1.bf16.msra.mxu1 %v6429_v27  ;;  %v5460_v27 = vld [vmem:[%s6133_s11 + $0x238] ss:$52 sps:$4 sm:$0xff]  }
 0x18a   : > { %3742 = vmatprep.mubr.bf16.mxu1 %v5455_v40  ;;  %4686 = vmatprep.subr.bf16.mxu1 %v6435_v30  ;;  %v5461_v30 = vld [vmem:[%s6133_s11 + $0x29c] ss:$52 sps:$4 sm:$0xff]  }
 0x18b   : > { %3855 = vmatprep.mubr.bf16.mxu0 %v5541_v12 }
 0x18d   : > { %4702 = vmatpush1.bf16.msra.mxu1 %v6442_v36  ;;  %v5467_v36 = vld [vmem:[%s6133_s11 + $0x300] ss:$52 sps:$4 sm:$0xff]  }
 0x190   : > { %3743 = vmatmul.mubr.bf16.vlgmr.msra.gmra.mrb[32].mxu1 %v5453_v8 }
 0x191   : > { %3856 = vmatmul.mubr.bf16.gmra.mrb[32].mxu0 %v5456_v11  ;;  %3752 = vmatprep.mubr.bf16.mxu1 %v5457_v18 }
 0x192   : > { %3865 = vmatprep.mubr.bf16.mxu0 %v5541_v12 }
 0x198   : > { %3753 = vmatmul.mubr.bf16.gmra.mrb[36].mxu1 %v5459_v21 }
 0x199   : > { %3866 = vmatmul.mubr.bf16.gmra.mrb[36].mxu0 %v5460_v27  ;;  %3762 = vmatprep.mubr.bf16.mxu1 %v5461_v30 }
 0x19a   : > { %3875 = vmatprep.mubr.bf16.mxu0 %v5541_v12 }
 0x1a0   : > { %3763 = vmatmul.mubr.bf16.gmra.mrb[40].mxu1 %v5463_v42 }
 0x1a1   : > { %3876 = vmatmul.mubr.bf16.gmra.mrb[40].mxu0 %v5464_v44  ;;  %3772 = vmatprep.mubr.bf16.mxu1 %v5465_v45 }
 0x1a2   : > { %3885 = vmatprep.mubr.bf16.mxu0 %v5541_v12 }
 0x1a8   : > { %3773 = vmatmul.mubr.bf16.gmra.mrb[44].mxu1 %v5467_v36 }
 0x1a9   : > { %3886 = vmatmul.mubr.bf16.gmra.mrb[44].mxu0 %v5468_v46 }
 0x1bb   : > { %v1500_v7 = vpop.permute.xlu0 %1499 }
 0x1bc   : > { %v6594_v10 = vpop.permute.xlu1 %1509 }
 0x1c3   : > { %v1505_v14 = vpop.permute.xlu0 %1504 }
 0x1cb   : > { %v6602_v20 = vpop.permute.xlu0 %1519 }
 0x1de   : > { %v6600_v16 = vpop.permute.xlu1 %1514 }
 0x1e3   : > { %v6608_v23 = vpop.permute.xlu1 %1524 }
 0x1e7   : > { %v6616_v26 = vpop.permute.xlu1 %1534 }
 0x1eb   : > { %v6614_v31 = vpop.permute.xlu0 %1529 }
 0x1ec   : > { %v1465_v41 = vpop.permute.xlu1 %1464 }
 0x1ef   : > { %v1460_v32 = vpop.permute.xlu0 %1459 }
 0x1f3   : > { %v1470_v47 = vpop.permute.xlu0 %1469 }
 0x204   : > { %v6562_v48 = vpop.f32.mrb[16].mxu0 }
 0x205   : > { %v6564_v50 = vpop.f32.mrb[17].mxu0 }
 0x206   : > { %v6566_v52 = vpop.f32.mrb[18].mxu0 }
 0x207   : > { %v6568_v51 = vpop.f32.mrb[19].mxu0 }
 0x20c   : > { %v6570_v53 = vpop.f32.mrb[20].mxu0 }
 0x20d   : > { %v6572_v56 = vpop.f32.mrb[21].mxu0 }
 0x20e   : > { %v6574_v58 = vpop.f32.mrb[22].mxu0 }
 0x20f   : > { %v6576_v55 = vpop.f32.mrb[23].mxu0 }
 0x214   : > { %v6578_v12 = vpop.f32.mrb[24].mxu0 }
 0x215   : > { %v6580_v62 = vpop.f32.mrb[25].mxu0 }
 0x216   : > { %v6582_v59 = vpop.f32.mrb[26].mxu0 }
 0x217   : > { %v6584_v60 = vpop.f32.mrb[27].mxu0 }
 0x21c   : > { %v6586_v0 = vpop.f32.mrb[28].mxu0 }
 0x21d   : > { %v6588_v61 = vpop.f32.mrb[29].mxu0 }
 0x21e   : > { %v6590_v1 = vpop.f32.mrb[30].mxu0 }
 0x21f   : > { %v6592_v4 = vpop.f32.mrb[31].mxu0 }
 0x223   : > { %v3365_v6 = vpop.f32.mrb[0].mxu1 }
 0x224   : > { %v3367_v3 = vpop.f32.mrb[1].mxu1  ;;  %v4703_v43 = vadd.f32 %v3365_v6, %v1460_v32 }
 0x225   : > { %v3369_v5 = vpop.f32.mrb[2].mxu1  ;;  %v4705_v49 = vadd.f32 %v3367_v3, %v1460_v32 }
 0x226   : > { %v3371_v9 = vpop.f32.mrb[3].mxu1  ;;  %v4707_v54 = vadd.f32 %v3369_v5, %v1465_v41 }
 0x227   : > { %v4709_v8 = vadd.f32 %v3371_v9, %v1465_v41 }
 0x22b   : > { %v3375_v13 = vpop.f32.mrb[4].mxu1 }
 0x22c   : > { %v3377_v15 = vpop.f32.mrb[5].mxu1  ;;  %v4711_v11 = vadd.f32 %v3375_v13, %v1470_v47  ;;  %v1475_v13 = vpop.permute.xlu1 %1474 }
 0x22d   : > { %v6596_v17 = vpop.f32.mrb[6].mxu1 }
 0x22e   : > { %v6598_v19 = vpop.f32.mrb[7].mxu1 }
 0x233   : > { %v6604_v22 = vpop.f32.mrb[8].mxu1 }
 0x234   : > { %v6606_v24 = vpop.f32.mrb[9].mxu1 }
 0x235   : > { %v6610_v25 = vpop.f32.mrb[10].mxu1 }
 0x236   : > { %v6612_v29 = vpop.f32.mrb[11].mxu1 }
 0x23b   : > { %v6618_v35 = vpop.f32.mrb[12].mxu1 }
 0x23c   : > { %v6620_v28 = vpop.f32.mrb[13].mxu1 }
 0x23d   : > { %v6622_v37 = vpop.f32.mrb[14].mxu1 }
 0x23e   : > { %v6624_v33 = vpop.f32.mrb[15].mxu1 }
 0x243   : > { %v3405_v34 = vpop.f32.mrb[16].mxu1 }
 0x244   : > { %v3817_v38 = vpop.f32.mrb[0].mxu0  ;;  %v4735_v57 = vadd.f32 %v3405_v34, %v1500_v7  ;;  %v3407_v2 = vpop.f32.mrb[17].mxu1 }
 0x245   : > { %v4704_v63 = vadd.f32 %v4703_v43, %v3817_v38  ;;  %v3819_v40 = vpop.f32.mrb[1].mxu0  ;;  %v4739_v18 = vadd.f32 %v3407_v2, %v1500_v7  ;;  %v3409_v27 = vpop.f32.mrb[18].mxu1  ;;  %v4713_v2 = vadd.f32 %v3377_v15, %v1470_v47 }
 0x246   : > { %v4706_v21 = vadd.f32 %v4705_v49, %v3819_v40  ;;  %v3821_v30 = vpop.f32.mrb[2].mxu0  ;;  %v4743_v44 = vadd.f32 %v3409_v27, %v1505_v14  ;;  %v3411_v36 = vpop.f32.mrb[19].mxu1  ;;  %v6633_v9 = vadd.f32 %v4735_v57, %v6562_v48 }
 0x247   : > { %vm3897_vm0 = vcmp.gt.f32.partialorder %v4704_v63, 0.0  ;;  %v3930_v42 = vmul.f32 %v4704_v63, %v6626_v39  ;;  %v4708_v45 = vadd.f32 %v4707_v54, %v3821_v30  ;;  %v3823_v46 = vpop.f32.mrb[3].mxu0  ;;  %v4747_v3 = vadd.f32 %v3411_v36, %v1505_v14  ;;  %v1480_v34 = vpop.permute.xlu0 %1479 }
 0x248   : > { %vm3898_vm1 = vcmp.gt.f32.partialorder %v4706_v21, 0.0  ;;  %v3931_v6 = vmul.f32 %v4706_v21, %v6626_v39  ;;  %v4710_v5 = vadd.f32 %v4709_v8, %v3823_v46  ;;  %v6637_v49 = vadd.f32 %v4739_v18, %v6564_v50 }
 0x249   : > { %v3962_v32 = vsel %vm3897_vm0, %v4704_v63, %v3930_v42  ;;  %vm3899_vm2 = vcmp.gt.f32.partialorder %v4708_v45, 0.0  ;;  %v3932_v7 = vmul.f32 %v4708_v45, %v6626_v39  ;;  %v6640_v14 = vadd.f32 %v4743_v44, %v6566_v52 }
 0x24a   : > { %v3963_v41 = vsel %vm3898_vm1, %v4706_v21, %v3931_v6  ;;  %vm3900_vm3 = vcmp.gt.f32.partialorder %v4710_v5, 0.0  ;;  %v3933_v43 = vmul.f32 %v4710_v5, %v6626_v39  ;;  %v6643_v63 = vadd.f32 %v4747_v3, %v6568_v51 }
 0x24b   : > { %v4654_v38 = vpack.c.bf16 %v3963_v41, %v3962_v32  ;;  %v3964_v54 = vsel %vm3899_vm2, %v4708_v45, %v3932_v7  ;;  %v3415_v57 = vpop.f32.mrb[20].mxu1  ;;  %v4715_v8 = vadd.f32 %v6596_v17, %v1475_v13  ;;  %v4717_v51 = vadd.f32 %v6598_v19, %v1475_v13  ;;  %v1485_v32 = vpop.permute.xlu1 %1484 }
 0x24c   : > { %v3965_v48 = vsel %vm3900_vm3, %v4710_v5, %v3933_v43  ;;  %v3827_v40 = vpop.f32.mrb[4].mxu0  ;;  %v4751_v18 = vadd.f32 %v3415_v57, %v6594_v10  ;;  %v3417_v52 = vpop.f32.mrb[21].mxu1  ;;  %v4719_v15 = vadd.f32 %v6604_v22, %v1480_v34 }
 0x24d   : > { %4090 = vst [vmem:[%s6646_s17] sm:$0xff] %v4654_v38  ;;  %v4655_v50 = vpack.c.bf16 %v3965_v48, %v3964_v54  ;;  %v4712_v21 = vadd.f32 %v4711_v11, %v3827_v40  ;;  %v3829_v27 = vpop.f32.mrb[5].mxu0  ;;  %v4755_v47 = vadd.f32 %v3417_v52, %v6594_v10  ;;  %v3419_v42 = vpop.f32.mrb[22].mxu1 }
 0x24e   : > { %v4714_v30 = vadd.f32 %v4713_v2, %v3829_v27  ;;  %v3831_v17 = vpop.f32.mrb[6].mxu0  ;;  %v4759_v45 = vadd.f32 %v3419_v42, %v6600_v16  ;;  %v3421_v46 = vpop.f32.mrb[23].mxu1  ;;  %v6660_v5 = vadd.f32 %v4751_v18, %v6570_v53  ;;  %v4721_v53 = vadd.f32 %v6606_v24, %v1480_v34 }
 0x24f   : > { %4091 = vst [vmem:[%s6646_s17 + $0x8] sm:$0xff] %v4655_v50  ;;  %vm3901_vm4 = vcmp.gt.f32.partialorder %v4712_v21, 0.0  ;;  %v3934_v44 = vmul.f32 %v4712_v21, %v6626_v39  ;;  %v4716_v36 = vadd.f32 %v4715_v8, %v3831_v17  ;;  %v3833_v11 = vpop.f32.mrb[7].mxu0  ;;  %v4763_v19 = vadd.f32 %v3421_v46, %v6600_v16  ;;  %v1490_v43 = vpop.permute.xlu0 %1489 }
 0x250   : > { %vm3902_vm5 = vcmp.gt.f32.partialorder %v4714_v30, 0.0  ;;  %v3935_v6 = vmul.f32 %v4714_v30, %v6626_v39  ;;  %v4718_v22 = vadd.f32 %v4717_v51, %v3833_v11  ;;  %v6664_v41 = vadd.f32 %v4755_v47, %v6572_v56 }
 0x251   : > { %v3966_v3 = vsel %vm3901_vm4, %v4712_v21, %v3934_v44  ;;  %vm3903_vm6 = vcmp.gt.f32.partialorder %v4716_v36, 0.0  ;;  %v3936_v10 = vmul.f32 %v4716_v36, %v6626_v39  ;;  %v6667_v54 = vadd.f32 %v4759_v45, %v6574_v58 }
 0x252   : > { %v3967_v7 = vsel %vm3902_vm5, %v4714_v30, %v3935_v6  ;;  %vm3904_vm7 = vcmp.gt.f32.partialorder %v4718_v22, 0.0  ;;  %v3937_v13 = vmul.f32 %v4718_v22, %v6626_v39  ;;  %v6670_v2 = vadd.f32 %v4763_v19, %v6576_v55 }
 0x253   : > { %v4656_v38 = vpack.c.bf16 %v3967_v7, %v3966_v3  ;;  %v3968_v16 = vsel %vm3903_vm6, %v4716_v36, %v3936_v10  ;;  %v3425_v57 = vpop.f32.mrb[24].mxu1  ;;  %v4723_v8 = vadd.f32 %v6610_v25, %v1485_v32  ;;  %v4725_v58 = vadd.f32 %v6612_v29, %v1485_v32  ;;  %v1495_v36 = vpop.permute.xlu1 %1494 }
 0x254   : > { %v3969_v48 = vsel %vm3904_vm7, %v4718_v22, %v3937_v13  ;;  %v3837_v40 = vpop.f32.mrb[8].mxu0  ;;  %v4767_v50 = vadd.f32 %v3425_v57, %v6602_v20  ;;  %v3427_v21 = vpop.f32.mrb[25].mxu1  ;;  %v4727_v55 = vadd.f32 %v6618_v35, %v1490_v43  ;;  %v4729_v10 = vadd.f32 %v6620_v28, %v1490_v43 }
 0x255   : > { %4092 = vst [vmem:[%s6646_s17 + $0x10] sm:$0xff] %v4656_v38  ;;  %v4657_v56 = vpack.c.bf16 %v3969_v48, %v3968_v16  ;;  %v4720_v18 = vadd.f32 %v4719_v15, %v3837_v40  ;;  %v3839_v52 = vpop.f32.mrb[9].mxu0  ;;  %v4771_v27 = vadd.f32 %v3427_v21, %v6602_v20  ;;  %v3429_v34 = vpop.f32.mrb[26].mxu1  ;;  %v4731_v13 = vadd.f32 %v6622_v37, %v1495_v36 }
 0x256   : > { %v4722_v24 = vadd.f32 %v4721_v53, %v3839_v52  ;;  %v3841_v51 = vpop.f32.mrb[10].mxu0  ;;  %v4775_v47 = vadd.f32 %v3429_v34, %v6608_v23  ;;  %v3431_v42 = vpop.f32.mrb[27].mxu1  ;;  %v6686_v45 = vadd.f32 %v4767_v50, %v6578_v12 }
 0x257   : > { %4093 = vst [vmem:[%s6646_s17 + $0x18] sm:$0xff] %v4657_v56  ;;  %vm3905_vm8 = vcmp.gt.f32.partialorder %v4720_v18, 0.0  ;;  %v3938_v25 = vmul.f32 %v4720_v18, %v6626_v39  ;;  %v4724_v30 = vadd.f32 %v4723_v8, %v3841_v51  ;;  %v3843_v15 = vpop.f32.mrb[11].mxu0  ;;  %v4779_v29 = vadd.f32 %v3431_v42, %v6608_v23 }
 0x258   : > { %vm3906_vm9 = vcmp.gt.f32.partialorder %v4722_v24, 0.0  ;;  %v3939_v17 = vmul.f32 %v4722_v24, %v6626_v39  ;;  %v4726_v35 = vadd.f32 %v4725_v58, %v3843_v15  ;;  %v6690_v6 = vadd.f32 %v4771_v27, %v6580_v62 }
 0x259   : > { %v3970_v44 = vsel %vm3905_vm8, %v4720_v18, %v3938_v25  ;;  %vm3907_vm10 = vcmp.gt.f32.partialorder %v4724_v30, 0.0  ;;  %v3940_v20 = vmul.f32 %v4724_v30, %v6626_v39  ;;  %v6693_v23 = vadd.f32 %v4775_v47, %v6582_v59 }
 0x25a   : > { %v3971_v46 = vsel %vm3906_vm9, %v4722_v24, %v3939_v17  ;;  %vm3908_vm11 = vcmp.gt.f32.partialorder %v4726_v35, 0.0  ;;  %v3941_v11 = vmul.f32 %v4726_v35, %v6626_v39  ;;  %v6696_v3 = vadd.f32 %v4779_v29, %v6584_v60 }
 0x25b   : > { %v4658_v19 = vpack.c.bf16 %v3971_v46, %v3970_v44  ;;  %v3972_v22 = vsel %vm3907_vm10, %v4724_v30, %v3940_v20  ;;  %v3435_v32 = vpop.f32.mrb[28].mxu1  ;;  %v4733_v59 = vadd.f32 %v6624_v33, %v1495_v36 }
 0x25c   : > { %v3973_v12 = vsel %vm3908_vm11, %v4726_v35, %v3941_v11  ;;  %v3847_v7 = vpop.f32.mrb[12].mxu0  ;;  %v4783_v62 = vadd.f32 %v3435_v32, %v6614_v31  ;;  %v3437_v53 = vpop.f32.mrb[29].mxu1 }
 0x25d   : > { %4094 = vst [vmem:[%s6646_s17 + $0x20] sm:$0xff] %v4658_v19  ;;  %v4659_v38 = vpack.c.bf16 %v3973_v12, %v3972_v22  ;;  %v4728_v16 = vadd.f32 %v4727_v55, %v3847_v7  ;;  %v3849_v48 = vpop.f32.mrb[13].mxu0  ;;  %v4787_v60 = vadd.f32 %v3437_v53, %v6614_v31  ;;  %v3439_v40 = vpop.f32.mrb[30].mxu1 }
 0x25e   : > { %v4730_v57 = vadd.f32 %v4729_v10, %v3849_v48  ;;  %v3851_v28 = vpop.f32.mrb[14].mxu0  ;;  %v4791_v37 = vadd.f32 %v3439_v40, %v6616_v26  ;;  %v3441_v56 = vpop.f32.mrb[31].mxu1  ;;  %v6711_v58 = vadd.f32 %v4783_v62, %v6586_v0 }
 0x25f   : > { %4095 = vst [vmem:[%s6646_s17 + $0x28] sm:$0xff] %v4659_v38  ;;  %vm3909_vm12 = vcmp.gt.f32.partialorder %v4728_v16, 0.0  ;;  %v3942_v43 = vmul.f32 %v4728_v16, %v6626_v39  ;;  %v4732_v8 = vadd.f32 %v4731_v13, %v3851_v28  ;;  %v3853_v50 = vpop.f32.mrb[15].mxu0  ;;  %v4795_v21 = vadd.f32 %v3441_v56, %v6616_v26 }
 0x260   : > { %vm3910_vm13 = vcmp.gt.f32.partialorder %v4730_v57, 0.0  ;;  %v3943_v18 = vmul.f32 %v4730_v57, %v6626_v39  ;;  %v4734_v33 = vadd.f32 %v4733_v59, %v3853_v50  ;;  %v6715_v24 = vadd.f32 %v4787_v60, %v6588_v61 }
 0x261   : > { %v3974_v31 = vsel %vm3909_vm12, %v4728_v16, %v3942_v43  ;;  %vm3911_vm14 = vcmp.gt.f32.partialorder %v4732_v8, 0.0  ;;  %v3944_v52 = vmul.f32 %v4732_v8, %v6626_v39  ;;  %v6718_v26 = vadd.f32 %v4791_v37, %v6590_v1 }
 0x262   : > { %v3975_v55 = vsel %vm3910_vm13, %v4730_v57, %v3943_v18  ;;  %vm3912_vm15 = vcmp.gt.f32.partialorder %v4734_v33, 0.0  ;;  %v3945_v27 = vmul.f32 %v4734_v33, %v6626_v39  ;;  %v6721_v25 = vadd.f32 %v4795_v21, %v6592_v4 }
 0x263   : > { %v4660_v34 = vpack.c.bf16 %v3975_v55, %v3974_v31  ;;  %v3976_v51 = vsel %vm3911_vm14, %v4732_v8, %v3944_v52  ;;  %v3744_v30 = vpop.f32.mrb[32].mxu1 }
 0x264   : > { %v3977_v47 = vsel %vm3912_vm15, %v4734_v33, %v3945_v27  ;;  %v3857_v0 = vpop.f32.mrb[32].mxu0  ;;  %v4737_v15 = vadd.f32 %v6633_v9, %v3744_v30  ;;  %v3746_v17 = vpop.f32.mrb[33].mxu1 }
 0x265   : > { %4096 = vst [vmem:[%s6646_s17 + $0x30] sm:$0xff] %v4660_v34  ;;  %v4661_v42 = vpack.c.bf16 %v3977_v47, %v3976_v51  ;;  %v3859_v29 = vpop.f32.mrb[33].mxu0  ;;  %v4741_v61 = vadd.f32 %v6637_v49, %v3746_v17  ;;  %v3748_v35 = vpop.f32.mrb[34].mxu1 }
 0x266   : > { %v3861_v44 = vpop.f32.mrb[34].mxu0  ;;  %v4738_v20 = vadd.f32 %v4737_v15, %v3857_v0  ;;  %v4745_v1 = vadd.f32 %v6640_v14, %v3748_v35  ;;  %v3750_v36 = vpop.f32.mrb[35].mxu1 }
 0x267   : > { %4097 = vst [vmem:[%s6646_s17 + $0x38] sm:$0xff] %v4661_v42  ;;  %v3863_v4 = vpop.f32.mrb[35].mxu0  ;;  %v4742_v46 = vadd.f32 %v4741_v61, %v3859_v29  ;;  %v4749_v11 = vadd.f32 %v6643_v63, %v3750_v36 }
 0x268   : > { %vm3913_vm0 = vcmp.gt.f32.partialorder %v4738_v20, 0.0  ;;  %v3946_v19 = vmul.f32 %v4738_v20, %v6626_v39  ;;  %v4746_v22 = vadd.f32 %v4745_v1, %v3861_v44 }
 0x269   : > { %vm3914_vm1 = vcmp.gt.f32.partialorder %v4742_v46, 0.0  ;;  %v3947_v9 = vmul.f32 %v4742_v46, %v6626_v39  ;;  %v4750_v10 = vadd.f32 %v4749_v11, %v3863_v4 }
 0x26a   : > { %v3978_v49 = vsel %vm3913_vm0, %v4738_v20, %v3946_v19  ;;  %vm3915_vm2 = vcmp.gt.f32.partialorder %v4746_v22, 0.0  ;;  %v3948_v12 = vmul.f32 %v4746_v22, %v6626_v39 }
 0x26b   : > { %v3979_v32 = vsel %vm3914_vm1, %v4742_v46, %v3947_v9  ;;  %vm3916_vm3 = vcmp.gt.f32.partialorder %v4750_v10, 0.0  ;;  %v3949_v14 = vmul.f32 %v4750_v10, %v6626_v39  ;;  %v3754_v7 = vpop.f32.mrb[36].mxu1 }
 0x26c   : > { %v3867_v13 = vpop.f32.mrb[36].mxu0  ;;  %v4662_v63 = vpack.c.bf16 %v3979_v32, %v3978_v49  ;;  %v3980_v38 = vsel %vm3915_vm2, %v4746_v22, %v3948_v12  ;;  %v4753_v62 = vadd.f32 %v6660_v5, %v3754_v7  ;;  %v3756_v16 = vpop.f32.mrb[37].mxu1 }
 0x26d   : > { %v3869_v53 = vpop.f32.mrb[37].mxu0  ;;  %v3981_v48 = vsel %vm3916_vm3, %v4750_v10, %v3949_v14  ;;  %v4757_v59 = vadd.f32 %v6664_v41, %v3756_v16  ;;  %v3758_v60 = vpop.f32.mrb[38].mxu1 }
 0x26e   : > { %v3871_v57 = vpop.f32.mrb[38].mxu0  ;;  %4098 = vst [vmem:[%s6646_s17 + $0x40] sm:$0xff] %v4662_v63  ;;  %v4663_v40 = vpack.c.bf16 %v3981_v48, %v3980_v38  ;;  %v4754_v28 = vadd.f32 %v4753_v62, %v3867_v13  ;;  %v4761_v43 = vadd.f32 %v6667_v54, %v3758_v60  ;;  %v3760_v37 = vpop.f32.mrb[39].mxu1 }
 0x26f   : > { %v3873_v8 = vpop.f32.mrb[39].mxu0  ;;  %v4758_v56 = vadd.f32 %v4757_v59, %v3869_v53  ;;  %v4765_v50 = vadd.f32 %v6670_v2, %v3760_v37 }
 0x270   : > { %4099 = vst [vmem:[%s6646_s17 + $0x48] sm:$0xff] %v4663_v40  ;;  %vm3917_vm4 = vcmp.gt.f32.partialorder %v4754_v28, 0.0  ;;  %v3950_v5 = vmul.f32 %v4754_v28, %v6626_v39  ;;  %v4762_v18 = vadd.f32 %v4761_v43, %v3871_v57 }
 0x271   : > { %vm3918_vm5 = vcmp.gt.f32.partialorder %v4758_v56, 0.0  ;;  %v3951_v41 = vmul.f32 %v4758_v56, %v6626_v39  ;;  %v4766_v21 = vadd.f32 %v4765_v50, %v3873_v8 }
 0x272   : > { %v3982_v33 = vsel %vm3917_vm4, %v4754_v28, %v3950_v5  ;;  %vm3919_vm6 = vcmp.gt.f32.partialorder %v4762_v18, 0.0  ;;  %v3952_v31 = vmul.f32 %v4762_v18, %v6626_v39 }
 0x273   : > { %v3983_v54 = vsel %vm3918_vm5, %v4758_v56, %v3951_v41  ;;  %vm3920_vm7 = vcmp.gt.f32.partialorder %v4766_v21, 0.0  ;;  %v3953_v52 = vmul.f32 %v4766_v21, %v6626_v39  ;;  %v3764_v55 = vpop.f32.mrb[40].mxu1  ;;  %v4180_v41 = vld [vmem:[%s6646_s17 + $0x10] sm:$0xff] (%p5638_p9) }
 0x274   : > { %v3877_v2 = vpop.f32.mrb[40].mxu0  ;;  %v4664_v27 = vpack.c.bf16 %v3983_v54, %v3982_v33  ;;  %v3984_v34 = vsel %vm3919_vm6, %v4762_v18, %v3952_v31  ;;  %v4769_v51 = vadd.f32 %v6686_v45, %v3764_v55  ;;  %v3766_v47 = vpop.f32.mrb[41].mxu1  ;;  %v4178_v18 = vld [vmem:[%s6646_s17 + $0x8] sm:$0xff] (%p5638_p9)  ;;  %v4184_v33 = vld [vmem:[%s6646_s17 + $0x20] sm:$0xff] (%p5638_p9)  ;;  %v4188_v54 = vld [vmem:[%s6646_s17 + $0x30] sm:$0xff] (%p5638_p9)  ;;  %4181 = vst [vmem:[%s4118_s7 + $0x20] sm:$0xff] (%p5638_p9), %v4180_v41 }
 0x275   : > { %v3879_v30 = vpop.f32.mrb[41].mxu0  ;;  %v3985_v0 = vsel %vm3920_vm7, %v4766_v21, %v3953_v52  ;;  %v4773_v42 = vadd.f32 %v6690_v6, %v3766_v47  ;;  %v3768_v15 = vpop.f32.mrb[42].mxu1  ;;  %v4182_v21 = vld [vmem:[%s6646_s17 + $0x18] sm:$0xff] (%p5638_p9)  ;;  %v4186_v31 = vld [vmem:[%s6646_s17 + $0x28] sm:$0xff] (%p5638_p9)  ;;  %v4192_v55 = vld [vmem:[%s6646_s17 + $0x40] sm:$0xff] (%p5638_p9)  ;;  %4179 = vst [vmem:[%s4118_s7 + $0x10] sm:$0xff] (%p5638_p9), %v4178_v18 }
 0x276   : > { %v3881_v17 = vpop.f32.mrb[42].mxu0  ;;  %4100 = vst [vmem:[%s6646_s17 + $0x50] sm:$0xff] %v4664_v27  ;;  %v4665_v29 = vpack.c.bf16 %v3985_v0, %v3984_v34  ;;  %v4770_v61 = vadd.f32 %v4769_v51, %v3877_v2  ;;  %v4777_v35 = vadd.f32 %v6693_v23, %v3768_v15  ;;  %v3770_v44 = vpop.f32.mrb[43].mxu1  ;;  %v4190_v52 = vld [vmem:[%s6646_s17 + $0x38] sm:$0xff] (%p5638_p9)  ;;  %4183 = vst [vmem:[%s4118_s7 + $0x30] sm:$0xff] (%p5638_p9), %v4182_v21 }
 0x277   : > { %v3883_v20 = vpop.f32.mrb[43].mxu0  ;;  %v4774_v1 = vadd.f32 %v4773_v42, %v3879_v30  ;;  %v4781_v36 = vadd.f32 %v6696_v3, %v3770_v44  ;;  %v4194_v2 = vld [vmem:[%s6646_s17 + $0x48] sm:$0xff] (%p5638_p9)  ;;  %4185 = vst [vmem:[%s4118_s7 + $0x40] sm:$0xff] (%p5638_p9), %v4184_v33  ;;  %4187 = vst [vmem:[%s4118_s7 + $0x50] sm:$0xff] (%p5638_p9), %v4186_v31 }
 0x278   : > { %4101 = vst [vmem:[%s6646_s17 + $0x58] sm:$0xff] %v4665_v29  ;;  %vm3921_vm8 = vcmp.gt.f32.partialorder %v4770_v61, 0.0  ;;  %v3954_v45 = vmul.f32 %v4770_v61, %v6626_v39  ;;  %v4778_v4 = vadd.f32 %v4777_v35, %v3881_v17  ;;  %4189 = vst [vmem:[%s4118_s7 + $0x60] sm:$0xff] (%p5638_p9), %v4188_v54 }
 0x279   : > { %vm3922_vm9 = vcmp.gt.f32.partialorder %v4774_v1, 0.0  ;;  %v3955_v6 = vmul.f32 %v4774_v1, %v6626_v39  ;;  %v4782_v46 = vadd.f32 %v4781_v36, %v3883_v20  ;;  %4191 = vst [vmem:[%s4118_s7 + $0x70] sm:$0xff] (%p5638_p9), %v4190_v52  ;;  %4193 = vst [vmem:[%s4118_s7 + $0x80] sm:$0xff] (%p5638_p9), %v4192_v55 }
 0x27a   : > { %v3986_v11 = vsel %vm3921_vm8, %v4770_v61, %v3954_v45  ;;  %vm3923_vm10 = vcmp.gt.f32.partialorder %v4778_v4, 0.0  ;;  %v3956_v19 = vmul.f32 %v4778_v4, %v6626_v39  ;;  %4195 = vst [vmem:[%s4118_s7 + $0x90] sm:$0xff] (%p5638_p9), %v4194_v2 }
 0x27b   : > { %v3987_v23 = vsel %vm3922_vm9, %v4774_v1, %v3955_v6  ;;  %vm3924_vm11 = vcmp.gt.f32.partialorder %v4782_v46, 0.0  ;;  %v3957_v22 = vmul.f32 %v4782_v46, %v6626_v39  ;;  %v3774_v9 = vpop.f32.mrb[44].mxu1 }
 0x27c   : > { %v3887_v3 = vpop.f32.mrb[44].mxu0  ;;  %v4666_v10 = vpack.c.bf16 %v3987_v23, %v3986_v11  ;;  %v3988_v49 = vsel %vm3923_vm10, %v4778_v4, %v3956_v19  ;;  %v4785_v12 = vadd.f32 %v6711_v58, %v3774_v9  ;;  %v3776_v32 = vpop.f32.mrb[45].mxu1 }
 0x27d   : > { %v3889_v14 = vpop.f32.mrb[45].mxu0  ;;  %v3989_v7 = vsel %vm3924_vm11, %v4782_v46, %v3957_v22  ;;  %v4789_v13 = vadd.f32 %v6715_v24, %v3776_v32  ;;  %v3778_v63 = vpop.f32.mrb[46].mxu1  ;;  %v4196_v27 = vld [vmem:[%s6646_s17 + $0x50] sm:$0xff] (%p5638_p9) }
 0x27e   : > { %v3891_v38 = vpop.f32.mrb[46].mxu0  ;;  %4102 = vst [vmem:[%s6646_s17 + $0x60] sm:$0xff] %v4666_v10  ;;  %v4667_v62 = vpack.c.bf16 %v3989_v7, %v3988_v49  ;;  %v4786_v16 = vadd.f32 %v4785_v12, %v3887_v3  ;;  %v4793_v53 = vadd.f32 %v6718_v26, %v3778_v63  ;;  %v3780_v48 = vpop.f32.mrb[47].mxu1  ;;  %4197 = vst [vmem:[%s4118_s7 + $0xa0] sm:$0xff] (%p5638_p9), %v4196_v27 }
 0x27f   : > { %v3893_v59 = vpop.f32.mrb[47].mxu0  ;;  %v4790_v60 = vadd.f32 %v4789_v13, %v3889_v14  ;;  %v4797_v57 = vadd.f32 %v6721_v25, %v3780_v48  ;;  %v4198_v34 = vld [vmem:[%s6646_s17 + $0x58] sm:$0xff] (%p5638_p9) }
 0x280   : > { %4103 = vst [vmem:[%s6646_s17 + $0x68] sm:$0xff] %v4667_v62  ;;  %vm3925_vm12 = vcmp.gt.f32.partialorder %v4786_v16, 0.0  ;;  %v3958_v58 = vmul.f32 %v4786_v16, %v6626_v39  ;;  %v4794_v40 = vadd.f32 %v4793_v53, %v3891_v38  ;;  %4199 = vst [vmem:[%s4118_s7 + $0xb0] sm:$0xff] (%p5638_p9), %v4198_v34 }
 0x281   : > { %vm3926_vm13 = vcmp.gt.f32.partialorder %v4790_v60, 0.0  ;;  %v3959_v24 = vmul.f32 %v4790_v60, %v6626_v39  ;;  %v4798_v28 = vadd.f32 %v4797_v57, %v3893_v59 }
 0x282   : > { %v3990_v43 = vsel %vm3925_vm12, %v4786_v16, %v3958_v58  ;;  %vm3927_vm14 = vcmp.gt.f32.partialorder %v4794_v40, 0.0  ;;  %v3960_v26 = vmul.f32 %v4794_v40, %v6626_v39  ;;  %4112 = sbr.rel (!%p5638_p9) target bundleno = 657 (0x291), region = 78 }
 0x283   : > { %v3991_v37 = vsel %vm3926_vm13, %v4790_v60, %v3959_v24  ;;  %vm3928_vm15 = vcmp.gt.f32.partialorder %v4798_v28, 0.0  ;;  %v3961_v8 = vmul.f32 %v4798_v28, %v6626_v39  ;;  %v4176_v39 = vld [vmem:[%s6646_s17] sm:$0xff] (%p5638_p9) }
 0x284   : > { %v4668_v25 = vpack.c.bf16 %v3991_v37, %v3990_v43  ;;  %v3992_v56 = vsel %vm3927_vm14, %v4794_v40, %v3960_v26  ;;  %4177 = vst [vmem:[%s4118_s7] sm:$0xff] (%p5638_p9), %v4176_v39 }
 0x285   : > { %v3993_v50 = vsel %vm3928_vm15, %v4798_v28, %v3961_v8  ;;  %v4200_v51 = vld [vmem:[%s6646_s17 + $0x60] sm:$0xff] (%p5638_p9) }
 0x286   : > { %4104 = vst [vmem:[%s6646_s17 + $0x70] sm:$0xff] %v4668_v25  ;;  %v4669_v5 = vpack.c.bf16 %v3993_v50, %v3992_v56  ;;  %4201 = vst [vmem:[%s4118_s7 + $0xc0] sm:$0xff] (%p5638_p9), %v4200_v51 }
 0x287   : > { %v4202_v47 = vld [vmem:[%s6646_s17 + $0x68] sm:$0xff] (%p5638_p9) }
 0x288   : > { %4105 = vst [vmem:[%s6646_s17 + $0x78] sm:$0xff] %v4669_v5  ;;  %4203 = vst [vmem:[%s4118_s7 + $0xd0] sm:$0xff] (%p5638_p9), %v4202_v47 }
 0x28d   : > { %v4204_v30 = vld [vmem:[%s6646_s17 + $0x70] sm:$0xff] }
 0x28e   : > { %4205 = vst [vmem:[%s4118_s7 + $0xe0] sm:$0xff] %v4204_v30 }
 0x28f   : > { %v4206_v0 = vld [vmem:[%s6646_s17 + $0x78] sm:$0xff] }
 0x290   : > { %4207 = vst [vmem:[%s4118_s7 + $0xf0] sm:$0xff] %v4206_v0 }
 0x291 PF: > { %s15_s25 = sadd.s32 1, %s5539_s25   ;;  %s6822_s17 = smov %s5511_s18 }
 0x292   : > { %p12_p1 = scmp.ge.s32.totalorder %s15_s25, 6   ;;  %s6823_s18 = smov %s5646_s10 }
 0x293   : > { %s6824_s19 = smov %s5519_s20  ;;  %s6825_s20 = smov %s5643_s9 }
 0x294   : > { %s6826_s21 = smov %s5531_s23  ;;  %s6827_s22 = smov %s5535_s24 }
 0x295   : > { %s6828_s23 = smov %s6831_s3  ;;  %s6829_s24 = smov %s6835_s26 }
 0x296   :  { %14 = sbr.rel (!%p12_p1) target bundleno = 7 (0x7), region = 153 }

// kernel: edsr_forward.12
= control target key start
LH: loop header
LB: loop body
LE: loop exit
PB: predicated region body
PF: predicated region fallthrough
CT: control target
= control target key end

     0   :  { %s5077_s15 = smov 0   ;;  %s5079_s16 = smov 0   ;;  %s6161_s0 = inlined_call_operand.vmem [shape: bf16[32,2304], index: 0, kind: input, shape index: {}]   ;;  %s6162_s1 = inlined_call_operand.vmem [shape: bf16[2304,512], index: 1, kind: input, shape index: {}]   ;;  %s6163_s2 = inlined_call_operand.vmem [shape: f32[32,1], index: 2, kind: input, shape index: {}]   ;;  %s6164_s3 = inlined_call_operand.<no memory space> [shape: f32[1], index: 3, kind: input, shape index: {}]   ;;  %s6165_s4 = inlined_call_operand.vmem [shape: f32[32,512], index: 4, kind: output, shape index: {}]  }
   0x1   :  { %s5081_s17 = smov 0   ;;  %s5083_s18 = smov 0  }
   0x2   :  { %s5085_s19 = smov 0  }
   0x3 LB: > { %s27_s3 = sadd.s32 1, %s5045_s18  ;;  %s4035_s20 = sadd.s32 4294967295, %s5049_s19   ;;  %s5049_s19 = sphi %s5085_s19, %s15_s19   ;;  %s5045_s18 = sphi %s5083_s18, %s6170_s18   ;;  %s5041_s17 = sphi %s5081_s17, %s6169_s17   ;;  %s5037_s16 = sphi %s5079_s16, %s6168_s16   ;;  %s5033_s15 = sphi %s5077_s15, %s6167_s15  }
   0x4   : > { %p29_p0 = scmp.ge.s32.totalorder %s27_s3, 2  ;;  %p67_p1 = scmp.ne.s32.totalorder %s5037_s16, %s5033_s15 }
   0x5   : > { %p68_p2 = scmp.eq.s32.totalorder %s5049_s19, 0  ;;  %p146_p4 = scmp.eq.s32.totalorder %s4035_s20, 1 }
   0x6   : > { %s6172_s3 = smov (%p29_p0, %s27_s3), 0  ;;  %s60_s22 = sadd.s32 1, %s5037_s16 }
   0x7   : > { %p69_p3 = por %p68_p2, %p67_p1  ;;  %s57_s21 = ssub.s32 %s5045_s18, %s6172_s3 }
   0x8   : > { %p58_p5 = scmp.eq.s32.totalorder %s57_s21, 0  ;;  %p5112_p6 = por %p146_p4, %p67_p1 }
   0x9   : > { %p4040_p7 = scmp.ge.s32.totalorder %s5049_s19, 2 }
   0xa   : > { %s5117_s24 = scalar_select %p58_p5, %s5037_s16, %s60_s22  }
   0xb   : > { %190 = sbr.rel (%p4040_p7) target bundleno = 166 (0xa6), region = 28 }
  0x12   : > { %193 = sbr.rel (!%p69_p3) target bundleno = 166 (0xa6), region = 32  ;;  %s195_s25 = sand.u32 (%p69_p3), 1, %s5037_s16  }
  0x13   : > { %s4374_s26 = sshll.u32 (%p69_p3), %s5045_s18, 3  ;;  %s4480_s27 = smul.u32 (%p69_p3), 2304, %s195_s25 }
  0x14   : > { %s5125_s30 = scalar_lea.vmem (%p69_p3), %s6162_s1, %s4374_s26 }
  0x15   : > { %v802_v0 = vld [vmem:[%s5125_s30] sm:$0xff] (%p69_p3)  ;;  %v804_v1 = vld [vmem:[%s5125_s30 + $0x10] sm:$0xff] (%p69_p3)  ;;  %s5133_s5 = scalar_lea.vmem (%p69_p3), [#allocation3], %s4480_s27 }
  0x16   : > { %v806_v2 = vld [vmem:[%s5125_s30 + $0x20] sm:$0xff] (%p69_p3)  ;;  %v808_v3 = vld [vmem:[%s5125_s30 + $0x30] sm:$0xff] (%p69_p3)  ;;  %803 = vst [vmem:[%s5133_s5] sm:$0xff] (%p69_p3), %v802_v0  ;;  %805 = vst [vmem:[%s5133_s5 + $0x8] sm:$0xff] (%p69_p3), %v804_v1 }
  0x17   : > { %v810_v4 = vld [vmem:[%s5125_s30 + $0x40] sm:$0xff] (%p69_p3)  ;;  %v812_v5 = vld [vmem:[%s5125_s30 + $0x50] sm:$0xff] (%p69_p3)  ;;  %807 = vst [vmem:[%s5133_s5 + $0x10] sm:$0xff] (%p69_p3), %v806_v2  ;;  %809 = vst [vmem:[%s5133_s5 + $0x18] sm:$0xff] (%p69_p3), %v808_v3 }
  0x18   : > { %811 = vst [vmem:[%s5133_s5 + $0x20] sm:$0xff] (%p69_p3), %v810_v4  ;;  %813 = vst [vmem:[%s5133_s5 + $0x28] sm:$0xff] (%p69_p3), %v812_v5  ;;  %v814_v6 = vld [vmem:[%s5125_s30 + $0x60] sm:$0xff] (%p69_p3)  ;;  %v816_v7 = vld [vmem:[%s5125_s30 + $0x70] sm:$0xff] (%p69_p3) }
  0x19   : > { %v818_v8 = vld [vmem:[%s5125_s30 + $0x80] sm:$0xff]  ;;  %815 = vst [vmem:[%s5133_s5 + $0x30] sm:$0xff] %v814_v6  ;;  %817 = vst [vmem:[%s5133_s5 + $0x38] sm:$0xff] %v816_v7  ;;  %v820_v9 = vld [vmem:[%s5125_s30 + $0x90] sm:$0xff] }
  0x1a   : > { %819 = vst [vmem:[%s5133_s5 + $0x40] sm:$0xff] %v818_v8  ;;  %v822_v10 = vld [vmem:[%s5125_s30 + $0xa0] sm:$0xff]  ;;  %v824_v11 = vld [vmem:[%s5125_s30 + $0xb0] sm:$0xff]  ;;  %821 = vst [vmem:[%s5133_s5 + $0x48] sm:$0xff] %v820_v9 }
  0x1b   : > { %823 = vst [vmem:[%s5133_s5 + $0x50] sm:$0xff] %v822_v10  ;;  %825 = vst [vmem:[%s5133_s5 + $0x58] sm:$0xff] %v824_v11  ;;  %v826_v12 = vld [vmem:[%s5125_s30 + $0xc0] sm:$0xff]  ;;  %v828_v13 = vld [vmem:[%s5125_s30 + $0xd0] sm:$0xff] }
  0x1c   : > { %v830_v14 = vld [vmem:[%s5125_s30 + $0xe0] sm:$0xff]  ;;  %827 = vst [vmem:[%s5133_s5 + $0x60] sm:$0xff] %v826_v12  ;;  %829 = vst [vmem:[%s5133_s5 + $0x68] sm:$0xff] %v828_v13  ;;  %v832_v15 = vld [vmem:[%s5125_s30 + $0xf0] sm:$0xff] }
  0x1d   : > { %831 = vst [vmem:[%s5133_s5 + $0x70] sm:$0xff] %v830_v14  ;;  %v834_v16 = vld [vmem:[%s5125_s30 + $0x100] sm:$0xff]  ;;  %v836_v17 = vld [vmem:[%s5125_s30 + $0x110] sm:$0xff]  ;;  %833 = vst [vmem:[%s5133_s5 + $0x78] sm:$0xff] %v832_v15 }
  0x1e   : > { %835 = vst [vmem:[%s5133_s5 + $0x80] sm:$0xff] %v834_v16  ;;  %837 = vst [vmem:[%s5133_s5 + $0x88] sm:$0xff] %v836_v17  ;;  %v838_v18 = vld [vmem:[%s5125_s30 + $0x120] sm:$0xff]  ;;  %v840_v19 = vld [vmem:[%s5125_s30 + $0x130] sm:$0xff] }
  0x1f   : > { %v842_v20 = vld [vmem:[%s5125_s30 + $0x140] sm:$0xff]  ;;  %839 = vst [vmem:[%s5133_s5 + $0x90] sm:$0xff] %v838_v18  ;;  %841 = vst [vmem:[%s5133_s5 + $0x98] sm:$0xff] %v840_v19  ;;  %v844_v21 = vld [vmem:[%s5125_s30 + $0x150] sm:$0xff] }
  0x20   : > { %843 = vst [vmem:[%s5133_s5 + $0xa0] sm:$0xff] %v842_v20  ;;  %v846_v22 = vld [vmem:[%s5125_s30 + $0x160] sm:$0xff]  ;;  %v848_v23 = vld [vmem:[%s5125_s30 + $0x170] sm:$0xff]  ;;  %845 = vst [vmem:[%s5133_s5 + $0xa8] sm:$0xff] %v844_v21 }
  0x21   : > { %847 = vst [vmem:[%s5133_s5 + $0xb0] sm:$0xff] %v846_v22  ;;  %849 = vst [vmem:[%s5133_s5 + $0xb8] sm:$0xff] %v848_v23  ;;  %v850_v24 = vld [vmem:[%s5125_s30 + $0x180] sm:$0xff]  ;;  %v852_v25 = vld [vmem:[%s5125_s30 + $0x190] sm:$0xff] }
  0x22   : > { %v854_v26 = vld [vmem:[%s5125_s30 + $0x1a0] sm:$0xff]  ;;  %851 = vst [vmem:[%s5133_s5 + $0xc0] sm:$0xff] %v850_v24  ;;  %853 = vst [vmem:[%s5133_s5 + $0xc8] sm:$0xff] %v852_v25  ;;  %v856_v27 = vld [vmem:[%s5125_s30 + $0x1b0] sm:$0xff] }
  0x23   : > { %855 = vst [vmem:[%s5133_s5 + $0xd0] sm:$0xff] %v854_v26  ;;  %v858_v28 = vld [vmem:[%s5125_s30 + $0x1c0] sm:$0xff]  ;;  %v860_v29 = vld [vmem:[%s5125_s30 + $0x1d0] sm:$0xff]  ;;  %857 = vst [vmem:[%s5133_s5 + $0xd8] sm:$0xff] %v856_v27 }
  0x24   : > { %859 = vst [vmem:[%s5133_s5 + $0xe0] sm:$0xff] %v858_v28  ;;  %861 = vst [vmem:[%s5133_s5 + $0xe8] sm:$0xff] %v860_v29  ;;  %v862_v30 = vld [vmem:[%s5125_s30 + $0x1e0] sm:$0xff]  ;;  %v864_v31 = vld [vmem:[%s5125_s30 + $0x1f0] sm:$0xff] }
  0x25   : > { %v866_v32 = vld [vmem:[%s5125_s30 + $0x200] sm:$0xff]  ;;  %863 = vst [vmem:[%s5133_s5 + $0xf0] sm:$0xff] %v862_v30  ;;  %865 = vst [vmem:[%s5133_s5 + $0xf8] sm:$0xff] %v864_v31  ;;  %v868_v33 = vld [vmem:[%s5125_s30 + $0x210] sm:$0xff] }
  0x26   : > { %867 = vst [vmem:[%s5133_s5 + $0x100] sm:$0xff] %v866_v32  ;;  %v870_v34 = vld [vmem:[%s5125_s30 + $0x220] sm:$0xff]  ;;  %v872_v35 = vld [vmem:[%s5125_s30 + $0x230] sm:$0xff]  ;;  %869 = vst [vmem:[%s5133_s5 + $0x108] sm:$0xff] %v868_v33 }
  0x27   : > { %871 = vst [vmem:[%s5133_s5 + $0x110] sm:$0xff] %v870_v34  ;;  %873 = vst [vmem:[%s5133_s5 + $0x118] sm:$0xff] %v872_v35  ;;  %v874_v36 = vld [vmem:[%s5125_s30 + $0x240] sm:$0xff]  ;;  %v876_v37 = vld [vmem:[%s5125_s30 + $0x250] sm:$0xff] }
  0x28   : > { %v878_v38 = vld [vmem:[%s5125_s30 + $0x260] sm:$0xff]  ;;  %875 = vst [vmem:[%s5133_s5 + $0x120] sm:$0xff] %v874_v36  ;;  %877 = vst [vmem:[%s5133_s5 + $0x128] sm:$0xff] %v876_v37  ;;  %v880_v39 = vld [vmem:[%s5125_s30 + $0x270] sm:$0xff] }
  0x29   : > { %879 = vst [vmem:[%s5133_s5 + $0x130] sm:$0xff] %v878_v38  ;;  %v882_v40 = vld [vmem:[%s5125_s30 + $0x280] sm:$0xff]  ;;  %v884_v41 = vld [vmem:[%s5125_s30 + $0x290] sm:$0xff]  ;;  %881 = vst [vmem:[%s5133_s5 + $0x138] sm:$0xff] %v880_v39 }
  0x2a   : > { %883 = vst [vmem:[%s5133_s5 + $0x140] sm:$0xff] %v882_v40  ;;  %885 = vst [vmem:[%s5133_s5 + $0x148] sm:$0xff] %v884_v41  ;;  %v886_v42 = vld [vmem:[%s5125_s30 + $0x2a0] sm:$0xff]  ;;  %v888_v43 = vld [vmem:[%s5125_s30 + $0x2b0] sm:$0xff] }
  0x2b   : > { %v890_v44 = vld [vmem:[%s5125_s30 + $0x2c0] sm:$0xff]  ;;  %887 = vst [vmem:[%s5133_s5 + $0x150] sm:$0xff] %v886_v42  ;;  %889 = vst [vmem:[%s5133_s5 + $0x158] sm:$0xff] %v888_v43  ;;  %v892_v45 = vld [vmem:[%s5125_s30 + $0x2d0] sm:$0xff] }
  0x2c   : > { %891 = vst [vmem:[%s5133_s5 + $0x160] sm:$0xff] %v890_v44  ;;  %v894_v46 = vld [vmem:[%s5125_s30 + $0x2e0] sm:$0xff]  ;;  %v896_v47 = vld [vmem:[%s5125_s30 + $0x2f0] sm:$0xff]  ;;  %893 = vst [vmem:[%s5133_s5 + $0x168] sm:$0xff] %v892_v45 }
  0x2d   : > { %895 = vst [vmem:[%s5133_s5 + $0x170] sm:$0xff] %v894_v46  ;;  %897 = vst [vmem:[%s5133_s5 + $0x178] sm:$0xff] %v896_v47  ;;  %v898_v48 = vld [vmem:[%s5125_s30 + $0x300] sm:$0xff]  ;;  %v900_v49 = vld [vmem:[%s5125_s30 + $0x310] sm:$0xff] }
  0x2e   : > { %v902_v50 = vld [vmem:[%s5125_s30 + $0x320] sm:$0xff]  ;;  %899 = vst [vmem:[%s5133_s5 + $0x180] sm:$0xff] %v898_v48  ;;  %901 = vst [vmem:[%s5133_s5 + $0x188] sm:$0xff] %v900_v49  ;;  %v904_v51 = vld [vmem:[%s5125_s30 + $0x330] sm:$0xff] }
  0x2f   : > { %903 = vst [vmem:[%s5133_s5 + $0x190] sm:$0xff] %v902_v50  ;;  %v906_v52 = vld [vmem:[%s5125_s30 + $0x340] sm:$0xff]  ;;  %v908_v53 = vld [vmem:[%s5125_s30 + $0x350] sm:$0xff]  ;;  %905 = vst [vmem:[%s5133_s5 + $0x198] sm:$0xff] %v904_v51 }
  0x30   : > { %907 = vst [vmem:[%s5133_s5 + $0x1a0] sm:$0xff] %v906_v52  ;;  %909 = vst [vmem:[%s5133_s5 + $0x1a8] sm:$0xff] %v908_v53  ;;  %v910_v54 = vld [vmem:[%s5125_s30 + $0x360] sm:$0xff]  ;;  %v912_v55 = vld [vmem:[%s5125_s30 + $0x370] sm:$0xff] }
  0x31   : > { %v914_v56 = vld [vmem:[%s5125_s30 + $0x380] sm:$0xff]  ;;  %911 = vst [vmem:[%s5133_s5 + $0x1b0] sm:$0xff] %v910_v54  ;;  %913 = vst [vmem:[%s5133_s5 + $0x1b8] sm:$0xff] %v912_v55  ;;  %v916_v57 = vld [vmem:[%s5125_s30 + $0x390] sm:$0xff] }
  0x32   : > { %915 = vst [vmem:[%s5133_s5 + $0x1c0] sm:$0xff] %v914_v56  ;;  %v918_v58 = vld [vmem:[%s5125_s30 + $0x3a0] sm:$0xff]  ;;  %v920_v59 = vld [vmem:[%s5125_s30 + $0x3b0] sm:$0xff]  ;;  %917 = vst [vmem:[%s5133_s5 + $0x1c8] sm:$0xff] %v916_v57 }
  0x33   : > { %919 = vst [vmem:[%s5133_s5 + $0x1d0] sm:$0xff] %v918_v58  ;;  %921 = vst [vmem:[%s5133_s5 + $0x1d8] sm:$0xff] %v920_v59  ;;  %v922_v60 = vld [vmem:[%s5125_s30 + $0x3c0] sm:$0xff]  ;;  %v924_v61 = vld [vmem:[%s5125_s30 + $0x3d0] sm:$0xff] }
  0x34   : > { %v926_v62 = vld [vmem:[%s5125_s30 + $0x3e0] sm:$0xff]  ;;  %923 = vst [vmem:[%s5133_s5 + $0x1e0] sm:$0xff] %v922_v60  ;;  %925 = vst [vmem:[%s5133_s5 + $0x1e8] sm:$0xff] %v924_v61  ;;  %v928_v63 = vld [vmem:[%s5125_s30 + $0x3f0] sm:$0xff] }
  0x35   : > { %927 = vst [vmem:[%s5133_s5 + $0x1f0] sm:$0xff] %v926_v62  ;;  %v930_v0 = vld [vmem:[%s5125_s30 + $0x400] sm:$0xff]  ;;  %v932_v1 = vld [vmem:[%s5125_s30 + $0x410] sm:$0xff]  ;;  %929 = vst [vmem:[%s5133_s5 + $0x1f8] sm:$0xff] %v928_v63 }
  0x36   : > { %931 = vst [vmem:[%s5133_s5 + $0x200] sm:$0xff] %v930_v0  ;;  %933 = vst [vmem:[%s5133_s5 + $0x208] sm:$0xff] %v932_v1  ;;  %v934_v2 = vld [vmem:[%s5125_s30 + $0x420] sm:$0xff]  ;;  %v936_v3 = vld [vmem:[%s5125_s30 + $0x430] sm:$0xff] }
  0x37   : > { %v938_v4 = vld [vmem:[%s5125_s30 + $0x440] sm:$0xff]  ;;  %935 = vst [vmem:[%s5133_s5 + $0x210] sm:$0xff] %v934_v2  ;;  %937 = vst [vmem:[%s5133_s5 + $0x218] sm:$0xff] %v936_v3  ;;  %v940_v5 = vld [vmem:[%s5125_s30 + $0x450] sm:$0xff] }
  0x38   : > { %939 = vst [vmem:[%s5133_s5 + $0x220] sm:$0xff] %v938_v4  ;;  %v942_v6 = vld [vmem:[%s5125_s30 + $0x460] sm:$0xff]  ;;  %v944_v7 = vld [vmem:[%s5125_s30 + $0x470] sm:$0xff]  ;;  %941 = vst [vmem:[%s5133_s5 + $0x228] sm:$0xff] %v940_v5 }
  0x39   : > { %943 = vst [vmem:[%s5133_s5 + $0x230] sm:$0xff] %v942_v6  ;;  %945 = vst [vmem:[%s5133_s5 + $0x238] sm:$0xff] %v944_v7  ;;  %v946_v8 = vld [vmem:[%s5125_s30 + $0x480] sm:$0xff]  ;;  %v948_v9 = vld [vmem:[%s5125_s30 + $0x490] sm:$0xff] }
  0x3a   : > { %v950_v10 = vld [vmem:[%s5125_s30 + $0x4a0] sm:$0xff]  ;;  %947 = vst [vmem:[%s5133_s5 + $0x240] sm:$0xff] %v946_v8  ;;  %949 = vst [vmem:[%s5133_s5 + $0x248] sm:$0xff] %v948_v9  ;;  %v952_v11 = vld [vmem:[%s5125_s30 + $0x4b0] sm:$0xff] }
  0x3b   : > { %951 = vst [vmem:[%s5133_s5 + $0x250] sm:$0xff] %v950_v10  ;;  %v954_v12 = vld [vmem:[%s5125_s30 + $0x4c0] sm:$0xff]  ;;  %v956_v13 = vld [vmem:[%s5125_s30 + $0x4d0] sm:$0xff]  ;;  %953 = vst [vmem:[%s5133_s5 + $0x258] sm:$0xff] %v952_v11 }
  0x3c   : > { %955 = vst [vmem:[%s5133_s5 + $0x260] sm:$0xff] %v954_v12  ;;  %957 = vst [vmem:[%s5133_s5 + $0x268] sm:$0xff] %v956_v13  ;;  %v958_v14 = vld [vmem:[%s5125_s30 + $0x4e0] sm:$0xff]  ;;  %v960_v15 = vld [vmem:[%s5125_s30 + $0x4f0] sm:$0xff] }
  0x3d   : > { %v962_v16 = vld [vmem:[%s5125_s30 + $0x500] sm:$0xff]  ;;  %959 = vst [vmem:[%s5133_s5 + $0x270] sm:$0xff] %v958_v14  ;;  %961 = vst [vmem:[%s5133_s5 + $0x278] sm:$0xff] %v960_v15  ;;  %v964_v17 = vld [vmem:[%s5125_s30 + $0x510] sm:$0xff] }
  0x3e   : > { %963 = vst [vmem:[%s5133_s5 + $0x280] sm:$0xff] %v962_v16  ;;  %v966_v18 = vld [vmem:[%s5125_s30 + $0x520] sm:$0xff]  ;;  %v968_v19 = vld [vmem:[%s5125_s30 + $0x530] sm:$0xff]  ;;  %965 = vst [vmem:[%s5133_s5 + $0x288] sm:$0xff] %v964_v17 }
  0x3f   : > { %967 = vst [vmem:[%s5133_s5 + $0x290] sm:$0xff] %v966_v18  ;;  %969 = vst [vmem:[%s5133_s5 + $0x298] sm:$0xff] %v968_v19  ;;  %v970_v20 = vld [vmem:[%s5125_s30 + $0x540] sm:$0xff]  ;;  %v972_v21 = vld [vmem:[%s5125_s30 + $0x550] sm:$0xff] }
  0x40   : > { %v974_v22 = vld [vmem:[%s5125_s30 + $0x560] sm:$0xff]  ;;  %971 = vst [vmem:[%s5133_s5 + $0x2a0] sm:$0xff] %v970_v20  ;;  %973 = vst [vmem:[%s5133_s5 + $0x2a8] sm:$0xff] %v972_v21  ;;  %v976_v23 = vld [vmem:[%s5125_s30 + $0x570] sm:$0xff] }
  0x41   : > { %975 = vst [vmem:[%s5133_s5 + $0x2b0] sm:$0xff] %v974_v22  ;;  %v978_v24 = vld [vmem:[%s5125_s30 + $0x580] sm:$0xff]  ;;  %v980_v25 = vld [vmem:[%s5125_s30 + $0x590] sm:$0xff]  ;;  %977 = vst [vmem:[%s5133_s5 + $0x2b8] sm:$0xff] %v976_v23 }
  0x42   : > { %979 = vst [vmem:[%s5133_s5 + $0x2c0] sm:$0xff] %v978_v24  ;;  %981 = vst [vmem:[%s5133_s5 + $0x2c8] sm:$0xff] %v980_v25  ;;  %v982_v26 = vld [vmem:[%s5125_s30 + $0x5a0] sm:$0xff]  ;;  %v984_v27 = vld [vmem:[%s5125_s30 + $0x5b0] sm:$0xff] }
  0x43   : > { %v986_v28 = vld [vmem:[%s5125_s30 + $0x5c0] sm:$0xff]  ;;  %983 = vst [vmem:[%s5133_s5 + $0x2d0] sm:$0xff] %v982_v26  ;;  %985 = vst [vmem:[%s5133_s5 + $0x2d8] sm:$0xff] %v984_v27  ;;  %v988_v29 = vld [vmem:[%s5125_s30 + $0x5d0] sm:$0xff] }
  0x44   : > { %987 = vst [vmem:[%s5133_s5 + $0x2e0] sm:$0xff] %v986_v28  ;;  %v990_v30 = vld [vmem:[%s5125_s30 + $0x5e0] sm:$0xff]  ;;  %v992_v31 = vld [vmem:[%s5125_s30 + $0x5f0] sm:$0xff]  ;;  %989 = vst [vmem:[%s5133_s5 + $0x2e8] sm:$0xff] %v988_v29 }
  0x45   : > { %991 = vst [vmem:[%s5133_s5 + $0x2f0] sm:$0xff] %v990_v30  ;;  %993 = vst [vmem:[%s5133_s5 + $0x2f8] sm:$0xff] %v992_v31  ;;  %v994_v32 = vld [vmem:[%s5125_s30 + $0x600] sm:$0xff]  ;;  %v996_v33 = vld [vmem:[%s5125_s30 + $0x610] sm:$0xff] }
  0x46   : > { %v998_v34 = vld [vmem:[%s5125_s30 + $0x620] sm:$0xff]  ;;  %995 = vst [vmem:[%s5133_s5 + $0x300] sm:$0xff] %v994_v32  ;;  %997 = vst [vmem:[%s5133_s5 + $0x308] sm:$0xff] %v996_v33  ;;  %v1000_v35 = vld [vmem:[%s5125_s30 + $0x630] sm:$0xff] }
  0x47   : > { %999 = vst [vmem:[%s5133_s5 + $0x310] sm:$0xff] %v998_v34  ;;  %v1002_v36 = vld [vmem:[%s5125_s30 + $0x640] sm:$0xff]  ;;  %v1004_v37 = vld [vmem:[%s5125_s30 + $0x650] sm:$0xff]  ;;  %1001 = vst [vmem:[%s5133_s5 + $0x318] sm:$0xff] %v1000_v35 }
  0x48   : > { %1003 = vst [vmem:[%s5133_s5 + $0x320] sm:$0xff] %v1002_v36  ;;  %1005 = vst [vmem:[%s5133_s5 + $0x328] sm:$0xff] %v1004_v37  ;;  %v1006_v38 = vld [vmem:[%s5125_s30 + $0x660] sm:$0xff]  ;;  %v1008_v39 = vld [vmem:[%s5125_s30 + $0x670] sm:$0xff] }
  0x49   : > { %v1010_v40 = vld [vmem:[%s5125_s30 + $0x680] sm:$0xff]  ;;  %1007 = vst [vmem:[%s5133_s5 + $0x330] sm:$0xff] %v1006_v38  ;;  %1009 = vst [vmem:[%s5133_s5 + $0x338] sm:$0xff] %v1008_v39  ;;  %v1012_v41 = vld [vmem:[%s5125_s30 + $0x690] sm:$0xff] }
  0x4a   : > { %1011 = vst [vmem:[%s5133_s5 + $0x340] sm:$0xff] %v1010_v40  ;;  %v1014_v42 = vld [vmem:[%s5125_s30 + $0x6a0] sm:$0xff]  ;;  %v1016_v43 = vld [vmem:[%s5125_s30 + $0x6b0] sm:$0xff]  ;;  %1013 = vst [vmem:[%s5133_s5 + $0x348] sm:$0xff] %v1012_v41 }
  0x4b   : > { %1015 = vst [vmem:[%s5133_s5 + $0x350] sm:$0xff] %v1014_v42  ;;  %1017 = vst [vmem:[%s5133_s5 + $0x358] sm:$0xff] %v1016_v43  ;;  %v1018_v44 = vld [vmem:[%s5125_s30 + $0x6c0] sm:$0xff]  ;;  %v1020_v45 = vld [vmem:[%s5125_s30 + $0x6d0] sm:$0xff] }
  0x4c   : > { %v1022_v46 = vld [vmem:[%s5125_s30 + $0x6e0] sm:$0xff]  ;;  %1019 = vst [vmem:[%s5133_s5 + $0x360] sm:$0xff] %v1018_v44  ;;  %1021 = vst [vmem:[%s5133_s5 + $0x368] sm:$0xff] %v1020_v45  ;;  %v1024_v47 = vld [vmem:[%s5125_s30 + $0x6f0] sm:$0xff] }
  0x4d   : > { %1023 = vst [vmem:[%s5133_s5 + $0x370] sm:$0xff] %v1022_v46  ;;  %v1026_v48 = vld [vmem:[%s5125_s30 + $0x700] sm:$0xff]  ;;  %v1028_v49 = vld [vmem:[%s5125_s30 + $0x710] sm:$0xff]  ;;  %1025 = vst [vmem:[%s5133_s5 + $0x378] sm:$0xff] %v1024_v47 }
  0x4e   : > { %1027 = vst [vmem:[%s5133_s5 + $0x380] sm:$0xff] %v1026_v48  ;;  %1029 = vst [vmem:[%s5133_s5 + $0x388] sm:$0xff] %v1028_v49  ;;  %v1030_v50 = vld [vmem:[%s5125_s30 + $0x720] sm:$0xff]  ;;  %v1032_v51 = vld [vmem:[%s5125_s30 + $0x730] sm:$0xff] }
  0x4f   : > { %v1034_v52 = vld [vmem:[%s5125_s30 + $0x740] sm:$0xff]  ;;  %1031 = vst [vmem:[%s5133_s5 + $0x390] sm:$0xff] %v1030_v50  ;;  %1033 = vst [vmem:[%s5133_s5 + $0x398] sm:$0xff] %v1032_v51  ;;  %v1036_v53 = vld [vmem:[%s5125_s30 + $0x750] sm:$0xff] }
  0x50   : > { %1035 = vst [vmem:[%s5133_s5 + $0x3a0] sm:$0xff] %v1034_v52  ;;  %v1038_v54 = vld [vmem:[%s5125_s30 + $0x760] sm:$0xff]  ;;  %v1040_v55 = vld [vmem:[%s5125_s30 + $0x770] sm:$0xff]  ;;  %1037 = vst [vmem:[%s5133_s5 + $0x3a8] sm:$0xff] %v1036_v53 }
  0x51   : > { %1039 = vst [vmem:[%s5133_s5 + $0x3b0] sm:$0xff] %v1038_v54  ;;  %1041 = vst [vmem:[%s5133_s5 + $0x3b8] sm:$0xff] %v1040_v55  ;;  %v1042_v56 = vld [vmem:[%s5125_s30 + $0x780] sm:$0xff]  ;;  %v1044_v57 = vld [vmem:[%s5125_s30 + $0x790] sm:$0xff] }
  0x52   : > { %v1046_v58 = vld [vmem:[%s5125_s30 + $0x7a0] sm:$0xff]  ;;  %1043 = vst [vmem:[%s5133_s5 + $0x3c0] sm:$0xff] %v1042_v56  ;;  %1045 = vst [vmem:[%s5133_s5 + $0x3c8] sm:$0xff] %v1044_v57  ;;  %v1048_v59 = vld [vmem:[%s5125_s30 + $0x7b0] sm:$0xff] }
  0x53   : > { %1047 = vst [vmem:[%s5133_s5 + $0x3d0] sm:$0xff] %v1046_v58  ;;  %v1050_v60 = vld [vmem:[%s5125_s30 + $0x7c0] sm:$0xff]  ;;  %v1052_v61 = vld [vmem:[%s5125_s30 + $0x7d0] sm:$0xff]  ;;  %1049 = vst [vmem:[%s5133_s5 + $0x3d8] sm:$0xff] %v1048_v59 }
  0x54   : > { %1051 = vst [vmem:[%s5133_s5 + $0x3e0] sm:$0xff] %v1050_v60  ;;  %1053 = vst [vmem:[%s5133_s5 + $0x3e8] sm:$0xff] %v1052_v61  ;;  %v1054_v62 = vld [vmem:[%s5125_s30 + $0x7e0] sm:$0xff]  ;;  %v1056_v63 = vld [vmem:[%s5125_s30 + $0x7f0] sm:$0xff] }
  0x55   : > { %v1058_v0 = vld [vmem:[%s5125_s30 + $0x800] sm:$0xff]  ;;  %1055 = vst [vmem:[%s5133_s5 + $0x3f0] sm:$0xff] %v1054_v62  ;;  %1057 = vst [vmem:[%s5133_s5 + $0x3f8] sm:$0xff] %v1056_v63  ;;  %v1060_v1 = vld [vmem:[%s5125_s30 + $0x810] sm:$0xff] }
  0x56   : > { %1059 = vst [vmem:[%s5133_s5 + $0x400] sm:$0xff] %v1058_v0  ;;  %v1062_v2 = vld [vmem:[%s5125_s30 + $0x820] sm:$0xff]  ;;  %v1064_v3 = vld [vmem:[%s5125_s30 + $0x830] sm:$0xff]  ;;  %1061 = vst [vmem:[%s5133_s5 + $0x408] sm:$0xff] %v1060_v1 }
  0x57   : > { %1063 = vst [vmem:[%s5133_s5 + $0x410] sm:$0xff] %v1062_v2  ;;  %1065 = vst [vmem:[%s5133_s5 + $0x418] sm:$0xff] %v1064_v3  ;;  %v1066_v4 = vld [vmem:[%s5125_s30 + $0x840] sm:$0xff]  ;;  %v1068_v5 = vld [vmem:[%s5125_s30 + $0x850] sm:$0xff] }
  0x58   : > { %v1070_v6 = vld [vmem:[%s5125_s30 + $0x860] sm:$0xff]  ;;  %1067 = vst [vmem:[%s5133_s5 + $0x420] sm:$0xff] %v1066_v4  ;;  %1069 = vst [vmem:[%s5133_s5 + $0x428] sm:$0xff] %v1068_v5  ;;  %v1072_v7 = vld [vmem:[%s5125_s30 + $0x870] sm:$0xff] }
  0x59   : > { %1071 = vst [vmem:[%s5133_s5 + $0x430] sm:$0xff] %v1070_v6  ;;  %v1074_v8 = vld [vmem:[%s5125_s30 + $0x880] sm:$0xff]  ;;  %v1076_v9 = vld [vmem:[%s5125_s30 + $0x890] sm:$0xff]  ;;  %1073 = vst [vmem:[%s5133_s5 + $0x438] sm:$0xff] %v1072_v7 }
  0x5a   : > { %1075 = vst [vmem:[%s5133_s5 + $0x440] sm:$0xff] %v1074_v8  ;;  %1077 = vst [vmem:[%s5133_s5 + $0x448] sm:$0xff] %v1076_v9  ;;  %v1078_v10 = vld [vmem:[%s5125_s30 + $0x8a0] sm:$0xff]  ;;  %v1080_v11 = vld [vmem:[%s5125_s30 + $0x8b0] sm:$0xff] }
  0x5b   : > { %v1082_v12 = vld [vmem:[%s5125_s30 + $0x8c0] sm:$0xff]  ;;  %1079 = vst [vmem:[%s5133_s5 + $0x450] sm:$0xff] %v1078_v10  ;;  %1081 = vst [vmem:[%s5133_s5 + $0x458] sm:$0xff] %v1080_v11  ;;  %v1084_v13 = vld [vmem:[%s5125_s30 + $0x8d0] sm:$0xff] }
  0x5c   : > { %1083 = vst [vmem:[%s5133_s5 + $0x460] sm:$0xff] %v1082_v12  ;;  %v1086_v14 = vld [vmem:[%s5125_s30 + $0x8e0] sm:$0xff]  ;;  %v1088_v15 = vld [vmem:[%s5125_s30 + $0x8f0] sm:$0xff]  ;;  %1085 = vst [vmem:[%s5133_s5 + $0x468] sm:$0xff] %v1084_v13 }
  0x5d   : > { %1087 = vst [vmem:[%s5133_s5 + $0x470] sm:$0xff] %v1086_v14  ;;  %1089 = vst [vmem:[%s5133_s5 + $0x478] sm:$0xff] %v1088_v15  ;;  %v1090_v16 = vld [vmem:[%s5125_s30 + $0x900] sm:$0xff]  ;;  %v1092_v17 = vld [vmem:[%s5125_s30 + $0x910] sm:$0xff] }
  0x5e   : > { %v1094_v18 = vld [vmem:[%s5125_s30 + $0x920] sm:$0xff]  ;;  %1091 = vst [vmem:[%s5133_s5 + $0x480] sm:$0xff] %v1090_v16  ;;  %1093 = vst [vmem:[%s5133_s5 + $0x488] sm:$0xff] %v1092_v17  ;;  %v1096_v19 = vld [vmem:[%s5125_s30 + $0x930] sm:$0xff] }
  0x5f   : > { %1095 = vst [vmem:[%s5133_s5 + $0x490] sm:$0xff] %v1094_v18  ;;  %v1098_v20 = vld [vmem:[%s5125_s30 + $0x940] sm:$0xff]  ;;  %v1100_v21 = vld [vmem:[%s5125_s30 + $0x950] sm:$0xff]  ;;  %1097 = vst [vmem:[%s5133_s5 + $0x498] sm:$0xff] %v1096_v19 }
  0x60   : > { %1099 = vst [vmem:[%s5133_s5 + $0x4a0] sm:$0xff] %v1098_v20  ;;  %1101 = vst [vmem:[%s5133_s5 + $0x4a8] sm:$0xff] %v1100_v21  ;;  %v1102_v22 = vld [vmem:[%s5125_s30 + $0x960] sm:$0xff]  ;;  %v1104_v23 = vld [vmem:[%s5125_s30 + $0x970] sm:$0xff] }
  0x61   : > { %v1106_v24 = vld [vmem:[%s5125_s30 + $0x980] sm:$0xff]  ;;  %1103 = vst [vmem:[%s5133_s5 + $0x4b0] sm:$0xff] %v1102_v22  ;;  %1105 = vst [vmem:[%s5133_s5 + $0x4b8] sm:$0xff] %v1104_v23  ;;  %v1108_v25 = vld [vmem:[%s5125_s30 + $0x990] sm:$0xff] }
  0x62   : > { %1107 = vst [vmem:[%s5133_s5 + $0x4c0] sm:$0xff] %v1106_v24  ;;  %v1110_v26 = vld [vmem:[%s5125_s30 + $0x9a0] sm:$0xff]  ;;  %v1112_v27 = vld [vmem:[%s5125_s30 + $0x9b0] sm:$0xff]  ;;  %1109 = vst [vmem:[%s5133_s5 + $0x4c8] sm:$0xff] %v1108_v25 }
  0x63   : > { %1111 = vst [vmem:[%s5133_s5 + $0x4d0] sm:$0xff] %v1110_v26  ;;  %1113 = vst [vmem:[%s5133_s5 + $0x4d8] sm:$0xff] %v1112_v27  ;;  %v1114_v28 = vld [vmem:[%s5125_s30 + $0x9c0] sm:$0xff]  ;;  %v1116_v29 = vld [vmem:[%s5125_s30 + $0x9d0] sm:$0xff] }
  0x64   : > { %v1118_v30 = vld [vmem:[%s5125_s30 + $0x9e0] sm:$0xff]  ;;  %1115 = vst [vmem:[%s5133_s5 + $0x4e0] sm:$0xff] %v1114_v28  ;;  %1117 = vst [vmem:[%s5133_s5 + $0x4e8] sm:$0xff] %v1116_v29  ;;  %v1120_v31 = vld [vmem:[%s5125_s30 + $0x9f0] sm:$0xff] }
  0x65   : > { %1119 = vst [vmem:[%s5133_s5 + $0x4f0] sm:$0xff] %v1118_v30  ;;  %v1122_v32 = vld [vmem:[%s5125_s30 + $0xa00] sm:$0xff]  ;;  %v1124_v33 = vld [vmem:[%s5125_s30 + $0xa10] sm:$0xff]  ;;  %1121 = vst [vmem:[%s5133_s5 + $0x4f8] sm:$0xff] %v1120_v31 }
  0x66   : > { %1123 = vst [vmem:[%s5133_s5 + $0x500] sm:$0xff] %v1122_v32  ;;  %1125 = vst [vmem:[%s5133_s5 + $0x508] sm:$0xff] %v1124_v33  ;;  %v1126_v34 = vld [vmem:[%s5125_s30 + $0xa20] sm:$0xff]  ;;  %v1128_v35 = vld [vmem:[%s5125_s30 + $0xa30] sm:$0xff] }
  0x67   : > { %v1130_v36 = vld [vmem:[%s5125_s30 + $0xa40] sm:$0xff]  ;;  %1127 = vst [vmem:[%s5133_s5 + $0x510] sm:$0xff] %v1126_v34  ;;  %1129 = vst [vmem:[%s5133_s5 + $0x518] sm:$0xff] %v1128_v35  ;;  %v1132_v37 = vld [vmem:[%s5125_s30 + $0xa50] sm:$0xff] }
  0x68   : > { %1131 = vst [vmem:[%s5133_s5 + $0x520] sm:$0xff] %v1130_v36  ;;  %v1134_v38 = vld [vmem:[%s5125_s30 + $0xa60] sm:$0xff]  ;;  %v1136_v39 = vld [vmem:[%s5125_s30 + $0xa70] sm:$0xff]  ;;  %1133 = vst [vmem:[%s5133_s5 + $0x528] sm:$0xff] %v1132_v37 }
  0x69   : > { %1135 = vst [vmem:[%s5133_s5 + $0x530] sm:$0xff] %v1134_v38  ;;  %1137 = vst [vmem:[%s5133_s5 + $0x538] sm:$0xff] %v1136_v39  ;;  %v1138_v40 = vld [vmem:[%s5125_s30 + $0xa80] sm:$0xff]  ;;  %v1140_v41 = vld [vmem:[%s5125_s30 + $0xa90] sm:$0xff] }
  0x6a   : > { %v1142_v42 = vld [vmem:[%s5125_s30 + $0xaa0] sm:$0xff]  ;;  %1139 = vst [vmem:[%s5133_s5 + $0x540] sm:$0xff] %v1138_v40  ;;  %1141 = vst [vmem:[%s5133_s5 + $0x548] sm:$0xff] %v1140_v41  ;;  %v1144_v43 = vld [vmem:[%s5125_s30 + $0xab0] sm:$0xff] }
  0x6b   : > { %1143 = vst [vmem:[%s5133_s5 + $0x550] sm:$0xff] %v1142_v42  ;;  %v1146_v44 = vld [vmem:[%s5125_s30 + $0xac0] sm:$0xff]  ;;  %v1148_v45 = vld [vmem:[%s5125_s30 + $0xad0] sm:$0xff]  ;;  %1145 = vst [vmem:[%s5133_s5 + $0x558] sm:$0xff] %v1144_v43 }
  0x6c   : > { %1147 = vst [vmem:[%s5133_s5 + $0x560] sm:$0xff] %v1146_v44  ;;  %1149 = vst [vmem:[%s5133_s5 + $0x568] sm:$0xff] %v1148_v45  ;;  %v1150_v46 = vld [vmem:[%s5125_s30 + $0xae0] sm:$0xff]  ;;  %v1152_v47 = vld [vmem:[%s5125_s30 + $0xaf0] sm:$0xff] }
  0x6d   : > { %v1154_v48 = vld [vmem:[%s5125_s30 + $0xb00] sm:$0xff]  ;;  %1151 = vst [vmem:[%s5133_s5 + $0x570] sm:$0xff] %v1150_v46  ;;  %1153 = vst [vmem:[%s5133_s5 + $0x578] sm:$0xff] %v1152_v47  ;;  %v1156_v49 = vld [vmem:[%s5125_s30 + $0xb10] sm:$0xff] }
  0x6e   : > { %1155 = vst [vmem:[%s5133_s5 + $0x580] sm:$0xff] %v1154_v48  ;;  %v1158_v50 = vld [vmem:[%s5125_s30 + $0xb20] sm:$0xff]  ;;  %v1160_v51 = vld [vmem:[%s5125_s30 + $0xb30] sm:$0xff]  ;;  %1157 = vst [vmem:[%s5133_s5 + $0x588] sm:$0xff] %v1156_v49 }
  0x6f   : > { %1159 = vst [vmem:[%s5133_s5 + $0x590] sm:$0xff] %v1158_v50  ;;  %1161 = vst [vmem:[%s5133_s5 + $0x598] sm:$0xff] %v1160_v51  ;;  %v1162_v52 = vld [vmem:[%s5125_s30 + $0xb40] sm:$0xff]  ;;  %v1164_v53 = vld [vmem:[%s5125_s30 + $0xb50] sm:$0xff] }
  0x70   : > { %v1166_v54 = vld [vmem:[%s5125_s30 + $0xb60] sm:$0xff]  ;;  %1163 = vst [vmem:[%s5133_s5 + $0x5a0] sm:$0xff] %v1162_v52  ;;  %1165 = vst [vmem:[%s5133_s5 + $0x5a8] sm:$0xff] %v1164_v53  ;;  %v1168_v55 = vld [vmem:[%s5125_s30 + $0xb70] sm:$0xff] }
  0x71   : > { %1167 = vst [vmem:[%s5133_s5 + $0x5b0] sm:$0xff] %v1166_v54  ;;  %v1170_v56 = vld [vmem:[%s5125_s30 + $0xb80] sm:$0xff]  ;;  %v1172_v57 = vld [vmem:[%s5125_s30 + $0xb90] sm:$0xff]  ;;  %1169 = vst [vmem:[%s5133_s5 + $0x5b8] sm:$0xff] %v1168_v55 }
  0x72   : > { %1171 = vst [vmem:[%s5133_s5 + $0x5c0] sm:$0xff] %v1170_v56  ;;  %1173 = vst [vmem:[%s5133_s5 + $0x5c8] sm:$0xff] %v1172_v57  ;;  %v1174_v58 = vld [vmem:[%s5125_s30 + $0xba0] sm:$0xff]  ;;  %v1176_v59 = vld [vmem:[%s5125_s30 + $0xbb0] sm:$0xff] }
  0x73   : > { %v1178_v60 = vld [vmem:[%s5125_s30 + $0xbc0] sm:$0xff]  ;;  %1175 = vst [vmem:[%s5133_s5 + $0x5d0] sm:$0xff] %v1174_v58  ;;  %1177 = vst [vmem:[%s5133_s5 + $0x5d8] sm:$0xff] %v1176_v59  ;;  %v1180_v61 = vld [vmem:[%s5125_s30 + $0xbd0] sm:$0xff] }
  0x74   : > { %1179 = vst [vmem:[%s5133_s5 + $0x5e0] sm:$0xff] %v1178_v60  ;;  %v1182_v62 = vld [vmem:[%s5125_s30 + $0xbe0] sm:$0xff]  ;;  %v1184_v63 = vld [vmem:[%s5125_s30 + $0xbf0] sm:$0xff]  ;;  %1181 = vst [vmem:[%s5133_s5 + $0x5e8] sm:$0xff] %v1180_v61 }
  0x75   : > { %1183 = vst [vmem:[%s5133_s5 + $0x5f0] sm:$0xff] %v1182_v62  ;;  %1185 = vst [vmem:[%s5133_s5 + $0x5f8] sm:$0xff] %v1184_v63  ;;  %v1186_v0 = vld [vmem:[%s5125_s30 + $0xc00] sm:$0xff]  ;;  %v1188_v1 = vld [vmem:[%s5125_s30 + $0xc10] sm:$0xff] }
  0x76   : > { %v1190_v2 = vld [vmem:[%s5125_s30 + $0xc20] sm:$0xff]  ;;  %1187 = vst [vmem:[%s5133_s5 + $0x600] sm:$0xff] %v1186_v0  ;;  %1189 = vst [vmem:[%s5133_s5 + $0x608] sm:$0xff] %v1188_v1  ;;  %v1192_v3 = vld [vmem:[%s5125_s30 + $0xc30] sm:$0xff] }
  0x77   : > { %1191 = vst [vmem:[%s5133_s5 + $0x610] sm:$0xff] %v1190_v2  ;;  %v1194_v4 = vld [vmem:[%s5125_s30 + $0xc40] sm:$0xff]  ;;  %v1196_v5 = vld [vmem:[%s5125_s30 + $0xc50] sm:$0xff]  ;;  %1193 = vst [vmem:[%s5133_s5 + $0x618] sm:$0xff] %v1192_v3 }
  0x78   : > { %1195 = vst [vmem:[%s5133_s5 + $0x620] sm:$0xff] %v1194_v4  ;;  %1197 = vst [vmem:[%s5133_s5 + $0x628] sm:$0xff] %v1196_v5  ;;  %v1198_v6 = vld [vmem:[%s5125_s30 + $0xc60] sm:$0xff]  ;;  %v1200_v7 = vld [vmem:[%s5125_s30 + $0xc70] sm:$0xff] }
  0x79   : > { %v1202_v8 = vld [vmem:[%s5125_s30 + $0xc80] sm:$0xff]  ;;  %1199 = vst [vmem:[%s5133_s5 + $0x630] sm:$0xff] %v1198_v6  ;;  %1201 = vst [vmem:[%s5133_s5 + $0x638] sm:$0xff] %v1200_v7  ;;  %v1204_v9 = vld [vmem:[%s5125_s30 + $0xc90] sm:$0xff] }
  0x7a   : > { %1203 = vst [vmem:[%s5133_s5 + $0x640] sm:$0xff] %v1202_v8  ;;  %v1206_v10 = vld [vmem:[%s5125_s30 + $0xca0] sm:$0xff]  ;;  %v1208_v11 = vld [vmem:[%s5125_s30 + $0xcb0] sm:$0xff]  ;;  %1205 = vst [vmem:[%s5133_s5 + $0x648] sm:$0xff] %v1204_v9 }
  0x7b   : > { %1207 = vst [vmem:[%s5133_s5 + $0x650] sm:$0xff] %v1206_v10  ;;  %1209 = vst [vmem:[%s5133_s5 + $0x658] sm:$0xff] %v1208_v11  ;;  %v1210_v12 = vld [vmem:[%s5125_s30 + $0xcc0] sm:$0xff]  ;;  %v1212_v13 = vld [vmem:[%s5125_s30 + $0xcd0] sm:$0xff] }
  0x7c   : > { %v1214_v14 = vld [vmem:[%s5125_s30 + $0xce0] sm:$0xff]  ;;  %1211 = vst [vmem:[%s5133_s5 + $0x660] sm:$0xff] %v1210_v12  ;;  %1213 = vst [vmem:[%s5133_s5 + $0x668] sm:$0xff] %v1212_v13  ;;  %v1216_v15 = vld [vmem:[%s5125_s30 + $0xcf0] sm:$0xff] }
  0x7d   : > { %1215 = vst [vmem:[%s5133_s5 + $0x670] sm:$0xff] %v1214_v14  ;;  %v1218_v16 = vld [vmem:[%s5125_s30 + $0xd00] sm:$0xff]  ;;  %v1220_v17 = vld [vmem:[%s5125_s30 + $0xd10] sm:$0xff]  ;;  %1217 = vst [vmem:[%s5133_s5 + $0x678] sm:$0xff] %v1216_v15 }
  0x7e   : > { %1219 = vst [vmem:[%s5133_s5 + $0x680] sm:$0xff] %v1218_v16  ;;  %1221 = vst [vmem:[%s5133_s5 + $0x688] sm:$0xff] %v1220_v17  ;;  %v1222_v18 = vld [vmem:[%s5125_s30 + $0xd20] sm:$0xff]  ;;  %v1224_v19 = vld [vmem:[%s5125_s30 + $0xd30] sm:$0xff] }
  0x7f   : > { %v1226_v20 = vld [vmem:[%s5125_s30 + $0xd40] sm:$0xff]  ;;  %1223 = vst [vmem:[%s5133_s5 + $0x690] sm:$0xff] %v1222_v18  ;;  %1225 = vst [vmem:[%s5133_s5 + $0x698] sm:$0xff] %v1224_v19  ;;  %v1228_v21 = vld [vmem:[%s5125_s30 + $0xd50] sm:$0xff] }
  0x80   : > { %1227 = vst [vmem:[%s5133_s5 + $0x6a0] sm:$0xff] %v1226_v20  ;;  %v1230_v22 = vld [vmem:[%s5125_s30 + $0xd60] sm:$0xff]  ;;  %v1232_v23 = vld [vmem:[%s5125_s30 + $0xd70] sm:$0xff]  ;;  %1229 = vst [vmem:[%s5133_s5 + $0x6a8] sm:$0xff] %v1228_v21 }
  0x81   : > { %1231 = vst [vmem:[%s5133_s5 + $0x6b0] sm:$0xff] %v1230_v22  ;;  %1233 = vst [vmem:[%s5133_s5 + $0x6b8] sm:$0xff] %v1232_v23  ;;  %v1234_v24 = vld [vmem:[%s5125_s30 + $0xd80] sm:$0xff]  ;;  %v1236_v25 = vld [vmem:[%s5125_s30 + $0xd90] sm:$0xff] }
  0x82   : > { %v1238_v26 = vld [vmem:[%s5125_s30 + $0xda0] sm:$0xff]  ;;  %1235 = vst [vmem:[%s5133_s5 + $0x6c0] sm:$0xff] %v1234_v24  ;;  %1237 = vst [vmem:[%s5133_s5 + $0x6c8] sm:$0xff] %v1236_v25  ;;  %v1240_v27 = vld [vmem:[%s5125_s30 + $0xdb0] sm:$0xff] }
  0x83   : > { %1239 = vst [vmem:[%s5133_s5 + $0x6d0] sm:$0xff] %v1238_v26  ;;  %v1242_v28 = vld [vmem:[%s5125_s30 + $0xdc0] sm:$0xff]  ;;  %v1244_v29 = vld [vmem:[%s5125_s30 + $0xdd0] sm:$0xff]  ;;  %1241 = vst [vmem:[%s5133_s5 + $0x6d8] sm:$0xff] %v1240_v27 }
  0x84   : > { %1243 = vst [vmem:[%s5133_s5 + $0x6e0] sm:$0xff] %v1242_v28  ;;  %1245 = vst [vmem:[%s5133_s5 + $0x6e8] sm:$0xff] %v1244_v29  ;;  %v1246_v30 = vld [vmem:[%s5125_s30 + $0xde0] sm:$0xff]  ;;  %v1248_v31 = vld [vmem:[%s5125_s30 + $0xdf0] sm:$0xff] }
  0x85   : > { %v1250_v32 = vld [vmem:[%s5125_s30 + $0xe00] sm:$0xff]  ;;  %1247 = vst [vmem:[%s5133_s5 + $0x6f0] sm:$0xff] %v1246_v30  ;;  %1249 = vst [vmem:[%s5133_s5 + $0x6f8] sm:$0xff] %v1248_v31  ;;  %v1252_v33 = vld [vmem:[%s5125_s30 + $0xe10] sm:$0xff] }
  0x86   : > { %1251 = vst [vmem:[%s5133_s5 + $0x700] sm:$0xff] %v1250_v32  ;;  %v1254_v34 = vld [vmem:[%s5125_s30 + $0xe20] sm:$0xff]  ;;  %v1256_v35 = vld [vmem:[%s5125_s30 + $0xe30] sm:$0xff]  ;;  %1253 = vst [vmem:[%s5133_s5 + $0x708] sm:$0xff] %v1252_v33 }
  0x87   : > { %1255 = vst [vmem:[%s5133_s5 + $0x710] sm:$0xff] %v1254_v34  ;;  %1257 = vst [vmem:[%s5133_s5 + $0x718] sm:$0xff] %v1256_v35  ;;  %v1258_v36 = vld [vmem:[%s5125_s30 + $0xe40] sm:$0xff]  ;;  %v1260_v37 = vld [vmem:[%s5125_s30 + $0xe50] sm:$0xff] }
  0x88   : > { %v1262_v38 = vld [vmem:[%s5125_s30 + $0xe60] sm:$0xff]  ;;  %1259 = vst [vmem:[%s5133_s5 + $0x720] sm:$0xff] %v1258_v36  ;;  %1261 = vst [vmem:[%s5133_s5 + $0x728] sm:$0xff] %v1260_v37  ;;  %v1264_v39 = vld [vmem:[%s5125_s30 + $0xe70] sm:$0xff] }
  0x89   : > { %1263 = vst [vmem:[%s5133_s5 + $0x730] sm:$0xff] %v1262_v38  ;;  %v1266_v40 = vld [vmem:[%s5125_s30 + $0xe80] sm:$0xff]  ;;  %v1268_v41 = vld [vmem:[%s5125_s30 + $0xe90] sm:$0xff]  ;;  %1265 = vst [vmem:[%s5133_s5 + $0x738] sm:$0xff] %v1264_v39 }
  0x8a   : > { %1267 = vst [vmem:[%s5133_s5 + $0x740] sm:$0xff] %v1266_v40  ;;  %1269 = vst [vmem:[%s5133_s5 + $0x748] sm:$0xff] %v1268_v41  ;;  %v1270_v42 = vld [vmem:[%s5125_s30 + $0xea0] sm:$0xff]  ;;  %v1272_v43 = vld [vmem:[%s5125_s30 + $0xeb0] sm:$0xff] }
  0x8b   : > { %v1274_v44 = vld [vmem:[%s5125_s30 + $0xec0] sm:$0xff]  ;;  %1271 = vst [vmem:[%s5133_s5 + $0x750] sm:$0xff] %v1270_v42  ;;  %1273 = vst [vmem:[%s5133_s5 + $0x758] sm:$0xff] %v1272_v43  ;;  %v1276_v45 = vld [vmem:[%s5125_s30 + $0xed0] sm:$0xff] }
  0x8c   : > { %1275 = vst [vmem:[%s5133_s5 + $0x760] sm:$0xff] %v1274_v44  ;;  %v1278_v46 = vld [vmem:[%s5125_s30 + $0xee0] sm:$0xff]  ;;  %v1280_v47 = vld [vmem:[%s5125_s30 + $0xef0] sm:$0xff]  ;;  %1277 = vst [vmem:[%s5133_s5 + $0x768] sm:$0xff] %v1276_v45 }
  0x8d   : > { %1279 = vst [vmem:[%s5133_s5 + $0x770] sm:$0xff] %v1278_v46  ;;  %1281 = vst [vmem:[%s5133_s5 + $0x778] sm:$0xff] %v1280_v47  ;;  %v1282_v48 = vld [vmem:[%s5125_s30 + $0xf00] sm:$0xff]  ;;  %v1284_v49 = vld [vmem:[%s5125_s30 + $0xf10] sm:$0xff] }
  0x8e   : > { %v1286_v50 = vld [vmem:[%s5125_s30 + $0xf20] sm:$0xff]  ;;  %1283 = vst [vmem:[%s5133_s5 + $0x780] sm:$0xff] %v1282_v48  ;;  %1285 = vst [vmem:[%s5133_s5 + $0x788] sm:$0xff] %v1284_v49  ;;  %v1288_v51 = vld [vmem:[%s5125_s30 + $0xf30] sm:$0xff] }
  0x8f   : > { %1287 = vst [vmem:[%s5133_s5 + $0x790] sm:$0xff] %v1286_v50  ;;  %v1290_v52 = vld [vmem:[%s5125_s30 + $0xf40] sm:$0xff]  ;;  %v1292_v53 = vld [vmem:[%s5125_s30 + $0xf50] sm:$0xff]  ;;  %1289 = vst [vmem:[%s5133_s5 + $0x798] sm:$0xff] %v1288_v51 }
  0x90   : > { %1291 = vst [vmem:[%s5133_s5 + $0x7a0] sm:$0xff] %v1290_v52  ;;  %1293 = vst [vmem:[%s5133_s5 + $0x7a8] sm:$0xff] %v1292_v53  ;;  %v1294_v54 = vld [vmem:[%s5125_s30 + $0xf60] sm:$0xff]  ;;  %v1296_v55 = vld [vmem:[%s5125_s30 + $0xf70] sm:$0xff] }
  0x91   : > { %v1298_v56 = vld [vmem:[%s5125_s30 + $0xf80] sm:$0xff]  ;;  %1295 = vst [vmem:[%s5133_s5 + $0x7b0] sm:$0xff] %v1294_v54  ;;  %1297 = vst [vmem:[%s5133_s5 + $0x7b8] sm:$0xff] %v1296_v55  ;;  %v1300_v57 = vld [vmem:[%s5125_s30 + $0xf90] sm:$0xff] }
  0x92   : > { %1299 = vst [vmem:[%s5133_s5 + $0x7c0] sm:$0xff] %v1298_v56  ;;  %v1302_v58 = vld [vmem:[%s5125_s30 + $0xfa0] sm:$0xff]  ;;  %v1304_v59 = vld [vmem:[%s5125_s30 + $0xfb0] sm:$0xff]  ;;  %1301 = vst [vmem:[%s5133_s5 + $0x7c8] sm:$0xff] %v1300_v57 }
  0x93   : > { %1303 = vst [vmem:[%s5133_s5 + $0x7d0] sm:$0xff] %v1302_v58  ;;  %1305 = vst [vmem:[%s5133_s5 + $0x7d8] sm:$0xff] %v1304_v59  ;;  %v1306_v60 = vld [vmem:[%s5125_s30 + $0xfc0] sm:$0xff]  ;;  %v1308_v61 = vld [vmem:[%s5125_s30 + $0xfd0] sm:$0xff] }
  0x94   : > { %v1310_v62 = vld [vmem:[%s5125_s30 + $0xfe0] sm:$0xff]  ;;  %1307 = vst [vmem:[%s5133_s5 + $0x7e0] sm:$0xff] %v1306_v60  ;;  %1309 = vst [vmem:[%s5133_s5 + $0x7e8] sm:$0xff] %v1308_v61  ;;  %v1312_v63 = vld [vmem:[%s5125_s30 + $0xff0] sm:$0xff] }
  0x95   : > { %1311 = vst [vmem:[%s5133_s5 + $0x7f0] sm:$0xff] %v1310_v62  ;;  %v1314_v0 = vld [vmem:[%s5125_s30 + $0x1000] sm:$0xff]  ;;  %v1316_v1 = vld [vmem:[%s5125_s30 + $0x1010] sm:$0xff]  ;;  %1313 = vst [vmem:[%s5133_s5 + $0x7f8] sm:$0xff] %v1312_v63 }
  0x96   : > { %1315 = vst [vmem:[%s5133_s5 + $0x800] sm:$0xff] %v1314_v0  ;;  %1317 = vst [vmem:[%s5133_s5 + $0x808] sm:$0xff] %v1316_v1  ;;  %v1318_v2 = vld [vmem:[%s5125_s30 + $0x1020] sm:$0xff]  ;;  %v1320_v3 = vld [vmem:[%s5125_s30 + $0x1030] sm:$0xff] }
  0x97   : > { %v1322_v4 = vld [vmem:[%s5125_s30 + $0x1040] sm:$0xff]  ;;  %1319 = vst [vmem:[%s5133_s5 + $0x810] sm:$0xff] %v1318_v2  ;;  %1321 = vst [vmem:[%s5133_s5 + $0x818] sm:$0xff] %v1320_v3  ;;  %v1324_v5 = vld [vmem:[%s5125_s30 + $0x1050] sm:$0xff] }
  0x98   : > { %1323 = vst [vmem:[%s5133_s5 + $0x820] sm:$0xff] %v1322_v4  ;;  %v1326_v6 = vld [vmem:[%s5125_s30 + $0x1060] sm:$0xff]  ;;  %v1328_v7 = vld [vmem:[%s5125_s30 + $0x1070] sm:$0xff]  ;;  %1325 = vst [vmem:[%s5133_s5 + $0x828] sm:$0xff] %v1324_v5 }
  0x99   : > { %1327 = vst [vmem:[%s5133_s5 + $0x830] sm:$0xff] %v1326_v6  ;;  %1329 = vst [vmem:[%s5133_s5 + $0x838] sm:$0xff] %v1328_v7  ;;  %v1330_v8 = vld [vmem:[%s5125_s30 + $0x1080] sm:$0xff]  ;;  %v1332_v9 = vld [vmem:[%s5125_s30 + $0x1090] sm:$0xff] }
  0x9a   : > { %v1334_v10 = vld [vmem:[%s5125_s30 + $0x10a0] sm:$0xff]  ;;  %1331 = vst [vmem:[%s5133_s5 + $0x840] sm:$0xff] %v1330_v8  ;;  %1333 = vst [vmem:[%s5133_s5 + $0x848] sm:$0xff] %v1332_v9  ;;  %v1336_v11 = vld [vmem:[%s5125_s30 + $0x10b0] sm:$0xff] }
  0x9b   : > { %1335 = vst [vmem:[%s5133_s5 + $0x850] sm:$0xff] %v1334_v10  ;;  %v1338_v12 = vld [vmem:[%s5125_s30 + $0x10c0] sm:$0xff]  ;;  %v1340_v13 = vld [vmem:[%s5125_s30 + $0x10d0] sm:$0xff]  ;;  %1337 = vst [vmem:[%s5133_s5 + $0x858] sm:$0xff] %v1336_v11 }
  0x9c   : > { %1339 = vst [vmem:[%s5133_s5 + $0x860] sm:$0xff] %v1338_v12  ;;  %1341 = vst [vmem:[%s5133_s5 + $0x868] sm:$0xff] %v1340_v13  ;;  %v1342_v14 = vld [vmem:[%s5125_s30 + $0x10e0] sm:$0xff]  ;;  %v1344_v15 = vld [vmem:[%s5125_s30 + $0x10f0] sm:$0xff] }
  0x9d   : > { %v1346_v16 = vld [vmem:[%s5125_s30 + $0x1100] sm:$0xff]  ;;  %1343 = vst [vmem:[%s5133_s5 + $0x870] sm:$0xff] %v1342_v14  ;;  %1345 = vst [vmem:[%s5133_s5 + $0x878] sm:$0xff] %v1344_v15  ;;  %v1348_v17 = vld [vmem:[%s5125_s30 + $0x1110] sm:$0xff] }
  0x9e   : > { %1347 = vst [vmem:[%s5133_s5 + $0x880] sm:$0xff] %v1346_v16  ;;  %v1350_v18 = vld [vmem:[%s5125_s30 + $0x1120] sm:$0xff]  ;;  %v1352_v19 = vld [vmem:[%s5125_s30 + $0x1130] sm:$0xff]  ;;  %1349 = vst [vmem:[%s5133_s5 + $0x888] sm:$0xff] %v1348_v17 }
  0x9f   : > { %1351 = vst [vmem:[%s5133_s5 + $0x890] sm:$0xff] %v1350_v18  ;;  %1353 = vst [vmem:[%s5133_s5 + $0x898] sm:$0xff] %v1352_v19  ;;  %v1354_v20 = vld [vmem:[%s5125_s30 + $0x1140] sm:$0xff]  ;;  %v1356_v21 = vld [vmem:[%s5125_s30 + $0x1150] sm:$0xff] }
  0xa0   : > { %v1358_v22 = vld [vmem:[%s5125_s30 + $0x1160] sm:$0xff]  ;;  %1355 = vst [vmem:[%s5133_s5 + $0x8a0] sm:$0xff] %v1354_v20  ;;  %1357 = vst [vmem:[%s5133_s5 + $0x8a8] sm:$0xff] %v1356_v21  ;;  %v1360_v23 = vld [vmem:[%s5125_s30 + $0x1170] sm:$0xff] }
  0xa1   : > { %1359 = vst [vmem:[%s5133_s5 + $0x8b0] sm:$0xff] %v1358_v22  ;;  %v1362_v24 = vld [vmem:[%s5125_s30 + $0x1180] sm:$0xff]  ;;  %v1364_v25 = vld [vmem:[%s5125_s30 + $0x1190] sm:$0xff]  ;;  %1361 = vst [vmem:[%s5133_s5 + $0x8b8] sm:$0xff] %v1360_v23 }
  0xa2   : > { %1363 = vst [vmem:[%s5133_s5 + $0x8c0] sm:$0xff] %v1362_v24  ;;  %1365 = vst [vmem:[%s5133_s5 + $0x8c8] sm:$0xff] %v1364_v25  ;;  %v1366_v26 = vld [vmem:[%s5125_s30 + $0x11a0] sm:$0xff]  ;;  %v1368_v27 = vld [vmem:[%s5125_s30 + $0x11b0] sm:$0xff] }
  0xa3   : > { %v1370_v28 = vld [vmem:[%s5125_s30 + $0x11c0] sm:$0xff]  ;;  %1367 = vst [vmem:[%s5133_s5 + $0x8d0] sm:$0xff] %v1366_v26  ;;  %1369 = vst [vmem:[%s5133_s5 + $0x8d8] sm:$0xff] %v1368_v27  ;;  %v1372_v29 = vld [vmem:[%s5125_s30 + $0x11d0] sm:$0xff] }
  0xa4   : > { %1371 = vst [vmem:[%s5133_s5 + $0x8e0] sm:$0xff] %v1370_v28  ;;  %v1374_v30 = vld [vmem:[%s5125_s30 + $0x11e0] sm:$0xff]  ;;  %v1376_v31 = vld [vmem:[%s5125_s30 + $0x11f0] sm:$0xff]  ;;  %1373 = vst [vmem:[%s5133_s5 + $0x8e8] sm:$0xff] %v1372_v29 }
  0xa5   : > { %1375 = vst [vmem:[%s5133_s5 + $0x8f0] sm:$0xff] %v1374_v30  ;;  %1377 = vst [vmem:[%s5133_s5 + $0x8f8] sm:$0xff] %v1376_v31 }
  0xa6 PF: > { %p4043_p8 = scmp.ge.s32.totalorder %s5049_s19, 1  ;;  %p1382_p9 = scmp.lt.s32.totalorder %s5049_s19, 3 }
  0xa8   : > { %p1383_p10 = pnand %p4043_p8, %p1382_p9 }
  0xa9   : > { %s1389_s6 = sand.u32 (!%p1383_p10), 1, %s5033_s15   ;;  %v4623_v32 = vld [vmem:[%s6161_s0 + $0x4] ss:$72 sps:$4 sm:$0xff] (!%p1383_p10)  }
  0xaa   : > { %1386 = sbr.rel (%p1383_p10) target bundleno = 722 (0x2d2), region = 70  ;;  %v4629_v33 = vld [vmem:[%s6161_s0 + $0x24] ss:$72 sps:$4 sm:$0xff] (!%p1383_p10)   ;;  %3440 = vmatprep.mubr.bf16.mxu1 (!%p1383_p10), %v4623_v32 }
  0xab   : > { %s4481_s7 = smul.u32 (!%p1383_p10), 2304, %s1389_s6  ;;  %3652 = vmatprep.mubr.bf16.mxu0 (!%p1383_p10), %v4629_v33 }
  0xad   : > { %s5716_s12 = scalar_lea.vmem (!%p1383_p10), [#allocation3], %s4481_s7 }
  0xae   : > { %v4525_v34 = vld [vmem:[%s5716_s12 + $0x4] ss:$8 sps:$4 sm:$0xff] (!%p1383_p10)   ;;  %v4529_v36 = vld [vmem:[%s5716_s12] ss:$8 sps:$4 sm:$0xff] (!%p1383_p10)   ;;  %v4531_v38 = vld [vmem:[%s5716_s12 + $0x14] ss:$8 sps:$4 sm:$0xff] (!%p1383_p10)  }
  0xaf   : > { %v4527_v35 = vld [vmem:[%s5716_s12 + $0x404] ss:$8 sps:$4 sm:$0xff] (!%p1383_p10)   ;;  %3408 = vmatprep.subr.bf16.mxu1 (!%p1383_p10), %v4525_v34  ;;  %v4530_v37 = vld [vmem:[%s5716_s12 + $0x400] ss:$8 sps:$4 sm:$0xff] (!%p1383_p10)   ;;  %v4533_v39 = vld [vmem:[%s5716_s12 + $0x414] ss:$8 sps:$4 sm:$0xff] (!%p1383_p10)  }
  0xb0   : > { %3620 = vmatprep.subr.bf16.mxu0 (!%p1383_p10), %v4527_v35  ;;  %3409 = vmatpush1.bf16.msra.mxu1 (!%p1383_p10), %v4529_v36  ;;  %v4535_v40 = vld [vmem:[%s5716_s12 + $0x10] ss:$8 sps:$4 sm:$0xff] (!%p1383_p10)   ;;  %v4537_v42 = vld [vmem:[%s5716_s12 + $0x24] ss:$8 sps:$4 sm:$0xff] (!%p1383_p10)   ;;  %v4541_v44 = vld [vmem:[%s5716_s12 + $0x20] ss:$8 sps:$4 sm:$0xff] (!%p1383_p10)  }
  0xb1   : > { %3621 = vmatpush1.bf16.msra.mxu0 %v4530_v37  ;;  %3410 = vmatprep.subr.bf16.mxu1 %v4531_v38  ;;  %v4536_v41 = vld [vmem:[%s5716_s12 + $0x410] ss:$8 sps:$4 sm:$0xff]   ;;  %v4539_v43 = vld [vmem:[%s5716_s12 + $0x424] ss:$8 sps:$4 sm:$0xff]   ;;  %v4542_v45 = vld [vmem:[%s5716_s12 + $0x420] ss:$8 sps:$4 sm:$0xff]  }
  0xb2   : > { %3622 = vmatprep.subr.bf16.mxu0 %v4533_v39  ;;  %v4543_v46 = vld [vmem:[%s5716_s12 + $0x34] ss:$8 sps:$4 sm:$0xff]   ;;  %v4547_v48 = vld [vmem:[%s5716_s12 + $0x30] ss:$8 sps:$4 sm:$0xff]   ;;  %v4549_v50 = vld [vmem:[%s5716_s12 + $0x44] ss:$8 sps:$4 sm:$0xff]  }
  0xb3   : > { %v4545_v47 = vld [vmem:[%s5716_s12 + $0x434] ss:$8 sps:$4 sm:$0xff]   ;;  %v4548_v49 = vld [vmem:[%s5716_s12 + $0x430] ss:$8 sps:$4 sm:$0xff]   ;;  %v4551_v51 = vld [vmem:[%s5716_s12 + $0x444] ss:$8 sps:$4 sm:$0xff]  }
  0xb4   : > { %3411 = vmatpush1.bf16.msra.mxu1 %v4535_v40  ;;  %v4553_v52 = vld [vmem:[%s5716_s12 + $0x40] ss:$8 sps:$4 sm:$0xff]   ;;  %v4555_v54 = vld [vmem:[%s5716_s12 + $0x54] ss:$8 sps:$4 sm:$0xff]   ;;  %v4559_v56 = vld [vmem:[%s5716_s12 + $0x50] ss:$8 sps:$4 sm:$0xff]  }
  0xb5   : > { %3623 = vmatpush1.bf16.msra.mxu0 %v4536_v41  ;;  %3412 = vmatprep.subr.bf16.mxu1 %v4537_v42  ;;  %v4554_v53 = vld [vmem:[%s5716_s12 + $0x440] ss:$8 sps:$4 sm:$0xff]   ;;  %v4557_v55 = vld [vmem:[%s5716_s12 + $0x454] ss:$8 sps:$4 sm:$0xff]   ;;  %v4560_v57 = vld [vmem:[%s5716_s12 + $0x450] ss:$8 sps:$4 sm:$0xff]  }
  0xb6   : > { %3624 = vmatprep.subr.bf16.mxu0 %v4539_v43  ;;  %v4561_v58 = vld [vmem:[%s5716_s12 + $0x64] ss:$8 sps:$4 sm:$0xff]   ;;  %v4565_v60 = vld [vmem:[%s5716_s12 + $0x60] ss:$8 sps:$4 sm:$0xff]   ;;  %v4567_v62 = vld [vmem:[%s5716_s12 + $0x74] ss:$8 sps:$4 sm:$0xff]  }
  0xb7   : > { %v4563_v59 = vld [vmem:[%s5716_s12 + $0x464] ss:$8 sps:$4 sm:$0xff]   ;;  %v4566_v61 = vld [vmem:[%s5716_s12 + $0x460] ss:$8 sps:$4 sm:$0xff]   ;;  %v4569_v63 = vld [vmem:[%s5716_s12 + $0x474] ss:$8 sps:$4 sm:$0xff]  }
  0xb8   : > { %3413 = vmatpush1.bf16.msra.mxu1 %v4541_v44  ;;  %v4571_v0 = vld [vmem:[%s5716_s12 + $0x70] ss:$8 sps:$4 sm:$0xff]   ;;  %v4573_v2 = vld [vmem:[%s5716_s12 + $0x84] ss:$8 sps:$4 sm:$0xff]   ;;  %v4577_v4 = vld [vmem:[%s5716_s12 + $0x80] ss:$8 sps:$4 sm:$0xff]  }
  0xb9   : > { %3625 = vmatpush1.bf16.msra.mxu0 %v4542_v45  ;;  %3414 = vmatprep.subr.bf16.mxu1 %v4543_v46  ;;  %v4572_v1 = vld [vmem:[%s5716_s12 + $0x470] ss:$8 sps:$4 sm:$0xff]   ;;  %v4575_v3 = vld [vmem:[%s5716_s12 + $0x484] ss:$8 sps:$4 sm:$0xff]   ;;  %v4578_v5 = vld [vmem:[%s5716_s12 + $0x480] ss:$8 sps:$4 sm:$0xff]  }
  0xba   : > { %3626 = vmatprep.subr.bf16.mxu0 %v4545_v47  ;;  %v4579_v6 = vld [vmem:[%s5716_s12 + $0x94] ss:$8 sps:$4 sm:$0xff]   ;;  %v4583_v8 = vld [vmem:[%s5716_s12 + $0x90] ss:$8 sps:$4 sm:$0xff]   ;;  %v4585_v10 = vld [vmem:[%s5716_s12 + $0xa4] ss:$8 sps:$4 sm:$0xff]  }
  0xbb   : > { %v4581_v7 = vld [vmem:[%s5716_s12 + $0x494] ss:$8 sps:$4 sm:$0xff]   ;;  %v4584_v9 = vld [vmem:[%s5716_s12 + $0x490] ss:$8 sps:$4 sm:$0xff]   ;;  %v4587_v11 = vld [vmem:[%s5716_s12 + $0x4a4] ss:$8 sps:$4 sm:$0xff]  }
  0xbc   : > { %3415 = vmatpush1.bf16.msra.mxu1 %v4547_v48  ;;  %v4589_v12 = vld [vmem:[%s5716_s12 + $0xa0] ss:$8 sps:$4 sm:$0xff]   ;;  %v4591_v14 = vld [vmem:[%s5716_s12 + $0xb4] ss:$8 sps:$4 sm:$0xff]   ;;  %v4595_v16 = vld [vmem:[%s5716_s12 + $0xb0] ss:$8 sps:$4 sm:$0xff]  }
  0xbd   : > { %3627 = vmatpush1.bf16.msra.mxu0 %v4548_v49  ;;  %3416 = vmatprep.subr.bf16.mxu1 %v4549_v50  ;;  %v4590_v13 = vld [vmem:[%s5716_s12 + $0x4a0] ss:$8 sps:$4 sm:$0xff]   ;;  %v4593_v15 = vld [vmem:[%s5716_s12 + $0x4b4] ss:$8 sps:$4 sm:$0xff]   ;;  %v4596_v17 = vld [vmem:[%s5716_s12 + $0x4b0] ss:$8 sps:$4 sm:$0xff]  }
  0xbe   : > { %3628 = vmatprep.subr.bf16.mxu0 %v4551_v51  ;;  %v4597_v18 = vld [vmem:[%s5716_s12 + $0xc4] ss:$8 sps:$4 sm:$0xff]   ;;  %v4601_v20 = vld [vmem:[%s5716_s12 + $0xc0] ss:$8 sps:$4 sm:$0xff]   ;;  %v4603_v22 = vld [vmem:[%s5716_s12 + $0xd4] ss:$8 sps:$4 sm:$0xff]  }
  0xbf   : > { %v4599_v19 = vld [vmem:[%s5716_s12 + $0x4c4] ss:$8 sps:$4 sm:$0xff]   ;;  %v4602_v21 = vld [vmem:[%s5716_s12 + $0x4c0] ss:$8 sps:$4 sm:$0xff]   ;;  %v4605_v23 = vld [vmem:[%s5716_s12 + $0x4d4] ss:$8 sps:$4 sm:$0xff]  }
  0xc0   : > { %3417 = vmatpush1.bf16.msra.mxu1 %v4553_v52  ;;  %v4607_v24 = vld [vmem:[%s5716_s12 + $0xd0] ss:$8 sps:$4 sm:$0xff]   ;;  %v4609_v26 = vld [vmem:[%s5716_s12 + $0xe4] ss:$8 sps:$4 sm:$0xff]   ;;  %v4613_v28 = vld [vmem:[%s5716_s12 + $0xe0] ss:$8 sps:$4 sm:$0xff]  }
  0xc1   : > { %3629 = vmatpush1.bf16.msra.mxu0 %v4554_v53  ;;  %3418 = vmatprep.subr.bf16.mxu1 %v4555_v54  ;;  %v4608_v25 = vld [vmem:[%s5716_s12 + $0x4d0] ss:$8 sps:$4 sm:$0xff]   ;;  %v4611_v27 = vld [vmem:[%s5716_s12 + $0x4e4] ss:$8 sps:$4 sm:$0xff]   ;;  %v4614_v29 = vld [vmem:[%s5716_s12 + $0x4e0] ss:$8 sps:$4 sm:$0xff]  }
  0xc2   : > { %3630 = vmatprep.subr.bf16.mxu0 %v4557_v55  ;;  %v4615_v30 = vld [vmem:[%s5716_s12 + $0xf4] ss:$8 sps:$4 sm:$0xff]   ;;  %v4619_v32 = vld [vmem:[%s5716_s12 + $0xf0] ss:$8 sps:$4 sm:$0xff]   ;;  %v4626_v34 = vld [vmem:[%s5716_s12 + $0x104] ss:$8 sps:$4 sm:$0xff]  }
  0xc3   : > { %v4617_v31 = vld [vmem:[%s5716_s12 + $0x4f4] ss:$8 sps:$4 sm:$0xff]   ;;  %v4620_v33 = vld [vmem:[%s5716_s12 + $0x4f0] ss:$8 sps:$4 sm:$0xff]   ;;  %v4632_v35 = vld [vmem:[%s5716_s12 + $0x504] ss:$8 sps:$4 sm:$0xff]  }
  0xc4   : > { %3419 = vmatpush1.bf16.msra.mxu1 %v4559_v56  ;;  %v4621_v36 = vld [vmem:[%s6161_s0] ss:$72 sps:$4 sm:$0xff]   ;;  %v4635_v40 = vld [vmem:[%s5716_s12 + $0x114] ss:$8 sps:$4 sm:$0xff]   ;;  %v4633_v43 = vld [vmem:[%s5716_s12 + $0x110] ss:$8 sps:$4 sm:$0xff]  }
  0xc5   : > { %3631 = vmatpush1.bf16.msra.mxu0 %v4560_v57  ;;  %3420 = vmatprep.subr.bf16.mxu1 %v4561_v58  ;;  %v4627_v37 = vld [vmem:[%s6161_s0 + $0x20] ss:$72 sps:$4 sm:$0xff]   ;;  %v4638_v41 = vld [vmem:[%s5716_s12 + $0x514] ss:$8 sps:$4 sm:$0xff]   ;;  %v4636_v44 = vld [vmem:[%s5716_s12 + $0x510] ss:$8 sps:$4 sm:$0xff]  }
  0xc6   : > { %3632 = vmatprep.subr.bf16.mxu0 %v4563_v59  ;;  %v4624_v38 = vld [vmem:[%s5716_s12 + $0x100] ss:$8 sps:$4 sm:$0xff]   ;;  %v4711_v42 = vld [vmem:[%s6161_s0 + $0x94] ss:$72 sps:$4 sm:$0xff]   ;;  %v4641_v45 = vld [vmem:[%s5716_s12 + $0x124] ss:$8 sps:$4 sm:$0xff]  }
  0xc7   : > { %v4630_v39 = vld [vmem:[%s5716_s12 + $0x500] ss:$8 sps:$4 sm:$0xff]   ;;  %v4644_v46 = vld [vmem:[%s5716_s12 + $0x524] ss:$8 sps:$4 sm:$0xff]   ;;  %v4647_v49 = vld [vmem:[%s5716_s12 + $0x134] ss:$8 sps:$4 sm:$0xff]  }
  0xc8   : > { %3421 = vmatpush1.bf16.msra.mxu1 %v4565_v60  ;;  %v4639_v47 = vld [vmem:[%s5716_s12 + $0x120] ss:$8 sps:$4 sm:$0xff]   ;;  %v4650_v50 = vld [vmem:[%s5716_s12 + $0x534] ss:$8 sps:$4 sm:$0xff]   ;;  %v4645_v51 = vld [vmem:[%s5716_s12 + $0x130] ss:$8 sps:$4 sm:$0xff]  }
  0xc9   : > { %3633 = vmatpush1.bf16.msra.mxu0 %v4566_v61  ;;  %3422 = vmatprep.subr.bf16.mxu1 %v4567_v62  ;;  %v4642_v48 = vld [vmem:[%s5716_s12 + $0x520] ss:$8 sps:$4 sm:$0xff]   ;;  %v4648_v52 = vld [vmem:[%s5716_s12 + $0x530] ss:$8 sps:$4 sm:$0xff]   ;;  %v4653_v53 = vld [vmem:[%s5716_s12 + $0x144] ss:$8 sps:$4 sm:$0xff]  }
  0xca   : > { %3634 = vmatprep.subr.bf16.mxu0 %v4569_v63  ;;  %v4656_v54 = vld [vmem:[%s5716_s12 + $0x544] ss:$8 sps:$4 sm:$0xff]   ;;  %v4651_v55 = vld [vmem:[%s5716_s12 + $0x140] ss:$8 sps:$4 sm:$0xff]   ;;  %v4659_v57 = vld [vmem:[%s5716_s12 + $0x154] ss:$8 sps:$4 sm:$0xff]  }
  0xcb   : > { %v4654_v56 = vld [vmem:[%s5716_s12 + $0x540] ss:$8 sps:$4 sm:$0xff]   ;;  %v4662_v58 = vld [vmem:[%s5716_s12 + $0x554] ss:$8 sps:$4 sm:$0xff]   ;;  %v4657_v60 = vld [vmem:[%s5716_s12 + $0x150] ss:$8 sps:$4 sm:$0xff]  }
  0xcc   : > { %3423 = vmatpush1.bf16.msra.mxu1 %v4571_v0  ;;  %v4716_v59 = vld [vmem:[%s6161_s0 + $0xb4] ss:$72 sps:$4 sm:$0xff]   ;;  %v4660_v61 = vld [vmem:[%s5716_s12 + $0x550] ss:$8 sps:$4 sm:$0xff]   ;;  %v4665_v0 = vld [vmem:[%s5716_s12 + $0x164] ss:$8 sps:$4 sm:$0xff]  }
  0xcd   : > { %3635 = vmatpush1.bf16.msra.mxu0 %v4572_v1  ;;  %3424 = vmatprep.subr.bf16.mxu1 %v4573_v2  ;;  %v4721_v62 = vld [vmem:[%s6161_s0 + $0x90] ss:$72 sps:$4 sm:$0xff]   ;;  %v4668_v1 = vld [vmem:[%s5716_s12 + $0x564] ss:$8 sps:$4 sm:$0xff]   ;;  %v4663_v2 = vld [vmem:[%s5716_s12 + $0x160] ss:$8 sps:$4 sm:$0xff]  }
  0xce   : > { %3636 = vmatprep.subr.bf16.mxu0 %v4575_v3  ;;  %v4722_v63 = vld [vmem:[%s6161_s0 + $0xb0] ss:$72 sps:$4 sm:$0xff]   ;;  %v4666_v3 = vld [vmem:[%s5716_s12 + $0x560] ss:$8 sps:$4 sm:$0xff]   ;;  %s4375_s15 = sshll.u32 (%p5112_p6), %s5041_s17, 4 }
  0xcf   : > { %s3905_s30 = scalar_lea.vmem (%p5112_p6), %s6165_s4, %s4375_s15 }
  0xd0   : > { %3425 = vmatpush1.bf16.msra.mxu1 %v4577_v4  ;;  %v4731_v4 = vld [vmem:[%s6161_s0 + $0xc] ss:$72 sps:$4 sm:$0xff]  }
  0xd1   : > { %3637 = vmatpush1.bf16.msra.mxu0 %v4578_v5  ;;  %3426 = vmatprep.subr.bf16.mxu1 %v4579_v6  ;;  %v4671_v5 = vld [vmem:[%s5716_s12 + $0x174] ss:$8 sps:$4 sm:$0xff]  }
  0xd2   : > { %3638 = vmatprep.subr.bf16.mxu0 %v4581_v7  ;;  %v4674_v6 = vld [vmem:[%s5716_s12 + $0x574] ss:$8 sps:$4 sm:$0xff]  }
  0xd3   : > { %v4737_v7 = vld [vmem:[%s6161_s0 + $0x2c] ss:$72 sps:$4 sm:$0xff]  }
  0xd4   : > { %3427 = vmatpush1.bf16.msra.mxu1 %v4583_v8  ;;  %v4669_v8 = vld [vmem:[%s5716_s12 + $0x170] ss:$8 sps:$4 sm:$0xff]  }
  0xd5   : > { %3639 = vmatpush1.bf16.msra.mxu0 %v4584_v9  ;;  %3428 = vmatprep.subr.bf16.mxu1 %v4585_v10  ;;  %v4672_v9 = vld [vmem:[%s5716_s12 + $0x570] ss:$8 sps:$4 sm:$0xff]   ;;  %v4677_v10 = vld [vmem:[%s5716_s12 + $0x184] ss:$8 sps:$4 sm:$0xff]  }
  0xd6   : > { %3640 = vmatprep.subr.bf16.mxu0 %v4587_v11  ;;  %v4680_v11 = vld [vmem:[%s5716_s12 + $0x584] ss:$8 sps:$4 sm:$0xff]  }
  0xd8   : > { %3429 = vmatpush1.bf16.msra.mxu1 %v4589_v12  ;;  %v4675_v12 = vld [vmem:[%s5716_s12 + $0x180] ss:$8 sps:$4 sm:$0xff]  }
  0xd9   : > { %3641 = vmatpush1.bf16.msra.mxu0 %v4590_v13  ;;  %3430 = vmatprep.subr.bf16.mxu1 %v4591_v14  ;;  %v4678_v13 = vld [vmem:[%s5716_s12 + $0x580] ss:$8 sps:$4 sm:$0xff]   ;;  %v4683_v14 = vld [vmem:[%s5716_s12 + $0x194] ss:$8 sps:$4 sm:$0xff]  }
  0xda   : > { %3642 = vmatprep.subr.bf16.mxu0 %v4593_v15  ;;  %v4686_v15 = vld [vmem:[%s5716_s12 + $0x594] ss:$8 sps:$4 sm:$0xff]  }
  0xdc   : > { %3431 = vmatpush1.bf16.msra.mxu1 %v4595_v16  ;;  %v4681_v16 = vld [vmem:[%s5716_s12 + $0x190] ss:$8 sps:$4 sm:$0xff]  }
  0xdd   : > { %3643 = vmatpush1.bf16.msra.mxu0 %v4596_v17  ;;  %3432 = vmatprep.subr.bf16.mxu1 %v4597_v18  ;;  %v4684_v17 = vld [vmem:[%s5716_s12 + $0x590] ss:$8 sps:$4 sm:$0xff]   ;;  %v4689_v18 = vld [vmem:[%s5716_s12 + $0x1a4] ss:$8 sps:$4 sm:$0xff]  }
  0xde   : > { %3644 = vmatprep.subr.bf16.mxu0 %v4599_v19  ;;  %v4692_v19 = vld [vmem:[%s5716_s12 + $0x5a4] ss:$8 sps:$4 sm:$0xff]  }
  0xe0   : > { %3433 = vmatpush1.bf16.msra.mxu1 %v4601_v20  ;;  %v4687_v20 = vld [vmem:[%s5716_s12 + $0x1a0] ss:$8 sps:$4 sm:$0xff]  }
  0xe1   : > { %3645 = vmatpush1.bf16.msra.mxu0 %v4602_v21  ;;  %3434 = vmatprep.subr.bf16.mxu1 %v4603_v22  ;;  %v4690_v21 = vld [vmem:[%s5716_s12 + $0x5a0] ss:$8 sps:$4 sm:$0xff]   ;;  %v4695_v22 = vld [vmem:[%s5716_s12 + $0x1b4] ss:$8 sps:$4 sm:$0xff]  }
  0xe2   : > { %3646 = vmatprep.subr.bf16.mxu0 %v4605_v23  ;;  %v4698_v23 = vld [vmem:[%s5716_s12 + $0x5b4] ss:$8 sps:$4 sm:$0xff]  }
  0xe4   : > { %3435 = vmatpush1.bf16.msra.mxu1 %v4607_v24  ;;  %v4693_v24 = vld [vmem:[%s5716_s12 + $0x1b0] ss:$8 sps:$4 sm:$0xff]  }
  0xe5   : > { %3647 = vmatpush1.bf16.msra.mxu0 %v4608_v25  ;;  %3436 = vmatprep.subr.bf16.mxu1 %v4609_v26  ;;  %v4696_v25 = vld [vmem:[%s5716_s12 + $0x5b0] ss:$8 sps:$4 sm:$0xff]   ;;  %v4701_v26 = vld [vmem:[%s5716_s12 + $0x1c4] ss:$8 sps:$4 sm:$0xff]  }
  0xe6   : > { %3648 = vmatprep.subr.bf16.mxu0 %v4611_v27  ;;  %v4704_v27 = vld [vmem:[%s5716_s12 + $0x5c4] ss:$8 sps:$4 sm:$0xff]  }
  0xe8   : > { %3437 = vmatpush1.bf16.msra.mxu1 %v4613_v28  ;;  %v4699_v28 = vld [vmem:[%s5716_s12 + $0x1c0] ss:$8 sps:$4 sm:$0xff]  }
  0xe9   : > { %3649 = vmatpush1.bf16.msra.mxu0 %v4614_v29  ;;  %3438 = vmatprep.subr.bf16.mxu1 %v4615_v30  ;;  %v4702_v29 = vld [vmem:[%s5716_s12 + $0x5c0] ss:$8 sps:$4 sm:$0xff]   ;;  %v4707_v30 = vld [vmem:[%s5716_s12 + $0x1d4] ss:$8 sps:$4 sm:$0xff]  }
  0xea   : > { %3650 = vmatprep.subr.bf16.mxu0 %v4617_v31  ;;  %v4710_v31 = vld [vmem:[%s5716_s12 + $0x5d4] ss:$8 sps:$4 sm:$0xff]  }
  0xec   : > { %3439 = vmatpush1.bf16.msra.mxu1 %v4619_v32  ;;  %v4705_v32 = vld [vmem:[%s5716_s12 + $0x1d0] ss:$8 sps:$4 sm:$0xff]  }
  0xed   : > { %3651 = vmatpush1.bf16.msra.mxu0 %v4620_v33  ;;  %3461 = vmatprep.subr.bf16.mxu1 %v4626_v34  ;;  %v4708_v33 = vld [vmem:[%s5716_s12 + $0x5d0] ss:$8 sps:$4 sm:$0xff]   ;;  %v4715_v34 = vld [vmem:[%s5716_s12 + $0x1e4] ss:$8 sps:$4 sm:$0xff]  }
  0xee   : > { %3673 = vmatprep.subr.bf16.mxu0 %v4632_v35  ;;  %v4720_v35 = vld [vmem:[%s5716_s12 + $0x5e4] ss:$8 sps:$4 sm:$0xff]  }
  0xef   : > { %3441 = vmatmul.mubr.bf16.vlgmr.msra.gmra.mrb[0].mxu1 %v4621_v36  ;;  %v4713_v36 = vld [vmem:[%s5716_s12 + $0x1e0] ss:$8 sps:$4 sm:$0xff]  }
  0xf0   : > { %3653 = vmatmul.mubr.bf16.vlgmr.msra.gmra.mrb[0].mxu0 %v4627_v37  ;;  %3462 = vmatpush1.bf16.msra.mxu1 %v4624_v38  ;;  %v4718_v37 = vld [vmem:[%s5716_s12 + $0x5e0] ss:$8 sps:$4 sm:$0xff]   ;;  %v4725_v38 = vld [vmem:[%s5716_s12 + $0x1f4] ss:$8 sps:$4 sm:$0xff]  }
  0xf1   : > { %3674 = vmatpush1.bf16.msra.mxu0 %v4630_v39  ;;  %3463 = vmatprep.subr.bf16.mxu1 %v4635_v40  ;;  %v4728_v39 = vld [vmem:[%s5716_s12 + $0x5f4] ss:$8 sps:$4 sm:$0xff]   ;;  %v4723_v40 = vld [vmem:[%s5716_s12 + $0x1f0] ss:$8 sps:$4 sm:$0xff]  }
  0xf2   : > { %3675 = vmatprep.subr.bf16.mxu0 %v4638_v41  ;;  %3450 = vmatprep.mubr.bf16.mxu1 %v4711_v42  ;;  %v4726_v41 = vld [vmem:[%s5716_s12 + $0x5f0] ss:$8 sps:$4 sm:$0xff]   ;;  %v4734_v42 = vld [vmem:[%s5716_s12 + $0x204] ss:$8 sps:$4 sm:$0xff]  }
  0xf3   : > { %3662 = vmatprep.mubr.bf16.mxu0 %v4716_v59  ;;  %v4830_v59 = vld [vmem:[%s6161_s0 + $0xb8] ss:$72 sps:$4 sm:$0xff]  }
  0xf4   : > { %3464 = vmatpush1.bf16.msra.mxu1 %v4633_v43  ;;  %v4729_v43 = vld [vmem:[%s6161_s0 + $0x8] ss:$72 sps:$4 sm:$0xff]  }
  0xf5   : > { %3676 = vmatpush1.bf16.msra.mxu0 %v4636_v44  ;;  %3465 = vmatprep.subr.bf16.mxu1 %v4641_v45  ;;  %v4740_v44 = vld [vmem:[%s5716_s12 + $0x604] ss:$8 sps:$4 sm:$0xff]   ;;  %v4732_v45 = vld [vmem:[%s5716_s12 + $0x200] ss:$8 sps:$4 sm:$0xff]  }
  0xf6   : > { %3677 = vmatprep.subr.bf16.mxu0 %v4644_v46  ;;  %v4735_v46 = vld [vmem:[%s6161_s0 + $0x28] ss:$72 sps:$4 sm:$0xff]  }
  0xf7   : > { %3451 = vmatmul.mubr.bf16.gmra.mrb[4].mxu1 %v4721_v62  ;;  %v4839_v62 = vld [vmem:[%s6161_s0 + $0x14] ss:$72 sps:$4 sm:$0xff]  }
  0xf8   : > { %3466 = vmatpush1.bf16.msra.mxu1 %v4639_v47  ;;  %3663 = vmatmul.mubr.bf16.gmra.mrb[4].mxu0 %v4722_v63  ;;  %v4738_v47 = vld [vmem:[%s5716_s12 + $0x600] ss:$8 sps:$4 sm:$0xff]   ;;  %v4845_v63 = vld [vmem:[%s6161_s0 + $0x34] ss:$72 sps:$4 sm:$0xff]  }
  0xf9   : > { %3678 = vmatpush1.bf16.msra.mxu0 %v4642_v48  ;;  %3467 = vmatprep.subr.bf16.mxu1 %v4647_v49  ;;  %v4743_v48 = vld [vmem:[%s5716_s12 + $0x214] ss:$8 sps:$4 sm:$0xff]  }
  0xfa   : > { %3679 = vmatprep.subr.bf16.mxu0 %v4650_v50  ;;  %3493 = vmatprep.mubr.bf16.mxu1 %v4731_v4  ;;  %v4746_v49 = vld [vmem:[%s5716_s12 + $0x614] ss:$8 sps:$4 sm:$0xff]   ;;  %v4759_v4 = vld [vmem:[%s5716_s12 + $0x240] ss:$8 sps:$4 sm:$0xff]  }
  0xfb   : > { %3705 = vmatprep.mubr.bf16.mxu0 %v4737_v7  ;;  %v4819_v50 = vld [vmem:[%s6161_s0 + $0x9c] ss:$72 sps:$4 sm:$0xff]  }
  0xfc   : > { %3468 = vmatpush1.bf16.msra.mxu1 %v4645_v51  ;;  %v4824_v51 = vld [vmem:[%s6161_s0 + $0xbc] ss:$72 sps:$4 sm:$0xff]  }
  0xfd   : > { %3680 = vmatpush1.bf16.msra.mxu0 %v4648_v52  ;;  %3469 = vmatprep.subr.bf16.mxu1 %v4653_v53  ;;  %v4741_v52 = vld [vmem:[%s5716_s12 + $0x210] ss:$8 sps:$4 sm:$0xff]   ;;  %v4770_v7 = vld [vmem:[%s5716_s12 + $0x654] ss:$8 sps:$4 sm:$0xff]  }
  0xfe   : > { %3681 = vmatprep.subr.bf16.mxu0 %v4656_v54  ;;  %v4744_v53 = vld [vmem:[%s5716_s12 + $0x610] ss:$8 sps:$4 sm:$0xff]   ;;  %v4749_v54 = vld [vmem:[%s5716_s12 + $0x224] ss:$8 sps:$4 sm:$0xff]  }
 0x100   : > { %3470 = vmatpush1.bf16.msra.mxu1 %v4651_v55  ;;  %v4752_v55 = vld [vmem:[%s5716_s12 + $0x624] ss:$8 sps:$4 sm:$0xff]  }
 0x101   : > { %3682 = vmatpush1.bf16.msra.mxu0 %v4654_v56  ;;  %3471 = vmatprep.subr.bf16.mxu1 %v4659_v57  ;;  %v4747_v56 = vld [vmem:[%s5716_s12 + $0x220] ss:$8 sps:$4 sm:$0xff]  }
 0x102   : > { %3683 = vmatprep.subr.bf16.mxu0 %v4662_v58  ;;  %v4750_v57 = vld [vmem:[%s5716_s12 + $0x620] ss:$8 sps:$4 sm:$0xff]  }
 0x103   : > { %v4829_v58 = vld [vmem:[%s6161_s0 + $0x98] ss:$72 sps:$4 sm:$0xff]  }
 0x104   : > { %3472 = vmatpush1.bf16.msra.mxu1 %v4657_v60  ;;  %v4755_v60 = vld [vmem:[%s5716_s12 + $0x234] ss:$8 sps:$4 sm:$0xff]  }
 0x105   : > { %3684 = vmatpush1.bf16.msra.mxu0 %v4660_v61  ;;  %3473 = vmatprep.subr.bf16.mxu1 %v4665_v0  ;;  %v4758_v61 = vld [vmem:[%s5716_s12 + $0x634] ss:$8 sps:$4 sm:$0xff]   ;;  %v4753_v0 = vld [vmem:[%s5716_s12 + $0x230] ss:$8 sps:$4 sm:$0xff]  }
 0x106   : > { %3685 = vmatprep.subr.bf16.mxu0 %v4668_v1  ;;  %v4756_v1 = vld [vmem:[%s5716_s12 + $0x630] ss:$8 sps:$4 sm:$0xff]  }
 0x108   : > { %3474 = vmatpush1.bf16.msra.mxu1 %v4663_v2  ;;  %v4761_v2 = vld [vmem:[%s5716_s12 + $0x244] ss:$8 sps:$4 sm:$0xff]  }
 0x109   : > { %3686 = vmatpush1.bf16.msra.mxu0 %v4666_v3  ;;  %3475 = vmatprep.subr.bf16.mxu1 %v4671_v5  ;;  %v4764_v3 = vld [vmem:[%s5716_s12 + $0x644] ss:$8 sps:$4 sm:$0xff]   ;;  %v4762_v5 = vld [vmem:[%s5716_s12 + $0x640] ss:$8 sps:$4 sm:$0xff]  }
 0x10a   : > { %3687 = vmatprep.subr.bf16.mxu0 %v4674_v6  ;;  %v4767_v6 = vld [vmem:[%s5716_s12 + $0x254] ss:$8 sps:$4 sm:$0xff]  }
 0x10c   : > { %3476 = vmatpush1.bf16.msra.mxu1 %v4669_v8  ;;  %v4765_v8 = vld [vmem:[%s5716_s12 + $0x250] ss:$8 sps:$4 sm:$0xff]  }
 0x10d   : > { %3688 = vmatpush1.bf16.msra.mxu0 %v4672_v9  ;;  %3477 = vmatprep.subr.bf16.mxu1 %v4677_v10  ;;  %v4768_v9 = vld [vmem:[%s5716_s12 + $0x650] ss:$8 sps:$4 sm:$0xff]   ;;  %v4773_v10 = vld [vmem:[%s5716_s12 + $0x264] ss:$8 sps:$4 sm:$0xff]  }
 0x10e   : > { %3689 = vmatprep.subr.bf16.mxu0 %v4680_v11  ;;  %v4776_v11 = vld [vmem:[%s5716_s12 + $0x664] ss:$8 sps:$4 sm:$0xff]  }
 0x110   : > { %3478 = vmatpush1.bf16.msra.mxu1 %v4675_v12  ;;  %v4771_v12 = vld [vmem:[%s5716_s12 + $0x260] ss:$8 sps:$4 sm:$0xff]  }
 0x111   : > { %3690 = vmatpush1.bf16.msra.mxu0 %v4678_v13  ;;  %3479 = vmatprep.subr.bf16.mxu1 %v4683_v14  ;;  %v4774_v13 = vld [vmem:[%s5716_s12 + $0x660] ss:$8 sps:$4 sm:$0xff]   ;;  %v4779_v14 = vld [vmem:[%s5716_s12 + $0x274] ss:$8 sps:$4 sm:$0xff]  }
 0x112   : > { %3691 = vmatprep.subr.bf16.mxu0 %v4686_v15  ;;  %v4782_v15 = vld [vmem:[%s5716_s12 + $0x674] ss:$8 sps:$4 sm:$0xff]  }
 0x114   : > { %3480 = vmatpush1.bf16.msra.mxu1 %v4681_v16  ;;  %v4777_v16 = vld [vmem:[%s5716_s12 + $0x270] ss:$8 sps:$4 sm:$0xff]  }
 0x115   : > { %3692 = vmatpush1.bf16.msra.mxu0 %v4684_v17  ;;  %3481 = vmatprep.subr.bf16.mxu1 %v4689_v18  ;;  %v4780_v17 = vld [vmem:[%s5716_s12 + $0x670] ss:$8 sps:$4 sm:$0xff]   ;;  %v4785_v18 = vld [vmem:[%s5716_s12 + $0x284] ss:$8 sps:$4 sm:$0xff]  }
 0x116   : > { %3693 = vmatprep.subr.bf16.mxu0 %v4692_v19  ;;  %v4788_v19 = vld [vmem:[%s5716_s12 + $0x684] ss:$8 sps:$4 sm:$0xff]  }
 0x118   : > { %3482 = vmatpush1.bf16.msra.mxu1 %v4687_v20  ;;  %v4783_v20 = vld [vmem:[%s5716_s12 + $0x280] ss:$8 sps:$4 sm:$0xff]  }
 0x119   : > { %3694 = vmatpush1.bf16.msra.mxu0 %v4690_v21  ;;  %3483 = vmatprep.subr.bf16.mxu1 %v4695_v22  ;;  %v4786_v21 = vld [vmem:[%s5716_s12 + $0x680] ss:$8 sps:$4 sm:$0xff]   ;;  %v4791_v22 = vld [vmem:[%s5716_s12 + $0x294] ss:$8 sps:$4 sm:$0xff]  }
 0x11a   : > { %3695 = vmatprep.subr.bf16.mxu0 %v4698_v23  ;;  %v4794_v23 = vld [vmem:[%s5716_s12 + $0x694] ss:$8 sps:$4 sm:$0xff]  }
 0x11c   : > { %3484 = vmatpush1.bf16.msra.mxu1 %v4693_v24  ;;  %v4789_v24 = vld [vmem:[%s5716_s12 + $0x290] ss:$8 sps:$4 sm:$0xff]  }
 0x11d   : > { %3696 = vmatpush1.bf16.msra.mxu0 %v4696_v25  ;;  %3485 = vmatprep.subr.bf16.mxu1 %v4701_v26  ;;  %v4792_v25 = vld [vmem:[%s5716_s12 + $0x690] ss:$8 sps:$4 sm:$0xff]   ;;  %v4797_v26 = vld [vmem:[%s5716_s12 + $0x2a4] ss:$8 sps:$4 sm:$0xff]  }
 0x11e   : > { %3697 = vmatprep.subr.bf16.mxu0 %v4704_v27  ;;  %v4800_v27 = vld [vmem:[%s5716_s12 + $0x6a4] ss:$8 sps:$4 sm:$0xff]  }
 0x120   : > { %3486 = vmatpush1.bf16.msra.mxu1 %v4699_v28  ;;  %v4795_v28 = vld [vmem:[%s5716_s12 + $0x2a0] ss:$8 sps:$4 sm:$0xff]  }
 0x121   : > { %3698 = vmatpush1.bf16.msra.mxu0 %v4702_v29  ;;  %3487 = vmatprep.subr.bf16.mxu1 %v4707_v30  ;;  %v4798_v29 = vld [vmem:[%s5716_s12 + $0x6a0] ss:$8 sps:$4 sm:$0xff]   ;;  %v4803_v30 = vld [vmem:[%s5716_s12 + $0x2b4] ss:$8 sps:$4 sm:$0xff]  }
 0x122   : > { %3699 = vmatprep.subr.bf16.mxu0 %v4710_v31  ;;  %v4806_v31 = vld [vmem:[%s5716_s12 + $0x6b4] ss:$8 sps:$4 sm:$0xff]  }
 0x124   : > { %3488 = vmatpush1.bf16.msra.mxu1 %v4705_v32  ;;  %v4801_v32 = vld [vmem:[%s5716_s12 + $0x2b0] ss:$8 sps:$4 sm:$0xff]  }
 0x125   : > { %3700 = vmatpush1.bf16.msra.mxu0 %v4708_v33  ;;  %3489 = vmatprep.subr.bf16.mxu1 %v4715_v34  ;;  %v4804_v33 = vld [vmem:[%s5716_s12 + $0x6b0] ss:$8 sps:$4 sm:$0xff]   ;;  %v4809_v34 = vld [vmem:[%s5716_s12 + $0x2c4] ss:$8 sps:$4 sm:$0xff]  }
 0x126   : > { %3701 = vmatprep.subr.bf16.mxu0 %v4720_v35  ;;  %v4812_v35 = vld [vmem:[%s5716_s12 + $0x6c4] ss:$8 sps:$4 sm:$0xff]  }
 0x128   : > { %3490 = vmatpush1.bf16.msra.mxu1 %v4713_v36  ;;  %v4807_v36 = vld [vmem:[%s5716_s12 + $0x2c0] ss:$8 sps:$4 sm:$0xff]  }
 0x129   : > { %3702 = vmatpush1.bf16.msra.mxu0 %v4718_v37  ;;  %3491 = vmatprep.subr.bf16.mxu1 %v4725_v38  ;;  %v4810_v37 = vld [vmem:[%s5716_s12 + $0x6c0] ss:$8 sps:$4 sm:$0xff]   ;;  %v4815_v38 = vld [vmem:[%s5716_s12 + $0x2d4] ss:$8 sps:$4 sm:$0xff]  }
 0x12a   : > { %3703 = vmatprep.subr.bf16.mxu0 %v4728_v39  ;;  %v4818_v39 = vld [vmem:[%s5716_s12 + $0x6d4] ss:$8 sps:$4 sm:$0xff]  }
 0x12c   : > { %3492 = vmatpush1.bf16.msra.mxu1 %v4723_v40  ;;  %v4813_v40 = vld [vmem:[%s5716_s12 + $0x2d0] ss:$8 sps:$4 sm:$0xff]  }
 0x12d   : > { %3704 = vmatpush1.bf16.msra.mxu0 %v4726_v41  ;;  %3514 = vmatprep.subr.bf16.mxu1 %v4734_v42  ;;  %v4816_v41 = vld [vmem:[%s5716_s12 + $0x6d0] ss:$8 sps:$4 sm:$0xff]   ;;  %v4823_v42 = vld [vmem:[%s5716_s12 + $0x2e4] ss:$8 sps:$4 sm:$0xff]  }
 0x12e   : > { %3726 = vmatprep.subr.bf16.mxu0 %v4740_v44  ;;  %v4821_v44 = vld [vmem:[%s5716_s12 + $0x2e0] ss:$8 sps:$4 sm:$0xff]  }
 0x12f   : > { %3494 = vmatmul.mubr.bf16.vlgmr.msra.gmra.mrb[0].mxu1 %v4729_v43  ;;  %v4828_v43 = vld [vmem:[%s5716_s12 + $0x6e4] ss:$8 sps:$4 sm:$0xff]  }
 0x130   : > { %3706 = vmatmul.mubr.bf16.vlgmr.msra.gmra.mrb[0].mxu0 %v4735_v46  ;;  %3515 = vmatpush1.bf16.msra.mxu1 %v4732_v45  ;;  %v4826_v45 = vld [vmem:[%s5716_s12 + $0x6e0] ss:$8 sps:$4 sm:$0xff]   ;;  %v4833_v46 = vld [vmem:[%s5716_s12 + $0x2f4] ss:$8 sps:$4 sm:$0xff]  }
 0x131   : > { %3727 = vmatpush1.bf16.msra.mxu0 %v4738_v47  ;;  %3516 = vmatprep.subr.bf16.mxu1 %v4743_v48  ;;  %v4836_v47 = vld [vmem:[%s5716_s12 + $0x6f4] ss:$8 sps:$4 sm:$0xff]   ;;  %v4831_v48 = vld [vmem:[%s5716_s12 + $0x2f0] ss:$8 sps:$4 sm:$0xff]  }
 0x132   : > { %3728 = vmatprep.subr.bf16.mxu0 %v4746_v49  ;;  %3503 = vmatprep.mubr.bf16.mxu1 %v4819_v50  ;;  %v4834_v49 = vld [vmem:[%s5716_s12 + $0x6f0] ss:$8 sps:$4 sm:$0xff]   ;;  %v4842_v50 = vld [vmem:[%s5716_s12 + $0x304] ss:$8 sps:$4 sm:$0xff]  }
 0x133   : > { %3715 = vmatprep.mubr.bf16.mxu0 %v4824_v51  ;;  %v4848_v51 = vld [vmem:[%s5716_s12 + $0x704] ss:$8 sps:$4 sm:$0xff]  }
 0x134   : > { %3517 = vmatpush1.bf16.msra.mxu1 %v4741_v52  ;;  %v4837_v52 = vld [vmem:[%s6161_s0 + $0x10] ss:$72 sps:$4 sm:$0xff]  }
 0x135   : > { %3729 = vmatpush1.bf16.msra.mxu0 %v4744_v53  ;;  %3518 = vmatprep.subr.bf16.mxu1 %v4749_v54  ;;  %v4840_v53 = vld [vmem:[%s5716_s12 + $0x300] ss:$8 sps:$4 sm:$0xff]   ;;  %v4843_v54 = vld [vmem:[%s6161_s0 + $0x30] ss:$72 sps:$4 sm:$0xff]  }
 0x136   : > { %3730 = vmatprep.subr.bf16.mxu0 %v4752_v55  ;;  %v4846_v55 = vld [vmem:[%s5716_s12 + $0x700] ss:$8 sps:$4 sm:$0xff]  }
 0x137   : > { %3504 = vmatmul.mubr.bf16.gmra.mrb[4].mxu1 %v4829_v58  ;;  %v4927_v58 = vld [vmem:[%s6161_s0 + $0xa4] ss:$72 sps:$4 sm:$0xff]  }
 0x138   : > { %3716 = vmatmul.mubr.bf16.gmra.mrb[4].mxu0 %v4830_v59  ;;  %3519 = vmatpush1.bf16.msra.mxu1 %v4747_v56  ;;  %v4851_v56 = vld [vmem:[%s5716_s12 + $0x314] ss:$8 sps:$4 sm:$0xff]   ;;  %v4929_v59 = vld [vmem:[%s6161_s0 + $0xc4] ss:$72 sps:$4 sm:$0xff]  }
 0x139   : > { %3731 = vmatpush1.bf16.msra.mxu0 %v4750_v57  ;;  %3520 = vmatprep.subr.bf16.mxu1 %v4755_v60  ;;  %v4854_v57 = vld [vmem:[%s5716_s12 + $0x714] ss:$8 sps:$4 sm:$0xff]   ;;  %v4849_v60 = vld [vmem:[%s5716_s12 + $0x310] ss:$8 sps:$4 sm:$0xff]  }
 0x13a   : > { %3732 = vmatprep.subr.bf16.mxu0 %v4758_v61  ;;  %3546 = vmatprep.mubr.bf16.mxu1 %v4839_v62  ;;  %v4852_v61 = vld [vmem:[%s5716_s12 + $0x710] ss:$8 sps:$4 sm:$0xff]   ;;  %v4857_v62 = vld [vmem:[%s5716_s12 + $0x324] ss:$8 sps:$4 sm:$0xff]  }
 0x13b   : > { %3758 = vmatprep.mubr.bf16.mxu0 %v4845_v63  ;;  %v4860_v63 = vld [vmem:[%s5716_s12 + $0x724] ss:$8 sps:$4 sm:$0xff]  }
 0x13c   : > { %3521 = vmatpush1.bf16.msra.mxu1 %v4753_v0  ;;  %v4855_v0 = vld [vmem:[%s5716_s12 + $0x320] ss:$8 sps:$4 sm:$0xff]  }
 0x13d   : > { %3733 = vmatpush1.bf16.msra.mxu0 %v4756_v1  ;;  %3522 = vmatprep.subr.bf16.mxu1 %v4761_v2  ;;  %v4858_v1 = vld [vmem:[%s5716_s12 + $0x720] ss:$8 sps:$4 sm:$0xff]  }
 0x13e   : > { %3734 = vmatprep.subr.bf16.mxu0 %v4764_v3  ;;  %v4931_v2 = vld [vmem:[%s6161_s0 + $0xa0] ss:$72 sps:$4 sm:$0xff]  }
 0x13f   : > { %v4935_v3 = vld [vmem:[%s6161_s0 + $0xc0] ss:$72 sps:$4 sm:$0xff]  }
 0x140   : > { %3523 = vmatpush1.bf16.msra.mxu1 %v4759_v4  ;;  %v5051_v4 = vmov 0  }
 0x141   : > { %3735 = vmatpush1.bf16.msra.mxu0 %v4762_v5  ;;  %3524 = vmatprep.subr.bf16.mxu1 %v4767_v6  ;;  %v4863_v5 = vld [vmem:[%s5716_s12 + $0x334] ss:$8 sps:$4 sm:$0xff]  }
 0x142   : > { %3736 = vmatprep.subr.bf16.mxu0 %v4770_v7  ;;  %4524 = vset.pattern.permute.xlu1 %v5051_v4  ;;  %v4866_v6 = vld [vmem:[%s5716_s12 + $0x734] ss:$8 sps:$4 sm:$0xff]  }
 0x143   : > { %4523 = vset.pattern.permute.xlu0 %v5051_v4  ;;  %v4947_v7 = vld [vmem:[%s6161_s0 + $0x1c] ss:$72 sps:$4 sm:$0xff]   ;;  %v4957_v4 = vld [vmem:[%s6161_s0 + $0xac] ss:$72 sps:$4 sm:$0xff]  }
 0x144   : > { %3525 = vmatpush1.bf16.msra.mxu1 %v4765_v8  ;;  %v4950_v8 = vld [vmem:[%s6161_s0 + $0x3c] ss:$72 sps:$4 sm:$0xff]  }
 0x145   : > { %3737 = vmatpush1.bf16.msra.mxu0 %v4768_v9  ;;  %3526 = vmatprep.subr.bf16.mxu1 %v4773_v10  ;;  %v4861_v9 = vld [vmem:[%s5716_s12 + $0x330] ss:$8 sps:$4 sm:$0xff]  }
 0x146   : > { %3738 = vmatprep.subr.bf16.mxu0 %v4776_v11  ;;  %v4864_v10 = vld [vmem:[%s5716_s12 + $0x730] ss:$8 sps:$4 sm:$0xff]   ;;  %v4869_v11 = vld [vmem:[%s5716_s12 + $0x344] ss:$8 sps:$4 sm:$0xff]  }
 0x148   : > { %3527 = vmatpush1.bf16.msra.mxu1 %v4771_v12  ;;  %v4872_v12 = vld [vmem:[%s5716_s12 + $0x744] ss:$8 sps:$4 sm:$0xff]  }
 0x149   : > { %3739 = vmatpush1.bf16.msra.mxu0 %v4774_v13  ;;  %3528 = vmatprep.subr.bf16.mxu1 %v4779_v14  ;;  %v4867_v13 = vld [vmem:[%s5716_s12 + $0x340] ss:$8 sps:$4 sm:$0xff]  }
 0x14a   : > { %3740 = vmatprep.subr.bf16.mxu0 %v4782_v15  ;;  %v4870_v14 = vld [vmem:[%s5716_s12 + $0x740] ss:$8 sps:$4 sm:$0xff]   ;;  %v4875_v15 = vld [vmem:[%s5716_s12 + $0x354] ss:$8 sps:$4 sm:$0xff]  }
 0x14c   : > { %3529 = vmatpush1.bf16.msra.mxu1 %v4777_v16  ;;  %v4878_v16 = vld [vmem:[%s5716_s12 + $0x754] ss:$8 sps:$4 sm:$0xff]  }
 0x14d   : > { %3741 = vmatpush1.bf16.msra.mxu0 %v4780_v17  ;;  %3530 = vmatprep.subr.bf16.mxu1 %v4785_v18  ;;  %v4873_v17 = vld [vmem:[%s5716_s12 + $0x350] ss:$8 sps:$4 sm:$0xff]  }
 0x14e   : > { %3742 = vmatprep.subr.bf16.mxu0 %v4788_v19  ;;  %v4876_v18 = vld [vmem:[%s5716_s12 + $0x750] ss:$8 sps:$4 sm:$0xff]   ;;  %v1764_v19 = vld [vmem:[%s6163_s2] sm:$0xff] }
 0x14f   : > { %1770 = vperm.xlu1 %4524, %v1764_v19   ;;  %v4977_v19 = vld [vmem:[%s5716_s12 + $0x864] ss:$8 sps:$4 sm:$0xff]  }
 0x150   : > { %3531 = vmatpush1.bf16.msra.mxu1 %v4783_v20  ;;  %v1766_v20 = vld [vmem:[%s6163_s2 + $0x10] sm:$0xff] }
 0x151   : > { %3743 = vmatpush1.bf16.msra.mxu0 %v4786_v21  ;;  %3532 = vmatprep.subr.bf16.mxu1 %v4791_v22  ;;  %v4881_v21 = vld [vmem:[%s5716_s12 + $0x364] ss:$8 sps:$4 sm:$0xff]  }
 0x152   : > { %3744 = vmatprep.subr.bf16.mxu0 %v4794_v23  ;;  %v4884_v22 = vld [vmem:[%s5716_s12 + $0x764] ss:$8 sps:$4 sm:$0xff]   ;;  %1780 = vperm.xlu0 %4523, %v1766_v20   ;;  %v4975_v20 = vld [vmem:[%s5716_s12 + $0x860] ss:$8 sps:$4 sm:$0xff]  }
 0x153   : > { %v1765_v23 = vld [vmem:[%s6163_s2 + $0x8] sm:$0xff] }
 0x154   : > { %3533 = vmatpush1.bf16.msra.mxu1 %v4789_v24  ;;  %v1767_v24 = vld [vmem:[%s6163_s2 + $0x18] sm:$0xff]  ;;  %1775 = vperm.xlu1 %4524, %v1765_v23   ;;  %v4983_v23 = vld [vmem:[%s5716_s12 + $0x884] ss:$8 sps:$4 sm:$0xff]  }
 0x155   : > { %3745 = vmatpush1.bf16.msra.mxu0 %v4792_v25  ;;  %3534 = vmatprep.subr.bf16.mxu1 %v4797_v26  ;;  %v4879_v25 = vld [vmem:[%s5716_s12 + $0x360] ss:$8 sps:$4 sm:$0xff]  }
 0x156   : > { %3746 = vmatprep.subr.bf16.mxu0 %v4800_v27  ;;  %v4882_v26 = vld [vmem:[%s5716_s12 + $0x760] ss:$8 sps:$4 sm:$0xff]   ;;  %v4887_v27 = vld [vmem:[%s5716_s12 + $0x374] ss:$8 sps:$4 sm:$0xff]   ;;  %1785 = vperm.xlu0 %4523, %v1767_v24  }
 0x157   : > { %v4981_v24 = vld [vmem:[%s5716_s12 + $0x880] ss:$8 sps:$4 sm:$0xff]  }
 0x158   : > { %3535 = vmatpush1.bf16.msra.mxu1 %v4795_v28  ;;  %v4890_v28 = vld [vmem:[%s5716_s12 + $0x774] ss:$8 sps:$4 sm:$0xff]  }
 0x159   : > { %3747 = vmatpush1.bf16.msra.mxu0 %v4798_v29  ;;  %3536 = vmatprep.subr.bf16.mxu1 %v4803_v30  ;;  %v4885_v29 = vld [vmem:[%s5716_s12 + $0x370] ss:$8 sps:$4 sm:$0xff]  }
 0x15a   : > { %3748 = vmatprep.subr.bf16.mxu0 %v4806_v31  ;;  %v4888_v30 = vld [vmem:[%s5716_s12 + $0x770] ss:$8 sps:$4 sm:$0xff]   ;;  %v4893_v31 = vld [vmem:[%s5716_s12 + $0x384] ss:$8 sps:$4 sm:$0xff]  }
 0x15c   : > { %3537 = vmatpush1.bf16.msra.mxu1 %v4801_v32  ;;  %v4896_v32 = vld [vmem:[%s5716_s12 + $0x784] ss:$8 sps:$4 sm:$0xff]  }
 0x15d   : > { %3749 = vmatpush1.bf16.msra.mxu0 %v4804_v33  ;;  %3538 = vmatprep.subr.bf16.mxu1 %v4809_v34  ;;  %v4891_v33 = vld [vmem:[%s5716_s12 + $0x380] ss:$8 sps:$4 sm:$0xff]  }
 0x15e   : > { %3750 = vmatprep.subr.bf16.mxu0 %v4812_v35  ;;  %v4894_v34 = vld [vmem:[%s5716_s12 + $0x780] ss:$8 sps:$4 sm:$0xff]   ;;  %v4899_v35 = vld [vmem:[%s5716_s12 + $0x394] ss:$8 sps:$4 sm:$0xff]  }
 0x160   : > { %3539 = vmatpush1.bf16.msra.mxu1 %v4807_v36  ;;  %v4902_v36 = vld [vmem:[%s5716_s12 + $0x794] ss:$8 sps:$4 sm:$0xff]  }
 0x161   : > { %3751 = vmatpush1.bf16.msra.mxu0 %v4810_v37  ;;  %3540 = vmatprep.subr.bf16.mxu1 %v4815_v38  ;;  %v4897_v37 = vld [vmem:[%s5716_s12 + $0x390] ss:$8 sps:$4 sm:$0xff]  }
 0x162   : > { %3752 = vmatprep.subr.bf16.mxu0 %v4818_v39  ;;  %v4900_v38 = vld [vmem:[%s5716_s12 + $0x790] ss:$8 sps:$4 sm:$0xff]   ;;  %v4905_v39 = vld [vmem:[%s5716_s12 + $0x3a4] ss:$8 sps:$4 sm:$0xff]  }
 0x164   : > { %3541 = vmatpush1.bf16.msra.mxu1 %v4813_v40  ;;  %v4908_v40 = vld [vmem:[%s5716_s12 + $0x7a4] ss:$8 sps:$4 sm:$0xff]  }
 0x165   : > { %3753 = vmatpush1.bf16.msra.mxu0 %v4816_v41  ;;  %3542 = vmatprep.subr.bf16.mxu1 %v4823_v42  ;;  %v4903_v41 = vld [vmem:[%s5716_s12 + $0x3a0] ss:$8 sps:$4 sm:$0xff]  }
 0x166   : > { %3754 = vmatprep.subr.bf16.mxu0 %v4828_v43  ;;  %v4906_v42 = vld [vmem:[%s5716_s12 + $0x7a0] ss:$8 sps:$4 sm:$0xff]   ;;  %v4911_v43 = vld [vmem:[%s5716_s12 + $0x3b4] ss:$8 sps:$4 sm:$0xff]  }
 0x168   : > { %3543 = vmatpush1.bf16.msra.mxu1 %v4821_v44  ;;  %v4914_v44 = vld [vmem:[%s5716_s12 + $0x7b4] ss:$8 sps:$4 sm:$0xff]  }
 0x169   : > { %3755 = vmatpush1.bf16.msra.mxu0 %v4826_v45  ;;  %3544 = vmatprep.subr.bf16.mxu1 %v4833_v46  ;;  %v4909_v45 = vld [vmem:[%s5716_s12 + $0x3b0] ss:$8 sps:$4 sm:$0xff]  }
 0x16a   : > { %3756 = vmatprep.subr.bf16.mxu0 %v4836_v47  ;;  %v4912_v46 = vld [vmem:[%s5716_s12 + $0x7b0] ss:$8 sps:$4 sm:$0xff]   ;;  %v4917_v47 = vld [vmem:[%s5716_s12 + $0x3c4] ss:$8 sps:$4 sm:$0xff]  }
 0x16c   : > { %3545 = vmatpush1.bf16.msra.mxu1 %v4831_v48  ;;  %v4920_v48 = vld [vmem:[%s5716_s12 + $0x7c4] ss:$8 sps:$4 sm:$0xff]  }
 0x16d   : > { %3757 = vmatpush1.bf16.msra.mxu0 %v4834_v49  ;;  %3567 = vmatprep.subr.bf16.mxu1 %v4842_v50  ;;  %v4915_v49 = vld [vmem:[%s5716_s12 + $0x3c0] ss:$8 sps:$4 sm:$0xff]  }
 0x16e   : > { %3779 = vmatprep.subr.bf16.mxu0 %v4848_v51  ;;  %v4918_v50 = vld [vmem:[%s5716_s12 + $0x7c0] ss:$8 sps:$4 sm:$0xff]   ;;  %v4923_v51 = vld [vmem:[%s5716_s12 + $0x3d4] ss:$8 sps:$4 sm:$0xff]  }
 0x16f   : > { %3547 = vmatmul.mubr.bf16.vlgmr.msra.gmra.mrb[0].mxu1 %v4837_v52  ;;  %v4926_v52 = vld [vmem:[%s5716_s12 + $0x7d4] ss:$8 sps:$4 sm:$0xff]  }
 0x170   : > { %3759 = vmatmul.mubr.bf16.vlgmr.msra.gmra.mrb[0].mxu0 %v4843_v54  ;;  %3568 = vmatpush1.bf16.msra.mxu1 %v4840_v53  ;;  %v4921_v53 = vld [vmem:[%s5716_s12 + $0x3d0] ss:$8 sps:$4 sm:$0xff]  }
 0x171   : > { %3780 = vmatpush1.bf16.msra.mxu0 %v4846_v55  ;;  %3569 = vmatprep.subr.bf16.mxu1 %v4851_v56  ;;  %v4924_v54 = vld [vmem:[%s5716_s12 + $0x7d0] ss:$8 sps:$4 sm:$0xff]   ;;  %v4934_v55 = vld [vmem:[%s5716_s12 + $0x3e4] ss:$8 sps:$4 sm:$0xff]  }
 0x172   : > { %3781 = vmatprep.subr.bf16.mxu0 %v4854_v57  ;;  %3556 = vmatprep.mubr.bf16.mxu1 %v4927_v58  ;;  %v4938_v56 = vld [vmem:[%s5716_s12 + $0x7e4] ss:$8 sps:$4 sm:$0xff]   ;;  %v4932_v57 = vld [vmem:[%s5716_s12 + $0x3e0] ss:$8 sps:$4 sm:$0xff]  }
 0x173   : > { %3768 = vmatprep.mubr.bf16.mxu0 %v4929_v59  ;;  %v4936_v58 = vld [vmem:[%s5716_s12 + $0x7e0] ss:$8 sps:$4 sm:$0xff]   ;;  %v4941_v59 = vld [vmem:[%s5716_s12 + $0x3f4] ss:$8 sps:$4 sm:$0xff]  }
 0x174   : > { %3570 = vmatpush1.bf16.msra.mxu1 %v4849_v60  ;;  %v4944_v60 = vld [vmem:[%s5716_s12 + $0x7f4] ss:$8 sps:$4 sm:$0xff]  }
 0x175   : > { %3782 = vmatpush1.bf16.msra.mxu0 %v4852_v61  ;;  %3571 = vmatprep.subr.bf16.mxu1 %v4857_v62  ;;  %v4939_v61 = vld [vmem:[%s5716_s12 + $0x3f0] ss:$8 sps:$4 sm:$0xff]  }
 0x176   : > { %3783 = vmatprep.subr.bf16.mxu0 %v4860_v63  ;;  %v4942_v62 = vld [vmem:[%s5716_s12 + $0x7f0] ss:$8 sps:$4 sm:$0xff]   ;;  %v4953_v63 = vld [vmem:[%s5716_s12 + $0x804] ss:$8 sps:$4 sm:$0xff]  }
 0x177   : > { %3557 = vmatmul.mubr.bf16.gmra.mrb[4].mxu1 %v4931_v2  ;;  %v4951_v2 = vld [vmem:[%s5716_s12 + $0x800] ss:$8 sps:$4 sm:$0xff]  }
 0x178   : > { %3769 = vmatmul.mubr.bf16.gmra.mrb[4].mxu0 %v4935_v3  ;;  %3572 = vmatpush1.bf16.msra.mxu1 %v4855_v0  ;;  %v4945_v0 = vld [vmem:[%s6161_s0 + $0x18] ss:$72 sps:$4 sm:$0xff]   ;;  %v4956_v3 = vld [vmem:[%s5716_s12 + $0x814] ss:$8 sps:$4 sm:$0xff]  }
 0x179   : > { %3784 = vmatpush1.bf16.msra.mxu0 %v4858_v1  ;;  %3573 = vmatprep.subr.bf16.mxu1 %v4863_v5  ;;  %v4948_v1 = vld [vmem:[%s6161_s0 + $0x38] ss:$72 sps:$4 sm:$0xff]   ;;  %v4959_v5 = vld [vmem:[%s6161_s0 + $0xcc] ss:$72 sps:$4 sm:$0xff]  }
 0x17a   : > { %3785 = vmatprep.subr.bf16.mxu0 %v4866_v6  ;;  %3599 = vmatprep.mubr.bf16.mxu1 %v4947_v7  ;;  %v4954_v6 = vld [vmem:[%s5716_s12 + $0x810] ss:$8 sps:$4 sm:$0xff]   ;;  %v4965_v7 = vld [vmem:[%s5716_s12 + $0x824] ss:$8 sps:$4 sm:$0xff]  }
 0x17b   : > { %3811 = vmatprep.mubr.bf16.mxu0 %v4950_v8  ;;  %v4961_v8 = vld [vmem:[%s6161_s0 + $0xa8] ss:$72 sps:$4 sm:$0xff]  }
 0x17c   : > { %3574 = vmatpush1.bf16.msra.mxu1 %v4861_v9  ;;  %v4962_v9 = vld [vmem:[%s6161_s0 + $0xc8] ss:$72 sps:$4 sm:$0xff]  }
 0x17d   : > { %3786 = vmatpush1.bf16.msra.mxu0 %v4864_v10  ;;  %3575 = vmatprep.subr.bf16.mxu1 %v4869_v11  ;;  %v4963_v10 = vld [vmem:[%s5716_s12 + $0x820] ss:$8 sps:$4 sm:$0xff]   ;;  %v4968_v11 = vld [vmem:[%s5716_s12 + $0x834] ss:$8 sps:$4 sm:$0xff]  }
 0x17e   : > { %3787 = vmatprep.subr.bf16.mxu0 %v4872_v12  ;;  %v5007_v12 = vld [vmem:[%s6161_s0 + $0x44] ss:$72 sps:$4 sm:$0xff]  }
 0x180   : > { %3576 = vmatpush1.bf16.msra.mxu1 %v4867_v13  ;;  %v5010_v13 = vld [vmem:[%s6161_s0 + $0xd4] ss:$72 sps:$4 sm:$0xff]  }
 0x181   : > { %3788 = vmatpush1.bf16.msra.mxu0 %v4870_v14  ;;  %3577 = vmatprep.subr.bf16.mxu1 %v4875_v15  ;;  %v4966_v14 = vld [vmem:[%s5716_s12 + $0x830] ss:$8 sps:$4 sm:$0xff]   ;;  %v4971_v15 = vld [vmem:[%s5716_s12 + $0x844] ss:$8 sps:$4 sm:$0xff]  }
 0x182   : > { %3789 = vmatprep.subr.bf16.mxu0 %v4878_v16  ;;  %v4969_v16 = vld [vmem:[%s5716_s12 + $0x840] ss:$8 sps:$4 sm:$0xff]  }
 0x184   : > { %3578 = vmatpush1.bf16.msra.mxu1 %v4873_v17  ;;  %v4974_v17 = vld [vmem:[%s5716_s12 + $0x854] ss:$8 sps:$4 sm:$0xff]  }
 0x185   : > { %3790 = vmatpush1.bf16.msra.mxu0 %v4876_v18  ;;  %3579 = vmatprep.subr.bf16.mxu1 %v4881_v21  ;;  %v4972_v18 = vld [vmem:[%s5716_s12 + $0x850] ss:$8 sps:$4 sm:$0xff]   ;;  %v4980_v21 = vld [vmem:[%s5716_s12 + $0x874] ss:$8 sps:$4 sm:$0xff]  }
 0x186   : > { %3791 = vmatprep.subr.bf16.mxu0 %v4884_v22  ;;  %v4978_v22 = vld [vmem:[%s5716_s12 + $0x870] ss:$8 sps:$4 sm:$0xff]  }
 0x188   : > { %3580 = vmatpush1.bf16.msra.mxu1 %v4879_v25  ;;  %v4986_v25 = vld [vmem:[%s5716_s12 + $0x894] ss:$8 sps:$4 sm:$0xff]  }
 0x189   : > { %3792 = vmatpush1.bf16.msra.mxu0 %v4882_v26  ;;  %3581 = vmatprep.subr.bf16.mxu1 %v4887_v27  ;;  %v4984_v26 = vld [vmem:[%s5716_s12 + $0x890] ss:$8 sps:$4 sm:$0xff]   ;;  %v4989_v27 = vld [vmem:[%s5716_s12 + $0x8a4] ss:$8 sps:$4 sm:$0xff]  }
 0x18a   : > { %3793 = vmatprep.subr.bf16.mxu0 %v4890_v28  ;;  %v4987_v28 = vld [vmem:[%s5716_s12 + $0x8a0] ss:$8 sps:$4 sm:$0xff]  }
 0x18c   : > { %3582 = vmatpush1.bf16.msra.mxu1 %v4885_v29  ;;  %v4992_v29 = vld [vmem:[%s5716_s12 + $0x8b4] ss:$8 sps:$4 sm:$0xff]  }
 0x18d   : > { %3794 = vmatpush1.bf16.msra.mxu0 %v4888_v30  ;;  %3583 = vmatprep.subr.bf16.mxu1 %v4893_v31  ;;  %v4990_v30 = vld [vmem:[%s5716_s12 + $0x8b0] ss:$8 sps:$4 sm:$0xff]   ;;  %v4995_v31 = vld [vmem:[%s5716_s12 + $0x8c4] ss:$8 sps:$4 sm:$0xff]  }
 0x18e   : > { %3795 = vmatprep.subr.bf16.mxu0 %v4896_v32  ;;  %v4993_v32 = vld [vmem:[%s5716_s12 + $0x8c0] ss:$8 sps:$4 sm:$0xff]  }
 0x190   : > { %3584 = vmatpush1.bf16.msra.mxu1 %v4891_v33  ;;  %v4998_v33 = vld [vmem:[%s5716_s12 + $0x8d4] ss:$8 sps:$4 sm:$0xff]  }
 0x191   : > { %3796 = vmatpush1.bf16.msra.mxu0 %v4894_v34  ;;  %3585 = vmatprep.subr.bf16.mxu1 %v4899_v35  ;;  %v4996_v34 = vld [vmem:[%s5716_s12 + $0x8d0] ss:$8 sps:$4 sm:$0xff]   ;;  %v5001_v35 = vld [vmem:[%s5716_s12 + $0x8e4] ss:$8 sps:$4 sm:$0xff]  }
 0x192   : > { %3797 = vmatprep.subr.bf16.mxu0 %v4902_v36  ;;  %v4999_v36 = vld [vmem:[%s5716_s12 + $0x8e0] ss:$8 sps:$4 sm:$0xff]  }
 0x194   : > { %3586 = vmatpush1.bf16.msra.mxu1 %v4897_v37  ;;  %v5004_v37 = vld [vmem:[%s5716_s12 + $0x8f4] ss:$8 sps:$4 sm:$0xff]  }
 0x195   : > { %3798 = vmatpush1.bf16.msra.mxu0 %v4900_v38  ;;  %3587 = vmatprep.subr.bf16.mxu1 %v4905_v39  ;;  %v5002_v38 = vld [vmem:[%s5716_s12 + $0x8f0] ss:$8 sps:$4 sm:$0xff]   ;;  %v5005_v39 = vld [vmem:[%s6161_s0 + $0x40] ss:$72 sps:$4 sm:$0xff]   ;;  %s4044_s12 = sshll.u32 %s1389_s6, 6 }
 0x196   : > { %3799 = vmatprep.subr.bf16.mxu0 %v4908_v40  ;;  %v5008_v40 = vld [vmem:[%s6161_s0 + $0xd0] ss:$72 sps:$4 sm:$0xff]   ;;  %s6122_s28 = scalar_lea.vmem [#allocation4], %s4044_s12 }
 0x198   : > { %3588 = vmatpush1.bf16.msra.mxu1 %v4903_v41 }
 0x199   : > { %3800 = vmatpush1.bf16.msra.mxu0 %v4906_v42  ;;  %3589 = vmatprep.subr.bf16.mxu1 %v4911_v43 }
 0x19a   : > { %3801 = vmatprep.subr.bf16.mxu0 %v4914_v44 }
 0x19c   : > { %3590 = vmatpush1.bf16.msra.mxu1 %v4909_v45 }
 0x19d   : > { %3802 = vmatpush1.bf16.msra.mxu0 %v4912_v46  ;;  %3591 = vmatprep.subr.bf16.mxu1 %v4917_v47 }
 0x19e   : > { %3803 = vmatprep.subr.bf16.mxu0 %v4920_v48 }
 0x1a0   : > { %3592 = vmatpush1.bf16.msra.mxu1 %v4915_v49 }
 0x1a1   : > { %3804 = vmatpush1.bf16.msra.mxu0 %v4918_v50  ;;  %3593 = vmatprep.subr.bf16.mxu1 %v4923_v51 }
 0x1a2   : > { %3805 = vmatprep.subr.bf16.mxu0 %v4926_v52 }
 0x1a4   : > { %3594 = vmatpush1.bf16.msra.mxu1 %v4921_v53 }
 0x1a5   : > { %3806 = vmatpush1.bf16.msra.mxu0 %v4924_v54  ;;  %3595 = vmatprep.subr.bf16.mxu1 %v4934_v55 }
 0x1a6   : > { %3807 = vmatprep.subr.bf16.mxu0 %v4938_v56 }
 0x1a8   : > { %3596 = vmatpush1.bf16.msra.mxu1 %v4932_v57 }
 0x1a9   : > { %3808 = vmatpush1.bf16.msra.mxu0 %v4936_v58  ;;  %3597 = vmatprep.subr.bf16.mxu1 %v4941_v59 }
 0x1aa   : > { %3809 = vmatprep.subr.bf16.mxu0 %v4944_v60 }
 0x1ac   : > { %3598 = vmatpush1.bf16.msra.mxu1 %v4939_v61 }
 0x1ad   : > { %3810 = vmatpush1.bf16.msra.mxu0 %v4942_v62  ;;  %4376 = vmatprep.subr.bf16.mxu1 %v4953_v63 }
 0x1ae   : > { %3832 = vmatprep.subr.bf16.mxu0 %v4953_v63 }
 0x1af   : > { %3600 = vmatmul.mubr.bf16.vlgmr.msra.gmra.mrb[0].mxu1 %v4945_v0 }
 0x1b0   : > { %3812 = vmatmul.mubr.bf16.vlgmr.msra.gmra.mrb[0].mxu0 %v4948_v1  ;;  %4392 = vmatpush1.bf16.msra.mxu1 %v4951_v2 }
 0x1b1   : > { %3833 = vmatpush1.bf16.msra.mxu0 %v4951_v2  ;;  %4377 = vmatprep.subr.bf16.mxu1 %v4956_v3 }
 0x1b2   : > { %3834 = vmatprep.subr.bf16.mxu0 %v4956_v3  ;;  %3609 = vmatprep.mubr.bf16.mxu1 %v4957_v4 }
 0x1b3   : > { %3821 = vmatprep.mubr.bf16.mxu0 %v4959_v5 }
 0x1b4   : > { %4393 = vmatpush1.bf16.msra.mxu1 %v4954_v6 }
 0x1b5   : > { %3835 = vmatpush1.bf16.msra.mxu0 %v4954_v6  ;;  %4378 = vmatprep.subr.bf16.mxu1 %v4965_v7 }
 0x1b6   : > { %3836 = vmatprep.subr.bf16.mxu0 %v4965_v7 }
 0x1b7   : > { %3610 = vmatmul.mubr.bf16.gmra.mrb[4].mxu1 %v4961_v8 }
 0x1b8   : > { %3822 = vmatmul.mubr.bf16.gmra.mrb[4].mxu0 %v4962_v9  ;;  %4394 = vmatpush1.bf16.msra.mxu1 %v4963_v10 }
 0x1b9   : > { %3837 = vmatpush1.bf16.msra.mxu0 %v4963_v10  ;;  %4379 = vmatprep.subr.bf16.mxu1 %v4968_v11 }
 0x1ba   : > { %3838 = vmatprep.subr.bf16.mxu0 %v4968_v11  ;;  %3864 = vmatprep.mubr.bf16.mxu0 %v5007_v12 }
 0x1bb   : > { %3874 = vmatprep.mubr.bf16.mxu1 %v5010_v13 }
 0x1bc   : > { %4395 = vmatpush1.bf16.msra.mxu1 %v4966_v14 }
 0x1bd   : > { %3839 = vmatpush1.bf16.msra.mxu0 %v4966_v14  ;;  %4380 = vmatprep.subr.bf16.mxu1 %v4971_v15 }
 0x1be   : > { %3840 = vmatprep.subr.bf16.mxu0 %v4971_v15 }
 0x1c0   : > { %4396 = vmatpush1.bf16.msra.mxu1 %v4969_v16 }
 0x1c1   : > { %3841 = vmatpush1.bf16.msra.mxu0 %v4969_v16  ;;  %4381 = vmatprep.subr.bf16.mxu1 %v4974_v17 }
 0x1c2   : > { %3842 = vmatprep.subr.bf16.mxu0 %v4974_v17 }
 0x1c4   : > { %4397 = vmatpush1.bf16.msra.mxu1 %v4972_v18 }
 0x1c5   : > { %3843 = vmatpush1.bf16.msra.mxu0 %v4972_v18  ;;  %4382 = vmatprep.subr.bf16.mxu1 %v4977_v19 }
 0x1c6   : > { %3844 = vmatprep.subr.bf16.mxu0 %v4977_v19 }
 0x1c8   : > { %4398 = vmatpush1.bf16.msra.mxu1 %v4975_v20 }
 0x1c9   : > { %3845 = vmatpush1.bf16.msra.mxu0 %v4975_v20  ;;  %4383 = vmatprep.subr.bf16.mxu1 %v4980_v21 }
 0x1ca   : > { %3846 = vmatprep.subr.bf16.mxu0 %v4980_v21 }
 0x1cc   : > { %4399 = vmatpush1.bf16.msra.mxu1 %v4978_v22 }
 0x1cd   : > { %3847 = vmatpush1.bf16.msra.mxu0 %v4978_v22  ;;  %4384 = vmatprep.subr.bf16.mxu1 %v4983_v23 }
 0x1ce   : > { %3848 = vmatprep.subr.bf16.mxu0 %v4983_v23  ;;  %v1771_v63 = vpop.permute.xlu1 %1770 }
 0x1d0   : > { %4400 = vmatpush1.bf16.msra.mxu1 %v4981_v24 }
 0x1d1   : > { %3849 = vmatpush1.bf16.msra.mxu0 %v4981_v24  ;;  %4385 = vmatprep.subr.bf16.mxu1 %v4986_v25  ;;  %v1781_v43 = vpop.permute.xlu0 %1780 }
 0x1d2   : > { %3850 = vmatprep.subr.bf16.mxu0 %v4986_v25 }
 0x1d3   : > { %v1776_v0 = vpop.permute.xlu1 %1775 }
 0x1d4   : > { %4401 = vmatpush1.bf16.msra.mxu1 %v4984_v26 }
 0x1d5   : > { %3851 = vmatpush1.bf16.msra.mxu0 %v4984_v26  ;;  %4386 = vmatprep.subr.bf16.mxu1 %v4989_v27  ;;  %v1786_v46 = vpop.permute.xlu0 %1785 }
 0x1d6   : > { %3852 = vmatprep.subr.bf16.mxu0 %v4989_v27 }
 0x1d8   : > { %4402 = vmatpush1.bf16.msra.mxu1 %v4987_v28 }
 0x1d9   : > { %3853 = vmatpush1.bf16.msra.mxu0 %v4987_v28  ;;  %4387 = vmatprep.subr.bf16.mxu1 %v4992_v29 }
 0x1da   : > { %3854 = vmatprep.subr.bf16.mxu0 %v4992_v29 }
 0x1dc   : > { %4403 = vmatpush1.bf16.msra.mxu1 %v4990_v30 }
 0x1dd   : > { %3855 = vmatpush1.bf16.msra.mxu0 %v4990_v30  ;;  %4388 = vmatprep.subr.bf16.mxu1 %v4995_v31 }
 0x1de   : > { %3856 = vmatprep.subr.bf16.mxu0 %v4995_v31 }
 0x1e0   : > { %4404 = vmatpush1.bf16.msra.mxu1 %v4993_v32 }
 0x1e1   : > { %3857 = vmatpush1.bf16.msra.mxu0 %v4993_v32  ;;  %4389 = vmatprep.subr.bf16.mxu1 %v4998_v33 }
 0x1e2   : > { %3858 = vmatprep.subr.bf16.mxu0 %v4998_v33 }
 0x1e4   : > { %4405 = vmatpush1.bf16.msra.mxu1 %v4996_v34 }
 0x1e5   : > { %3859 = vmatpush1.bf16.msra.mxu0 %v4996_v34  ;;  %4390 = vmatprep.subr.bf16.mxu1 %v5001_v35 }
 0x1e6   : > { %3860 = vmatprep.subr.bf16.mxu0 %v5001_v35 }
 0x1e8   : > { %4406 = vmatpush1.bf16.msra.mxu1 %v4999_v36 }
 0x1e9   : > { %3861 = vmatpush1.bf16.msra.mxu0 %v4999_v36  ;;  %4391 = vmatprep.subr.bf16.mxu1 %v5004_v37 }
 0x1ea   : > { %3862 = vmatprep.subr.bf16.mxu0 %v5004_v37 }
 0x1ec   : > { %4407 = vmatpush1.bf16.msra.mxu1 %v5002_v38 }
 0x1ed   : > { %3863 = vmatpush1.bf16.msra.mxu0 %v5002_v38 }
 0x1ef   : > { %3875 = vmatmul.mubr.bf16.vlgmr.msra.gmra.mrb[8].mxu1 %v5008_v40 }
 0x1f0   : > { %3865 = vmatmul.mubr.bf16.vlgmr.msra.gmra.mrb[0].mxu0 %v5005_v39 }
 0x282   : > { %v3601_v41 = vpop.f32.mrb[0].mxu1 }
 0x283   : > { %v3603_v42 = vpop.f32.mrb[1].mxu1  ;;  %v4408_v1 = vadd.f32 %v3601_v41, %v1771_v63 }
 0x284   : > { %v3605_v44 = vpop.f32.mrb[2].mxu1  ;;  %v4410_v2 = vadd.f32 %v3603_v42, %v1771_v63 }
 0x285   : > { %v3607_v45 = vpop.f32.mrb[3].mxu1  ;;  %v4412_v5 = vadd.f32 %v3605_v44, %v1776_v0 }
 0x286   : > { %v4414_v10 = vadd.f32 %v3607_v45, %v1776_v0 }
 0x28a   : > { %v3611_v47 = vpop.f32.mrb[4].mxu1 }
 0x28b   : > { %v3823_v48 = vpop.f32.mrb[4].mxu0  ;;  %v4416_v49 = vadd.f32 %v3611_v47, %v1781_v43  ;;  %v3613_v50 = vpop.f32.mrb[5].mxu1 }
 0x28c   : > { %v3825_v51 = vpop.f32.mrb[5].mxu0  ;;  %v4419_v52 = vadd.f32 %v3613_v50, %v1781_v43  ;;  %v3615_v53 = vpop.f32.mrb[6].mxu1 }
 0x28d   : > { %v3827_v54 = vpop.f32.mrb[6].mxu0  ;;  %v4417_v55 = vadd.f32 %v4416_v49, %v3823_v48  ;;  %v4422_v56 = vadd.f32 %v3615_v53, %v1786_v46  ;;  %v3617_v57 = vpop.f32.mrb[7].mxu1 }
 0x28e   : > { %v3829_v58 = vpop.f32.mrb[7].mxu0  ;;  %v4420_v59 = vadd.f32 %v4419_v52, %v3825_v51  ;;  %v4425_v60 = vadd.f32 %v3617_v57, %v1786_v46 }
 0x28f   : > { %v4423_v61 = vadd.f32 %v4422_v56, %v3827_v54 }
 0x290   : > { %v4426_v62 = vadd.f32 %v4425_v60, %v3829_v58 }
 0x2c2   : > { %v3876_v4 = vpop.f32.mrb[8].mxu1 }
 0x2c3   : > { %v3866_v3 = vpop.f32.mrb[0].mxu0  ;;  %v4418_v7 = vadd.f32 %v4417_v55, %v3876_v4  ;;  %v3878_v9 = vpop.f32.mrb[9].mxu1  ;;  %3899 = sbr.rel (!%p5112_p6) target bundleno = 722 (0x2d2), region = 78 }
 0x2c4   : > { %v4409_v6 = vadd.f32 %v4408_v1, %v3866_v3  ;;  %v3868_v8 = vpop.f32.mrb[1].mxu0  ;;  %v4421_v12 = vadd.f32 %v4420_v59, %v3878_v9  ;;  %v3880_v14 = vpop.f32.mrb[10].mxu1 }
 0x2c5   : > { %v4411_v11 = vadd.f32 %v4410_v2, %v3868_v8  ;;  %v3870_v13 = vpop.f32.mrb[2].mxu0  ;;  %3889 = vst [vmem:[%s6122_s28 + $0x20] sm:$0xff] %v4418_v7  ;;  %v4424_v16 = vadd.f32 %v4423_v61, %v3880_v14  ;;  %v3882_v18 = vpop.f32.mrb[11].mxu1 }
 0x2c6   : > { %3885 = vst [vmem:[%s6122_s28] sm:$0xff] %v4409_v6  ;;  %v4413_v15 = vadd.f32 %v4412_v5, %v3870_v13  ;;  %v3872_v17 = vpop.f32.mrb[3].mxu0  ;;  %3890 = vst [vmem:[%s6122_s28 + $0x28] sm:$0xff] %v4421_v12  ;;  %v4427_v20 = vadd.f32 %v4426_v62, %v3882_v18 }
 0x2c7   : > { %3886 = vst [vmem:[%s6122_s28 + $0x8] sm:$0xff] %v4411_v11  ;;  %v4415_v19 = vadd.f32 %v4414_v10, %v3872_v17  ;;  %3891 = vst [vmem:[%s6122_s28 + $0x30] sm:$0xff] %v4424_v16 }
 0x2c8   : > { %3887 = vst [vmem:[%s6122_s28 + $0x10] sm:$0xff] %v4413_v15  ;;  %3892 = vst [vmem:[%s6122_s28 + $0x38] sm:$0xff] %v4427_v20 }
 0x2c9   : > { %3888 = vst [vmem:[%s6122_s28 + $0x18] sm:$0xff] %v4415_v19 }
 0x2cc   : > { %v3926_v25 = vld [vmem:[%s6122_s28 + $0x20] sm:$0xff] }
 0x2cd   : > { %v3918_v21 = vld [vmem:[%s6122_s28] sm:$0xff]  ;;  %v3928_v26 = vld [vmem:[%s6122_s28 + $0x28] sm:$0xff]  ;;  %3927 = vst [vmem:[%s3905_s30 + $0x40] sm:$0xff] %v3926_v25 }
 0x2ce   : > { %v3920_v22 = vld [vmem:[%s6122_s28 + $0x8] sm:$0xff]  ;;  %3919 = vst [vmem:[%s3905_s30] sm:$0xff] %v3918_v21  ;;  %3929 = vst [vmem:[%s3905_s30 + $0x48] sm:$0xff] %v3928_v26  ;;  %v3930_v27 = vld [vmem:[%s6122_s28 + $0x30] sm:$0xff] }
 0x2cf   : > { %v3922_v23 = vld [vmem:[%s6122_s28 + $0x10] sm:$0xff]  ;;  %3921 = vst [vmem:[%s3905_s30 + $0x8] sm:$0xff] %v3920_v22  ;;  %v3932_v28 = vld [vmem:[%s6122_s28 + $0x38] sm:$0xff]  ;;  %3931 = vst [vmem:[%s3905_s30 + $0x60] sm:$0xff] %v3930_v27 }
 0x2d0   : > { %v3924_v24 = vld [vmem:[%s6122_s28 + $0x18] sm:$0xff]  ;;  %3923 = vst [vmem:[%s3905_s30 + $0x20] sm:$0xff] %v3922_v23  ;;  %3933 = vst [vmem:[%s3905_s30 + $0x68] sm:$0xff] %v3932_v28 }
 0x2d1   : > { %3925 = vst [vmem:[%s3905_s30 + $0x28] sm:$0xff] %v3924_v24 }
 0x2d2 PF: > { %s15_s19 = sadd.s32 1, %s5049_s19   ;;  %s6167_s15 = smov %s5037_s16 }
 0x2d3   : > { %p12_p11 = scmp.ge.s32.totalorder %s15_s19, 4   ;;  %s6168_s16 = smov %s5117_s24 }
 0x2d4   : > { %s6169_s17 = smov %s5045_s18  ;;  %s6170_s18 = smov %s6172_s3 }
 0x2d5   :  { %14 = sbr.rel (!%p12_p11) target bundleno = 3 (0x3), region = 138 }

// kernel: edsr_forward.13
= control target key start
LH: loop header
LB: loop body
LE: loop exit
PB: predicated region body
PF: predicated region fallthrough
CT: control target
= control target key end

     0   :  { %s1362_s15 = smov 0   ;;  %s1364_s16 = smov 0   ;;  %s1582_s0 = inlined_call_operand.vmem [shape: bf16[32,384], index: 0, kind: input, shape index: {}]   ;;  %s1583_s1 = inlined_call_operand.vmem [shape: bf16[288,512], index: 1, kind: input, shape index: {}]   ;;  %s1584_s2 = inlined_call_operand.vmem [shape: f32[32,1], index: 2, kind: input, shape index: {}]   ;;  %s1585_s3 = inlined_call_operand.<no memory space> [shape: f32[1], index: 3, kind: input, shape index: {}]   ;;  %s1586_s4 = inlined_call_operand.vmem [shape: bf16[32,512], index: 4, kind: output, shape index: {}]  }
   0x1   :  { %s1366_s17 = smov 0   ;;  %s1368_s18 = smov 0  }
   0x2   :  { %s1370_s19 = smov 0  }
   0x3 LB: > { %s27_s3 = sadd.s32 1, %s1330_s18  ;;  %s1106_s20 = sadd.s32 4294967295, %s1334_s19   ;;  %s1334_s19 = sphi %s1370_s19, %s15_s19   ;;  %s1330_s18 = sphi %s1368_s18, %s1591_s18   ;;  %s1326_s17 = sphi %s1366_s17, %s1590_s17   ;;  %s1322_s16 = sphi %s1364_s16, %s1589_s16   ;;  %s1318_s15 = sphi %s1362_s15, %s1588_s15  }
   0x4   : > { %p29_p0 = scmp.ge.s32.totalorder %s27_s3, 2  ;;  %p67_p1 = scmp.ne.s32.totalorder %s1322_s16, %s1318_s15 }
   0x5   : > { %p68_p2 = scmp.eq.s32.totalorder %s1334_s19, 0  ;;  %p146_p4 = scmp.eq.s32.totalorder %s1106_s20, 1 }
   0x6   : > { %s1593_s3 = smov (%p29_p0, %s27_s3), 0  ;;  %s60_s22 = sadd.s32 1, %s1322_s16 }
   0x7   : > { %p69_p3 = por %p68_p2, %p67_p1  ;;  %s57_s21 = ssub.s32 %s1330_s18, %s1593_s3 }
   0x8   : > { %p58_p5 = scmp.eq.s32.totalorder %s57_s21, 0  ;;  %p1397_p6 = por %p146_p4, %p67_p1 }
   0x9   : > { %p1111_p7 = scmp.ge.s32.totalorder %s1334_s19, 2 }
   0xa   : > { %s1402_s24 = scalar_select %p58_p5, %s1322_s16, %s60_s22  }
   0xb   : > { %190 = sbr.rel (%p1111_p7) target bundleno = 40 (0x28), region = 28 }
  0x12   : > { %193 = sbr.rel (!%p69_p3) target bundleno = 40 (0x28), region = 32  ;;  %s195_s25 = sand.u32 (%p69_p3), 1, %s1322_s16  }
  0x13   : > { %s1167_s26 = sshll.u32 (%p69_p3), %s1330_s18, 3  ;;  %s1189_s27 = smul.u32 (%p69_p3), 288, %s195_s25 }
  0x14   : > { %s1410_s30 = scalar_lea.vmem (%p69_p3), %s1583_s1, %s1167_s26 }
  0x15   : > { %v298_v0 = vld [vmem:[%s1410_s30] sm:$0xff] (%p69_p3)  ;;  %v300_v1 = vld [vmem:[%s1410_s30 + $0x10] sm:$0xff] (%p69_p3)  ;;  %s1418_s5 = scalar_lea.vmem (%p69_p3), [#allocation4], %s1189_s27 }
  0x16   : > { %v302_v2 = vld [vmem:[%s1410_s30 + $0x20] sm:$0xff] (%p69_p3)  ;;  %v304_v3 = vld [vmem:[%s1410_s30 + $0x30] sm:$0xff] (%p69_p3)  ;;  %299 = vst [vmem:[%s1418_s5] sm:$0xff] (%p69_p3), %v298_v0  ;;  %301 = vst [vmem:[%s1418_s5 + $0x8] sm:$0xff] (%p69_p3), %v300_v1 }
  0x17   : > { %v306_v4 = vld [vmem:[%s1410_s30 + $0x40] sm:$0xff] (%p69_p3)  ;;  %v308_v5 = vld [vmem:[%s1410_s30 + $0x50] sm:$0xff] (%p69_p3)  ;;  %303 = vst [vmem:[%s1418_s5 + $0x10] sm:$0xff] (%p69_p3), %v302_v2  ;;  %305 = vst [vmem:[%s1418_s5 + $0x18] sm:$0xff] (%p69_p3), %v304_v3 }
  0x18   : > { %307 = vst [vmem:[%s1418_s5 + $0x20] sm:$0xff] (%p69_p3), %v306_v4  ;;  %309 = vst [vmem:[%s1418_s5 + $0x28] sm:$0xff] (%p69_p3), %v308_v5  ;;  %v310_v6 = vld [vmem:[%s1410_s30 + $0x60] sm:$0xff] (%p69_p3)  ;;  %v312_v7 = vld [vmem:[%s1410_s30 + $0x70] sm:$0xff] (%p69_p3) }
  0x19   : > { %v314_v8 = vld [vmem:[%s1410_s30 + $0x80] sm:$0xff]  ;;  %311 = vst [vmem:[%s1418_s5 + $0x30] sm:$0xff] %v310_v6  ;;  %313 = vst [vmem:[%s1418_s5 + $0x38] sm:$0xff] %v312_v7  ;;  %v316_v9 = vld [vmem:[%s1410_s30 + $0x90] sm:$0xff] }
  0x1a   : > { %315 = vst [vmem:[%s1418_s5 + $0x40] sm:$0xff] %v314_v8  ;;  %v318_v10 = vld [vmem:[%s1410_s30 + $0xa0] sm:$0xff]  ;;  %v320_v11 = vld [vmem:[%s1410_s30 + $0xb0] sm:$0xff]  ;;  %317 = vst [vmem:[%s1418_s5 + $0x48] sm:$0xff] %v316_v9 }
  0x1b   : > { %319 = vst [vmem:[%s1418_s5 + $0x50] sm:$0xff] %v318_v10  ;;  %321 = vst [vmem:[%s1418_s5 + $0x58] sm:$0xff] %v320_v11  ;;  %v322_v12 = vld [vmem:[%s1410_s30 + $0xc0] sm:$0xff]  ;;  %v324_v13 = vld [vmem:[%s1410_s30 + $0xd0] sm:$0xff] }
  0x1c   : > { %v326_v14 = vld [vmem:[%s1410_s30 + $0xe0] sm:$0xff]  ;;  %323 = vst [vmem:[%s1418_s5 + $0x60] sm:$0xff] %v322_v12  ;;  %325 = vst [vmem:[%s1418_s5 + $0x68] sm:$0xff] %v324_v13  ;;  %v328_v15 = vld [vmem:[%s1410_s30 + $0xf0] sm:$0xff] }
  0x1d   : > { %327 = vst [vmem:[%s1418_s5 + $0x70] sm:$0xff] %v326_v14  ;;  %v330_v16 = vld [vmem:[%s1410_s30 + $0x100] sm:$0xff]  ;;  %v332_v17 = vld [vmem:[%s1410_s30 + $0x110] sm:$0xff]  ;;  %329 = vst [vmem:[%s1418_s5 + $0x78] sm:$0xff] %v328_v15 }
  0x1e   : > { %331 = vst [vmem:[%s1418_s5 + $0x80] sm:$0xff] %v330_v16  ;;  %333 = vst [vmem:[%s1418_s5 + $0x88] sm:$0xff] %v332_v17  ;;  %v334_v18 = vld [vmem:[%s1410_s30 + $0x120] sm:$0xff]  ;;  %v336_v19 = vld [vmem:[%s1410_s30 + $0x130] sm:$0xff] }
  0x1f   : > { %v338_v20 = vld [vmem:[%s1410_s30 + $0x140] sm:$0xff]  ;;  %335 = vst [vmem:[%s1418_s5 + $0x90] sm:$0xff] %v334_v18  ;;  %337 = vst [vmem:[%s1418_s5 + $0x98] sm:$0xff] %v336_v19  ;;  %v340_v21 = vld [vmem:[%s1410_s30 + $0x150] sm:$0xff] }
  0x20   : > { %339 = vst [vmem:[%s1418_s5 + $0xa0] sm:$0xff] %v338_v20  ;;  %v342_v22 = vld [vmem:[%s1410_s30 + $0x160] sm:$0xff]  ;;  %v344_v23 = vld [vmem:[%s1410_s30 + $0x170] sm:$0xff]  ;;  %341 = vst [vmem:[%s1418_s5 + $0xa8] sm:$0xff] %v340_v21 }
  0x21   : > { %343 = vst [vmem:[%s1418_s5 + $0xb0] sm:$0xff] %v342_v22  ;;  %345 = vst [vmem:[%s1418_s5 + $0xb8] sm:$0xff] %v344_v23  ;;  %v346_v24 = vld [vmem:[%s1410_s30 + $0x180] sm:$0xff]  ;;  %v348_v25 = vld [vmem:[%s1410_s30 + $0x190] sm:$0xff] }
  0x22   : > { %v350_v26 = vld [vmem:[%s1410_s30 + $0x1a0] sm:$0xff]  ;;  %347 = vst [vmem:[%s1418_s5 + $0xc0] sm:$0xff] %v346_v24  ;;  %349 = vst [vmem:[%s1418_s5 + $0xc8] sm:$0xff] %v348_v25  ;;  %v352_v27 = vld [vmem:[%s1410_s30 + $0x1b0] sm:$0xff] }
  0x23   : > { %351 = vst [vmem:[%s1418_s5 + $0xd0] sm:$0xff] %v350_v26  ;;  %v354_v28 = vld [vmem:[%s1410_s30 + $0x1c0] sm:$0xff]  ;;  %v356_v29 = vld [vmem:[%s1410_s30 + $0x1d0] sm:$0xff]  ;;  %353 = vst [vmem:[%s1418_s5 + $0xd8] sm:$0xff] %v352_v27 }
  0x24   : > { %355 = vst [vmem:[%s1418_s5 + $0xe0] sm:$0xff] %v354_v28  ;;  %357 = vst [vmem:[%s1418_s5 + $0xe8] sm:$0xff] %v356_v29  ;;  %v358_v30 = vld [vmem:[%s1410_s30 + $0x1e0] sm:$0xff]  ;;  %v360_v31 = vld [vmem:[%s1410_s30 + $0x1f0] sm:$0xff] }
  0x25   : > { %v362_v32 = vld [vmem:[%s1410_s30 + $0x200] sm:$0xff]  ;;  %359 = vst [vmem:[%s1418_s5 + $0xf0] sm:$0xff] %v358_v30  ;;  %361 = vst [vmem:[%s1418_s5 + $0xf8] sm:$0xff] %v360_v31  ;;  %v364_v33 = vld [vmem:[%s1410_s30 + $0x210] sm:$0xff] }
  0x26   : > { %363 = vst [vmem:[%s1418_s5 + $0x100] sm:$0xff] %v362_v32  ;;  %v366_v34 = vld [vmem:[%s1410_s30 + $0x220] sm:$0xff]  ;;  %v368_v35 = vld [vmem:[%s1410_s30 + $0x230] sm:$0xff]  ;;  %365 = vst [vmem:[%s1418_s5 + $0x108] sm:$0xff] %v364_v33 }
  0x27   : > { %367 = vst [vmem:[%s1418_s5 + $0x110] sm:$0xff] %v366_v34  ;;  %369 = vst [vmem:[%s1418_s5 + $0x118] sm:$0xff] %v368_v35 }
  0x28 PF: > { %p1114_p8 = scmp.ge.s32.totalorder %s1334_s19, 1  ;;  %p374_p9 = scmp.lt.s32.totalorder %s1334_s19, 3 }
  0x2a   : > { %p375_p10 = pnand %p1114_p8, %p374_p9 }
  0x2b   : > { %s381_s6 = sand.u32 (!%p375_p10), 1, %s1318_s15   ;;  %v1336_v36 = vmov (!%p375_p10), 0   ;;  %v1290_v37 = vld [vmem:[%s1582_s0 + $0x4] ss:$12 sps:$4 sm:$0xff] (!%p375_p10)   ;;  %v1291_v58 = vld [vmem:[%s1582_s0 + $0x8] ss:$12 sps:$4 sm:$0xff] (!%p375_p10)  }
  0x2c   : > { %378 = sbr.rel (%p375_p10) target bundleno = 353 (0x161), region = 70  ;;  %894 = vmatprep.mubr.bf16.mxu0 (!%p375_p10), %v1336_v36  ;;  %1232 = vset.pattern.permute.xlu0 (!%p375_p10), %v1336_v36  ;;  %v753_v38 = vld [vmem:[%s1584_s2] sm:$0xff] (!%p375_p10)  ;;  %v754_v59 = vld [vmem:[%s1584_s2 + $0x8] sm:$0xff] (!%p375_p10)  ;;  %v755_v60 = vld [vmem:[%s1584_s2 + $0x10] sm:$0xff] (!%p375_p10)  ;;  %s1115_s11 = sshll.u32 (!%p375_p10), %s381_s6, 5 }
  0x2d   : > { %s1190_s7 = smul.u32 (!%p375_p10), 288, %s381_s6  ;;  %1233 = vset.pattern.permute.xlu1 (!%p375_p10), %v1336_v36  ;;  %841 = vmatprep.mubr.bf16.mxu1 (!%p375_p10), %v1290_v37  ;;  %v756_v63 = vld [vmem:[%s1584_s2 + $0x18] sm:$0xff] (!%p375_p10)  ;;  %v1294_v2 = vld [vmem:[%s1582_s0 + $0x20] ss:$12 sps:$4 sm:$0xff] (!%p375_p10)  }
  0x2e   : > { %759 = vperm.xlu0 (!%p375_p10), %1232, %v753_v38   ;;  %769 = vperm.xlu1 (!%p375_p10), %1233, %v755_v60   ;;  %v1288_v16 = vld [vmem:[%s1582_s0] ss:$12 sps:$4 sm:$0xff] (!%p375_p10)   ;;  %v1292_v17 = vld [vmem:[%s1582_s0 + $0x1c] ss:$12 sps:$4 sm:$0xff] (!%p375_p10)   ;;  %v1295_v18 = vld [vmem:[%s1582_s0 + $0x18] ss:$12 sps:$4 sm:$0xff] (!%p375_p10)  }
  0x2f   : > { %s1497_s12 = scalar_lea.vmem (!%p375_p10), [#allocation4], %s1190_s7 }
  0x30   : > { %v1234_v39 = vld [vmem:[%s1497_s12 + $0x4] ss:$8 sps:$4 sm:$0xff] (!%p375_p10)   ;;  %v1236_v40 = vld [vmem:[%s1497_s12] ss:$8 sps:$4 sm:$0xff] (!%p375_p10)   ;;  %v1237_v41 = vld [vmem:[%s1497_s12 + $0x14] ss:$8 sps:$4 sm:$0xff] (!%p375_p10)  }
  0x31   : > { %809 = vmatprep.subr.bf16.mxu1 (!%p375_p10), %v1234_v39  ;;  %v1239_v42 = vld [vmem:[%s1497_s12 + $0x10] ss:$8 sps:$4 sm:$0xff] (!%p375_p10)   ;;  %v1240_v43 = vld [vmem:[%s1497_s12 + $0x24] ss:$8 sps:$4 sm:$0xff] (!%p375_p10)   ;;  %v1242_v44 = vld [vmem:[%s1497_s12 + $0x20] ss:$8 sps:$4 sm:$0xff] (!%p375_p10)  }
  0x32   : > { %810 = vmatpush1.bf16.msra.mxu1 (!%p375_p10), %v1236_v40  ;;  %v1243_v45 = vld [vmem:[%s1497_s12 + $0x34] ss:$8 sps:$4 sm:$0xff] (!%p375_p10)   ;;  %v1245_v46 = vld [vmem:[%s1497_s12 + $0x30] ss:$8 sps:$4 sm:$0xff] (!%p375_p10)   ;;  %v1246_v47 = vld [vmem:[%s1497_s12 + $0x44] ss:$8 sps:$4 sm:$0xff] (!%p375_p10)   ;;  %764 = vperm.xlu0 (!%p375_p10), %1232, %v754_v59  }
  0x33   : > { %811 = vmatprep.subr.bf16.mxu1 %v1237_v41  ;;  %v1248_v48 = vld [vmem:[%s1497_s12 + $0x40] ss:$8 sps:$4 sm:$0xff]   ;;  %v1249_v49 = vld [vmem:[%s1497_s12 + $0x54] ss:$8 sps:$4 sm:$0xff]   ;;  %v1251_v50 = vld [vmem:[%s1497_s12 + $0x50] ss:$8 sps:$4 sm:$0xff]   ;;  %774 = vperm.xlu1 %1233, %v756_v63  }
  0x34   : > { %v1276_v51 = vld [vmem:[%s1497_s12 + $0x104] ss:$8 sps:$4 sm:$0xff]   ;;  %v1280_v53 = vld [vmem:[%s1497_s12 + $0x100] ss:$8 sps:$4 sm:$0xff]   ;;  %v1282_v54 = vld [vmem:[%s1497_s12 + $0x114] ss:$8 sps:$4 sm:$0xff]  }
  0x35   : > { %v1252_v52 = vld [vmem:[%s1497_s12 + $0x64] ss:$8 sps:$4 sm:$0xff]   ;;  %862 = vmatprep.subr.bf16.mxu0 %v1276_v51  ;;  %v1254_v55 = vld [vmem:[%s1497_s12 + $0x60] ss:$8 sps:$4 sm:$0xff]   ;;  %v1286_v56 = vld [vmem:[%s1497_s12 + $0x110] ss:$8 sps:$4 sm:$0xff]  }
  0x36   : > { %812 = vmatpush1.bf16.msra.mxu1 %v1239_v42  ;;  %863 = vmatpush1.bf16.msra.mxu0 %v1280_v53  ;;  %v1255_v57 = vld [vmem:[%s1497_s12 + $0x74] ss:$8 sps:$4 sm:$0xff]   ;;  %v1257_v61 = vld [vmem:[%s1497_s12 + $0x70] ss:$8 sps:$4 sm:$0xff]   ;;  %v1258_v62 = vld [vmem:[%s1497_s12 + $0x84] ss:$8 sps:$4 sm:$0xff]  }
  0x37   : > { %813 = vmatprep.subr.bf16.mxu1 %v1240_v43  ;;  %864 = vmatprep.subr.bf16.mxu0 %v1282_v54  ;;  %v1260_v0 = vld [vmem:[%s1497_s12 + $0x80] ss:$8 sps:$4 sm:$0xff]   ;;  %v1261_v1 = vld [vmem:[%s1497_s12 + $0x94] ss:$8 sps:$4 sm:$0xff]   ;;  %v1263_v3 = vld [vmem:[%s1497_s12 + $0x90] ss:$8 sps:$4 sm:$0xff]  }
  0x38   : > { %v1264_v4 = vld [vmem:[%s1497_s12 + $0xa4] ss:$8 sps:$4 sm:$0xff]   ;;  %v1266_v5 = vld [vmem:[%s1497_s12 + $0xa0] ss:$8 sps:$4 sm:$0xff]   ;;  %v1267_v6 = vld [vmem:[%s1497_s12 + $0xb4] ss:$8 sps:$4 sm:$0xff]  }
  0x39   : > { %v1269_v7 = vld [vmem:[%s1497_s12 + $0xb0] ss:$8 sps:$4 sm:$0xff]   ;;  %v1270_v8 = vld [vmem:[%s1497_s12 + $0xc4] ss:$8 sps:$4 sm:$0xff]   ;;  %v1272_v9 = vld [vmem:[%s1497_s12 + $0xc0] ss:$8 sps:$4 sm:$0xff]  }
  0x3a   : > { %814 = vmatpush1.bf16.msra.mxu1 %v1242_v44  ;;  %865 = vmatpush1.bf16.msra.mxu0 %v1286_v56  ;;  %v1273_v10 = vld [vmem:[%s1497_s12 + $0xd4] ss:$8 sps:$4 sm:$0xff]   ;;  %v1275_v11 = vld [vmem:[%s1497_s12 + $0xd0] ss:$8 sps:$4 sm:$0xff]   ;;  %v1278_v12 = vld [vmem:[%s1497_s12 + $0xe4] ss:$8 sps:$4 sm:$0xff]  }
  0x3b   : > { %815 = vmatprep.subr.bf16.mxu1 %v1243_v45  ;;  %v1281_v13 = vld [vmem:[%s1497_s12 + $0xe0] ss:$8 sps:$4 sm:$0xff]   ;;  %v1284_v14 = vld [vmem:[%s1497_s12 + $0xf4] ss:$8 sps:$4 sm:$0xff]   ;;  %v1287_v15 = vld [vmem:[%s1497_s12 + $0xf0] ss:$8 sps:$4 sm:$0xff]  }
  0x3c   : > { %s415_s12 = scalar_lea.vmem [#allocation5], %s1115_s11  ;;  %s1172_s15 = sshll.u32 (%p1397_p6), %s1326_s17, 3 }
  0x3d   : > { %895 = vmatmul.mubr.bf16.vlgmr.msra.gmra.mrb[0].mxu0 %v1291_v58  ;;  %s963_s14 = scalar_lea.vmem (%p1397_p6), %s1586_s4, %s1172_s15 }
  0x3e   : > { %816 = vmatpush1.bf16.msra.mxu1 %v1245_v46  ;;  %904 = vmatprep.mubr.bf16.mxu0 %v1336_v36 }
  0x3f   : > { %817 = vmatprep.subr.bf16.mxu1 %v1246_v47 }
  0x42   : > { %818 = vmatpush1.bf16.msra.mxu1 %v1248_v48 }
  0x43   : > { %819 = vmatprep.subr.bf16.mxu1 %v1249_v49 }
  0x45   : > { %905 = vmatmul.mubr.bf16.gmra.mrb[4].mxu0 %v1294_v2 }
  0x46   : > { %820 = vmatpush1.bf16.msra.mxu1 %v1251_v50 }
  0x47   : > { %821 = vmatprep.subr.bf16.mxu1 %v1252_v52 }
  0x4a   : > { %822 = vmatpush1.bf16.msra.mxu1 %v1254_v55 }
  0x4b   : > { %823 = vmatprep.subr.bf16.mxu1 %v1255_v57 }
  0x4e   : > { %824 = vmatpush1.bf16.msra.mxu1 %v1257_v61 }
  0x4f   : > { %825 = vmatprep.subr.bf16.mxu1 %v1258_v62 }
  0x52   : > { %826 = vmatpush1.bf16.msra.mxu1 %v1260_v0 }
  0x53   : > { %827 = vmatprep.subr.bf16.mxu1 %v1261_v1 }
  0x56   : > { %828 = vmatpush1.bf16.msra.mxu1 %v1263_v3 }
  0x57   : > { %829 = vmatprep.subr.bf16.mxu1 %v1264_v4 }
  0x5a   : > { %830 = vmatpush1.bf16.msra.mxu1 %v1266_v5 }
  0x5b   : > { %831 = vmatprep.subr.bf16.mxu1 %v1267_v6 }
  0x5e   : > { %832 = vmatpush1.bf16.msra.mxu1 %v1269_v7 }
  0x5f   : > { %833 = vmatprep.subr.bf16.mxu1 %v1270_v8 }
  0x62   : > { %834 = vmatpush1.bf16.msra.mxu1 %v1272_v9 }
  0x63   : > { %835 = vmatprep.subr.bf16.mxu1 %v1273_v10 }
  0x66   : > { %836 = vmatpush1.bf16.msra.mxu1 %v1275_v11 }
  0x67   : > { %837 = vmatprep.subr.bf16.mxu1 %v1278_v12 }
  0x6a   : > { %838 = vmatpush1.bf16.msra.mxu1 %v1281_v13 }
  0x6b   : > { %839 = vmatprep.subr.bf16.mxu1 %v1284_v14 }
  0x6e   : > { %840 = vmatpush1.bf16.msra.mxu1 %v1287_v15 }
  0x71   : > { %842 = vmatmul.mubr.bf16.vlgmr.msra.gmra.mrb[0].mxu1 %v1288_v16 }
  0x72   : > { %851 = vmatprep.mubr.bf16.mxu1 %v1292_v17 }
  0x79   : > { %852 = vmatmul.mubr.bf16.gmra.mrb[4].mxu1 %v1295_v18 }
  0xad   : > { %v760_v27 = vpop.permute.xlu0 %759  ;;  %v770_v38 = vpop.permute.xlu1 %769 }
  0xb1   : > { %v765_v29 = vpop.permute.xlu0 %764 }
  0xb2   : > { %v775_v51 = vpop.permute.xlu1 %774 }
 0x110   : > { %v896_v19 = vpop.f32.mrb[0].mxu0 }
 0x111   : > { %v898_v20 = vpop.f32.mrb[1].mxu0 }
 0x112   : > { %v900_v21 = vpop.f32.mrb[2].mxu0 }
 0x113   : > { %v902_v22 = vpop.f32.mrb[3].mxu0 }
 0x118   : > { %v906_v23 = vpop.f32.mrb[4].mxu0 }
 0x119   : > { %v908_v24 = vpop.f32.mrb[5].mxu0 }
 0x11a   : > { %v910_v25 = vpop.f32.mrb[6].mxu0 }
 0x11b   : > { %v912_v26 = vpop.f32.mrb[7].mxu0 }
 0x144   : > { %v843_v28 = vpop.f32.mrb[0].mxu1 }
 0x145   : > { %v844_v30 = vadd.f32 %v843_v28, %v760_v27  ;;  %v845_v31 = vpop.f32.mrb[1].mxu1 }
 0x146   : > { %v846_v32 = vadd.f32 %v845_v31, %v760_v27  ;;  %v847_v33 = vpop.f32.mrb[2].mxu1 }
 0x147   : > { %v897_v34 = vadd.f32 %v896_v19, %v844_v30  ;;  %v848_v35 = vadd.f32 %v847_v33, %v765_v29  ;;  %v849_v36 = vpop.f32.mrb[3].mxu1 }
 0x148   : > { %v899_v37 = vadd.f32 %v898_v20, %v846_v32  ;;  %v850_v39 = vadd.f32 %v849_v36, %v765_v29 }
 0x149   : > { %v915_v40 = vmax.f32 %v897_v34, 0.0  ;;  %v901_v41 = vadd.f32 %v900_v21, %v848_v35 }
 0x14a   : > { %v916_v42 = vmax.f32 %v899_v37, 0.0  ;;  %v903_v43 = vadd.f32 %v902_v22, %v850_v39 }
 0x14b   : > { %v917_v44 = vmax.f32 %v901_v41, 0.0 }
 0x14c   : > { %v1168_v45 = vpack.c.bf16 %v916_v42, %v915_v40  ;;  %v918_v46 = vmax.f32 %v903_v43, 0.0  ;;  %v853_v47 = vpop.f32.mrb[4].mxu1 }
 0x14d   : > { %v854_v48 = vadd.f32 %v853_v47, %v770_v38  ;;  %v855_v49 = vpop.f32.mrb[5].mxu1 }
 0x14e   : > { %947 = vst [vmem:[%s415_s12] sm:$0xff] %v1168_v45  ;;  %v1169_v50 = vpack.c.bf16 %v918_v46, %v917_v44  ;;  %v856_v52 = vadd.f32 %v855_v49, %v770_v38  ;;  %v857_v53 = vpop.f32.mrb[6].mxu1 }
 0x14f   : > { %v907_v54 = vadd.f32 %v906_v23, %v854_v48  ;;  %v858_v55 = vadd.f32 %v857_v53, %v775_v51  ;;  %v859_v56 = vpop.f32.mrb[7].mxu1 }
 0x150   : > { %948 = vst [vmem:[%s415_s12 + $0x8] sm:$0xff] %v1169_v50  ;;  %v909_v57 = vadd.f32 %v908_v24, %v856_v52  ;;  %v860_v58 = vadd.f32 %v859_v56, %v775_v51 }
 0x151   : > { %v919_v59 = vmax.f32 %v907_v54, 0.0  ;;  %v911_v60 = vadd.f32 %v910_v25, %v858_v55 }
 0x152   : > { %v920_v61 = vmax.f32 %v909_v57, 0.0  ;;  %v913_v62 = vadd.f32 %v912_v26, %v860_v58  ;;  %957 = sbr.rel (!%p1397_p6) target bundleno = 353 (0x161), region = 78 }
 0x153   : > { %v921_v63 = vmax.f32 %v911_v60, 0.0 }
 0x154   : > { %v1170_v0 = vpack.c.bf16 %v920_v61, %v919_v59  ;;  %v922_v1 = vmax.f32 %v913_v62, 0.0 }
 0x155   : > { %v997_v3 = vld [vmem:[%s415_s12] sm:$0xff] (%p1397_p6) }
 0x156   : > { %949 = vst [vmem:[%s415_s12 + $0x10] sm:$0xff] %v1170_v0  ;;  %v1171_v2 = vpack.c.bf16 %v922_v1, %v921_v63  ;;  %998 = vst [vmem:[%s963_s14] sm:$0xff] (%p1397_p6), %v997_v3 }
 0x157   : > { %v999_v4 = vld [vmem:[%s415_s12 + $0x8] sm:$0xff] (%p1397_p6) }
 0x158   : > { %950 = vst [vmem:[%s415_s12 + $0x18] sm:$0xff] %v1171_v2  ;;  %1000 = vst [vmem:[%s963_s14 + $0x10] sm:$0xff] (%p1397_p6), %v999_v4 }
 0x15d   : > { %v1001_v5 = vld [vmem:[%s415_s12 + $0x10] sm:$0xff] }
 0x15e   : > { %1002 = vst [vmem:[%s963_s14 + $0x20] sm:$0xff] %v1001_v5 }
 0x15f   : > { %v1003_v6 = vld [vmem:[%s415_s12 + $0x18] sm:$0xff] }
 0x160   : > { %1004 = vst [vmem:[%s963_s14 + $0x30] sm:$0xff] %v1003_v6 }
 0x161 PF: > { %s15_s19 = sadd.s32 1, %s1334_s19   ;;  %s1588_s15 = smov %s1322_s16 }
 0x162   : > { %p12_p11 = scmp.ge.s32.totalorder %s15_s19, 4   ;;  %s1589_s16 = smov %s1402_s24 }
 0x163   : > { %s1590_s17 = smov %s1330_s18  ;;  %s1591_s18 = smov %s1593_s3 }
 0x164   :  { %14 = sbr.rel (!%p12_p11) target bundleno = 3 (0x3), region = 153 }

// kernel: edsr_forward.17
= control target key start
LH: loop header
LB: loop body
LE: loop exit
PB: predicated region body
PF: predicated region fallthrough
CT: control target
= control target key end

     0   :  { %s1448_s18 = smov 0   ;;  %s1450_s19 = smov 0   ;;  %s1709_s0 = inlined_call_operand.vmem [shape: bf16[32,384], index: 0, kind: input, shape index: {}]   ;;  %s1710_s1 = inlined_call_operand.vmem [shape: bf16[288,512], index: 1, kind: input, shape index: {}]   ;;  %s1711_s2 = inlined_call_operand.vmem [shape: f32[32,1], index: 2, kind: input, shape index: {}]   ;;  %s1712_s3 = inlined_call_operand.<no memory space> [shape: f32[1], index: 3, kind: input, shape index: {}]   ;;  %s1713_s4 = inlined_call_operand.vmem [shape: f32[32,512], index: 4, kind: input, shape index: {}]   ;;  %s1714_s5 = inlined_call_operand.vmem [shape: f32[32,512], index: 5, kind: output, shape index: {}]  }
   0x1   :  { %s1452_s20 = smov 0   ;;  %s1454_s21 = smov 0  }
   0x2   :  { %s1456_s22 = smov 0  }
   0x3 LB: > { %s28_s3 = sadd.s32 1, %s1411_s21  ;;  %s1190_s23 = sadd.s32 4294967295, %s1415_s22   ;;  %s1415_s22 = sphi %s1456_s22, %s16_s22   ;;  %s1411_s21 = sphi %s1454_s21, %s1720_s21   ;;  %s1407_s20 = sphi %s1452_s20, %s1719_s20   ;;  %s1403_s19 = sphi %s1450_s19, %s1718_s19   ;;  %s1399_s18 = sphi %s1448_s18, %s1717_s18  }
   0x4   : > { %p30_p0 = scmp.ge.s32.totalorder %s28_s3, 2  ;;  %p68_p1 = scmp.ne.s32.totalorder %s1403_s19, %s1399_s18 }
   0x5   : > { %p69_p2 = scmp.eq.s32.totalorder %s1415_s22, 0  ;;  %p175_p4 = scmp.eq.s32.totalorder %s1190_s23, 1 }
   0x6   : > { %s1722_s3 = smov (%p30_p0, %s28_s3), 0  ;;  %s61_s26 = sadd.s32 1, %s1403_s19 }
   0x7   : > { %p1480_p3 = por %p69_p2, %p68_p1  ;;  %s58_s25 = ssub.s32 %s1411_s21, %s1722_s3 }
   0x8   : > { %p59_p5 = scmp.eq.s32.totalorder %s58_s25, 0  ;;  %p1487_p6 = por %p175_p4, %p68_p1 }
   0x9   : > { %p1195_p7 = scmp.ge.s32.totalorder %s1415_s22, 2 }
   0xa   : > { %s1492_s28 = scalar_select %p59_p5, %s1403_s19, %s61_s26  }
   0xb   : > { %219 = sbr.rel (%p1195_p7) target bundleno = 48 (0x30), region = 28 }
  0x12   : > { %222 = sbr.rel (!%p1480_p3) target bundleno = 40 (0x28), region = 32  ;;  %s224_s29 = sand.u32 (%p1480_p3), 1, %s1403_s19  }
  0x13   : > { %s1251_s30 = sshll.u32 (%p1480_p3), %s1411_s21, 3  ;;  %s1270_s6 = smul.u32 (%p1480_p3), 288, %s224_s29 }
  0x14   : > { %s1502_s9 = scalar_lea.vmem (%p1480_p3), %s1710_s1, %s1251_s30 }
  0x15   : > { %v327_v0 = vld [vmem:[%s1502_s9] sm:$0xff] (%p1480_p3)  ;;  %v329_v1 = vld [vmem:[%s1502_s9 + $0x10] sm:$0xff] (%p1480_p3)  ;;  %s1510_s10 = scalar_lea.vmem (%p1480_p3), [#allocation4], %s1270_s6 }
  0x16   : > { %v331_v2 = vld [vmem:[%s1502_s9 + $0x20] sm:$0xff] (%p1480_p3)  ;;  %v333_v3 = vld [vmem:[%s1502_s9 + $0x30] sm:$0xff] (%p1480_p3)  ;;  %328 = vst [vmem:[%s1510_s10] sm:$0xff] (%p1480_p3), %v327_v0  ;;  %330 = vst [vmem:[%s1510_s10 + $0x8] sm:$0xff] (%p1480_p3), %v329_v1 }
  0x17   : > { %v335_v4 = vld [vmem:[%s1502_s9 + $0x40] sm:$0xff] (%p1480_p3)  ;;  %v337_v5 = vld [vmem:[%s1502_s9 + $0x50] sm:$0xff] (%p1480_p3)  ;;  %332 = vst [vmem:[%s1510_s10 + $0x10] sm:$0xff] (%p1480_p3), %v331_v2  ;;  %334 = vst [vmem:[%s1510_s10 + $0x18] sm:$0xff] (%p1480_p3), %v333_v3 }
  0x18   : > { %336 = vst [vmem:[%s1510_s10 + $0x20] sm:$0xff] (%p1480_p3), %v335_v4  ;;  %338 = vst [vmem:[%s1510_s10 + $0x28] sm:$0xff] (%p1480_p3), %v337_v5  ;;  %v339_v6 = vld [vmem:[%s1502_s9 + $0x60] sm:$0xff] (%p1480_p3)  ;;  %v341_v7 = vld [vmem:[%s1502_s9 + $0x70] sm:$0xff] (%p1480_p3) }
  0x19   : > { %v343_v8 = vld [vmem:[%s1502_s9 + $0x80] sm:$0xff]  ;;  %340 = vst [vmem:[%s1510_s10 + $0x30] sm:$0xff] %v339_v6  ;;  %342 = vst [vmem:[%s1510_s10 + $0x38] sm:$0xff] %v341_v7  ;;  %v345_v9 = vld [vmem:[%s1502_s9 + $0x90] sm:$0xff] }
  0x1a   : > { %344 = vst [vmem:[%s1510_s10 + $0x40] sm:$0xff] %v343_v8  ;;  %v347_v10 = vld [vmem:[%s1502_s9 + $0xa0] sm:$0xff]  ;;  %v349_v11 = vld [vmem:[%s1502_s9 + $0xb0] sm:$0xff]  ;;  %346 = vst [vmem:[%s1510_s10 + $0x48] sm:$0xff] %v345_v9 }
  0x1b   : > { %348 = vst [vmem:[%s1510_s10 + $0x50] sm:$0xff] %v347_v10  ;;  %350 = vst [vmem:[%s1510_s10 + $0x58] sm:$0xff] %v349_v11  ;;  %v351_v12 = vld [vmem:[%s1502_s9 + $0xc0] sm:$0xff]  ;;  %v353_v13 = vld [vmem:[%s1502_s9 + $0xd0] sm:$0xff] }
  0x1c   : > { %v355_v14 = vld [vmem:[%s1502_s9 + $0xe0] sm:$0xff]  ;;  %352 = vst [vmem:[%s1510_s10 + $0x60] sm:$0xff] %v351_v12  ;;  %354 = vst [vmem:[%s1510_s10 + $0x68] sm:$0xff] %v353_v13  ;;  %v357_v15 = vld [vmem:[%s1502_s9 + $0xf0] sm:$0xff] }
  0x1d   : > { %356 = vst [vmem:[%s1510_s10 + $0x70] sm:$0xff] %v355_v14  ;;  %v359_v16 = vld [vmem:[%s1502_s9 + $0x100] sm:$0xff]  ;;  %v361_v17 = vld [vmem:[%s1502_s9 + $0x110] sm:$0xff]  ;;  %358 = vst [vmem:[%s1510_s10 + $0x78] sm:$0xff] %v357_v15 }
  0x1e   : > { %360 = vst [vmem:[%s1510_s10 + $0x80] sm:$0xff] %v359_v16  ;;  %362 = vst [vmem:[%s1510_s10 + $0x88] sm:$0xff] %v361_v17  ;;  %v363_v18 = vld [vmem:[%s1502_s9 + $0x120] sm:$0xff]  ;;  %v365_v19 = vld [vmem:[%s1502_s9 + $0x130] sm:$0xff] }
  0x1f   : > { %v367_v20 = vld [vmem:[%s1502_s9 + $0x140] sm:$0xff]  ;;  %364 = vst [vmem:[%s1510_s10 + $0x90] sm:$0xff] %v363_v18  ;;  %366 = vst [vmem:[%s1510_s10 + $0x98] sm:$0xff] %v365_v19  ;;  %v369_v21 = vld [vmem:[%s1502_s9 + $0x150] sm:$0xff] }
  0x20   : > { %368 = vst [vmem:[%s1510_s10 + $0xa0] sm:$0xff] %v367_v20  ;;  %v371_v22 = vld [vmem:[%s1502_s9 + $0x160] sm:$0xff]  ;;  %v373_v23 = vld [vmem:[%s1502_s9 + $0x170] sm:$0xff]  ;;  %370 = vst [vmem:[%s1510_s10 + $0xa8] sm:$0xff] %v369_v21 }
  0x21   : > { %372 = vst [vmem:[%s1510_s10 + $0xb0] sm:$0xff] %v371_v22  ;;  %374 = vst [vmem:[%s1510_s10 + $0xb8] sm:$0xff] %v373_v23  ;;  %v375_v24 = vld [vmem:[%s1502_s9 + $0x180] sm:$0xff]  ;;  %v377_v25 = vld [vmem:[%s1502_s9 + $0x190] sm:$0xff] }
  0x22   : > { %v379_v26 = vld [vmem:[%s1502_s9 + $0x1a0] sm:$0xff]  ;;  %376 = vst [vmem:[%s1510_s10 + $0xc0] sm:$0xff] %v375_v24  ;;  %378 = vst [vmem:[%s1510_s10 + $0xc8] sm:$0xff] %v377_v25  ;;  %v381_v27 = vld [vmem:[%s1502_s9 + $0x1b0] sm:$0xff] }
  0x23   : > { %380 = vst [vmem:[%s1510_s10 + $0xd0] sm:$0xff] %v379_v26  ;;  %v383_v28 = vld [vmem:[%s1502_s9 + $0x1c0] sm:$0xff]  ;;  %v385_v29 = vld [vmem:[%s1502_s9 + $0x1d0] sm:$0xff]  ;;  %382 = vst [vmem:[%s1510_s10 + $0xd8] sm:$0xff] %v381_v27 }
  0x24   : > { %384 = vst [vmem:[%s1510_s10 + $0xe0] sm:$0xff] %v383_v28  ;;  %386 = vst [vmem:[%s1510_s10 + $0xe8] sm:$0xff] %v385_v29  ;;  %v387_v30 = vld [vmem:[%s1502_s9 + $0x1e0] sm:$0xff]  ;;  %v389_v31 = vld [vmem:[%s1502_s9 + $0x1f0] sm:$0xff] }
  0x25   : > { %v391_v32 = vld [vmem:[%s1502_s9 + $0x200] sm:$0xff]  ;;  %388 = vst [vmem:[%s1510_s10 + $0xf0] sm:$0xff] %v387_v30  ;;  %390 = vst [vmem:[%s1510_s10 + $0xf8] sm:$0xff] %v389_v31  ;;  %v393_v33 = vld [vmem:[%s1502_s9 + $0x210] sm:$0xff] }
  0x26   : > { %392 = vst [vmem:[%s1510_s10 + $0x100] sm:$0xff] %v391_v32  ;;  %v395_v34 = vld [vmem:[%s1502_s9 + $0x220] sm:$0xff]  ;;  %v397_v35 = vld [vmem:[%s1502_s9 + $0x230] sm:$0xff]  ;;  %394 = vst [vmem:[%s1510_s10 + $0x108] sm:$0xff] %v393_v33 }
  0x27   : > { %396 = vst [vmem:[%s1510_s10 + $0x110] sm:$0xff] %v395_v34  ;;  %398 = vst [vmem:[%s1510_s10 + $0x118] sm:$0xff] %v397_v35 }
  0x28 PF: > { %404 = sbr.rel (!%p1480_p3) target bundleno = 48 (0x30), region = 70  ;;  %s406_s11 = sand.u32 (%p1480_p3), 1, %s1403_s19  }
  0x29   : > { %s1252_s12 = sshll.u32 (%p1480_p3), %s1411_s21, 4  ;;  %s1198_s13 = sshll.u32 (%p1480_p3), %s406_s11, 6 }
  0x2a   : > { %s414_s16 = scalar_lea.vmem (%p1480_p3), %s1713_s4, %s1252_s12  ;;  %s408_s17 = scalar_lea.vmem (%p1480_p3), [#allocation5], %s1198_s13 }
  0x2b   : > { %v427_v36 = vld [vmem:[%s414_s16] sm:$0xff] (%p1480_p3)  ;;  %v429_v37 = vld [vmem:[%s414_s16 + $0x8] sm:$0xff] (%p1480_p3) }
  0x2c   : > { %v431_v38 = vld [vmem:[%s414_s16 + $0x20] sm:$0xff] (%p1480_p3)  ;;  %428 = vst [vmem:[%s408_s17] sm:$0xff] (%p1480_p3), %v427_v36  ;;  %430 = vst [vmem:[%s408_s17 + $0x8] sm:$0xff] (%p1480_p3), %v429_v37  ;;  %v433_v39 = vld [vmem:[%s414_s16 + $0x28] sm:$0xff] (%p1480_p3) }
  0x2d   : > { %432 = vst [vmem:[%s408_s17 + $0x10] sm:$0xff] (%p1480_p3), %v431_v38  ;;  %v435_v40 = vld [vmem:[%s414_s16 + $0x40] sm:$0xff] (%p1480_p3)  ;;  %v437_v41 = vld [vmem:[%s414_s16 + $0x48] sm:$0xff] (%p1480_p3)  ;;  %434 = vst [vmem:[%s408_s17 + $0x18] sm:$0xff] (%p1480_p3), %v433_v39 }
  0x2e   : > { %436 = vst [vmem:[%s408_s17 + $0x20] sm:$0xff] (%p1480_p3), %v435_v40  ;;  %438 = vst [vmem:[%s408_s17 + $0x28] sm:$0xff] (%p1480_p3), %v437_v41  ;;  %v439_v42 = vld [vmem:[%s414_s16 + $0x60] sm:$0xff] (%p1480_p3)  ;;  %v441_v43 = vld [vmem:[%s414_s16 + $0x68] sm:$0xff] (%p1480_p3) }
  0x2f   : > { %440 = vst [vmem:[%s408_s17 + $0x30] sm:$0xff] %v439_v42  ;;  %442 = vst [vmem:[%s408_s17 + $0x38] sm:$0xff] %v441_v43 }
  0x30 PF: > { %p1201_p8 = scmp.ge.s32.totalorder %s1415_s22, 1  ;;  %p447_p9 = scmp.lt.s32.totalorder %s1415_s22, 3 }
  0x32   : > { %p448_p10 = pnand %p1201_p8, %p447_p9 }
  0x33   : > { %s454_s23 = sand.u32 (!%p448_p10), 1, %s1399_s18   ;;  %v1417_v44 = vmov (!%p448_p10), 0   ;;  %v1371_v45 = vld [vmem:[%s1709_s0 + $0x4] ss:$12 sps:$4 sm:$0xff] (!%p448_p10)   ;;  %v1372_v2 = vld [vmem:[%s1709_s0 + $0x8] ss:$12 sps:$4 sm:$0xff] (!%p448_p10)  }
  0x34   : > { %451 = sbr.rel (%p448_p10) target bundleno = 359 (0x167), region = 93  ;;  %982 = vmatprep.mubr.bf16.mxu0 (!%p448_p10), %v1417_v44  ;;  %1313 = vset.pattern.permute.xlu0 (!%p448_p10), %v1417_v44  ;;  %v841_v46 = vld [vmem:[%s1711_s2] sm:$0xff] (!%p448_p10)  ;;  %v842_v3 = vld [vmem:[%s1711_s2 + $0x8] sm:$0xff] (!%p448_p10)  ;;  %v843_v4 = vld [vmem:[%s1711_s2 + $0x10] sm:$0xff] (!%p448_p10) }
  0x35   : > { %s1271_s24 = smul.u32 (!%p448_p10), 288, %s454_s23  ;;  %1314 = vset.pattern.permute.xlu1 (!%p448_p10), %v1417_v44  ;;  %929 = vmatprep.mubr.bf16.mxu1 (!%p448_p10), %v1371_v45  ;;  %v844_v7 = vld [vmem:[%s1711_s2 + $0x18] sm:$0xff] (!%p448_p10)  ;;  %v1375_v10 = vld [vmem:[%s1709_s0 + $0x20] ss:$12 sps:$4 sm:$0xff] (!%p448_p10)  }
  0x36   : > { %847 = vperm.xlu0 (!%p448_p10), %1313, %v841_v46   ;;  %857 = vperm.xlu1 (!%p448_p10), %1314, %v843_v4   ;;  %v1369_v24 = vld [vmem:[%s1709_s0] ss:$12 sps:$4 sm:$0xff] (!%p448_p10)   ;;  %v1373_v25 = vld [vmem:[%s1709_s0 + $0x1c] ss:$12 sps:$4 sm:$0xff] (!%p448_p10)   ;;  %v1376_v26 = vld [vmem:[%s1709_s0 + $0x18] ss:$12 sps:$4 sm:$0xff] (!%p448_p10)  }
  0x37   : > { %s1596_s6 = scalar_lea.vmem (!%p448_p10), [#allocation4], %s1271_s24 }
  0x38   : > { %v1315_v47 = vld [vmem:[%s1596_s6 + $0x4] ss:$8 sps:$4 sm:$0xff] (!%p448_p10)   ;;  %v1317_v48 = vld [vmem:[%s1596_s6] ss:$8 sps:$4 sm:$0xff] (!%p448_p10)   ;;  %v1318_v49 = vld [vmem:[%s1596_s6 + $0x14] ss:$8 sps:$4 sm:$0xff] (!%p448_p10)  }
  0x39   : > { %897 = vmatprep.subr.bf16.mxu1 (!%p448_p10), %v1315_v47  ;;  %v1320_v50 = vld [vmem:[%s1596_s6 + $0x10] ss:$8 sps:$4 sm:$0xff] (!%p448_p10)   ;;  %v1321_v51 = vld [vmem:[%s1596_s6 + $0x24] ss:$8 sps:$4 sm:$0xff] (!%p448_p10)   ;;  %v1323_v52 = vld [vmem:[%s1596_s6 + $0x20] ss:$8 sps:$4 sm:$0xff] (!%p448_p10)  }
  0x3a   : > { %898 = vmatpush1.bf16.msra.mxu1 (!%p448_p10), %v1317_v48  ;;  %v1324_v53 = vld [vmem:[%s1596_s6 + $0x34] ss:$8 sps:$4 sm:$0xff] (!%p448_p10)   ;;  %v1326_v54 = vld [vmem:[%s1596_s6 + $0x30] ss:$8 sps:$4 sm:$0xff] (!%p448_p10)   ;;  %v1327_v55 = vld [vmem:[%s1596_s6 + $0x44] ss:$8 sps:$4 sm:$0xff] (!%p448_p10)   ;;  %852 = vperm.xlu0 (!%p448_p10), %1313, %v842_v3  }
  0x3b   : > { %899 = vmatprep.subr.bf16.mxu1 %v1318_v49  ;;  %v1329_v56 = vld [vmem:[%s1596_s6 + $0x40] ss:$8 sps:$4 sm:$0xff]   ;;  %v1330_v57 = vld [vmem:[%s1596_s6 + $0x54] ss:$8 sps:$4 sm:$0xff]   ;;  %v1332_v58 = vld [vmem:[%s1596_s6 + $0x50] ss:$8 sps:$4 sm:$0xff]   ;;  %862 = vperm.xlu1 %1314, %v844_v7  }
  0x3c   : > { %v1357_v59 = vld [vmem:[%s1596_s6 + $0x104] ss:$8 sps:$4 sm:$0xff]   ;;  %v1361_v61 = vld [vmem:[%s1596_s6 + $0x100] ss:$8 sps:$4 sm:$0xff]   ;;  %v1363_v62 = vld [vmem:[%s1596_s6 + $0x114] ss:$8 sps:$4 sm:$0xff]  }
  0x3d   : > { %v1333_v60 = vld [vmem:[%s1596_s6 + $0x64] ss:$8 sps:$4 sm:$0xff]   ;;  %950 = vmatprep.subr.bf16.mxu0 %v1357_v59  ;;  %v1335_v63 = vld [vmem:[%s1596_s6 + $0x60] ss:$8 sps:$4 sm:$0xff]   ;;  %v1367_v0 = vld [vmem:[%s1596_s6 + $0x110] ss:$8 sps:$4 sm:$0xff]  }
  0x3e   : > { %900 = vmatpush1.bf16.msra.mxu1 %v1320_v50  ;;  %951 = vmatpush1.bf16.msra.mxu0 %v1361_v61  ;;  %v1336_v1 = vld [vmem:[%s1596_s6 + $0x74] ss:$8 sps:$4 sm:$0xff]   ;;  %v1338_v5 = vld [vmem:[%s1596_s6 + $0x70] ss:$8 sps:$4 sm:$0xff]   ;;  %v1339_v6 = vld [vmem:[%s1596_s6 + $0x84] ss:$8 sps:$4 sm:$0xff]  }
  0x3f   : > { %901 = vmatprep.subr.bf16.mxu1 %v1321_v51  ;;  %952 = vmatprep.subr.bf16.mxu0 %v1363_v62  ;;  %v1341_v8 = vld [vmem:[%s1596_s6 + $0x80] ss:$8 sps:$4 sm:$0xff]   ;;  %v1342_v9 = vld [vmem:[%s1596_s6 + $0x94] ss:$8 sps:$4 sm:$0xff]   ;;  %v1344_v11 = vld [vmem:[%s1596_s6 + $0x90] ss:$8 sps:$4 sm:$0xff]  }
  0x40   : > { %v1345_v12 = vld [vmem:[%s1596_s6 + $0xa4] ss:$8 sps:$4 sm:$0xff]   ;;  %v1347_v13 = vld [vmem:[%s1596_s6 + $0xa0] ss:$8 sps:$4 sm:$0xff]   ;;  %v1348_v14 = vld [vmem:[%s1596_s6 + $0xb4] ss:$8 sps:$4 sm:$0xff]  }
  0x41   : > { %v1350_v15 = vld [vmem:[%s1596_s6 + $0xb0] ss:$8 sps:$4 sm:$0xff]   ;;  %v1351_v16 = vld [vmem:[%s1596_s6 + $0xc4] ss:$8 sps:$4 sm:$0xff]   ;;  %v1353_v17 = vld [vmem:[%s1596_s6 + $0xc0] ss:$8 sps:$4 sm:$0xff]  }
  0x42   : > { %902 = vmatpush1.bf16.msra.mxu1 %v1323_v52  ;;  %953 = vmatpush1.bf16.msra.mxu0 %v1367_v0  ;;  %v1354_v18 = vld [vmem:[%s1596_s6 + $0xd4] ss:$8 sps:$4 sm:$0xff]   ;;  %v1356_v19 = vld [vmem:[%s1596_s6 + $0xd0] ss:$8 sps:$4 sm:$0xff]   ;;  %v1359_v20 = vld [vmem:[%s1596_s6 + $0xe4] ss:$8 sps:$4 sm:$0xff]  }
  0x43   : > { %903 = vmatprep.subr.bf16.mxu1 %v1324_v53  ;;  %v1362_v21 = vld [vmem:[%s1596_s6 + $0xe0] ss:$8 sps:$4 sm:$0xff]   ;;  %v1365_v22 = vld [vmem:[%s1596_s6 + $0xf4] ss:$8 sps:$4 sm:$0xff]   ;;  %v1368_v23 = vld [vmem:[%s1596_s6 + $0xf0] ss:$8 sps:$4 sm:$0xff]  }
  0x44   : > { %s1202_s6 = sshll.u32 %s454_s23, 6  ;;  %s1253_s23 = sshll.u32 (%p1487_p6), %s1407_s20, 4 }
  0x45   : > { %983 = vmatmul.mubr.bf16.vlgmr.msra.gmra.mrb[0].mxu0 %v1372_v2  ;;  %s1660_s7 = scalar_lea.vmem [#allocation5], %s1202_s6  ;;  %s1666_s18 = scalar_lea.vmem [#allocation6], %s1202_s6 }
  0x46   : > { %904 = vmatpush1.bf16.msra.mxu1 %v1326_v54  ;;  %992 = vmatprep.mubr.bf16.mxu0 %v1417_v44  ;;  %v1003_v40 = vld [vmem:[%s1660_s7] sm:$0xff]  ;;  %v1004_v44 = vld [vmem:[%s1660_s7 + $0x8] sm:$0xff]  ;;  %v1005_v48 = vld [vmem:[%s1660_s7 + $0x10] sm:$0xff]  ;;  %s1039_s10 = scalar_lea.vmem (%p1487_p6), %s1714_s5, %s1253_s23 }
  0x47   : > { %905 = vmatprep.subr.bf16.mxu1 %v1327_v55  ;;  %v1006_v53 = vld [vmem:[%s1660_s7 + $0x18] sm:$0xff]  ;;  %v1007_v62 = vld [vmem:[%s1660_s7 + $0x20] sm:$0xff]  ;;  %v1008_v2 = vld [vmem:[%s1660_s7 + $0x28] sm:$0xff] }
  0x4a   : > { %906 = vmatpush1.bf16.msra.mxu1 %v1329_v56 }
  0x4b   : > { %907 = vmatprep.subr.bf16.mxu1 %v1330_v57 }
  0x4d   : > { %993 = vmatmul.mubr.bf16.gmra.mrb[4].mxu0 %v1375_v10  ;;  %v1010_v10 = vld [vmem:[%s1660_s7 + $0x38] sm:$0xff] }
  0x4e   : > { %908 = vmatpush1.bf16.msra.mxu1 %v1332_v58 }
  0x4f   : > { %909 = vmatprep.subr.bf16.mxu1 %v1333_v60 }
  0x52   : > { %910 = vmatpush1.bf16.msra.mxu1 %v1335_v63 }
  0x53   : > { %911 = vmatprep.subr.bf16.mxu1 %v1336_v1 }
  0x56   : > { %912 = vmatpush1.bf16.msra.mxu1 %v1338_v5 }
  0x57   : > { %913 = vmatprep.subr.bf16.mxu1 %v1339_v6  ;;  %v1009_v6 = vld [vmem:[%s1660_s7 + $0x30] sm:$0xff] }
  0x5a   : > { %914 = vmatpush1.bf16.msra.mxu1 %v1341_v8 }
  0x5b   : > { %915 = vmatprep.subr.bf16.mxu1 %v1342_v9 }
  0x5e   : > { %916 = vmatpush1.bf16.msra.mxu1 %v1344_v11 }
  0x5f   : > { %917 = vmatprep.subr.bf16.mxu1 %v1345_v12 }
  0x62   : > { %918 = vmatpush1.bf16.msra.mxu1 %v1347_v13 }
  0x63   : > { %919 = vmatprep.subr.bf16.mxu1 %v1348_v14 }
  0x66   : > { %920 = vmatpush1.bf16.msra.mxu1 %v1350_v15 }
  0x67   : > { %921 = vmatprep.subr.bf16.mxu1 %v1351_v16 }
  0x6a   : > { %922 = vmatpush1.bf16.msra.mxu1 %v1353_v17 }
  0x6b   : > { %923 = vmatprep.subr.bf16.mxu1 %v1354_v18 }
  0x6e   : > { %924 = vmatpush1.bf16.msra.mxu1 %v1356_v19 }
  0x6f   : > { %925 = vmatprep.subr.bf16.mxu1 %v1359_v20 }
  0x72   : > { %926 = vmatpush1.bf16.msra.mxu1 %v1362_v21 }
  0x73   : > { %927 = vmatprep.subr.bf16.mxu1 %v1365_v22 }
  0x76   : > { %928 = vmatpush1.bf16.msra.mxu1 %v1368_v23 }
  0x79   : > { %930 = vmatmul.mubr.bf16.vlgmr.msra.gmra.mrb[0].mxu1 %v1369_v24 }
  0x7a   : > { %939 = vmatprep.mubr.bf16.mxu1 %v1373_v25 }
  0x81   : > { %940 = vmatmul.mubr.bf16.gmra.mrb[4].mxu1 %v1376_v26 }
  0xb5   : > { %v848_v35 = vpop.permute.xlu0 %847  ;;  %v858_v49 = vpop.permute.xlu1 %857 }
  0xb9   : > { %v853_v37 = vpop.permute.xlu0 %852 }
  0xba   : > { %v863_v61 = vpop.permute.xlu1 %862 }
 0x118   : > { %v984_v27 = vpop.f32.mrb[0].mxu0 }
 0x119   : > { %v986_v28 = vpop.f32.mrb[1].mxu0 }
 0x11a   : > { %v988_v29 = vpop.f32.mrb[2].mxu0 }
 0x11b   : > { %v990_v30 = vpop.f32.mrb[3].mxu0 }
 0x120   : > { %v994_v31 = vpop.f32.mrb[4].mxu0 }
 0x121   : > { %v996_v32 = vpop.f32.mrb[5].mxu0 }
 0x122   : > { %v998_v33 = vpop.f32.mrb[6].mxu0 }
 0x123   : > { %v1000_v34 = vpop.f32.mrb[7].mxu0 }
 0x14c   : > { %v931_v36 = vpop.f32.mrb[0].mxu1 }
 0x14d   : > { %v932_v38 = vadd.f32 %v931_v36, %v848_v35  ;;  %v933_v39 = vpop.f32.mrb[1].mxu1 }
 0x14e   : > { %v934_v41 = vadd.f32 %v933_v39, %v848_v35  ;;  %v935_v42 = vpop.f32.mrb[2].mxu1 }
 0x14f   : > { %v985_v43 = vadd.f32 %v984_v27, %v932_v38  ;;  %v936_v45 = vadd.f32 %v935_v42, %v853_v37  ;;  %v937_v46 = vpop.f32.mrb[3].mxu1 }
 0x150   : > { %v987_v47 = vadd.f32 %v986_v28, %v934_v41  ;;  %v938_v50 = vadd.f32 %v937_v46, %v853_v37 }
 0x151   : > { %v1011_v51 = vadd.f32 %v1003_v40, %v985_v43  ;;  %v989_v52 = vadd.f32 %v988_v29, %v936_v45 }
 0x152   : > { %v1012_v54 = vadd.f32 %v1004_v44, %v987_v47  ;;  %v991_v55 = vadd.f32 %v990_v30, %v938_v50 }
 0x153   : > { %1019 = vst [vmem:[%s1666_s18] sm:$0xff] %v1011_v51  ;;  %v1013_v56 = vadd.f32 %v1005_v48, %v989_v52 }
 0x154   : > { %1020 = vst [vmem:[%s1666_s18 + $0x8] sm:$0xff] %v1012_v54  ;;  %v1014_v57 = vadd.f32 %v1006_v53, %v991_v55  ;;  %v941_v58 = vpop.f32.mrb[4].mxu1 }
 0x155   : > { %1021 = vst [vmem:[%s1666_s18 + $0x10] sm:$0xff] %v1013_v56  ;;  %v942_v59 = vadd.f32 %v941_v58, %v858_v49  ;;  %v943_v60 = vpop.f32.mrb[5].mxu1 }
 0x156   : > { %1022 = vst [vmem:[%s1666_s18 + $0x18] sm:$0xff] %v1014_v57  ;;  %v944_v63 = vadd.f32 %v943_v60, %v858_v49  ;;  %v945_v0 = vpop.f32.mrb[6].mxu1 }
 0x157   : > { %v995_v1 = vadd.f32 %v994_v31, %v942_v59  ;;  %v946_v3 = vadd.f32 %v945_v0, %v863_v61  ;;  %v947_v4 = vpop.f32.mrb[7].mxu1 }
 0x158   : > { %v997_v5 = vadd.f32 %v996_v32, %v944_v63  ;;  %v948_v7 = vadd.f32 %v947_v4, %v863_v61  ;;  %1033 = sbr.rel (!%p1487_p6) target bundleno = 359 (0x167), region = 105 }
 0x159   : > { %v1015_v8 = vadd.f32 %v1007_v62, %v995_v1  ;;  %v999_v9 = vadd.f32 %v998_v33, %v946_v3 }
 0x15a   : > { %v1016_v11 = vadd.f32 %v1008_v2, %v997_v5  ;;  %v1001_v12 = vadd.f32 %v1000_v34, %v948_v7  ;;  %v1052_v15 = vld [vmem:[%s1666_s18] sm:$0xff] (%p1487_p6) }
 0x15b   : > { %1023 = vst [vmem:[%s1666_s18 + $0x20] sm:$0xff] %v1015_v8  ;;  %v1017_v13 = vadd.f32 %v1009_v6, %v999_v9  ;;  %v1054_v16 = vld [vmem:[%s1666_s18 + $0x8] sm:$0xff] (%p1487_p6)  ;;  %1053 = vst [vmem:[%s1039_s10] sm:$0xff] (%p1487_p6), %v1052_v15 }
 0x15c   : > { %1024 = vst [vmem:[%s1666_s18 + $0x28] sm:$0xff] %v1016_v11  ;;  %v1018_v14 = vadd.f32 %v1010_v10, %v1001_v12  ;;  %v1056_v17 = vld [vmem:[%s1666_s18 + $0x10] sm:$0xff] (%p1487_p6)  ;;  %1055 = vst [vmem:[%s1039_s10 + $0x8] sm:$0xff] (%p1487_p6), %v1054_v16 }
 0x15d   : > { %1025 = vst [vmem:[%s1666_s18 + $0x30] sm:$0xff] %v1017_v13  ;;  %v1058_v18 = vld [vmem:[%s1666_s18 + $0x18] sm:$0xff] (%p1487_p6)  ;;  %1057 = vst [vmem:[%s1039_s10 + $0x20] sm:$0xff] (%p1487_p6), %v1056_v17 }
 0x15e   : > { %1026 = vst [vmem:[%s1666_s18 + $0x38] sm:$0xff] %v1018_v14  ;;  %1059 = vst [vmem:[%s1039_s10 + $0x28] sm:$0xff] (%p1487_p6), %v1058_v18 }
 0x162   : > { %v1060_v19 = vld [vmem:[%s1666_s18 + $0x20] sm:$0xff] }
 0x163   : > { %v1062_v20 = vld [vmem:[%s1666_s18 + $0x28] sm:$0xff]  ;;  %1061 = vst [vmem:[%s1039_s10 + $0x40] sm:$0xff] %v1060_v19 }
 0x164   : > { %1063 = vst [vmem:[%s1039_s10 + $0x48] sm:$0xff] %v1062_v20  ;;  %v1064_v21 = vld [vmem:[%s1666_s18 + $0x30] sm:$0xff] }
 0x165   : > { %v1066_v22 = vld [vmem:[%s1666_s18 + $0x38] sm:$0xff]  ;;  %1065 = vst [vmem:[%s1039_s10 + $0x60] sm:$0xff] %v1064_v21 }
 0x166   : > { %1067 = vst [vmem:[%s1039_s10 + $0x68] sm:$0xff] %v1066_v22 }
 0x167 PF: > { %s16_s22 = sadd.s32 1, %s1415_s22   ;;  %s1717_s18 = smov %s1403_s19 }
 0x168   : > { %p13_p11 = scmp.ge.s32.totalorder %s16_s22, 4   ;;  %s1718_s19 = smov %s1492_s28 }
 0x169   : > { %s1719_s20 = smov %s1411_s21  ;;  %s1720_s21 = smov %s1722_s3 }
 0x16a   :  { %15 = sbr.rel (!%p13_p11) target bundleno = 3 (0x3), region = 173 }

// kernel: edsr_forward.14
= control target key start
LH: loop header
LB: loop body
LE: loop exit
PB: predicated region body
PF: predicated region fallthrough
CT: control target
= control target key end

     0   :  { %s1456_s18 = smov 0   ;;  %s1458_s19 = smov 0   ;;  %s1717_s0 = inlined_call_operand.vmem [shape: bf16[32,384], index: 0, kind: input, shape index: {}]   ;;  %s1718_s1 = inlined_call_operand.vmem [shape: bf16[288,512], index: 1, kind: input, shape index: {}]   ;;  %s1719_s2 = inlined_call_operand.vmem [shape: f32[32,1], index: 2, kind: input, shape index: {}]   ;;  %s1720_s3 = inlined_call_operand.<no memory space> [shape: f32[1], index: 3, kind: input, shape index: {}]   ;;  %s1721_s4 = inlined_call_operand.vmem [shape: f32[32,512], index: 4, kind: input, shape index: {}]   ;;  %s1722_s5 = inlined_call_operand.vmem [shape: f32[32,512], index: 5, kind: output, shape index: {}]  }
   0x1   :  { %s1460_s20 = smov 0   ;;  %s1462_s21 = smov 0  }
   0x2   :  { %s1464_s22 = smov 0  }
   0x3 LB: > { %s28_s3 = sadd.s32 1, %s1419_s21  ;;  %s1198_s23 = sadd.s32 4294967295, %s1423_s22   ;;  %s1423_s22 = sphi %s1464_s22, %s16_s22   ;;  %s1419_s21 = sphi %s1462_s21, %s1728_s21   ;;  %s1415_s20 = sphi %s1460_s20, %s1727_s20   ;;  %s1411_s19 = sphi %s1458_s19, %s1726_s19   ;;  %s1407_s18 = sphi %s1456_s18, %s1725_s18  }
   0x4   : > { %p30_p0 = scmp.ge.s32.totalorder %s28_s3, 2  ;;  %p68_p1 = scmp.ne.s32.totalorder %s1411_s19, %s1407_s18 }
   0x5   : > { %p69_p2 = scmp.eq.s32.totalorder %s1423_s22, 0  ;;  %p175_p4 = scmp.eq.s32.totalorder %s1198_s23, 1 }
   0x6   : > { %s1730_s3 = smov (%p30_p0, %s28_s3), 0  ;;  %s61_s26 = sadd.s32 1, %s1411_s19 }
   0x7   : > { %p1488_p3 = por %p69_p2, %p68_p1  ;;  %s58_s25 = ssub.s32 %s1419_s21, %s1730_s3 }
   0x8   : > { %p59_p5 = scmp.eq.s32.totalorder %s58_s25, 0  ;;  %p1495_p6 = por %p175_p4, %p68_p1 }
   0x9   : > { %p1203_p7 = scmp.ge.s32.totalorder %s1423_s22, 2 }
   0xa   : > { %s1500_s28 = scalar_select %p59_p5, %s1411_s19, %s61_s26  }
   0xb   : > { %219 = sbr.rel (%p1203_p7) target bundleno = 48 (0x30), region = 28 }
  0x12   : > { %222 = sbr.rel (!%p1488_p3) target bundleno = 40 (0x28), region = 32  ;;  %s224_s29 = sand.u32 (%p1488_p3), 1, %s1411_s19  }
  0x13   : > { %s1259_s30 = sshll.u32 (%p1488_p3), %s1419_s21, 3  ;;  %s1278_s6 = smul.u32 (%p1488_p3), 288, %s224_s29 }
  0x14   : > { %s1510_s9 = scalar_lea.vmem (%p1488_p3), %s1718_s1, %s1259_s30 }
  0x15   : > { %v327_v0 = vld [vmem:[%s1510_s9] sm:$0xff] (%p1488_p3)  ;;  %v329_v1 = vld [vmem:[%s1510_s9 + $0x10] sm:$0xff] (%p1488_p3)  ;;  %s1518_s10 = scalar_lea.vmem (%p1488_p3), [#allocation4], %s1278_s6 }
  0x16   : > { %v331_v2 = vld [vmem:[%s1510_s9 + $0x20] sm:$0xff] (%p1488_p3)  ;;  %v333_v3 = vld [vmem:[%s1510_s9 + $0x30] sm:$0xff] (%p1488_p3)  ;;  %328 = vst [vmem:[%s1518_s10] sm:$0xff] (%p1488_p3), %v327_v0  ;;  %330 = vst [vmem:[%s1518_s10 + $0x8] sm:$0xff] (%p1488_p3), %v329_v1 }
  0x17   : > { %v335_v4 = vld [vmem:[%s1510_s9 + $0x40] sm:$0xff] (%p1488_p3)  ;;  %v337_v5 = vld [vmem:[%s1510_s9 + $0x50] sm:$0xff] (%p1488_p3)  ;;  %332 = vst [vmem:[%s1518_s10 + $0x10] sm:$0xff] (%p1488_p3), %v331_v2  ;;  %334 = vst [vmem:[%s1518_s10 + $0x18] sm:$0xff] (%p1488_p3), %v333_v3 }
  0x18   : > { %336 = vst [vmem:[%s1518_s10 + $0x20] sm:$0xff] (%p1488_p3), %v335_v4  ;;  %338 = vst [vmem:[%s1518_s10 + $0x28] sm:$0xff] (%p1488_p3), %v337_v5  ;;  %v339_v6 = vld [vmem:[%s1510_s9 + $0x60] sm:$0xff] (%p1488_p3)  ;;  %v341_v7 = vld [vmem:[%s1510_s9 + $0x70] sm:$0xff] (%p1488_p3) }
  0x19   : > { %v343_v8 = vld [vmem:[%s1510_s9 + $0x80] sm:$0xff]  ;;  %340 = vst [vmem:[%s1518_s10 + $0x30] sm:$0xff] %v339_v6  ;;  %342 = vst [vmem:[%s1518_s10 + $0x38] sm:$0xff] %v341_v7  ;;  %v345_v9 = vld [vmem:[%s1510_s9 + $0x90] sm:$0xff] }
  0x1a   : > { %344 = vst [vmem:[%s1518_s10 + $0x40] sm:$0xff] %v343_v8  ;;  %v347_v10 = vld [vmem:[%s1510_s9 + $0xa0] sm:$0xff]  ;;  %v349_v11 = vld [vmem:[%s1510_s9 + $0xb0] sm:$0xff]  ;;  %346 = vst [vmem:[%s1518_s10 + $0x48] sm:$0xff] %v345_v9 }
  0x1b   : > { %348 = vst [vmem:[%s1518_s10 + $0x50] sm:$0xff] %v347_v10  ;;  %350 = vst [vmem:[%s1518_s10 + $0x58] sm:$0xff] %v349_v11  ;;  %v351_v12 = vld [vmem:[%s1510_s9 + $0xc0] sm:$0xff]  ;;  %v353_v13 = vld [vmem:[%s1510_s9 + $0xd0] sm:$0xff] }
  0x1c   : > { %v355_v14 = vld [vmem:[%s1510_s9 + $0xe0] sm:$0xff]  ;;  %352 = vst [vmem:[%s1518_s10 + $0x60] sm:$0xff] %v351_v12  ;;  %354 = vst [vmem:[%s1518_s10 + $0x68] sm:$0xff] %v353_v13  ;;  %v357_v15 = vld [vmem:[%s1510_s9 + $0xf0] sm:$0xff] }
  0x1d   : > { %356 = vst [vmem:[%s1518_s10 + $0x70] sm:$0xff] %v355_v14  ;;  %v359_v16 = vld [vmem:[%s1510_s9 + $0x100] sm:$0xff]  ;;  %v361_v17 = vld [vmem:[%s1510_s9 + $0x110] sm:$0xff]  ;;  %358 = vst [vmem:[%s1518_s10 + $0x78] sm:$0xff] %v357_v15 }
  0x1e   : > { %360 = vst [vmem:[%s1518_s10 + $0x80] sm:$0xff] %v359_v16  ;;  %362 = vst [vmem:[%s1518_s10 + $0x88] sm:$0xff] %v361_v17  ;;  %v363_v18 = vld [vmem:[%s1510_s9 + $0x120] sm:$0xff]  ;;  %v365_v19 = vld [vmem:[%s1510_s9 + $0x130] sm:$0xff] }
  0x1f   : > { %v367_v20 = vld [vmem:[%s1510_s9 + $0x140] sm:$0xff]  ;;  %364 = vst [vmem:[%s1518_s10 + $0x90] sm:$0xff] %v363_v18  ;;  %366 = vst [vmem:[%s1518_s10 + $0x98] sm:$0xff] %v365_v19  ;;  %v369_v21 = vld [vmem:[%s1510_s9 + $0x150] sm:$0xff] }
  0x20   : > { %368 = vst [vmem:[%s1518_s10 + $0xa0] sm:$0xff] %v367_v20  ;;  %v371_v22 = vld [vmem:[%s1510_s9 + $0x160] sm:$0xff]  ;;  %v373_v23 = vld [vmem:[%s1510_s9 + $0x170] sm:$0xff]  ;;  %370 = vst [vmem:[%s1518_s10 + $0xa8] sm:$0xff] %v369_v21 }
  0x21   : > { %372 = vst [vmem:[%s1518_s10 + $0xb0] sm:$0xff] %v371_v22  ;;  %374 = vst [vmem:[%s1518_s10 + $0xb8] sm:$0xff] %v373_v23  ;;  %v375_v24 = vld [vmem:[%s1510_s9 + $0x180] sm:$0xff]  ;;  %v377_v25 = vld [vmem:[%s1510_s9 + $0x190] sm:$0xff] }
  0x22   : > { %v379_v26 = vld [vmem:[%s1510_s9 + $0x1a0] sm:$0xff]  ;;  %376 = vst [vmem:[%s1518_s10 + $0xc0] sm:$0xff] %v375_v24  ;;  %378 = vst [vmem:[%s1518_s10 + $0xc8] sm:$0xff] %v377_v25  ;;  %v381_v27 = vld [vmem:[%s1510_s9 + $0x1b0] sm:$0xff] }
  0x23   : > { %380 = vst [vmem:[%s1518_s10 + $0xd0] sm:$0xff] %v379_v26  ;;  %v383_v28 = vld [vmem:[%s1510_s9 + $0x1c0] sm:$0xff]  ;;  %v385_v29 = vld [vmem:[%s1510_s9 + $0x1d0] sm:$0xff]  ;;  %382 = vst [vmem:[%s1518_s10 + $0xd8] sm:$0xff] %v381_v27 }
  0x24   : > { %384 = vst [vmem:[%s1518_s10 + $0xe0] sm:$0xff] %v383_v28  ;;  %386 = vst [vmem:[%s1518_s10 + $0xe8] sm:$0xff] %v385_v29  ;;  %v387_v30 = vld [vmem:[%s1510_s9 + $0x1e0] sm:$0xff]  ;;  %v389_v31 = vld [vmem:[%s1510_s9 + $0x1f0] sm:$0xff] }
  0x25   : > { %v391_v32 = vld [vmem:[%s1510_s9 + $0x200] sm:$0xff]  ;;  %388 = vst [vmem:[%s1518_s10 + $0xf0] sm:$0xff] %v387_v30  ;;  %390 = vst [vmem:[%s1518_s10 + $0xf8] sm:$0xff] %v389_v31  ;;  %v393_v33 = vld [vmem:[%s1510_s9 + $0x210] sm:$0xff] }
  0x26   : > { %392 = vst [vmem:[%s1518_s10 + $0x100] sm:$0xff] %v391_v32  ;;  %v395_v34 = vld [vmem:[%s1510_s9 + $0x220] sm:$0xff]  ;;  %v397_v35 = vld [vmem:[%s1510_s9 + $0x230] sm:$0xff]  ;;  %394 = vst [vmem:[%s1518_s10 + $0x108] sm:$0xff] %v393_v33 }
  0x27   : > { %396 = vst [vmem:[%s1518_s10 + $0x110] sm:$0xff] %v395_v34  ;;  %398 = vst [vmem:[%s1518_s10 + $0x118] sm:$0xff] %v397_v35 }
  0x28 PF: > { %404 = sbr.rel (!%p1488_p3) target bundleno = 48 (0x30), region = 70  ;;  %s406_s11 = sand.u32 (%p1488_p3), 1, %s1411_s19  }
  0x29   : > { %s1260_s12 = sshll.u32 (%p1488_p3), %s1419_s21, 4  ;;  %s1206_s13 = sshll.u32 (%p1488_p3), %s406_s11, 6 }
  0x2a   : > { %s414_s16 = scalar_lea.vmem (%p1488_p3), %s1721_s4, %s1260_s12  ;;  %s408_s17 = scalar_lea.vmem (%p1488_p3), [#allocation5], %s1206_s13 }
  0x2b   : > { %v427_v36 = vld [vmem:[%s414_s16] sm:$0xff] (%p1488_p3)  ;;  %v429_v37 = vld [vmem:[%s414_s16 + $0x8] sm:$0xff] (%p1488_p3) }
  0x2c   : > { %v431_v38 = vld [vmem:[%s414_s16 + $0x20] sm:$0xff] (%p1488_p3)  ;;  %428 = vst [vmem:[%s408_s17] sm:$0xff] (%p1488_p3), %v427_v36  ;;  %430 = vst [vmem:[%s408_s17 + $0x8] sm:$0xff] (%p1488_p3), %v429_v37  ;;  %v433_v39 = vld [vmem:[%s414_s16 + $0x28] sm:$0xff] (%p1488_p3) }
  0x2d   : > { %432 = vst [vmem:[%s408_s17 + $0x10] sm:$0xff] (%p1488_p3), %v431_v38  ;;  %v435_v40 = vld [vmem:[%s414_s16 + $0x40] sm:$0xff] (%p1488_p3)  ;;  %v437_v41 = vld [vmem:[%s414_s16 + $0x48] sm:$0xff] (%p1488_p3)  ;;  %434 = vst [vmem:[%s408_s17 + $0x18] sm:$0xff] (%p1488_p3), %v433_v39 }
  0x2e   : > { %436 = vst [vmem:[%s408_s17 + $0x20] sm:$0xff] (%p1488_p3), %v435_v40  ;;  %438 = vst [vmem:[%s408_s17 + $0x28] sm:$0xff] (%p1488_p3), %v437_v41  ;;  %v439_v42 = vld [vmem:[%s414_s16 + $0x60] sm:$0xff] (%p1488_p3)  ;;  %v441_v43 = vld [vmem:[%s414_s16 + $0x68] sm:$0xff] (%p1488_p3) }
  0x2f   : > { %440 = vst [vmem:[%s408_s17 + $0x30] sm:$0xff] %v439_v42  ;;  %442 = vst [vmem:[%s408_s17 + $0x38] sm:$0xff] %v441_v43 }
  0x30 PF: > { %p1209_p8 = scmp.ge.s32.totalorder %s1423_s22, 1  ;;  %p447_p9 = scmp.lt.s32.totalorder %s1423_s22, 3 }
  0x32   : > { %p448_p10 = pnand %p1209_p8, %p447_p9 }
  0x33   : > { %s454_s23 = sand.u32 (!%p448_p10), 1, %s1407_s18   ;;  %v1425_v44 = vmov (!%p448_p10), 0   ;;  %v1379_v45 = vld [vmem:[%s1717_s0 + $0x4] ss:$12 sps:$4 sm:$0xff] (!%p448_p10)   ;;  %v1380_v2 = vld [vmem:[%s1717_s0 + $0x8] ss:$12 sps:$4 sm:$0xff] (!%p448_p10)  }
  0x34   : > { %451 = sbr.rel (%p448_p10) target bundleno = 361 (0x169), region = 93  ;;  %982 = vmatprep.mubr.bf16.mxu0 (!%p448_p10), %v1425_v44  ;;  %1321 = vset.pattern.permute.xlu0 (!%p448_p10), %v1425_v44  ;;  %v841_v46 = vld [vmem:[%s1719_s2] sm:$0xff] (!%p448_p10)  ;;  %v842_v3 = vld [vmem:[%s1719_s2 + $0x8] sm:$0xff] (!%p448_p10)  ;;  %v843_v4 = vld [vmem:[%s1719_s2 + $0x10] sm:$0xff] (!%p448_p10) }
  0x35   : > { %s1279_s24 = smul.u32 (!%p448_p10), 288, %s454_s23  ;;  %1322 = vset.pattern.permute.xlu1 (!%p448_p10), %v1425_v44  ;;  %929 = vmatprep.mubr.bf16.mxu1 (!%p448_p10), %v1379_v45  ;;  %v844_v7 = vld [vmem:[%s1719_s2 + $0x18] sm:$0xff] (!%p448_p10)  ;;  %v1383_v10 = vld [vmem:[%s1717_s0 + $0x20] ss:$12 sps:$4 sm:$0xff] (!%p448_p10)  }
  0x36   : > { %847 = vperm.xlu0 (!%p448_p10), %1321, %v841_v46   ;;  %857 = vperm.xlu1 (!%p448_p10), %1322, %v843_v4   ;;  %v1377_v24 = vld [vmem:[%s1717_s0] ss:$12 sps:$4 sm:$0xff] (!%p448_p10)   ;;  %v1381_v25 = vld [vmem:[%s1717_s0 + $0x1c] ss:$12 sps:$4 sm:$0xff] (!%p448_p10)   ;;  %v1384_v26 = vld [vmem:[%s1717_s0 + $0x18] ss:$12 sps:$4 sm:$0xff] (!%p448_p10)  }
  0x37   : > { %s1604_s6 = scalar_lea.vmem (!%p448_p10), [#allocation4], %s1279_s24 }
  0x38   : > { %v1323_v47 = vld [vmem:[%s1604_s6 + $0x4] ss:$8 sps:$4 sm:$0xff] (!%p448_p10)   ;;  %v1325_v48 = vld [vmem:[%s1604_s6] ss:$8 sps:$4 sm:$0xff] (!%p448_p10)   ;;  %v1326_v49 = vld [vmem:[%s1604_s6 + $0x14] ss:$8 sps:$4 sm:$0xff] (!%p448_p10)  }
  0x39   : > { %897 = vmatprep.subr.bf16.mxu1 (!%p448_p10), %v1323_v47  ;;  %v1328_v50 = vld [vmem:[%s1604_s6 + $0x10] ss:$8 sps:$4 sm:$0xff] (!%p448_p10)   ;;  %v1329_v51 = vld [vmem:[%s1604_s6 + $0x24] ss:$8 sps:$4 sm:$0xff] (!%p448_p10)   ;;  %v1331_v52 = vld [vmem:[%s1604_s6 + $0x20] ss:$8 sps:$4 sm:$0xff] (!%p448_p10)  }
  0x3a   : > { %898 = vmatpush1.bf16.msra.mxu1 (!%p448_p10), %v1325_v48  ;;  %v1332_v53 = vld [vmem:[%s1604_s6 + $0x34] ss:$8 sps:$4 sm:$0xff] (!%p448_p10)   ;;  %v1334_v54 = vld [vmem:[%s1604_s6 + $0x30] ss:$8 sps:$4 sm:$0xff] (!%p448_p10)   ;;  %v1335_v55 = vld [vmem:[%s1604_s6 + $0x44] ss:$8 sps:$4 sm:$0xff] (!%p448_p10)   ;;  %852 = vperm.xlu0 (!%p448_p10), %1321, %v842_v3  }
  0x3b   : > { %899 = vmatprep.subr.bf16.mxu1 %v1326_v49  ;;  %v1337_v56 = vld [vmem:[%s1604_s6 + $0x40] ss:$8 sps:$4 sm:$0xff]   ;;  %v1338_v57 = vld [vmem:[%s1604_s6 + $0x54] ss:$8 sps:$4 sm:$0xff]   ;;  %v1340_v58 = vld [vmem:[%s1604_s6 + $0x50] ss:$8 sps:$4 sm:$0xff]   ;;  %862 = vperm.xlu1 %1322, %v844_v7  }
  0x3c   : > { %v1365_v59 = vld [vmem:[%s1604_s6 + $0x104] ss:$8 sps:$4 sm:$0xff]   ;;  %v1369_v61 = vld [vmem:[%s1604_s6 + $0x100] ss:$8 sps:$4 sm:$0xff]   ;;  %v1371_v62 = vld [vmem:[%s1604_s6 + $0x114] ss:$8 sps:$4 sm:$0xff]  }
  0x3d   : > { %v1341_v60 = vld [vmem:[%s1604_s6 + $0x64] ss:$8 sps:$4 sm:$0xff]   ;;  %950 = vmatprep.subr.bf16.mxu0 %v1365_v59  ;;  %v1343_v63 = vld [vmem:[%s1604_s6 + $0x60] ss:$8 sps:$4 sm:$0xff]   ;;  %v1375_v0 = vld [vmem:[%s1604_s6 + $0x110] ss:$8 sps:$4 sm:$0xff]  }
  0x3e   : > { %900 = vmatpush1.bf16.msra.mxu1 %v1328_v50  ;;  %951 = vmatpush1.bf16.msra.mxu0 %v1369_v61  ;;  %v1344_v1 = vld [vmem:[%s1604_s6 + $0x74] ss:$8 sps:$4 sm:$0xff]   ;;  %v1346_v5 = vld [vmem:[%s1604_s6 + $0x70] ss:$8 sps:$4 sm:$0xff]   ;;  %v1347_v6 = vld [vmem:[%s1604_s6 + $0x84] ss:$8 sps:$4 sm:$0xff]  }
  0x3f   : > { %901 = vmatprep.subr.bf16.mxu1 %v1329_v51  ;;  %952 = vmatprep.subr.bf16.mxu0 %v1371_v62  ;;  %v1349_v8 = vld [vmem:[%s1604_s6 + $0x80] ss:$8 sps:$4 sm:$0xff]   ;;  %v1350_v9 = vld [vmem:[%s1604_s6 + $0x94] ss:$8 sps:$4 sm:$0xff]   ;;  %v1352_v11 = vld [vmem:[%s1604_s6 + $0x90] ss:$8 sps:$4 sm:$0xff]  }
  0x40   : > { %v1353_v12 = vld [vmem:[%s1604_s6 + $0xa4] ss:$8 sps:$4 sm:$0xff]   ;;  %v1355_v13 = vld [vmem:[%s1604_s6 + $0xa0] ss:$8 sps:$4 sm:$0xff]   ;;  %v1356_v14 = vld [vmem:[%s1604_s6 + $0xb4] ss:$8 sps:$4 sm:$0xff]  }
  0x41   : > { %v1358_v15 = vld [vmem:[%s1604_s6 + $0xb0] ss:$8 sps:$4 sm:$0xff]   ;;  %v1359_v16 = vld [vmem:[%s1604_s6 + $0xc4] ss:$8 sps:$4 sm:$0xff]   ;;  %v1361_v17 = vld [vmem:[%s1604_s6 + $0xc0] ss:$8 sps:$4 sm:$0xff]  }
  0x42   : > { %902 = vmatpush1.bf16.msra.mxu1 %v1331_v52  ;;  %953 = vmatpush1.bf16.msra.mxu0 %v1375_v0  ;;  %v1362_v18 = vld [vmem:[%s1604_s6 + $0xd4] ss:$8 sps:$4 sm:$0xff]   ;;  %v1364_v19 = vld [vmem:[%s1604_s6 + $0xd0] ss:$8 sps:$4 sm:$0xff]   ;;  %v1367_v20 = vld [vmem:[%s1604_s6 + $0xe4] ss:$8 sps:$4 sm:$0xff]  }
  0x43   : > { %903 = vmatprep.subr.bf16.mxu1 %v1332_v53  ;;  %v1370_v21 = vld [vmem:[%s1604_s6 + $0xe0] ss:$8 sps:$4 sm:$0xff]   ;;  %v1373_v22 = vld [vmem:[%s1604_s6 + $0xf4] ss:$8 sps:$4 sm:$0xff]   ;;  %v1376_v23 = vld [vmem:[%s1604_s6 + $0xf0] ss:$8 sps:$4 sm:$0xff]  }
  0x44   : > { %s1210_s6 = sshll.u32 %s454_s23, 6  ;;  %s1261_s23 = sshll.u32 (%p1495_p6), %s1415_s20, 4 }
  0x45   : > { %983 = vmatmul.mubr.bf16.vlgmr.msra.gmra.mrb[0].mxu0 %v1380_v2  ;;  %s1668_s7 = scalar_lea.vmem [#allocation5], %s1210_s6  ;;  %s1674_s18 = scalar_lea.vmem [#allocation6], %s1210_s6 }
  0x46   : > { %904 = vmatpush1.bf16.msra.mxu1 %v1334_v54  ;;  %992 = vmatprep.mubr.bf16.mxu0 %v1425_v44  ;;  %v1003_v45 = vld [vmem:[%s1668_s7] sm:$0xff]  ;;  %v1004_v50 = vld [vmem:[%s1668_s7 + $0x8] sm:$0xff]  ;;  %v1005_v53 = vld [vmem:[%s1668_s7 + $0x10] sm:$0xff]  ;;  %s1047_s10 = scalar_lea.vmem (%p1495_p6), %s1722_s5, %s1261_s23 }
  0x47   : > { %905 = vmatprep.subr.bf16.mxu1 %v1335_v55  ;;  %v1007_v7 = vld [vmem:[%s1668_s7 + $0x20] sm:$0xff] }
  0x4a   : > { %906 = vmatpush1.bf16.msra.mxu1 %v1337_v56 }
  0x4b   : > { %907 = vmatprep.subr.bf16.mxu1 %v1338_v57  ;;  %v1006_v57 = vld [vmem:[%s1668_s7 + $0x18] sm:$0xff] }
  0x4d   : > { %993 = vmatmul.mubr.bf16.gmra.mrb[4].mxu0 %v1383_v10 }
  0x4e   : > { %908 = vmatpush1.bf16.msra.mxu1 %v1340_v58 }
  0x4f   : > { %909 = vmatprep.subr.bf16.mxu1 %v1341_v60 }
  0x52   : > { %910 = vmatpush1.bf16.msra.mxu1 %v1343_v63 }
  0x53   : > { %911 = vmatprep.subr.bf16.mxu1 %v1344_v1 }
  0x56   : > { %912 = vmatpush1.bf16.msra.mxu1 %v1346_v5 }
  0x57   : > { %913 = vmatprep.subr.bf16.mxu1 %v1347_v6 }
  0x5a   : > { %914 = vmatpush1.bf16.msra.mxu1 %v1349_v8 }
  0x5b   : > { %915 = vmatprep.subr.bf16.mxu1 %v1350_v9 }
  0x5e   : > { %916 = vmatpush1.bf16.msra.mxu1 %v1352_v11  ;;  %v1008_v11 = vld [vmem:[%s1668_s7 + $0x28] sm:$0xff] }
  0x5f   : > { %917 = vmatprep.subr.bf16.mxu1 %v1353_v12 }
  0x62   : > { %918 = vmatpush1.bf16.msra.mxu1 %v1355_v13 }
  0x63   : > { %919 = vmatprep.subr.bf16.mxu1 %v1356_v14  ;;  %v1009_v14 = vld [vmem:[%s1668_s7 + $0x30] sm:$0xff] }
  0x66   : > { %920 = vmatpush1.bf16.msra.mxu1 %v1358_v15 }
  0x67   : > { %921 = vmatprep.subr.bf16.mxu1 %v1359_v16 }
  0x6a   : > { %922 = vmatpush1.bf16.msra.mxu1 %v1361_v17 }
  0x6b   : > { %923 = vmatprep.subr.bf16.mxu1 %v1362_v18  ;;  %v1010_v18 = vld [vmem:[%s1668_s7 + $0x38] sm:$0xff] }
  0x6e   : > { %924 = vmatpush1.bf16.msra.mxu1 %v1364_v19 }
  0x6f   : > { %925 = vmatprep.subr.bf16.mxu1 %v1367_v20 }
  0x72   : > { %926 = vmatpush1.bf16.msra.mxu1 %v1370_v21 }
  0x73   : > { %927 = vmatprep.subr.bf16.mxu1 %v1373_v22 }
  0x76   : > { %928 = vmatpush1.bf16.msra.mxu1 %v1376_v23 }
  0x79   : > { %930 = vmatmul.mubr.bf16.vlgmr.msra.gmra.mrb[0].mxu1 %v1377_v24 }
  0x7a   : > { %939 = vmatprep.mubr.bf16.mxu1 %v1381_v25 }
  0x81   : > { %940 = vmatmul.mubr.bf16.gmra.mrb[4].mxu1 %v1384_v26 }
  0xb5   : > { %v848_v35 = vpop.permute.xlu0 %847  ;;  %v858_v47 = vpop.permute.xlu1 %857 }
  0xb9   : > { %v853_v37 = vpop.permute.xlu0 %852 }
  0xba   : > { %v863_v1 = vpop.permute.xlu1 %862 }
 0x118   : > { %v984_v27 = vpop.f32.mrb[0].mxu0 }
 0x119   : > { %v986_v28 = vpop.f32.mrb[1].mxu0 }
 0x11a   : > { %v988_v29 = vpop.f32.mrb[2].mxu0 }
 0x11b   : > { %v990_v30 = vpop.f32.mrb[3].mxu0 }
 0x120   : > { %v994_v31 = vpop.f32.mrb[4].mxu0 }
 0x121   : > { %v996_v32 = vpop.f32.mrb[5].mxu0 }
 0x122   : > { %v998_v33 = vpop.f32.mrb[6].mxu0 }
 0x123   : > { %v1000_v34 = vpop.f32.mrb[7].mxu0 }
 0x14c   : > { %v931_v36 = vpop.f32.mrb[0].mxu1 }
 0x14d   : > { %v932_v38 = vadd.f32 %v931_v36, %v848_v35  ;;  %v933_v39 = vpop.f32.mrb[1].mxu1 }
 0x14e   : > { %v934_v40 = vadd.f32 %v933_v39, %v848_v35  ;;  %v935_v41 = vpop.f32.mrb[2].mxu1 }
 0x14f   : > { %v985_v42 = vadd.f32 %v984_v27, %v932_v38  ;;  %v936_v43 = vadd.f32 %v935_v41, %v853_v37  ;;  %v937_v44 = vpop.f32.mrb[3].mxu1 }
 0x150   : > { %v987_v46 = vadd.f32 %v986_v28, %v934_v40  ;;  %v938_v48 = vadd.f32 %v937_v44, %v853_v37 }
 0x151   : > { %v1011_v49 = vmul.f32 0.1, %v985_v42  ;;  %v989_v51 = vadd.f32 %v988_v29, %v936_v43 }
 0x152   : > { %v1012_v52 = vmul.f32 0.1, %v987_v46  ;;  %v991_v54 = vadd.f32 %v990_v30, %v938_v48 }
 0x153   : > { %v1019_v55 = vadd.f32 %v1011_v49, %v1003_v45  ;;  %v1013_v56 = vmul.f32 0.1, %v989_v51 }
 0x154   : > { %v1020_v58 = vadd.f32 %v1012_v52, %v1004_v50  ;;  %v1014_v59 = vmul.f32 0.1, %v991_v54  ;;  %v941_v60 = vpop.f32.mrb[4].mxu1 }
 0x155   : > { %1027 = vst [vmem:[%s1674_s18] sm:$0xff] %v1019_v55  ;;  %v1021_v61 = vadd.f32 %v1013_v56, %v1005_v53  ;;  %v942_v62 = vadd.f32 %v941_v60, %v858_v47  ;;  %v943_v63 = vpop.f32.mrb[5].mxu1 }
 0x156   : > { %1028 = vst [vmem:[%s1674_s18 + $0x8] sm:$0xff] %v1020_v58  ;;  %v1022_v0 = vadd.f32 %v1014_v59, %v1006_v57  ;;  %v944_v2 = vadd.f32 %v943_v63, %v858_v47  ;;  %v945_v3 = vpop.f32.mrb[6].mxu1 }
 0x157   : > { %1029 = vst [vmem:[%s1674_s18 + $0x10] sm:$0xff] %v1021_v61  ;;  %v995_v4 = vadd.f32 %v994_v31, %v942_v62  ;;  %v946_v5 = vadd.f32 %v945_v3, %v863_v1  ;;  %v947_v6 = vpop.f32.mrb[7].mxu1 }
 0x158   : > { %1030 = vst [vmem:[%s1674_s18 + $0x18] sm:$0xff] %v1022_v0  ;;  %v997_v8 = vadd.f32 %v996_v32, %v944_v2  ;;  %v948_v9 = vadd.f32 %v947_v6, %v863_v1 }
 0x159   : > { %v1015_v10 = vmul.f32 0.1, %v995_v4  ;;  %v999_v12 = vadd.f32 %v998_v33, %v946_v5 }
 0x15a   : > { %v1016_v13 = vmul.f32 0.1, %v997_v8  ;;  %v1001_v15 = vadd.f32 %v1000_v34, %v948_v9  ;;  %1041 = sbr.rel (!%p1495_p6) target bundleno = 361 (0x169), region = 105 }
 0x15b   : > { %v1023_v16 = vadd.f32 %v1015_v10, %v1007_v7  ;;  %v1017_v17 = vmul.f32 0.1, %v999_v12 }
 0x15c   : > { %v1024_v19 = vadd.f32 %v1016_v13, %v1008_v11  ;;  %v1018_v20 = vmul.f32 0.1, %v1001_v15  ;;  %v1060_v23 = vld [vmem:[%s1674_s18] sm:$0xff] (%p1495_p6) }
 0x15d   : > { %1031 = vst [vmem:[%s1674_s18 + $0x20] sm:$0xff] %v1023_v16  ;;  %v1025_v21 = vadd.f32 %v1017_v17, %v1009_v14  ;;  %v1062_v24 = vld [vmem:[%s1674_s18 + $0x8] sm:$0xff] (%p1495_p6)  ;;  %1061 = vst [vmem:[%s1047_s10] sm:$0xff] (%p1495_p6), %v1060_v23 }
 0x15e   : > { %1032 = vst [vmem:[%s1674_s18 + $0x28] sm:$0xff] %v1024_v19  ;;  %v1026_v22 = vadd.f32 %v1018_v20, %v1010_v18  ;;  %v1064_v25 = vld [vmem:[%s1674_s18 + $0x10] sm:$0xff] (%p1495_p6)  ;;  %1063 = vst [vmem:[%s1047_s10 + $0x8] sm:$0xff] (%p1495_p6), %v1062_v24 }
 0x15f   : > { %1033 = vst [vmem:[%s1674_s18 + $0x30] sm:$0xff] %v1025_v21  ;;  %v1066_v26 = vld [vmem:[%s1674_s18 + $0x18] sm:$0xff] (%p1495_p6)  ;;  %1065 = vst [vmem:[%s1047_s10 + $0x20] sm:$0xff] (%p1495_p6), %v1064_v25 }
 0x160   : > { %1034 = vst [vmem:[%s1674_s18 + $0x38] sm:$0xff] %v1026_v22  ;;  %1067 = vst [vmem:[%s1047_s10 + $0x28] sm:$0xff] (%p1495_p6), %v1066_v26 }
 0x164   : > { %v1068_v27 = vld [vmem:[%s1674_s18 + $0x20] sm:$0xff] }
 0x165   : > { %v1070_v28 = vld [vmem:[%s1674_s18 + $0x28] sm:$0xff]  ;;  %1069 = vst [vmem:[%s1047_s10 + $0x40] sm:$0xff] %v1068_v27 }
 0x166   : > { %1071 = vst [vmem:[%s1047_s10 + $0x48] sm:$0xff] %v1070_v28  ;;  %v1072_v29 = vld [vmem:[%s1674_s18 + $0x30] sm:$0xff] }
 0x167   : > { %v1074_v30 = vld [vmem:[%s1674_s18 + $0x38] sm:$0xff]  ;;  %1073 = vst [vmem:[%s1047_s10 + $0x60] sm:$0xff] %v1072_v29 }
 0x168   : > { %1075 = vst [vmem:[%s1047_s10 + $0x68] sm:$0xff] %v1074_v30 }
 0x169 PF: > { %s16_s22 = sadd.s32 1, %s1423_s22   ;;  %s1725_s18 = smov %s1411_s19 }
 0x16a   : > { %p13_p11 = scmp.ge.s32.totalorder %s16_s22, 4   ;;  %s1726_s19 = smov %s1500_s28 }
 0x16b   : > { %s1727_s20 = smov %s1419_s21  ;;  %s1728_s21 = smov %s1730_s3 }
 0x16c   :  { %15 = sbr.rel (!%p13_p11) target bundleno = 3 (0x3), region = 173 }

// kernel: edsr_forward.18
= control target key start
LH: loop header
LB: loop body
LE: loop exit
PB: predicated region body
PF: predicated region fallthrough
CT: control target
= control target key end

     0   :  { %s1912_s15 = smov 0   ;;  %s1914_s16 = smov 0   ;;  %s2338_s0 = inlined_call_operand.vmem [shape: bf16[128,384], index: 0, kind: input, shape index: {}]   ;;  %s2339_s1 = inlined_call_operand.vmem [shape: bf16[288,512], index: 1, kind: input, shape index: {}]   ;;  %s2340_s2 = inlined_call_operand.vmem [shape: f32[128,1], index: 2, kind: input, shape index: {}]   ;;  %s2341_s3 = inlined_call_operand.<no memory space> [shape: f32[1], index: 3, kind: input, shape index: {}]   ;;  %s2342_s4 = inlined_call_operand.vmem [shape: bf16[128,512], index: 4, kind: output, shape index: {}]  }
   0x1   :  { %s1916_s17 = smov 0   ;;  %s1918_s18 = smov 0  }
   0x2   :  { %s1920_s19 = smov 0  }
   0x3 LB: > { %s27_s3 = sadd.s32 1, %s1880_s18  ;;  %s1542_s20 = sadd.s32 4294967295, %s1884_s19   ;;  %s1884_s19 = sphi %s1920_s19, %s15_s19   ;;  %s1880_s18 = sphi %s1918_s18, %s2347_s18   ;;  %s1876_s17 = sphi %s1916_s17, %s2346_s17   ;;  %s1872_s16 = sphi %s1914_s16, %s2345_s16   ;;  %s1868_s15 = sphi %s1912_s15, %s2344_s15  }
   0x4   : > { %p29_p0 = scmp.ge.s32.totalorder %s27_s3, 2  ;;  %p67_p1 = scmp.ne.s32.totalorder %s1872_s16, %s1868_s15 }
   0x5   : > { %p68_p2 = scmp.eq.s32.totalorder %s1884_s19, 0  ;;  %p146_p4 = scmp.eq.s32.totalorder %s1542_s20, 1 }
   0x6   : > { %s2349_s3 = smov (%p29_p0, %s27_s3), 0  ;;  %s60_s22 = sadd.s32 1, %s1872_s16 }
   0x7   : > { %p69_p3 = por %p68_p2, %p67_p1  ;;  %s57_s21 = ssub.s32 %s1880_s18, %s2349_s3 }
   0x8   : > { %p58_p5 = scmp.eq.s32.totalorder %s57_s21, 0  ;;  %p1947_p6 = por %p146_p4, %p67_p1 }
   0x9   : > { %p1547_p7 = scmp.ge.s32.totalorder %s1884_s19, 2 }
   0xa   : > { %s1952_s24 = scalar_select %p58_p5, %s1872_s16, %s60_s22  }
   0xb   : > { %190 = sbr.rel (%p1547_p7) target bundleno = 40 (0x28), region = 28 }
  0x12   : > { %193 = sbr.rel (!%p69_p3) target bundleno = 40 (0x28), region = 32  ;;  %s195_s25 = sand.u32 (%p69_p3), 1, %s1872_s16  }
  0x13   : > { %s1633_s26 = sshll.u32 (%p69_p3), %s1880_s18, 3  ;;  %s1715_s27 = smul.u32 (%p69_p3), 288, %s195_s25 }
  0x14   : > { %s1960_s30 = scalar_lea.vmem (%p69_p3), %s2339_s1, %s1633_s26 }
  0x15   : > { %v298_v0 = vld [vmem:[%s1960_s30] sm:$0xff] (%p69_p3)  ;;  %v300_v1 = vld [vmem:[%s1960_s30 + $0x10] sm:$0xff] (%p69_p3)  ;;  %s1968_s5 = scalar_lea.vmem (%p69_p3), [#allocation4], %s1715_s27 }
  0x16   : > { %v302_v2 = vld [vmem:[%s1960_s30 + $0x20] sm:$0xff] (%p69_p3)  ;;  %v304_v3 = vld [vmem:[%s1960_s30 + $0x30] sm:$0xff] (%p69_p3)  ;;  %299 = vst [vmem:[%s1968_s5] sm:$0xff] (%p69_p3), %v298_v0  ;;  %301 = vst [vmem:[%s1968_s5 + $0x8] sm:$0xff] (%p69_p3), %v300_v1 }
  0x17   : > { %v306_v4 = vld [vmem:[%s1960_s30 + $0x40] sm:$0xff] (%p69_p3)  ;;  %v308_v5 = vld [vmem:[%s1960_s30 + $0x50] sm:$0xff] (%p69_p3)  ;;  %303 = vst [vmem:[%s1968_s5 + $0x10] sm:$0xff] (%p69_p3), %v302_v2  ;;  %305 = vst [vmem:[%s1968_s5 + $0x18] sm:$0xff] (%p69_p3), %v304_v3 }
  0x18   : > { %307 = vst [vmem:[%s1968_s5 + $0x20] sm:$0xff] (%p69_p3), %v306_v4  ;;  %309 = vst [vmem:[%s1968_s5 + $0x28] sm:$0xff] (%p69_p3), %v308_v5  ;;  %v310_v6 = vld [vmem:[%s1960_s30 + $0x60] sm:$0xff] (%p69_p3)  ;;  %v312_v7 = vld [vmem:[%s1960_s30 + $0x70] sm:$0xff] (%p69_p3) }
  0x19   : > { %v314_v8 = vld [vmem:[%s1960_s30 + $0x80] sm:$0xff]  ;;  %311 = vst [vmem:[%s1968_s5 + $0x30] sm:$0xff] %v310_v6  ;;  %313 = vst [vmem:[%s1968_s5 + $0x38] sm:$0xff] %v312_v7  ;;  %v316_v9 = vld [vmem:[%s1960_s30 + $0x90] sm:$0xff] }
  0x1a   : > { %315 = vst [vmem:[%s1968_s5 + $0x40] sm:$0xff] %v314_v8  ;;  %v318_v10 = vld [vmem:[%s1960_s30 + $0xa0] sm:$0xff]  ;;  %v320_v11 = vld [vmem:[%s1960_s30 + $0xb0] sm:$0xff]  ;;  %317 = vst [vmem:[%s1968_s5 + $0x48] sm:$0xff] %v316_v9 }
  0x1b   : > { %319 = vst [vmem:[%s1968_s5 + $0x50] sm:$0xff] %v318_v10  ;;  %321 = vst [vmem:[%s1968_s5 + $0x58] sm:$0xff] %v320_v11  ;;  %v322_v12 = vld [vmem:[%s1960_s30 + $0xc0] sm:$0xff]  ;;  %v324_v13 = vld [vmem:[%s1960_s30 + $0xd0] sm:$0xff] }
  0x1c   : > { %v326_v14 = vld [vmem:[%s1960_s30 + $0xe0] sm:$0xff]  ;;  %323 = vst [vmem:[%s1968_s5 + $0x60] sm:$0xff] %v322_v12  ;;  %325 = vst [vmem:[%s1968_s5 + $0x68] sm:$0xff] %v324_v13  ;;  %v328_v15 = vld [vmem:[%s1960_s30 + $0xf0] sm:$0xff] }
  0x1d   : > { %327 = vst [vmem:[%s1968_s5 + $0x70] sm:$0xff] %v326_v14  ;;  %v330_v16 = vld [vmem:[%s1960_s30 + $0x100] sm:$0xff]  ;;  %v332_v17 = vld [vmem:[%s1960_s30 + $0x110] sm:$0xff]  ;;  %329 = vst [vmem:[%s1968_s5 + $0x78] sm:$0xff] %v328_v15 }
  0x1e   : > { %331 = vst [vmem:[%s1968_s5 + $0x80] sm:$0xff] %v330_v16  ;;  %333 = vst [vmem:[%s1968_s5 + $0x88] sm:$0xff] %v332_v17  ;;  %v334_v18 = vld [vmem:[%s1960_s30 + $0x120] sm:$0xff]  ;;  %v336_v19 = vld [vmem:[%s1960_s30 + $0x130] sm:$0xff] }
  0x1f   : > { %v338_v20 = vld [vmem:[%s1960_s30 + $0x140] sm:$0xff]  ;;  %335 = vst [vmem:[%s1968_s5 + $0x90] sm:$0xff] %v334_v18  ;;  %337 = vst [vmem:[%s1968_s5 + $0x98] sm:$0xff] %v336_v19  ;;  %v340_v21 = vld [vmem:[%s1960_s30 + $0x150] sm:$0xff] }
  0x20   : > { %339 = vst [vmem:[%s1968_s5 + $0xa0] sm:$0xff] %v338_v20  ;;  %v342_v22 = vld [vmem:[%s1960_s30 + $0x160] sm:$0xff]  ;;  %v344_v23 = vld [vmem:[%s1960_s30 + $0x170] sm:$0xff]  ;;  %341 = vst [vmem:[%s1968_s5 + $0xa8] sm:$0xff] %v340_v21 }
  0x21   : > { %343 = vst [vmem:[%s1968_s5 + $0xb0] sm:$0xff] %v342_v22  ;;  %345 = vst [vmem:[%s1968_s5 + $0xb8] sm:$0xff] %v344_v23  ;;  %v346_v24 = vld [vmem:[%s1960_s30 + $0x180] sm:$0xff]  ;;  %v348_v25 = vld [vmem:[%s1960_s30 + $0x190] sm:$0xff] }
  0x22   : > { %v350_v26 = vld [vmem:[%s1960_s30 + $0x1a0] sm:$0xff]  ;;  %347 = vst [vmem:[%s1968_s5 + $0xc0] sm:$0xff] %v346_v24  ;;  %349 = vst [vmem:[%s1968_s5 + $0xc8] sm:$0xff] %v348_v25  ;;  %v352_v27 = vld [vmem:[%s1960_s30 + $0x1b0] sm:$0xff] }
  0x23   : > { %351 = vst [vmem:[%s1968_s5 + $0xd0] sm:$0xff] %v350_v26  ;;  %v354_v28 = vld [vmem:[%s1960_s30 + $0x1c0] sm:$0xff]  ;;  %v356_v29 = vld [vmem:[%s1960_s30 + $0x1d0] sm:$0xff]  ;;  %353 = vst [vmem:[%s1968_s5 + $0xd8] sm:$0xff] %v352_v27 }
  0x24   : > { %355 = vst [vmem:[%s1968_s5 + $0xe0] sm:$0xff] %v354_v28  ;;  %357 = vst [vmem:[%s1968_s5 + $0xe8] sm:$0xff] %v356_v29  ;;  %v358_v30 = vld [vmem:[%s1960_s30 + $0x1e0] sm:$0xff]  ;;  %v360_v31 = vld [vmem:[%s1960_s30 + $0x1f0] sm:$0xff] }
  0x25   : > { %v362_v32 = vld [vmem:[%s1960_s30 + $0x200] sm:$0xff]  ;;  %359 = vst [vmem:[%s1968_s5 + $0xf0] sm:$0xff] %v358_v30  ;;  %361 = vst [vmem:[%s1968_s5 + $0xf8] sm:$0xff] %v360_v31  ;;  %v364_v33 = vld [vmem:[%s1960_s30 + $0x210] sm:$0xff] }
  0x26   : > { %363 = vst [vmem:[%s1968_s5 + $0x100] sm:$0xff] %v362_v32  ;;  %v366_v34 = vld [vmem:[%s1960_s30 + $0x220] sm:$0xff]  ;;  %v368_v35 = vld [vmem:[%s1960_s30 + $0x230] sm:$0xff]  ;;  %365 = vst [vmem:[%s1968_s5 + $0x108] sm:$0xff] %v364_v33 }
  0x27   : > { %367 = vst [vmem:[%s1968_s5 + $0x110] sm:$0xff] %v366_v34  ;;  %369 = vst [vmem:[%s1968_s5 + $0x118] sm:$0xff] %v368_v35 }
  0x28 PF: > { %p1550_p8 = scmp.ge.s32.totalorder %s1884_s19, 1  ;;  %p374_p9 = scmp.lt.s32.totalorder %s1884_s19, 3 }
  0x2a   : > { %p375_p10 = pnand %p1550_p8, %p374_p9 }
  0x2b   : > { %s381_s6 = sand.u32 (!%p375_p10), 1, %s1868_s15   ;;  %v1886_v36 = vmov (!%p375_p10), 0   ;;  %v1816_v37 = vld [vmem:[%s2338_s0 + $0x4] ss:$12 sps:$4 sm:$0xff] (!%p375_p10)   ;;  %v1817_v57 = vld [vmem:[%s2338_s0 + $0x8] ss:$12 sps:$4 sm:$0xff] (!%p375_p10)  }
  0x2c   : > { %378 = sbr.rel (%p375_p10) target bundleno = 399 (0x18f), region = 70  ;;  %1146 = vmatprep.mubr.bf16.mxu0 (!%p375_p10), %v1886_v36  ;;  %1758 = vset.pattern.permute.xlu0 (!%p375_p10), %v1886_v36  ;;  %v1820_v62 = vld [vmem:[%s2338_s0 + $0x20] ss:$12 sps:$4 sm:$0xff] (!%p375_p10)   ;;  %v779_v3 = vld [vmem:[%s2340_s2 + $0x10] sm:$0xff] (!%p375_p10)  ;;  %v1824_v6 = vld [vmem:[%s2338_s0 + $0x38] ss:$12 sps:$4 sm:$0xff] (!%p375_p10)  }
  0x2d   : > { %s1716_s7 = smul.u32 (!%p375_p10), 288, %s381_s6  ;;  %1759 = vset.pattern.permute.xlu1 (!%p375_p10), %v1886_v36  ;;  %1033 = vmatprep.mubr.bf16.mxu1 (!%p375_p10), %v1816_v37  ;;  %v777_v1 = vld [vmem:[%s2340_s2] sm:$0xff] (!%p375_p10)  ;;  %v778_v5 = vld [vmem:[%s2340_s2 + $0x8] sm:$0xff] (!%p375_p10)  ;;  %v780_v7 = vld [vmem:[%s2340_s2 + $0x18] sm:$0xff] (!%p375_p10)  ;;  %s1551_s25 = sshll.u32 (!%p375_p10), %s381_s6, 7 }
  0x2e   : > { %795 = vperm.xlu0 (!%p375_p10), %1758, %v777_v1   ;;  %805 = vperm.xlu1 (!%p375_p10), %1759, %v779_v3   ;;  %v781_v10 = vld [vmem:[%s2340_s2 + $0x20] sm:$0xff] (!%p375_p10)  ;;  %v782_v11 = vld [vmem:[%s2340_s2 + $0x28] sm:$0xff] (!%p375_p10)  ;;  %v783_v14 = vld [vmem:[%s2340_s2 + $0x30] sm:$0xff] (!%p375_p10)  ;;  %s2243_s15 = scalar_lea.vmem (!%p375_p10), [#allocation5], %s1551_s25 }
  0x2f   : > { %s2047_s10 = scalar_lea.vmem (!%p375_p10), [#allocation4], %s1716_s7  ;;  %v1828_v15 = vld [vmem:[%s2338_s0 + $0x50] ss:$12 sps:$4 sm:$0xff] (!%p375_p10)   ;;  %v785_v19 = vld [vmem:[%s2340_s2 + $0x40] sm:$0xff] (!%p375_p10)  ;;  %v786_v20 = vld [vmem:[%s2340_s2 + $0x48] sm:$0xff] (!%p375_p10) }
  0x30   : > { %v1760_v38 = vld [vmem:[%s2047_s10 + $0x4] ss:$8 sps:$4 sm:$0xff] (!%p375_p10)   ;;  %v1762_v39 = vld [vmem:[%s2047_s10] ss:$8 sps:$4 sm:$0xff] (!%p375_p10)   ;;  %v1763_v40 = vld [vmem:[%s2047_s10 + $0x14] ss:$8 sps:$4 sm:$0xff] (!%p375_p10)  }
  0x31   : > { %1001 = vmatprep.subr.bf16.mxu1 (!%p375_p10), %v1760_v38  ;;  %v1765_v41 = vld [vmem:[%s2047_s10 + $0x10] ss:$8 sps:$4 sm:$0xff] (!%p375_p10)   ;;  %v1766_v42 = vld [vmem:[%s2047_s10 + $0x24] ss:$8 sps:$4 sm:$0xff] (!%p375_p10)   ;;  %v1768_v43 = vld [vmem:[%s2047_s10 + $0x20] ss:$8 sps:$4 sm:$0xff] (!%p375_p10)  }
  0x32   : > { %1002 = vmatpush1.bf16.msra.mxu1 (!%p375_p10), %v1762_v39  ;;  %v1769_v44 = vld [vmem:[%s2047_s10 + $0x34] ss:$8 sps:$4 sm:$0xff] (!%p375_p10)   ;;  %v1771_v45 = vld [vmem:[%s2047_s10 + $0x30] ss:$8 sps:$4 sm:$0xff] (!%p375_p10)   ;;  %v1772_v46 = vld [vmem:[%s2047_s10 + $0x44] ss:$8 sps:$4 sm:$0xff] (!%p375_p10)   ;;  %800 = vperm.xlu0 (!%p375_p10), %1758, %v778_v5  }
  0x33   : > { %1003 = vmatprep.subr.bf16.mxu1 %v1763_v40  ;;  %v1774_v47 = vld [vmem:[%s2047_s10 + $0x40] ss:$8 sps:$4 sm:$0xff]   ;;  %v1775_v48 = vld [vmem:[%s2047_s10 + $0x54] ss:$8 sps:$4 sm:$0xff]   ;;  %v1777_v49 = vld [vmem:[%s2047_s10 + $0x50] ss:$8 sps:$4 sm:$0xff]   ;;  %810 = vperm.xlu1 %1759, %v780_v7  }
  0x34   : > { %v1802_v50 = vld [vmem:[%s2047_s10 + $0x104] ss:$8 sps:$4 sm:$0xff]   ;;  %v1806_v52 = vld [vmem:[%s2047_s10 + $0x100] ss:$8 sps:$4 sm:$0xff]   ;;  %v1808_v53 = vld [vmem:[%s2047_s10 + $0x114] ss:$8 sps:$4 sm:$0xff]  }
  0x35   : > { %v1778_v51 = vld [vmem:[%s2047_s10 + $0x64] ss:$8 sps:$4 sm:$0xff]   ;;  %1114 = vmatprep.subr.bf16.mxu0 %v1802_v50  ;;  %v1780_v54 = vld [vmem:[%s2047_s10 + $0x60] ss:$8 sps:$4 sm:$0xff]   ;;  %v1812_v55 = vld [vmem:[%s2047_s10 + $0x110] ss:$8 sps:$4 sm:$0xff]  }
  0x36   : > { %1004 = vmatpush1.bf16.msra.mxu1 %v1765_v41  ;;  %1115 = vmatpush1.bf16.msra.mxu0 %v1806_v52  ;;  %v1781_v56 = vld [vmem:[%s2047_s10 + $0x74] ss:$8 sps:$4 sm:$0xff]   ;;  %v1783_v58 = vld [vmem:[%s2047_s10 + $0x70] ss:$8 sps:$4 sm:$0xff]   ;;  %v1784_v59 = vld [vmem:[%s2047_s10 + $0x84] ss:$8 sps:$4 sm:$0xff]  }
  0x37   : > { %1005 = vmatprep.subr.bf16.mxu1 %v1766_v42  ;;  %1116 = vmatprep.subr.bf16.mxu0 %v1808_v53  ;;  %v1786_v60 = vld [vmem:[%s2047_s10 + $0x80] ss:$8 sps:$4 sm:$0xff]   ;;  %v1787_v61 = vld [vmem:[%s2047_s10 + $0x94] ss:$8 sps:$4 sm:$0xff]   ;;  %v1789_v63 = vld [vmem:[%s2047_s10 + $0x90] ss:$8 sps:$4 sm:$0xff]  }
  0x38   : > { %v1790_v0 = vld [vmem:[%s2047_s10 + $0xa4] ss:$8 sps:$4 sm:$0xff]   ;;  %v1792_v2 = vld [vmem:[%s2047_s10 + $0xa0] ss:$8 sps:$4 sm:$0xff]   ;;  %v1793_v4 = vld [vmem:[%s2047_s10 + $0xb4] ss:$8 sps:$4 sm:$0xff]   ;;  %815 = vperm.xlu0 %1758, %v781_v10   ;;  %820 = vperm.xlu1 %1759, %v782_v11  }
  0x39   : > { %v1795_v8 = vld [vmem:[%s2047_s10 + $0xb0] ss:$8 sps:$4 sm:$0xff]   ;;  %v1796_v9 = vld [vmem:[%s2047_s10 + $0xc4] ss:$8 sps:$4 sm:$0xff]   ;;  %v1798_v12 = vld [vmem:[%s2047_s10 + $0xc0] ss:$8 sps:$4 sm:$0xff]  }
  0x3a   : > { %1006 = vmatpush1.bf16.msra.mxu1 %v1768_v43  ;;  %1117 = vmatpush1.bf16.msra.mxu0 %v1812_v55  ;;  %v1799_v13 = vld [vmem:[%s2047_s10 + $0xd4] ss:$8 sps:$4 sm:$0xff]   ;;  %v1801_v17 = vld [vmem:[%s2047_s10 + $0xd0] ss:$8 sps:$4 sm:$0xff]   ;;  %v1804_v18 = vld [vmem:[%s2047_s10 + $0xe4] ss:$8 sps:$4 sm:$0xff]  }
  0x3b   : > { %1007 = vmatprep.subr.bf16.mxu1 %v1769_v44  ;;  %v784_v16 = vld [vmem:[%s2340_s2 + $0x38] sm:$0xff]  ;;  %v1807_v21 = vld [vmem:[%s2047_s10 + $0xe0] ss:$8 sps:$4 sm:$0xff]   ;;  %v787_v23 = vld [vmem:[%s2340_s2 + $0x50] sm:$0xff]  ;;  %s1650_s6 = sshll.u32 (%p1947_p6), %s1876_s17, 3 }
  0x3c   : > { %825 = vperm.xlu0 %1758, %v783_v14   ;;  %830 = vperm.xlu1 %1759, %v784_v16   ;;  %v1810_v22 = vld [vmem:[%s2047_s10 + $0xf4] ss:$8 sps:$4 sm:$0xff]   ;;  %v1813_v26 = vld [vmem:[%s2047_s10 + $0xf0] ss:$8 sps:$4 sm:$0xff]   ;;  %v789_v27 = vld [vmem:[%s2340_s2 + $0x60] sm:$0xff]  ;;  %s1351_s28 = scalar_lea.vmem (%p1947_p6), %s2342_s4, %s1650_s6 }
  0x3d   : > { %1147 = vmatmul.mubr.bf16.vlgmr.msra.gmra.mrb[0].mxu0 %v1817_v57  ;;  %v1832_v24 = vld [vmem:[%s2338_s0 + $0x68] ss:$12 sps:$4 sm:$0xff]   ;;  %v788_v25 = vld [vmem:[%s2340_s2 + $0x58] sm:$0xff]  ;;  %v1814_v29 = vld [vmem:[%s2338_s0] ss:$12 sps:$4 sm:$0xff]  }
  0x3e   : > { %1008 = vmatpush1.bf16.msra.mxu1 %v1771_v45  ;;  %1156 = vmatprep.mubr.bf16.mxu0 %v1886_v36  ;;  %v790_v28 = vld [vmem:[%s2340_s2 + $0x68] sm:$0xff]  ;;  %v791_v31 = vld [vmem:[%s2340_s2 + $0x70] sm:$0xff]  ;;  %v792_v33 = vld [vmem:[%s2340_s2 + $0x78] sm:$0xff] }
  0x3f   : > { %1009 = vmatprep.subr.bf16.mxu1 %v1772_v46  ;;  %v1818_v30 = vld [vmem:[%s2338_s0 + $0x1c] ss:$12 sps:$4 sm:$0xff]   ;;  %v1836_v32 = vld [vmem:[%s2338_s0 + $0x80] ss:$12 sps:$4 sm:$0xff]   ;;  %v1821_v34 = vld [vmem:[%s2338_s0 + $0x18] ss:$12 sps:$4 sm:$0xff]  }
  0x40   : > { %835 = vperm.xlu0 %1758, %v785_v19   ;;  %840 = vperm.xlu1 %1759, %v786_v20   ;;  %v1822_v35 = vld [vmem:[%s2338_s0 + $0x34] ss:$12 sps:$4 sm:$0xff]   ;;  %v1840_v37 = vld [vmem:[%s2338_s0 + $0x98] ss:$12 sps:$4 sm:$0xff]   ;;  %v1825_v38 = vld [vmem:[%s2338_s0 + $0x30] ss:$12 sps:$4 sm:$0xff]  }
  0x41   : > { %v1826_v39 = vld [vmem:[%s2338_s0 + $0x4c] ss:$12 sps:$4 sm:$0xff]   ;;  %v1844_v40 = vld [vmem:[%s2338_s0 + $0xb0] ss:$12 sps:$4 sm:$0xff]   ;;  %v1829_v41 = vld [vmem:[%s2338_s0 + $0x48] ss:$12 sps:$4 sm:$0xff]  }
  0x42   : > { %1010 = vmatpush1.bf16.msra.mxu1 %v1774_v47  ;;  %v1830_v42 = vld [vmem:[%s2338_s0 + $0x64] ss:$12 sps:$4 sm:$0xff]   ;;  %v1834_v43 = vld [vmem:[%s2338_s0 + $0x7c] ss:$12 sps:$4 sm:$0xff]   ;;  %v1838_v45 = vld [vmem:[%s2338_s0 + $0x94] ss:$12 sps:$4 sm:$0xff]  }
  0x43   : > { %1011 = vmatprep.subr.bf16.mxu1 %v1775_v48  ;;  %v1837_v44 = vld [vmem:[%s2338_s0 + $0x78] ss:$12 sps:$4 sm:$0xff]   ;;  %v1841_v46 = vld [vmem:[%s2338_s0 + $0x90] ss:$12 sps:$4 sm:$0xff]   ;;  %v1845_v48 = vld [vmem:[%s2338_s0 + $0xa8] ss:$12 sps:$4 sm:$0xff]  }
  0x44   : > { %845 = vperm.xlu0 %1758, %v787_v23   ;;  %850 = vperm.xlu1 %1759, %v788_v25   ;;  %v1842_v47 = vld [vmem:[%s2338_s0 + $0xac] ss:$12 sps:$4 sm:$0xff]  }
  0x45   : > { %1157 = vmatmul.mubr.bf16.gmra.mrb[4].mxu0 %v1820_v62 }
  0x46   : > { %1012 = vmatpush1.bf16.msra.mxu1 %v1777_v49  ;;  %1166 = vmatprep.mubr.bf16.mxu0 %v1886_v36 }
  0x47   : > { %1013 = vmatprep.subr.bf16.mxu1 %v1778_v51 }
  0x48   : > { %855 = vperm.xlu0 %1758, %v789_v27   ;;  %860 = vperm.xlu1 %1759, %v790_v28  }
  0x4a   : > { %1014 = vmatpush1.bf16.msra.mxu1 %v1780_v54 }
  0x4b   : > { %1015 = vmatprep.subr.bf16.mxu1 %v1781_v56 }
  0x4c   : > { %865 = vperm.xlu0 %1758, %v791_v31   ;;  %870 = vperm.xlu1 %1759, %v792_v33  }
  0x4d   : > { %1167 = vmatmul.mubr.bf16.gmra.mrb[8].mxu0 %v1824_v6 }
  0x4e   : > { %1016 = vmatpush1.bf16.msra.mxu1 %v1783_v58  ;;  %1176 = vmatprep.mubr.bf16.mxu0 %v1886_v36 }
  0x4f   : > { %1017 = vmatprep.subr.bf16.mxu1 %v1784_v59 }
  0x52   : > { %1018 = vmatpush1.bf16.msra.mxu1 %v1786_v60 }
  0x53   : > { %1019 = vmatprep.subr.bf16.mxu1 %v1787_v61 }
  0x55   : > { %1177 = vmatmul.mubr.bf16.gmra.mrb[12].mxu0 %v1828_v15 }
  0x56   : > { %1020 = vmatpush1.bf16.msra.mxu1 %v1789_v63  ;;  %1186 = vmatprep.mubr.bf16.mxu0 %v1886_v36 }
  0x57   : > { %1021 = vmatprep.subr.bf16.mxu1 %v1790_v0 }
  0x5a   : > { %1022 = vmatpush1.bf16.msra.mxu1 %v1792_v2 }
  0x5b   : > { %1023 = vmatprep.subr.bf16.mxu1 %v1793_v4 }
  0x5d   : > { %1187 = vmatmul.mubr.bf16.gmra.mrb[16].mxu0 %v1832_v24 }
  0x5e   : > { %1024 = vmatpush1.bf16.msra.mxu1 %v1795_v8  ;;  %1196 = vmatprep.mubr.bf16.mxu0 %v1886_v36 }
  0x5f   : > { %1025 = vmatprep.subr.bf16.mxu1 %v1796_v9 }
  0x62   : > { %1026 = vmatpush1.bf16.msra.mxu1 %v1798_v12 }
  0x63   : > { %1027 = vmatprep.subr.bf16.mxu1 %v1799_v13 }
  0x65   : > { %1197 = vmatmul.mubr.bf16.gmra.mrb[20].mxu0 %v1836_v32 }
  0x66   : > { %1028 = vmatpush1.bf16.msra.mxu1 %v1801_v17  ;;  %1206 = vmatprep.mubr.bf16.mxu0 %v1886_v36 }
  0x67   : > { %1029 = vmatprep.subr.bf16.mxu1 %v1804_v18 }
  0x6a   : > { %1030 = vmatpush1.bf16.msra.mxu1 %v1807_v21 }
  0x6b   : > { %1031 = vmatprep.subr.bf16.mxu1 %v1810_v22 }
  0x6d   : > { %1207 = vmatmul.mubr.bf16.gmra.mrb[24].mxu0 %v1840_v37 }
  0x6e   : > { %1032 = vmatpush1.bf16.msra.mxu1 %v1813_v26  ;;  %1216 = vmatprep.mubr.bf16.mxu0 %v1886_v36  ;;  %v1833_v36 = vld [vmem:[%s2338_s0 + $0x60] ss:$12 sps:$4 sm:$0xff]  }
  0x71   : > { %1034 = vmatmul.mubr.bf16.vlgmr.msra.gmra.mrb[0].mxu1 %v1814_v29 }
  0x72   : > { %1043 = vmatprep.mubr.bf16.mxu1 %v1818_v30 }
  0x75   : > { %1217 = vmatmul.mubr.bf16.gmra.mrb[28].mxu0 %v1844_v40 }
  0x79   : > { %1044 = vmatmul.mubr.bf16.gmra.mrb[4].mxu1 %v1821_v34 }
  0x7a   : > { %1053 = vmatprep.mubr.bf16.mxu1 %v1822_v35 }
  0x81   : > { %1054 = vmatmul.mubr.bf16.gmra.mrb[8].mxu1 %v1825_v38 }
  0x82   : > { %1063 = vmatprep.mubr.bf16.mxu1 %v1826_v39 }
  0x89   : > { %1064 = vmatmul.mubr.bf16.gmra.mrb[12].mxu1 %v1829_v41 }
  0x8a   : > { %1073 = vmatprep.mubr.bf16.mxu1 %v1830_v42 }
  0x91   : > { %1074 = vmatmul.mubr.bf16.gmra.mrb[16].mxu1 %v1833_v36 }
  0x92   : > { %1083 = vmatprep.mubr.bf16.mxu1 %v1834_v43 }
  0x99   : > { %1084 = vmatmul.mubr.bf16.gmra.mrb[20].mxu1 %v1837_v44 }
  0x9a   : > { %1093 = vmatprep.mubr.bf16.mxu1 %v1838_v45 }
  0xa1   : > { %1094 = vmatmul.mubr.bf16.gmra.mrb[24].mxu1 %v1841_v46 }
  0xa2   : > { %1103 = vmatprep.mubr.bf16.mxu1 %v1842_v47 }
  0xa9   : > { %1104 = vmatmul.mubr.bf16.gmra.mrb[28].mxu1 %v1845_v48 }
  0xad   : > { %v796_v1 = vpop.permute.xlu0 %795  ;;  %v806_v17 = vpop.permute.xlu1 %805 }
  0xb1   : > { %v801_v7 = vpop.permute.xlu0 %800 }
  0xb2   : > { %v811_v29 = vpop.permute.xlu1 %810 }
  0xb7   : > { %v816_v44 = vpop.permute.xlu0 %815 }
 0x110   : > { %v1148_v49 = vpop.f32.mrb[0].mxu0 }
 0x111   : > { %v1150_v50 = vpop.f32.mrb[1].mxu0 }
 0x112   : > { %v1152_v51 = vpop.f32.mrb[2].mxu0 }
 0x113   : > { %v1154_v52 = vpop.f32.mrb[3].mxu0 }
 0x118   : > { %v1158_v53 = vpop.f32.mrb[4].mxu0 }
 0x119   : > { %v1160_v54 = vpop.f32.mrb[5].mxu0 }
 0x11a   : > { %v1162_v55 = vpop.f32.mrb[6].mxu0 }
 0x11b   : > { %v1164_v56 = vpop.f32.mrb[7].mxu0 }
 0x120   : > { %v2209_v57 = vpop.f32.mrb[8].mxu0 }
 0x121   : > { %v2211_v58 = vpop.f32.mrb[9].mxu0 }
 0x122   : > { %v2213_v59 = vpop.f32.mrb[10].mxu0 }
 0x123   : > { %v2215_v60 = vpop.f32.mrb[11].mxu0 }
 0x128   : > { %v2217_v61 = vpop.f32.mrb[12].mxu0 }
 0x129   : > { %v2219_v62 = vpop.f32.mrb[13].mxu0 }
 0x12a   : > { %v2221_v63 = vpop.f32.mrb[14].mxu0 }
 0x12b   : > { %v2223_v0 = vpop.f32.mrb[15].mxu0 }
 0x130   : > { %v2225_v2 = vpop.f32.mrb[16].mxu0 }
 0x131   : > { %v2227_v3 = vpop.f32.mrb[17].mxu0 }
 0x132   : > { %v2229_v4 = vpop.f32.mrb[18].mxu0 }
 0x133   : > { %v2231_v5 = vpop.f32.mrb[19].mxu0 }
 0x138   : > { %v2235_v15 = vpop.f32.mrb[20].mxu0 }
 0x139   : > { %v2237_v19 = vpop.f32.mrb[21].mxu0 }
 0x13a   : > { %v2239_v21 = vpop.f32.mrb[22].mxu0 }
 0x13b   : > { %v2241_v24 = vpop.f32.mrb[23].mxu0 }
 0x140   : > { %v2247_v35 = vpop.f32.mrb[24].mxu0 }
 0x141   : > { %v2249_v39 = vpop.f32.mrb[25].mxu0 }
 0x142   : > { %v2251_v41 = vpop.f32.mrb[26].mxu0 }
 0x143   : > { %v2253_v43 = vpop.f32.mrb[27].mxu0 }
 0x144   : > { %v1035_v6 = vpop.f32.mrb[0].mxu1 }
 0x145   : > { %v1036_v8 = vadd.f32 %v1035_v6, %v796_v1  ;;  %v1037_v9 = vpop.f32.mrb[1].mxu1 }
 0x146   : > { %v1038_v10 = vadd.f32 %v1037_v9, %v796_v1  ;;  %v1039_v11 = vpop.f32.mrb[2].mxu1 }
 0x147   : > { %v1149_v12 = vadd.f32 %v1148_v49, %v1036_v8  ;;  %v1040_v13 = vadd.f32 %v1039_v11, %v801_v7  ;;  %v1041_v14 = vpop.f32.mrb[3].mxu1  ;;  %v821_v49 = vpop.permute.xlu1 %820 }
 0x148   : > { %v1151_v16 = vadd.f32 %v1150_v50, %v1038_v10  ;;  %v1042_v18 = vadd.f32 %v1041_v14, %v801_v7 }
 0x149   : > { %v1153_v20 = vadd.f32 %v1152_v51, %v1040_v13 }
 0x14a   : > { %v1634_v22 = vpack.c.bf16 %v1151_v16, %v1149_v12  ;;  %v1155_v23 = vadd.f32 %v1154_v52, %v1042_v18 }
 0x14c   : > { %1323 = vst [vmem:[%s2243_s15] sm:$0xff] %v1634_v22  ;;  %v1635_v25 = vpack.c.bf16 %v1155_v23, %v1153_v20  ;;  %v1045_v26 = vpop.f32.mrb[4].mxu1 }
 0x14d   : > { %v1046_v27 = vadd.f32 %v1045_v26, %v806_v17  ;;  %v1047_v28 = vpop.f32.mrb[5].mxu1 }
 0x14e   : > { %1324 = vst [vmem:[%s2243_s15 + $0x8] sm:$0xff] %v1635_v25  ;;  %v1048_v30 = vadd.f32 %v1047_v28, %v806_v17  ;;  %v1049_v31 = vpop.f32.mrb[6].mxu1 }
 0x14f   : > { %v1159_v32 = vadd.f32 %v1158_v53, %v1046_v27  ;;  %v1050_v33 = vadd.f32 %v1049_v31, %v811_v29  ;;  %v1051_v34 = vpop.f32.mrb[7].mxu1 }
 0x150   : > { %v1161_v37 = vadd.f32 %v1160_v54, %v1048_v30  ;;  %v1052_v38 = vadd.f32 %v1051_v34, %v811_v29 }
 0x151   : > { %v1163_v40 = vadd.f32 %v1162_v55, %v1050_v33  ;;  %v2258_v55 = vpop.f32.mrb[28].mxu0 }
 0x152   : > { %v1636_v42 = vpack.c.bf16 %v1161_v37, %v1159_v32  ;;  %v1165_v36 = vadd.f32 %v1164_v56, %v1052_v38  ;;  %v2261_v6 = vpop.f32.mrb[29].mxu0 }
 0x153   : > { %v2264_v8 = vpop.f32.mrb[30].mxu0 }
 0x154   : > { %1325 = vst [vmem:[%s2243_s15 + $0x10] sm:$0xff] %v1636_v42  ;;  %v1637_v45 = vpack.c.bf16 %v1165_v36, %v1163_v40  ;;  %v1055_v46 = vpop.f32.mrb[8].mxu1  ;;  %v2267_v11 = vpop.f32.mrb[31].mxu0 }
 0x155   : > { %v1056_v47 = vadd.f32 %v1055_v46, %v816_v44  ;;  %v1057_v48 = vpop.f32.mrb[9].mxu1 }
 0x156   : > { %1326 = vst [vmem:[%s2243_s15 + $0x18] sm:$0xff] %v1637_v45  ;;  %v1058_v50 = vadd.f32 %v1057_v48, %v816_v44  ;;  %v1059_v51 = vpop.f32.mrb[10].mxu1 }
 0x157   : > { %v1169_v52 = vadd.f32 %v2209_v57, %v1056_v47  ;;  %v1060_v53 = vadd.f32 %v1059_v51, %v821_v49  ;;  %v1061_v54 = vpop.f32.mrb[11].mxu1  ;;  %v826_v57 = vpop.permute.xlu0 %825 }
 0x158   : > { %v1171_v56 = vadd.f32 %v2211_v58, %v1058_v50  ;;  %v1062_v1 = vadd.f32 %v1061_v54, %v821_v49  ;;  %v831_v58 = vpop.permute.xlu1 %830 }
 0x159   : > { %v1173_v7 = vadd.f32 %v2213_v59, %v1060_v53 }
 0x15a   : > { %v1638_v9 = vpack.c.bf16 %v1171_v56, %v1169_v52  ;;  %v1175_v10 = vadd.f32 %v2215_v60, %v1062_v1 }
 0x15b   : > { %v836_v28 = vpop.permute.xlu0 %835 }
 0x15c   : > { %1327 = vst [vmem:[%s2243_s15 + $0x20] sm:$0xff] %v1638_v9  ;;  %v1639_v12 = vpack.c.bf16 %v1175_v10, %v1173_v7  ;;  %v1065_v13 = vpop.f32.mrb[12].mxu1  ;;  %v841_v33 = vpop.permute.xlu1 %840 }
 0x15d   : > { %v1066_v14 = vadd.f32 %v1065_v13, %v826_v57  ;;  %v1067_v16 = vpop.f32.mrb[13].mxu1 }
 0x15e   : > { %1328 = vst [vmem:[%s2243_s15 + $0x28] sm:$0xff] %v1639_v12  ;;  %v1068_v17 = vadd.f32 %v1067_v16, %v826_v57  ;;  %v1069_v18 = vpop.f32.mrb[14].mxu1 }
 0x15f   : > { %v1179_v59 = vadd.f32 %v2217_v61, %v1066_v14  ;;  %v1070_v20 = vadd.f32 %v1069_v18, %v831_v58  ;;  %v1071_v22 = vpop.f32.mrb[15].mxu1  ;;  %v846_v44 = vpop.permute.xlu0 %845 }
 0x160   : > { %v1181_v60 = vadd.f32 %v2219_v62, %v1068_v17  ;;  %v1072_v23 = vadd.f32 %v1071_v22, %v831_v58  ;;  %v851_v49 = vpop.permute.xlu1 %850 }
 0x161   : > { %v1183_v25 = vadd.f32 %v2221_v63, %v1070_v20 }
 0x162   : > { %v1640_v26 = vpack.c.bf16 %v1181_v60, %v1179_v59  ;;  %v1185_v27 = vadd.f32 %v2223_v0, %v1072_v23 }
 0x163   : > { %v856_v1 = vpop.permute.xlu0 %855 }
 0x164   : > { %1329 = vst [vmem:[%s2243_s15 + $0x30] sm:$0xff] %v1640_v26  ;;  %v1641_v29 = vpack.c.bf16 %v1185_v27, %v1183_v25  ;;  %v1075_v30 = vpop.f32.mrb[16].mxu1  ;;  %v861_v12 = vpop.permute.xlu1 %860 }
 0x165   : > { %v1076_v31 = vadd.f32 %v1075_v30, %v836_v28  ;;  %v1077_v32 = vpop.f32.mrb[17].mxu1 }
 0x166   : > { %1330 = vst [vmem:[%s2243_s15 + $0x38] sm:$0xff] %v1641_v29  ;;  %v1078_v61 = vadd.f32 %v1077_v32, %v836_v28  ;;  %v1079_v34 = vpop.f32.mrb[18].mxu1 }
 0x167   : > { %v1189_v62 = vadd.f32 %v2225_v2, %v1076_v31  ;;  %v1080_v37 = vadd.f32 %v1079_v34, %v841_v33  ;;  %v1081_v38 = vpop.f32.mrb[19].mxu1  ;;  %v866_v59 = vpop.permute.xlu0 %865 }
 0x168   : > { %v1191_v63 = vadd.f32 %v2227_v3, %v1078_v61  ;;  %v1082_v40 = vadd.f32 %v1081_v38, %v841_v33  ;;  %v871_v25 = vpop.permute.xlu1 %870  ;;  %v1417_v33 = vld [vmem:[%s2243_s15 + $0x20] sm:$0xff] (%p1947_p6)  ;;  %v1419_v61 = vld [vmem:[%s2243_s15 + $0x28] sm:$0xff] (%p1947_p6) }
 0x169   : > { %v1193_v0 = vadd.f32 %v2229_v4, %v1080_v37  ;;  %1418 = vst [vmem:[%s1351_s28 + $0x40] sm:$0xff] (%p1947_p6), %v1417_v33  ;;  %1420 = vst [vmem:[%s1351_s28 + $0x50] sm:$0xff] (%p1947_p6), %v1419_v61 }
 0x16a   : > { %v1642_v42 = vpack.c.bf16 %v1191_v63, %v1189_v62  ;;  %v1195_v36 = vadd.f32 %v2231_v5, %v1082_v40 }
 0x16b   : > { %v1421_v34 = vld [vmem:[%s2243_s15 + $0x30] sm:$0xff] (%p1947_p6) }
 0x16c   : > { %1331 = vst [vmem:[%s2243_s15 + $0x40] sm:$0xff] %v1642_v42  ;;  %v1643_v45 = vpack.c.bf16 %v1195_v36, %v1193_v0  ;;  %v1085_v46 = vpop.f32.mrb[20].mxu1  ;;  %1422 = vst [vmem:[%s1351_s28 + $0x60] sm:$0xff] (%p1947_p6), %v1421_v34 }
 0x16d   : > { %v1086_v47 = vadd.f32 %v1085_v46, %v846_v44  ;;  %v1087_v48 = vpop.f32.mrb[21].mxu1  ;;  %v1423_v62 = vld [vmem:[%s2243_s15 + $0x38] sm:$0xff] (%p1947_p6) }
 0x16e   : > { %1332 = vst [vmem:[%s2243_s15 + $0x48] sm:$0xff] %v1643_v45  ;;  %v1088_v2 = vadd.f32 %v1087_v48, %v846_v44  ;;  %v1089_v50 = vpop.f32.mrb[22].mxu1  ;;  %1424 = vst [vmem:[%s1351_s28 + $0x70] sm:$0xff] (%p1947_p6), %v1423_v62 }
 0x16f   : > { %v1199_v3 = vadd.f32 %v2235_v15, %v1086_v47  ;;  %v1090_v51 = vadd.f32 %v1089_v50, %v851_v49  ;;  %v1091_v52 = vpop.f32.mrb[23].mxu1 }
 0x170   : > { %v1201_v4 = vadd.f32 %v2237_v19, %v1088_v2  ;;  %v1092_v53 = vadd.f32 %v1091_v52, %v851_v49 }
 0x171   : > { %v1203_v5 = vadd.f32 %v2239_v21, %v1090_v51 }
 0x172   : > { %v1644_v54 = vpack.c.bf16 %v1201_v4, %v1199_v3  ;;  %v1205_v56 = vadd.f32 %v2241_v24, %v1092_v53 }
 0x173   : > { %v1425_v37 = vld [vmem:[%s2243_s15 + $0x40] sm:$0xff] (%p1947_p6) }
 0x174   : > { %1333 = vst [vmem:[%s2243_s15 + $0x50] sm:$0xff] %v1644_v54  ;;  %v1645_v7 = vpack.c.bf16 %v1205_v56, %v1203_v5  ;;  %v1095_v9 = vpop.f32.mrb[24].mxu1  ;;  %1426 = vst [vmem:[%s1351_s28 + $0x80] sm:$0xff] (%p1947_p6), %v1425_v37 }
 0x175   : > { %v1096_v10 = vadd.f32 %v1095_v9, %v856_v1  ;;  %v1097_v57 = vpop.f32.mrb[25].mxu1  ;;  %v1427_v38 = vld [vmem:[%s2243_s15 + $0x48] sm:$0xff] (%p1947_p6) }
 0x176   : > { %1334 = vst [vmem:[%s2243_s15 + $0x58] sm:$0xff] %v1645_v7  ;;  %v1098_v15 = vadd.f32 %v1097_v57, %v856_v1  ;;  %v1099_v13 = vpop.f32.mrb[26].mxu1  ;;  %1428 = vst [vmem:[%s1351_s28 + $0x90] sm:$0xff] (%p1947_p6), %v1427_v38 }
 0x177   : > { %v1209_v19 = vadd.f32 %v2247_v35, %v1096_v10  ;;  %v1100_v14 = vadd.f32 %v1099_v13, %v861_v12  ;;  %v1101_v16 = vpop.f32.mrb[27].mxu1 }
 0x178   : > { %v1211_v21 = vadd.f32 %v2249_v39, %v1098_v15  ;;  %v1102_v58 = vadd.f32 %v1101_v16, %v861_v12 }
 0x179   : > { %v1213_v24 = vadd.f32 %v2251_v41, %v1100_v14 }
 0x17a   : > { %v1646_v17 = vpack.c.bf16 %v1211_v21, %v1209_v19  ;;  %v1215_v18 = vadd.f32 %v2253_v43, %v1102_v58 }
 0x17b   : > { %v1429_v63 = vld [vmem:[%s2243_s15 + $0x50] sm:$0xff] (%p1947_p6) }
 0x17c   : > { %1335 = vst [vmem:[%s2243_s15 + $0x60] sm:$0xff] %v1646_v17  ;;  %v1647_v20 = vpack.c.bf16 %v1215_v18, %v1213_v24  ;;  %v1105_v22 = vpop.f32.mrb[28].mxu1  ;;  %1430 = vst [vmem:[%s1351_s28 + $0xa0] sm:$0xff] (%p1947_p6), %v1429_v63 }
 0x17d   : > { %v1106_v60 = vadd.f32 %v1105_v22, %v866_v59  ;;  %v1107_v23 = vpop.f32.mrb[29].mxu1  ;;  %v1431_v40 = vld [vmem:[%s2243_s15 + $0x58] sm:$0xff] (%p1947_p6) }
 0x17e   : > { %1336 = vst [vmem:[%s2243_s15 + $0x68] sm:$0xff] %v1647_v20  ;;  %v1108_v35 = vadd.f32 %v1107_v23, %v866_v59  ;;  %v1109_v26 = vpop.f32.mrb[30].mxu1  ;;  %1432 = vst [vmem:[%s1351_s28 + $0xb0] sm:$0xff] (%p1947_p6), %v1431_v40 }
 0x17f   : > { %v1219_v39 = vadd.f32 %v2258_v55, %v1106_v60  ;;  %v1110_v27 = vadd.f32 %v1109_v26, %v871_v25  ;;  %v1111_v28 = vpop.f32.mrb[31].mxu1  ;;  %v1409_v55 = vld [vmem:[%s2243_s15] sm:$0xff] (%p1947_p6) }
 0x180   : > { %v1221_v41 = vadd.f32 %v2261_v6, %v1108_v35  ;;  %v1112_v29 = vadd.f32 %v1111_v28, %v871_v25  ;;  %1345 = sbr.rel (!%p1947_p6) target bundleno = 399 (0x18f), region = 78  ;;  %v1411_v6 = vld [vmem:[%s2243_s15 + $0x8] sm:$0xff] (%p1947_p6)  ;;  %1410 = vst [vmem:[%s1351_s28] sm:$0xff] (%p1947_p6), %v1409_v55 }
 0x181   : > { %v1223_v43 = vadd.f32 %v2264_v8, %v1110_v27  ;;  %v1413_v8 = vld [vmem:[%s2243_s15 + $0x10] sm:$0xff] (%p1947_p6)  ;;  %1412 = vst [vmem:[%s1351_s28 + $0x10] sm:$0xff] (%p1947_p6), %v1411_v6 }
 0x182   : > { %v1648_v30 = vpack.c.bf16 %v1221_v41, %v1219_v39  ;;  %v1225_v31 = vadd.f32 %v2267_v11, %v1112_v29  ;;  %v1415_v11 = vld [vmem:[%s2243_s15 + $0x18] sm:$0xff] (%p1947_p6)  ;;  %1414 = vst [vmem:[%s1351_s28 + $0x20] sm:$0xff] (%p1947_p6), %v1413_v8 }
 0x183   : > { %1416 = vst [vmem:[%s1351_s28 + $0x30] sm:$0xff] (%p1947_p6), %v1415_v11  ;;  %v1433_v0 = vld [vmem:[%s2243_s15 + $0x60] sm:$0xff] (%p1947_p6) }
 0x184   : > { %1337 = vst [vmem:[%s2243_s15 + $0x70] sm:$0xff] %v1648_v30  ;;  %v1649_v32 = vpack.c.bf16 %v1225_v31, %v1223_v43  ;;  %1434 = vst [vmem:[%s1351_s28 + $0xc0] sm:$0xff] (%p1947_p6), %v1433_v0 }
 0x185   : > { %v1435_v42 = vld [vmem:[%s2243_s15 + $0x68] sm:$0xff] (%p1947_p6) }
 0x186   : > { %1338 = vst [vmem:[%s2243_s15 + $0x78] sm:$0xff] %v1649_v32  ;;  %1436 = vst [vmem:[%s1351_s28 + $0xd0] sm:$0xff] (%p1947_p6), %v1435_v42 }
 0x18b   : > { %v1437_v36 = vld [vmem:[%s2243_s15 + $0x70] sm:$0xff] }
 0x18c   : > { %1438 = vst [vmem:[%s1351_s28 + $0xe0] sm:$0xff] %v1437_v36 }
 0x18d   : > { %v1439_v44 = vld [vmem:[%s2243_s15 + $0x78] sm:$0xff] }
 0x18e   : > { %1440 = vst [vmem:[%s1351_s28 + $0xf0] sm:$0xff] %v1439_v44 }
 0x18f PF: > { %s15_s19 = sadd.s32 1, %s1884_s19   ;;  %s2344_s15 = smov %s1872_s16 }
 0x190   : > { %p12_p11 = scmp.ge.s32.totalorder %s15_s19, 4   ;;  %s2345_s16 = smov %s1952_s24 }
 0x191   : > { %s2346_s17 = smov %s1880_s18  ;;  %s2347_s18 = smov %s2349_s3 }
 0x192   :  { %14 = sbr.rel (!%p12_p11) target bundleno = 3 (0x3), region = 153 }

// kernel: edsr_forward.19
= control target key start
LH: loop header
LB: loop body
LE: loop exit
PB: predicated region body
PF: predicated region fallthrough
CT: control target
= control target key end

     0   :  { %s1728_s15 = smov 0   ;;  %s1730_s16 = smov 0   ;;  %s2062_s0 = inlined_call_operand.vmem [shape: bf16[16,384], index: 0, kind: input, shape index: {}]   ;;  %s2063_s1 = inlined_call_operand.vmem [shape: bf16[288,2048], index: 1, kind: input, shape index: {}]   ;;  %s2064_s2 = inlined_call_operand.vmem [shape: f32[16,1], index: 2, kind: input, shape index: {}]   ;;  %s2065_s3 = inlined_call_operand.<no memory space> [shape: f32[1], index: 3, kind: input, shape index: {}]   ;;  %s2066_s4 = inlined_call_operand.vmem [shape: f32[16,2048], index: 4, kind: output, shape index: {}]  }
   0x1   :  { %s1732_s17 = smov 0   ;;  %s1734_s18 = smov 0  }
   0x2   :  { %s1736_s19 = smov 0  }
   0x3 LB: > { %s27_s3 = sadd.s32 1, %s1696_s18  ;;  %s1398_s20 = sadd.s32 4294967295, %s1700_s19   ;;  %s1700_s19 = sphi %s1736_s19, %s15_s19   ;;  %s1696_s18 = sphi %s1734_s18, %s2071_s18   ;;  %s1692_s17 = sphi %s1732_s17, %s2070_s17   ;;  %s1688_s16 = sphi %s1730_s16, %s2069_s16   ;;  %s1684_s15 = sphi %s1728_s15, %s2068_s15  }
   0x4   : > { %p29_p0 = scmp.ge.s32.totalorder %s27_s3, 4  ;;  %p67_p1 = scmp.ne.s32.totalorder %s1688_s16, %s1684_s15 }
   0x5   : > { %p68_p2 = scmp.eq.s32.totalorder %s1700_s19, 0  ;;  %p146_p4 = scmp.eq.s32.totalorder %s1398_s20, 3 }
   0x6   : > { %s2073_s3 = smov (%p29_p0, %s27_s3), 0  ;;  %s60_s22 = sadd.s32 1, %s1688_s16 }
   0x7   : > { %p69_p3 = por %p68_p2, %p67_p1  ;;  %s57_s21 = ssub.s32 %s1696_s18, %s2073_s3 }
   0x8   : > { %p58_p5 = scmp.eq.s32.totalorder %s57_s21, 0  ;;  %p1763_p6 = por %p146_p4, %p67_p1 }
   0x9   : > { %p1403_p7 = scmp.ge.s32.totalorder %s1700_s19, 4 }
   0xa   : > { %s1768_s24 = scalar_select %p58_p5, %s1688_s16, %s60_s22  }
   0xb   : > { %190 = sbr.rel (%p1403_p7) target bundleno = 58 (0x3a), region = 28 }
  0x12   : > { %193 = sbr.rel (!%p69_p3) target bundleno = 58 (0x3a), region = 32  ;;  %s195_s25 = sand.u32 (%p69_p3), 1, %s1688_s16  }
  0x13   : > { %s1488_s26 = sshll.u32 (%p69_p3), %s1696_s18, 4  ;;  %s1506_s27 = smul.u32 (%p69_p3), 576, %s195_s25 }
  0x14   : > { %s1776_s30 = scalar_lea.vmem (%p69_p3), %s2063_s1, %s1488_s26 }
  0x15   : > { %v213_v0 = vld [vmem:[%s1776_s30] sm:$0xff] (%p69_p3)  ;;  %v215_v1 = vld [vmem:[%s1776_s30 + $0x8] sm:$0xff] (%p69_p3)  ;;  %s1784_s5 = scalar_lea.vmem (%p69_p3), [#allocation4], %s1506_s27 }
  0x16   : > { %v217_v2 = vld [vmem:[%s1776_s30 + $0x40] sm:$0xff] (%p69_p3)  ;;  %v219_v3 = vld [vmem:[%s1776_s30 + $0x48] sm:$0xff] (%p69_p3)  ;;  %214 = vst [vmem:[%s1784_s5] sm:$0xff] (%p69_p3), %v213_v0  ;;  %216 = vst [vmem:[%s1784_s5 + $0x8] sm:$0xff] (%p69_p3), %v215_v1 }
  0x17   : > { %v221_v4 = vld [vmem:[%s1776_s30 + $0x80] sm:$0xff] (%p69_p3)  ;;  %v223_v5 = vld [vmem:[%s1776_s30 + $0x88] sm:$0xff] (%p69_p3)  ;;  %218 = vst [vmem:[%s1784_s5 + $0x10] sm:$0xff] (%p69_p3), %v217_v2  ;;  %220 = vst [vmem:[%s1784_s5 + $0x18] sm:$0xff] (%p69_p3), %v219_v3 }
  0x18   : > { %222 = vst [vmem:[%s1784_s5 + $0x20] sm:$0xff] (%p69_p3), %v221_v4  ;;  %224 = vst [vmem:[%s1784_s5 + $0x28] sm:$0xff] (%p69_p3), %v223_v5  ;;  %v225_v6 = vld [vmem:[%s1776_s30 + $0xc0] sm:$0xff] (%p69_p3)  ;;  %v227_v7 = vld [vmem:[%s1776_s30 + $0xc8] sm:$0xff] (%p69_p3) }
  0x19   : > { %v229_v8 = vld [vmem:[%s1776_s30 + $0x100] sm:$0xff]  ;;  %226 = vst [vmem:[%s1784_s5 + $0x30] sm:$0xff] %v225_v6  ;;  %228 = vst [vmem:[%s1784_s5 + $0x38] sm:$0xff] %v227_v7  ;;  %v231_v9 = vld [vmem:[%s1776_s30 + $0x108] sm:$0xff] }
  0x1a   : > { %230 = vst [vmem:[%s1784_s5 + $0x40] sm:$0xff] %v229_v8  ;;  %v233_v10 = vld [vmem:[%s1776_s30 + $0x140] sm:$0xff]  ;;  %v235_v11 = vld [vmem:[%s1776_s30 + $0x148] sm:$0xff]  ;;  %232 = vst [vmem:[%s1784_s5 + $0x48] sm:$0xff] %v231_v9 }
  0x1b   : > { %234 = vst [vmem:[%s1784_s5 + $0x50] sm:$0xff] %v233_v10  ;;  %236 = vst [vmem:[%s1784_s5 + $0x58] sm:$0xff] %v235_v11  ;;  %v237_v12 = vld [vmem:[%s1776_s30 + $0x180] sm:$0xff]  ;;  %v239_v13 = vld [vmem:[%s1776_s30 + $0x188] sm:$0xff] }
  0x1c   : > { %v241_v14 = vld [vmem:[%s1776_s30 + $0x1c0] sm:$0xff]  ;;  %238 = vst [vmem:[%s1784_s5 + $0x60] sm:$0xff] %v237_v12  ;;  %240 = vst [vmem:[%s1784_s5 + $0x68] sm:$0xff] %v239_v13  ;;  %v243_v15 = vld [vmem:[%s1776_s30 + $0x1c8] sm:$0xff] }
  0x1d   : > { %242 = vst [vmem:[%s1784_s5 + $0x70] sm:$0xff] %v241_v14  ;;  %v245_v16 = vld [vmem:[%s1776_s30 + $0x200] sm:$0xff]  ;;  %v247_v17 = vld [vmem:[%s1776_s30 + $0x208] sm:$0xff]  ;;  %244 = vst [vmem:[%s1784_s5 + $0x78] sm:$0xff] %v243_v15 }
  0x1e   : > { %246 = vst [vmem:[%s1784_s5 + $0x80] sm:$0xff] %v245_v16  ;;  %248 = vst [vmem:[%s1784_s5 + $0x88] sm:$0xff] %v247_v17  ;;  %v249_v18 = vld [vmem:[%s1776_s30 + $0x240] sm:$0xff]  ;;  %v251_v19 = vld [vmem:[%s1776_s30 + $0x248] sm:$0xff] }
  0x1f   : > { %v253_v20 = vld [vmem:[%s1776_s30 + $0x280] sm:$0xff]  ;;  %250 = vst [vmem:[%s1784_s5 + $0x90] sm:$0xff] %v249_v18  ;;  %252 = vst [vmem:[%s1784_s5 + $0x98] sm:$0xff] %v251_v19  ;;  %v255_v21 = vld [vmem:[%s1776_s30 + $0x288] sm:$0xff] }
  0x20   : > { %254 = vst [vmem:[%s1784_s5 + $0xa0] sm:$0xff] %v253_v20  ;;  %v257_v22 = vld [vmem:[%s1776_s30 + $0x2c0] sm:$0xff]  ;;  %v259_v23 = vld [vmem:[%s1776_s30 + $0x2c8] sm:$0xff]  ;;  %256 = vst [vmem:[%s1784_s5 + $0xa8] sm:$0xff] %v255_v21 }
  0x21   : > { %258 = vst [vmem:[%s1784_s5 + $0xb0] sm:$0xff] %v257_v22  ;;  %260 = vst [vmem:[%s1784_s5 + $0xb8] sm:$0xff] %v259_v23  ;;  %v261_v24 = vld [vmem:[%s1776_s30 + $0x300] sm:$0xff]  ;;  %v263_v25 = vld [vmem:[%s1776_s30 + $0x308] sm:$0xff] }
  0x22   : > { %v265_v26 = vld [vmem:[%s1776_s30 + $0x340] sm:$0xff]  ;;  %262 = vst [vmem:[%s1784_s5 + $0xc0] sm:$0xff] %v261_v24  ;;  %264 = vst [vmem:[%s1784_s5 + $0xc8] sm:$0xff] %v263_v25  ;;  %v267_v27 = vld [vmem:[%s1776_s30 + $0x348] sm:$0xff] }
  0x23   : > { %266 = vst [vmem:[%s1784_s5 + $0xd0] sm:$0xff] %v265_v26  ;;  %v269_v28 = vld [vmem:[%s1776_s30 + $0x380] sm:$0xff]  ;;  %v271_v29 = vld [vmem:[%s1776_s30 + $0x388] sm:$0xff]  ;;  %268 = vst [vmem:[%s1784_s5 + $0xd8] sm:$0xff] %v267_v27 }
  0x24   : > { %270 = vst [vmem:[%s1784_s5 + $0xe0] sm:$0xff] %v269_v28  ;;  %272 = vst [vmem:[%s1784_s5 + $0xe8] sm:$0xff] %v271_v29  ;;  %v273_v30 = vld [vmem:[%s1776_s30 + $0x3c0] sm:$0xff]  ;;  %v275_v31 = vld [vmem:[%s1776_s30 + $0x3c8] sm:$0xff] }
  0x25   : > { %v277_v32 = vld [vmem:[%s1776_s30 + $0x400] sm:$0xff]  ;;  %274 = vst [vmem:[%s1784_s5 + $0xf0] sm:$0xff] %v273_v30  ;;  %276 = vst [vmem:[%s1784_s5 + $0xf8] sm:$0xff] %v275_v31  ;;  %v279_v33 = vld [vmem:[%s1776_s30 + $0x408] sm:$0xff] }
  0x26   : > { %278 = vst [vmem:[%s1784_s5 + $0x100] sm:$0xff] %v277_v32  ;;  %v281_v34 = vld [vmem:[%s1776_s30 + $0x440] sm:$0xff]  ;;  %v283_v35 = vld [vmem:[%s1776_s30 + $0x448] sm:$0xff]  ;;  %280 = vst [vmem:[%s1784_s5 + $0x108] sm:$0xff] %v279_v33 }
  0x27   : > { %282 = vst [vmem:[%s1784_s5 + $0x110] sm:$0xff] %v281_v34  ;;  %284 = vst [vmem:[%s1784_s5 + $0x118] sm:$0xff] %v283_v35  ;;  %v285_v36 = vld [vmem:[%s1776_s30 + $0x480] sm:$0xff]  ;;  %v287_v37 = vld [vmem:[%s1776_s30 + $0x488] sm:$0xff] }
  0x28   : > { %v289_v38 = vld [vmem:[%s1776_s30 + $0x4c0] sm:$0xff]  ;;  %286 = vst [vmem:[%s1784_s5 + $0x120] sm:$0xff] %v285_v36  ;;  %288 = vst [vmem:[%s1784_s5 + $0x128] sm:$0xff] %v287_v37  ;;  %v291_v39 = vld [vmem:[%s1776_s30 + $0x4c8] sm:$0xff] }
  0x29   : > { %290 = vst [vmem:[%s1784_s5 + $0x130] sm:$0xff] %v289_v38  ;;  %v293_v40 = vld [vmem:[%s1776_s30 + $0x500] sm:$0xff]  ;;  %v295_v41 = vld [vmem:[%s1776_s30 + $0x508] sm:$0xff]  ;;  %292 = vst [vmem:[%s1784_s5 + $0x138] sm:$0xff] %v291_v39 }
  0x2a   : > { %294 = vst [vmem:[%s1784_s5 + $0x140] sm:$0xff] %v293_v40  ;;  %296 = vst [vmem:[%s1784_s5 + $0x148] sm:$0xff] %v295_v41  ;;  %v297_v42 = vld [vmem:[%s1776_s30 + $0x540] sm:$0xff]  ;;  %v299_v43 = vld [vmem:[%s1776_s30 + $0x548] sm:$0xff] }
  0x2b   : > { %v301_v44 = vld [vmem:[%s1776_s30 + $0x580] sm:$0xff]  ;;  %298 = vst [vmem:[%s1784_s5 + $0x150] sm:$0xff] %v297_v42  ;;  %300 = vst [vmem:[%s1784_s5 + $0x158] sm:$0xff] %v299_v43  ;;  %v303_v45 = vld [vmem:[%s1776_s30 + $0x588] sm:$0xff] }
  0x2c   : > { %302 = vst [vmem:[%s1784_s5 + $0x160] sm:$0xff] %v301_v44  ;;  %v305_v46 = vld [vmem:[%s1776_s30 + $0x5c0] sm:$0xff]  ;;  %v307_v47 = vld [vmem:[%s1776_s30 + $0x5c8] sm:$0xff]  ;;  %304 = vst [vmem:[%s1784_s5 + $0x168] sm:$0xff] %v303_v45 }
  0x2d   : > { %306 = vst [vmem:[%s1784_s5 + $0x170] sm:$0xff] %v305_v46  ;;  %308 = vst [vmem:[%s1784_s5 + $0x178] sm:$0xff] %v307_v47  ;;  %v309_v48 = vld [vmem:[%s1776_s30 + $0x600] sm:$0xff]  ;;  %v311_v49 = vld [vmem:[%s1776_s30 + $0x608] sm:$0xff] }
  0x2e   : > { %v313_v50 = vld [vmem:[%s1776_s30 + $0x640] sm:$0xff]  ;;  %310 = vst [vmem:[%s1784_s5 + $0x180] sm:$0xff] %v309_v48  ;;  %312 = vst [vmem:[%s1784_s5 + $0x188] sm:$0xff] %v311_v49  ;;  %v315_v51 = vld [vmem:[%s1776_s30 + $0x648] sm:$0xff] }
  0x2f   : > { %314 = vst [vmem:[%s1784_s5 + $0x190] sm:$0xff] %v313_v50  ;;  %v317_v52 = vld [vmem:[%s1776_s30 + $0x680] sm:$0xff]  ;;  %v319_v53 = vld [vmem:[%s1776_s30 + $0x688] sm:$0xff]  ;;  %316 = vst [vmem:[%s1784_s5 + $0x198] sm:$0xff] %v315_v51 }
  0x30   : > { %318 = vst [vmem:[%s1784_s5 + $0x1a0] sm:$0xff] %v317_v52  ;;  %320 = vst [vmem:[%s1784_s5 + $0x1a8] sm:$0xff] %v319_v53  ;;  %v321_v54 = vld [vmem:[%s1776_s30 + $0x6c0] sm:$0xff]  ;;  %v323_v55 = vld [vmem:[%s1776_s30 + $0x6c8] sm:$0xff] }
  0x31   : > { %v325_v56 = vld [vmem:[%s1776_s30 + $0x700] sm:$0xff]  ;;  %322 = vst [vmem:[%s1784_s5 + $0x1b0] sm:$0xff] %v321_v54  ;;  %324 = vst [vmem:[%s1784_s5 + $0x1b8] sm:$0xff] %v323_v55  ;;  %v327_v57 = vld [vmem:[%s1776_s30 + $0x708] sm:$0xff] }
  0x32   : > { %326 = vst [vmem:[%s1784_s5 + $0x1c0] sm:$0xff] %v325_v56  ;;  %v329_v58 = vld [vmem:[%s1776_s30 + $0x740] sm:$0xff]  ;;  %v331_v59 = vld [vmem:[%s1776_s30 + $0x748] sm:$0xff]  ;;  %328 = vst [vmem:[%s1784_s5 + $0x1c8] sm:$0xff] %v327_v57 }
  0x33   : > { %330 = vst [vmem:[%s1784_s5 + $0x1d0] sm:$0xff] %v329_v58  ;;  %332 = vst [vmem:[%s1784_s5 + $0x1d8] sm:$0xff] %v331_v59  ;;  %v333_v60 = vld [vmem:[%s1776_s30 + $0x780] sm:$0xff]  ;;  %v335_v61 = vld [vmem:[%s1776_s30 + $0x788] sm:$0xff] }
  0x34   : > { %v337_v62 = vld [vmem:[%s1776_s30 + $0x7c0] sm:$0xff]  ;;  %334 = vst [vmem:[%s1784_s5 + $0x1e0] sm:$0xff] %v333_v60  ;;  %336 = vst [vmem:[%s1784_s5 + $0x1e8] sm:$0xff] %v335_v61  ;;  %v339_v63 = vld [vmem:[%s1776_s30 + $0x7c8] sm:$0xff] }
  0x35   : > { %338 = vst [vmem:[%s1784_s5 + $0x1f0] sm:$0xff] %v337_v62  ;;  %v341_v0 = vld [vmem:[%s1776_s30 + $0x800] sm:$0xff]  ;;  %v343_v1 = vld [vmem:[%s1776_s30 + $0x808] sm:$0xff]  ;;  %340 = vst [vmem:[%s1784_s5 + $0x1f8] sm:$0xff] %v339_v63 }
  0x36   : > { %342 = vst [vmem:[%s1784_s5 + $0x200] sm:$0xff] %v341_v0  ;;  %344 = vst [vmem:[%s1784_s5 + $0x208] sm:$0xff] %v343_v1  ;;  %v345_v2 = vld [vmem:[%s1776_s30 + $0x840] sm:$0xff]  ;;  %v347_v3 = vld [vmem:[%s1776_s30 + $0x848] sm:$0xff] }
  0x37   : > { %v349_v4 = vld [vmem:[%s1776_s30 + $0x880] sm:$0xff]  ;;  %346 = vst [vmem:[%s1784_s5 + $0x210] sm:$0xff] %v345_v2  ;;  %348 = vst [vmem:[%s1784_s5 + $0x218] sm:$0xff] %v347_v3  ;;  %v351_v5 = vld [vmem:[%s1776_s30 + $0x888] sm:$0xff] }
  0x38   : > { %350 = vst [vmem:[%s1784_s5 + $0x220] sm:$0xff] %v349_v4  ;;  %v353_v6 = vld [vmem:[%s1776_s30 + $0x8c0] sm:$0xff]  ;;  %v355_v7 = vld [vmem:[%s1776_s30 + $0x8c8] sm:$0xff]  ;;  %352 = vst [vmem:[%s1784_s5 + $0x228] sm:$0xff] %v351_v5 }
  0x39   : > { %354 = vst [vmem:[%s1784_s5 + $0x230] sm:$0xff] %v353_v6  ;;  %356 = vst [vmem:[%s1784_s5 + $0x238] sm:$0xff] %v355_v7 }
  0x3a PF: > { %p1406_p8 = scmp.ge.s32.totalorder %s1700_s19, 1  ;;  %p361_p9 = scmp.lt.s32.totalorder %s1700_s19, 5 }
  0x3c   : > { %p362_p10 = pnand %p1406_p8, %p361_p9 }
  0x3d   : > { %s368_s6 = sand.u32 (!%p362_p10), 1, %s1684_s15   ;;  %v1648_v8 = vld [vmem:[%s2062_s0 + $0x4] ss:$12 sps:$4 sm:$0xff] (!%p362_p10)   ;;  %v1702_v9 = vmov (!%p362_p10), 0   ;;  %v1049_v11 = vld [vmem:[%s2064_s2 + $0x8] sm:$0xff] (!%p362_p10) }
  0x3e   : > { %365 = sbr.rel (%p362_p10) target bundleno = 370 (0x172), region = 55  ;;  %1549 = vset.pattern.permute.xlu0 (!%p362_p10), %v1702_v9  ;;  %v1048_v10 = vld [vmem:[%s2064_s2] sm:$0xff] (!%p362_p10)  ;;  %1108 = vmatprep.mubr.bf16.mxu0 (!%p362_p10), %v1648_v8  ;;  %s1407_s26 = sshll.u32 (!%p362_p10), %s368_s6, 6 }
  0x3f   : > { %s1507_s7 = smul.u32 (!%p362_p10), 576, %s368_s6  ;;  %1052 = vperm.xlu0 (!%p362_p10), %1549, %v1048_v10   ;;  %1194 = vmatprep.mubr.bf16.mxu1 (!%p362_p10), %v1648_v8  ;;  %s2023_s27 = scalar_lea.vmem (!%p362_p10), [#allocation5], %s1407_s26 }
  0x41   : > { %s1939_s14 = scalar_lea.vmem (!%p362_p10), [#allocation4], %s1507_s7 }
  0x42   : > { %v1550_v12 = vld [vmem:[%s1939_s14 + $0x4] ss:$16 sps:$4 sm:$0xff] (!%p362_p10)   ;;  %v1552_v13 = vld [vmem:[%s1939_s14 + $0xc] ss:$16 sps:$4 sm:$0xff] (!%p362_p10)   ;;  %v1554_v14 = vld [vmem:[%s1939_s14] ss:$16 sps:$4 sm:$0xff] (!%p362_p10)  }
  0x43   : > { %1076 = vmatprep.subr.bf16.mxu0 (!%p362_p10), %v1550_v12  ;;  %v1555_v15 = vld [vmem:[%s1939_s14 + $0x8] ss:$16 sps:$4 sm:$0xff] (!%p362_p10)   ;;  %1057 = vperm.xlu0 (!%p362_p10), %1549, %v1049_v11   ;;  %v1556_v16 = vld [vmem:[%s1939_s14 + $0x24] ss:$16 sps:$4 sm:$0xff] (!%p362_p10)   ;;  %v1558_v17 = vld [vmem:[%s1939_s14 + $0x2c] ss:$16 sps:$4 sm:$0xff] (!%p362_p10)  }
  0x44   : > { %1162 = vmatprep.subr.bf16.mxu1 (!%p362_p10), %v1552_v13  ;;  %1077 = vmatpush1.bf16.msra.mxu0 (!%p362_p10), %v1554_v14  ;;  %v1560_v18 = vld [vmem:[%s1939_s14 + $0x20] ss:$16 sps:$4 sm:$0xff] (!%p362_p10)   ;;  %v1561_v19 = vld [vmem:[%s1939_s14 + $0x28] ss:$16 sps:$4 sm:$0xff] (!%p362_p10)   ;;  %v1562_v20 = vld [vmem:[%s1939_s14 + $0x44] ss:$16 sps:$4 sm:$0xff] (!%p362_p10)  }
  0x45   : > { %1163 = vmatpush1.bf16.msra.mxu1 %v1555_v15  ;;  %1078 = vmatprep.subr.bf16.mxu0 %v1556_v16  ;;  %v1564_v21 = vld [vmem:[%s1939_s14 + $0x4c] ss:$16 sps:$4 sm:$0xff]   ;;  %v1566_v22 = vld [vmem:[%s1939_s14 + $0x40] ss:$16 sps:$4 sm:$0xff]   ;;  %v1567_v23 = vld [vmem:[%s1939_s14 + $0x48] ss:$16 sps:$4 sm:$0xff]  }
  0x46   : > { %1164 = vmatprep.subr.bf16.mxu1 %v1558_v17  ;;  %v1568_v24 = vld [vmem:[%s1939_s14 + $0x64] ss:$16 sps:$4 sm:$0xff]   ;;  %v1570_v25 = vld [vmem:[%s1939_s14 + $0x6c] ss:$16 sps:$4 sm:$0xff]   ;;  %v1572_v26 = vld [vmem:[%s1939_s14 + $0x60] ss:$16 sps:$4 sm:$0xff]  }
  0x47   : > { %v1573_v27 = vld [vmem:[%s1939_s14 + $0x68] ss:$16 sps:$4 sm:$0xff]   ;;  %v1574_v28 = vld [vmem:[%s1939_s14 + $0x84] ss:$16 sps:$4 sm:$0xff]   ;;  %v1576_v29 = vld [vmem:[%s1939_s14 + $0x8c] ss:$16 sps:$4 sm:$0xff]  }
  0x48   : > { %1079 = vmatpush1.bf16.msra.mxu0 %v1560_v18  ;;  %v1578_v30 = vld [vmem:[%s1939_s14 + $0x80] ss:$16 sps:$4 sm:$0xff]   ;;  %v1579_v31 = vld [vmem:[%s1939_s14 + $0x88] ss:$16 sps:$4 sm:$0xff]   ;;  %v1580_v32 = vld [vmem:[%s1939_s14 + $0xa4] ss:$16 sps:$4 sm:$0xff]  }
  0x49   : > { %1165 = vmatpush1.bf16.msra.mxu1 %v1561_v19  ;;  %1080 = vmatprep.subr.bf16.mxu0 %v1562_v20  ;;  %v1582_v33 = vld [vmem:[%s1939_s14 + $0xac] ss:$16 sps:$4 sm:$0xff]   ;;  %v1584_v34 = vld [vmem:[%s1939_s14 + $0xa0] ss:$16 sps:$4 sm:$0xff]   ;;  %v1585_v35 = vld [vmem:[%s1939_s14 + $0xa8] ss:$16 sps:$4 sm:$0xff]  }
  0x4a   : > { %1166 = vmatprep.subr.bf16.mxu1 %v1564_v21  ;;  %v1586_v36 = vld [vmem:[%s1939_s14 + $0xc4] ss:$16 sps:$4 sm:$0xff]   ;;  %v1588_v37 = vld [vmem:[%s1939_s14 + $0xcc] ss:$16 sps:$4 sm:$0xff]   ;;  %v1590_v38 = vld [vmem:[%s1939_s14 + $0xc0] ss:$16 sps:$4 sm:$0xff]  }
  0x4b   : > { %v1591_v39 = vld [vmem:[%s1939_s14 + $0xc8] ss:$16 sps:$4 sm:$0xff]   ;;  %v1592_v40 = vld [vmem:[%s1939_s14 + $0xe4] ss:$16 sps:$4 sm:$0xff]   ;;  %v1594_v41 = vld [vmem:[%s1939_s14 + $0xec] ss:$16 sps:$4 sm:$0xff]  }
  0x4c   : > { %1081 = vmatpush1.bf16.msra.mxu0 %v1566_v22  ;;  %v1596_v42 = vld [vmem:[%s1939_s14 + $0xe0] ss:$16 sps:$4 sm:$0xff]   ;;  %v1597_v43 = vld [vmem:[%s1939_s14 + $0xe8] ss:$16 sps:$4 sm:$0xff]   ;;  %v1598_v44 = vld [vmem:[%s1939_s14 + $0x104] ss:$16 sps:$4 sm:$0xff]  }
  0x4d   : > { %1167 = vmatpush1.bf16.msra.mxu1 %v1567_v23  ;;  %1082 = vmatprep.subr.bf16.mxu0 %v1568_v24  ;;  %v1600_v45 = vld [vmem:[%s1939_s14 + $0x10c] ss:$16 sps:$4 sm:$0xff]   ;;  %v1602_v46 = vld [vmem:[%s1939_s14 + $0x100] ss:$16 sps:$4 sm:$0xff]   ;;  %v1603_v47 = vld [vmem:[%s1939_s14 + $0x108] ss:$16 sps:$4 sm:$0xff]  }
  0x4e   : > { %1168 = vmatprep.subr.bf16.mxu1 %v1570_v25  ;;  %v1604_v48 = vld [vmem:[%s1939_s14 + $0x124] ss:$16 sps:$4 sm:$0xff]   ;;  %v1606_v49 = vld [vmem:[%s1939_s14 + $0x12c] ss:$16 sps:$4 sm:$0xff]   ;;  %v1608_v50 = vld [vmem:[%s1939_s14 + $0x120] ss:$16 sps:$4 sm:$0xff]  }
  0x4f   : > { %v1609_v51 = vld [vmem:[%s1939_s14 + $0x128] ss:$16 sps:$4 sm:$0xff]   ;;  %v1610_v52 = vld [vmem:[%s1939_s14 + $0x144] ss:$16 sps:$4 sm:$0xff]   ;;  %v1612_v53 = vld [vmem:[%s1939_s14 + $0x14c] ss:$16 sps:$4 sm:$0xff]  }
  0x50   : > { %1083 = vmatpush1.bf16.msra.mxu0 %v1572_v26  ;;  %v1614_v54 = vld [vmem:[%s1939_s14 + $0x140] ss:$16 sps:$4 sm:$0xff]   ;;  %v1615_v55 = vld [vmem:[%s1939_s14 + $0x148] ss:$16 sps:$4 sm:$0xff]   ;;  %v1616_v56 = vld [vmem:[%s1939_s14 + $0x164] ss:$16 sps:$4 sm:$0xff]  }
  0x51   : > { %1169 = vmatpush1.bf16.msra.mxu1 %v1573_v27  ;;  %1084 = vmatprep.subr.bf16.mxu0 %v1574_v28  ;;  %v1618_v57 = vld [vmem:[%s1939_s14 + $0x16c] ss:$16 sps:$4 sm:$0xff]   ;;  %v1620_v58 = vld [vmem:[%s1939_s14 + $0x160] ss:$16 sps:$4 sm:$0xff]   ;;  %v1621_v59 = vld [vmem:[%s1939_s14 + $0x168] ss:$16 sps:$4 sm:$0xff]  }
  0x52   : > { %1170 = vmatprep.subr.bf16.mxu1 %v1576_v29  ;;  %v1622_v60 = vld [vmem:[%s1939_s14 + $0x184] ss:$16 sps:$4 sm:$0xff]   ;;  %v1624_v61 = vld [vmem:[%s1939_s14 + $0x18c] ss:$16 sps:$4 sm:$0xff]   ;;  %v1626_v62 = vld [vmem:[%s1939_s14 + $0x180] ss:$16 sps:$4 sm:$0xff]  }
  0x53   : > { %v1627_v63 = vld [vmem:[%s1939_s14 + $0x188] ss:$16 sps:$4 sm:$0xff]   ;;  %v1628_v0 = vld [vmem:[%s1939_s14 + $0x1a4] ss:$16 sps:$4 sm:$0xff]   ;;  %v1630_v1 = vld [vmem:[%s1939_s14 + $0x1ac] ss:$16 sps:$4 sm:$0xff]  }
  0x54   : > { %1085 = vmatpush1.bf16.msra.mxu0 %v1578_v30  ;;  %v1632_v2 = vld [vmem:[%s1939_s14 + $0x1a0] ss:$16 sps:$4 sm:$0xff]   ;;  %v1633_v3 = vld [vmem:[%s1939_s14 + $0x1a8] ss:$16 sps:$4 sm:$0xff]   ;;  %v1634_v4 = vld [vmem:[%s1939_s14 + $0x1c4] ss:$16 sps:$4 sm:$0xff]  }
  0x55   : > { %1171 = vmatpush1.bf16.msra.mxu1 %v1579_v31  ;;  %1086 = vmatprep.subr.bf16.mxu0 %v1580_v32  ;;  %v1636_v5 = vld [vmem:[%s1939_s14 + $0x1cc] ss:$16 sps:$4 sm:$0xff]   ;;  %v1638_v6 = vld [vmem:[%s1939_s14 + $0x1c0] ss:$16 sps:$4 sm:$0xff]   ;;  %v1639_v7 = vld [vmem:[%s1939_s14 + $0x1c8] ss:$16 sps:$4 sm:$0xff]  }
  0x56   : > { %1172 = vmatprep.subr.bf16.mxu1 %v1582_v33  ;;  %v1640_v8 = vld [vmem:[%s1939_s14 + $0x1e4] ss:$16 sps:$4 sm:$0xff]   ;;  %v1642_v10 = vld [vmem:[%s1939_s14 + $0x1ec] ss:$16 sps:$4 sm:$0xff]   ;;  %v1644_v11 = vld [vmem:[%s1939_s14 + $0x1e0] ss:$16 sps:$4 sm:$0xff]  }
  0x57   : > { %v1645_v12 = vld [vmem:[%s1939_s14 + $0x1e8] ss:$16 sps:$4 sm:$0xff]   ;;  %v1651_v13 = vld [vmem:[%s1939_s14 + $0x204] ss:$16 sps:$4 sm:$0xff]   ;;  %v1654_v14 = vld [vmem:[%s1939_s14 + $0x20c] ss:$16 sps:$4 sm:$0xff]  }
  0x58   : > { %1087 = vmatpush1.bf16.msra.mxu0 %v1584_v34  ;;  %v1646_v15 = vld [vmem:[%s2062_s0] ss:$12 sps:$4 sm:$0xff]   ;;  %v1652_v17 = vld [vmem:[%s1939_s14 + $0x208] ss:$16 sps:$4 sm:$0xff]   ;;  %v1657_v18 = vld [vmem:[%s1939_s14 + $0x224] ss:$16 sps:$4 sm:$0xff]  }
  0x59   : > { %1173 = vmatpush1.bf16.msra.mxu1 %v1585_v35  ;;  %1088 = vmatprep.subr.bf16.mxu0 %v1586_v36  ;;  %v1649_v16 = vld [vmem:[%s1939_s14 + $0x200] ss:$16 sps:$4 sm:$0xff]   ;;  %v1660_v19 = vld [vmem:[%s1939_s14 + $0x22c] ss:$16 sps:$4 sm:$0xff]   ;;  %v1658_v21 = vld [vmem:[%s1939_s14 + $0x228] ss:$16 sps:$4 sm:$0xff]  }
  0x5a   : > { %1174 = vmatprep.subr.bf16.mxu1 %v1588_v37  ;;  %v1655_v20 = vld [vmem:[%s1939_s14 + $0x220] ss:$16 sps:$4 sm:$0xff]   ;;  %v1661_v22 = vld [vmem:[%s2062_s0 + $0x8] ss:$12 sps:$4 sm:$0xff]   ;;  %s1489_s15 = sshll.u32 (%p1763_p6), %s1692_s17, 5 }
  0x5b   : > { %s1268_s30 = scalar_lea.vmem (%p1763_p6), %s2066_s4, %s1489_s15 }
  0x5c   : > { %1089 = vmatpush1.bf16.msra.mxu0 %v1590_v38 }
  0x5d   : > { %1175 = vmatpush1.bf16.msra.mxu1 %v1591_v39  ;;  %1090 = vmatprep.subr.bf16.mxu0 %v1592_v40 }
  0x5e   : > { %1176 = vmatprep.subr.bf16.mxu1 %v1594_v41 }
  0x60   : > { %1091 = vmatpush1.bf16.msra.mxu0 %v1596_v42 }
  0x61   : > { %1177 = vmatpush1.bf16.msra.mxu1 %v1597_v43  ;;  %1092 = vmatprep.subr.bf16.mxu0 %v1598_v44 }
  0x62   : > { %1178 = vmatprep.subr.bf16.mxu1 %v1600_v45 }
  0x64   : > { %1093 = vmatpush1.bf16.msra.mxu0 %v1602_v46 }
  0x65   : > { %1179 = vmatpush1.bf16.msra.mxu1 %v1603_v47  ;;  %1094 = vmatprep.subr.bf16.mxu0 %v1604_v48 }
  0x66   : > { %1180 = vmatprep.subr.bf16.mxu1 %v1606_v49 }
  0x68   : > { %1095 = vmatpush1.bf16.msra.mxu0 %v1608_v50 }
  0x69   : > { %1181 = vmatpush1.bf16.msra.mxu1 %v1609_v51  ;;  %1096 = vmatprep.subr.bf16.mxu0 %v1610_v52 }
  0x6a   : > { %1182 = vmatprep.subr.bf16.mxu1 %v1612_v53 }
  0x6c   : > { %1097 = vmatpush1.bf16.msra.mxu0 %v1614_v54 }
  0x6d   : > { %1183 = vmatpush1.bf16.msra.mxu1 %v1615_v55  ;;  %1098 = vmatprep.subr.bf16.mxu0 %v1616_v56 }
  0x6e   : > { %1184 = vmatprep.subr.bf16.mxu1 %v1618_v57 }
  0x70   : > { %1099 = vmatpush1.bf16.msra.mxu0 %v1620_v58 }
  0x71   : > { %1185 = vmatpush1.bf16.msra.mxu1 %v1621_v59  ;;  %1100 = vmatprep.subr.bf16.mxu0 %v1622_v60 }
  0x72   : > { %1186 = vmatprep.subr.bf16.mxu1 %v1624_v61 }
  0x74   : > { %1101 = vmatpush1.bf16.msra.mxu0 %v1626_v62 }
  0x75   : > { %1187 = vmatpush1.bf16.msra.mxu1 %v1627_v63  ;;  %1102 = vmatprep.subr.bf16.mxu0 %v1628_v0 }
  0x76   : > { %1188 = vmatprep.subr.bf16.mxu1 %v1630_v1 }
  0x78   : > { %1103 = vmatpush1.bf16.msra.mxu0 %v1632_v2 }
  0x79   : > { %1189 = vmatpush1.bf16.msra.mxu1 %v1633_v3  ;;  %1104 = vmatprep.subr.bf16.mxu0 %v1634_v4 }
  0x7a   : > { %1190 = vmatprep.subr.bf16.mxu1 %v1636_v5 }
  0x7c   : > { %1105 = vmatpush1.bf16.msra.mxu0 %v1638_v6 }
  0x7d   : > { %1191 = vmatpush1.bf16.msra.mxu1 %v1639_v7  ;;  %1106 = vmatprep.subr.bf16.mxu0 %v1640_v8 }
  0x7e   : > { %1192 = vmatprep.subr.bf16.mxu1 %v1642_v10 }
  0x80   : > { %1107 = vmatpush1.bf16.msra.mxu0 %v1644_v11 }
  0x81   : > { %1193 = vmatpush1.bf16.msra.mxu1 %v1645_v12  ;;  %1119 = vmatprep.subr.bf16.mxu0 %v1651_v13 }
  0x82   : > { %1205 = vmatprep.subr.bf16.mxu1 %v1654_v14 }
  0x83   : > { %1109 = vmatmul.mubr.bf16.vlgmr.msra.gmra.mrb[0].mxu0 %v1646_v15 }
  0x84   : > { %1195 = vmatmul.mubr.bf16.vlgmr.msra.gmra.mrb[0].mxu1 %v1646_v15  ;;  %1120 = vmatpush1.bf16.msra.mxu0 %v1649_v16 }
  0x85   : > { %1206 = vmatpush1.bf16.msra.mxu1 %v1652_v17  ;;  %1121 = vmatprep.subr.bf16.mxu0 %v1657_v18 }
  0x86   : > { %1207 = vmatprep.subr.bf16.mxu1 %v1660_v19  ;;  %1151 = vmatprep.mubr.bf16.mxu0 %v1702_v9 }
  0x87   : > { %1237 = vmatprep.mubr.bf16.mxu1 %v1702_v9 }
  0x88   : > { %1122 = vmatpush1.bf16.msra.mxu0 %v1655_v20 }
  0x89   : > { %1208 = vmatpush1.bf16.msra.mxu1 %v1658_v21 }
  0x8f   : > { %1152 = vmatmul.mubr.bf16.vlgmr.msra.gmra.mrb[0].mxu0 %v1661_v22 }
  0x90   : > { %1238 = vmatmul.mubr.bf16.vlgmr.msra.gmra.mrb[0].mxu1 %v1661_v22 }
  0xbe   : > { %v1053_v23 = vpop.permute.xlu0 %1052 }
  0xc2   : > { %v1058_v24 = vpop.permute.xlu0 %1057 }
 0x162   : > { %v1153_v25 = vpop.f32.mrb[0].mxu0 }
 0x163   : > { %v1239_v26 = vpop.f32.mrb[0].mxu1  ;;  %v1490_v27 = vadd.f32 %v1153_v25, %v1053_v23  ;;  %v1155_v29 = vpop.f32.mrb[1].mxu0  ;;  %1262 = sbr.rel (!%p1763_p6) target bundleno = 370 (0x172), region = 63 }
 0x164   : > { %v1494_v28 = vadd.f32 %v1239_v26, %v1053_v23  ;;  %v1241_v30 = vpop.f32.mrb[1].mxu1  ;;  %v1491_v31 = vadd.f32 %v1155_v29, %v1053_v23  ;;  %v1157_v32 = vpop.f32.mrb[2].mxu0 }
 0x165   : > { %v1495_v9 = vadd.f32 %v1241_v30, %v1053_v23  ;;  %v1243_v33 = vpop.f32.mrb[2].mxu1  ;;  %1248 = vst [vmem:[%s2023_s27] sm:$0xff] %v1490_v27  ;;  %v1492_v34 = vadd.f32 %v1157_v32, %v1058_v24  ;;  %v1159_v36 = vpop.f32.mrb[3].mxu0 }
 0x166   : > { %1250 = vst [vmem:[%s2023_s27 + $0x10] sm:$0xff] %v1494_v28  ;;  %v1496_v35 = vadd.f32 %v1243_v33, %v1058_v24  ;;  %v1245_v37 = vpop.f32.mrb[3].mxu1  ;;  %1249 = vst [vmem:[%s2023_s27 + $0x8] sm:$0xff] %v1491_v31  ;;  %v1493_v38 = vadd.f32 %v1159_v36, %v1058_v24 }
 0x167   : > { %1251 = vst [vmem:[%s2023_s27 + $0x18] sm:$0xff] %v1495_v9  ;;  %v1497_v39 = vadd.f32 %v1245_v37, %v1058_v24  ;;  %1252 = vst [vmem:[%s2023_s27 + $0x20] sm:$0xff] %v1492_v34 }
 0x168   : > { %1254 = vst [vmem:[%s2023_s27 + $0x30] sm:$0xff] %v1496_v35  ;;  %1253 = vst [vmem:[%s2023_s27 + $0x28] sm:$0xff] %v1493_v38 }
 0x169   : > { %1255 = vst [vmem:[%s2023_s27 + $0x38] sm:$0xff] %v1497_v39 }
 0x16c   : > { %v1281_v40 = vld [vmem:[%s2023_s27] sm:$0xff] }
 0x16d   : > { %v1283_v41 = vld [vmem:[%s2023_s27 + $0x8] sm:$0xff]  ;;  %v1285_v42 = vld [vmem:[%s2023_s27 + $0x10] sm:$0xff]  ;;  %1282 = vst [vmem:[%s1268_s30] sm:$0xff] %v1281_v40 }
 0x16e   : > { %v1287_v43 = vld [vmem:[%s2023_s27 + $0x18] sm:$0xff]  ;;  %v1289_v44 = vld [vmem:[%s2023_s27 + $0x20] sm:$0xff]  ;;  %1284 = vst [vmem:[%s1268_s30 + $0x8] sm:$0xff] %v1283_v41  ;;  %1286 = vst [vmem:[%s1268_s30 + $0x10] sm:$0xff] %v1285_v42 }
 0x16f   : > { %v1291_v45 = vld [vmem:[%s2023_s27 + $0x28] sm:$0xff]  ;;  %1288 = vst [vmem:[%s1268_s30 + $0x18] sm:$0xff] %v1287_v43  ;;  %1290 = vst [vmem:[%s1268_s30 + $0x80] sm:$0xff] %v1289_v44  ;;  %v1293_v46 = vld [vmem:[%s2023_s27 + $0x30] sm:$0xff] }
 0x170   : > { %1292 = vst [vmem:[%s1268_s30 + $0x88] sm:$0xff] %v1291_v45  ;;  %v1295_v47 = vld [vmem:[%s2023_s27 + $0x38] sm:$0xff]  ;;  %1294 = vst [vmem:[%s1268_s30 + $0x90] sm:$0xff] %v1293_v46 }
 0x171   : > { %1296 = vst [vmem:[%s1268_s30 + $0x98] sm:$0xff] %v1295_v47 }
 0x172 PF: > { %s15_s19 = sadd.s32 1, %s1700_s19   ;;  %s2068_s15 = smov %s1688_s16 }
 0x173   : > { %p12_p11 = scmp.ge.s32.totalorder %s15_s19, 6   ;;  %s2069_s16 = smov %s1768_s24 }
 0x174   : > { %s2070_s17 = smov %s1696_s18  ;;  %s2071_s18 = smov %s2073_s3 }
 0x175   :  { %14 = sbr.rel (!%p12_p11) target bundleno = 3 (0x3), region = 123 }

</bundles_post_ra>
